<compile_context>
chip_gen: v7x
topology: tpu7x:2x2x1
jax: 0.10.0
libtpu: 0.0.40
codegen_flags: <defaults>
</compile_context>

<pallas_src>
import functools

import jax
import jax.numpy as jnp
from jax import lax
from jax.experimental import pallas as pl
from jax.experimental.pallas import tpu as pltpu

BN_EPS = 1e-5


# --------------------------------------------------------------------------- #
# Generation-aware budgets
# --------------------------------------------------------------------------- #
def _vmem_and_tile_budget():
    """Scoped-VMEM limit and spatial tile target (positions) per TPU generation."""
    cap = 64 * 1024 * 1024                      # conservative default (v7x per-TC)
    try:
        cap = int(getattr(pltpu.get_tpu_info(), "vmem_capacity_bytes", cap))
    except Exception:                            # non-TPU trace / old runtime
        pass
    vmem_limit = min(cap * 3 // 4, 100 * 1024 * 1024)   # 48 MiB on v7x, 96 MiB on v5e/v6e
    tile_target = 4096 if cap > 64 * 1024 * 1024 else 2048
    return vmem_limit, tile_target


def _fold_bn(gamma, beta, mean, var):
    inv = 1.0 / jnp.sqrt(var + BN_EPS)
    return gamma * inv, beta - mean * gamma * inv


def _plan_rows(ho, wo, target):
    """Pick tile_h (rows per tile).  Pads ho up instead of collapsing to 1."""
    max_h = max(1, min(ho, target // max(wo, 1)))
    best = 1
    for d in range(1, max_h + 1):
        if ho % d == 0:
            best = d
    if best * 4 >= max_h:                        # divisor is close enough to target
        return best, ho
    ho_pad = -(-ho // max_h) * max_h             # ragged tail -> pad rows, slice later
    return max_h, ho_pad


# --------------------------------------------------------------------------- #
# Conv + folded-BN kernel: whole padded image resident, k*k taps sliced
# in-kernel, f32 accumulation, optional residual / ReLU / SE channel-sum.
# --------------------------------------------------------------------------- #
def _conv_kernel(x_ref, *rest, k, tile_h, wo, cin, n_out, has_res, emit_psum, relu):
    rest = list(rest)
    w_refs = [rest.pop(0) for _ in range(n_out)]
    sh_refs = [rest.pop(0) for _ in range(n_out)]
    r_ref = rest.pop(0) if has_res else None
    y_refs = [rest.pop(0) for _ in range(n_out)]
    ps_ref = rest.pop(0) if emit_psum else None

    t = pl.program_id(1)
    row0 = t * tile_h
    m = tile_h * wo
    couts = [int(w.shape[-1]) for w in w_refs]
    accs = [jnp.zeros((m, c), jnp.float32) for c in couts]

    # Static unroll over the k*k conv taps; each tap is one small MXU matmul
    # shared by all fused output heads (conv1 + conv3 share the same lhs).
    for kh in range(k):
        for kw in range(k):
            lhs = x_ref[0, pl.ds(row0 + kh, tile_h), kw:kw + wo, :].reshape(m, cin)
            for j in range(n_out):
                accs[j] = accs[j] + jnp.dot(lhs, w_refs[j][kh, kw],
                                            preferred_element_type=jnp.float32)

    for j in range(n_out):
        y = accs[j] + sh_refs[j][...]                       # folded-BN shift (f32)
        if has_res and j == 0:
            y = y + r_ref[0].reshape(m, couts[j]).astype(jnp.float32)
        if relu[j]:
            y = jnp.maximum(y, 0.0)
        if emit_psum and j == 0:                            # SE global-pool partial sum
            ps_ref[0, 0] = jnp.sum(y, axis=0, keepdims=True)
        y_refs[j][0] = y.reshape(tile_h, wo, couts[j]).astype(y_refs[j].dtype)


def conv_bn_act(x_nhwc, weights, scales, shifts, *, padding, relu, residual=None,
                emit_psum=False, tile_target=2048, vmem_limit=48 * 1024 * 1024,
                out_dtype=jnp.bfloat16):
    """Stride-1 Conv2d(bias=False) + folded BN for >=1 weight sets sharing input
    patches; optional residual add / ReLU / SE channel-sum on the first output.

    weights: list of PyTorch-layout (Cout, Cin, k, k).  Returns (list_of_y, ch_sum).
    """
    n, h, w_in, cin = x_nhwc.shape
    n_out = len(weights)
    k = int(weights[0].shape[-1])
    couts = [int(w.shape[0]) for w in weights]

    ho = h + 2 * padding - k + 1
    wo = w_in + 2 * padding - k + 1
    assert ho >= 1 and wo >= 1

    # keep the f32 accumulators bounded even for wide Cout
    eff_target = max(256, min(tile_target, (4 * 1024 * 1024) // max(1, 4 * sum(couts))))
    tile_h, ho_pad = _plan_rows(ho, wo, eff_target)
    n_t = ho_pad // tile_h
    wo_pad = max(8, -(-wo // 8) * 8)             # sublane-friendly width
    pad_r, pad_c = ho_pad - ho, wo_pad - wo
    hp, wp = ho_pad + k - 1, wo_pad + k - 1

    xp = jnp.pad(x_nhwc.astype(jnp.bfloat16),
                 ((0, 0), (padding, padding + pad_r),
                  (padding, padding + pad_c), (0, 0)))
    assert xp.shape == (n, hp, wp, cin)

    # (kh, kw, Cin, Cout) weight slabs with the BN scale folded in (bf16 for MXU).
    w_slabs = [(jnp.transpose(w, (2, 3, 1, 0)).astype(jnp.float32)
                * s.astype(jnp.float32)[None, None, None, :]).astype(jnp.bfloat16)
               for w, s in zip(weights, scales)]
    sh_rows = [s.reshape(1, c).astype(jnp.float32) for s, c in zip(shifts, couts)]

    has_res = residual is not None
    if has_res:
        assert residual.shape == (n, ho, wo, couts[0])
        res_p = jnp.pad(residual.astype(jnp.bfloat16),
                        ((0, 0), (0, pad_r), (0, pad_c), (0, 0)))

    # In-kernel pool only when no spatial padding (padded rows would pollute it).
    psum_in_kernel = bool(emit_psum and pad_r == 0 and pad_c == 0)

    kern = functools.partial(_conv_kernel, k=k, tile_h=tile_h, wo=wo_pad, cin=cin,
                             n_out=n_out, has_res=has_res,
                             emit_psum=psum_in_kernel, relu=tuple(relu))

    # Whole padded image per batch item; block index constant along t so the
    # input is DMA'd exactly once per image and reused across row tiles.
    in_specs = [pl.BlockSpec((1, hp, wp, cin), lambda b, t: (b, 0, 0, 0))]
    args = [xp]
    for w_s in w_slabs:
        in_specs.append(pl.BlockSpec(w_s.shape, lambda b, t: (0, 0, 0, 0)))
        args.append(w_s)
    for sh in sh_rows:
        in_specs.append(pl.BlockSpec(sh.shape, lambda b, t: (0, 0)))
        args.append(sh)
    if has_res:
        in_specs.append(pl.BlockSpec((1, tile_h, wo_pad, couts[0]),
                                     lambda b, t: (b, t, 0, 0)))
        args.append(res_p)

    out_specs = [pl.BlockSpec((1, tile_h, wo_pad, c), lambda b, t: (b, t, 0, 0))
                 for c in couts]
    out_shapes = [jax.ShapeDtypeStruct((n, ho_pad, wo_pad, c), out_dtype)
                  for c in couts]
    if psum_in_kernel:
        out_specs.append(pl.BlockSpec((1, 1, 1, couts[0]), lambda b, t: (b, t, 0, 0)))
        out_shapes.append(jax.ShapeDtypeStruct((n, n_t, 1, couts[0]), jnp.float32))

    outs = pl.pallas_call(
        kern,
        grid=(n, n_t),
        in_specs=in_specs,
        out_specs=tuple(out_specs),
        out_shape=tuple(out_shapes),
        compiler_params=pltpu.CompilerParams(
            dimension_semantics=("parallel", "arbitrary"),
            vmem_limit_bytes=vmem_limit),
    )(*args)

    outs = list(outs)
    ys = [o[:, :ho, :wo, :] for o in outs[:n_out]]          # drop planning padding
    ch_sum = None
    if psum_in_kernel:
        ch_sum = outs[n_out].reshape(n, n_t, couts[0]).sum(axis=1)   # (N, Cout) f32
    return ys, ch_sum


# --------------------------------------------------------------------------- #
# Streaming SE channel rescale
# --------------------------------------------------------------------------- #
def _rescale_kernel(y_ref, s_ref, o_ref):
    o_ref[0] = (y_ref[0].astype(jnp.float32) * s_ref[0, 0, 0]).astype(o_ref.dtype)


def se_rescale(y, s, *, tile_target, vmem_limit, out_dtype=jnp.float32):
    """y: (N, H, W, C); s: (N, C) per-channel scales."""
    n, ho, wo, c = y.shape
    tile_h = max(1, min(ho, tile_target // max(wo, 1)))
    n_t = pl.cdiv(ho, tile_h)
    return pl.pallas_call(
        _rescale_kernel,
        grid=(n, n_t),
        in_specs=[pl.BlockSpec((1, tile_h, wo, c), lambda b, t: (b, t, 0, 0)),
                  pl.BlockSpec((1, 1, 1, c), lambda b, t: (b, 0, 0, 0))],
        out_specs=pl.BlockSpec((1, tile_h, wo, c), lambda b, t: (b, t, 0, 0)),
        out_shape=jax.ShapeDtypeStruct((n, ho, wo, c), out_dtype),
        compiler_params=pltpu.CompilerParams(
            dimension_semantics=("parallel", "arbitrary"),
            vmem_limit_bytes=vmem_limit),
    )(y, s.astype(jnp.float32).reshape(n, 1, 1, c))


# --------------------------------------------------------------------------- #
# Full ResSEConvBlock forward
# --------------------------------------------------------------------------- #
def res_se_conv_block(x_nchw, params, *, stride, padding):
    vmem_limit, tile_target = _vmem_and_tile_budget()
    # TODO(synk): keep NHWC end-to-end in the surrounding model to drop both
    # boundary transposes (each is a full HBM pass over the feature map).
    x = jnp.transpose(x_nchw, (0, 2, 3, 1))                 # NCHW -> NHWC

    sc1, sh1 = _fold_bn(*params["bn1"])
    sc2, sh2 = _fold_bn(*params["bn2"])
    sc3, sh3 = _fold_bn(*params["bn3"])

    # conv1 & conv3 share the same input patches: one kernel pass, two outputs
    # (ReLU only on the conv1 head; no channel mask, no JAX lane slices).
    (y1, ysc), _ = conv_bn_act(
        x, [params["w1"], params["w3"]], [sc1, sc3], [sh1, sh3],
        padding=padding, relu=[True, False],
        tile_target=tile_target, vmem_limit=vmem_limit)

    if stride != 1:
        # TODO(synk): stride>1 is computed at stride 1 and subsampled
        # (stride^2 extra work); MUNet's ResSEConvBlock uses stride == 1.
        y1 = y1[:, ::stride, ::stride, :]
        ysc = ysc[:, ::stride, ::stride, :]

    # conv2 -> bn2 -> +shortcut -> ReLU, with SE global-pool partial sums
    # emitted from the same kernel's f32 epilogue.
    (y2,), ch_sum = conv_bn_act(
        y1, [params["w2"]], [sc2], [sh2], padding=padding, relu=[True],
        residual=ysc, emit_psum=True,
        tile_target=tile_target, vmem_limit=vmem_limit)
    n, ho, wo, _ = y2.shape

    if ch_sum is None:           # only when spatial padding was needed
        pooled = jnp.mean(y2.astype(jnp.float32), axis=(1, 2))
    else:
        pooled = ch_sum / float(ho * wo)                     # (N, C) f32

    # SE squeeze/excite: tiny (N, C) MLP -> plain JAX (MXU M=1 is waste).
    hdn = jax.nn.relu(pooled @ params["wc"][:, :, 0, 0].T + params["bc"])
    e = hdn @ params["we"][:, :, 0, 0].T + params["be"]
    s = jax.nn.softmax(e, axis=-1)          # F.softmax default dim=1 (channels)

    out = se_rescale(y2, s, tile_target=tile_target, vmem_limit=vmem_limit)
    return jnp.transpose(out, (0, 3, 1, 2))                  # NHWC -> NCHW


# --------------------------------------------------------------------------- #
# Pure-JAX reference (f32, HIGHEST precision)
# --------------------------------------------------------------------------- #
def _ref_bn(x, gamma, beta, mean, var):
    return ((x - mean[None, :, None, None])
            / jnp.sqrt(var[None, :, None, None] + BN_EPS)
            * gamma[None, :, None, None] + beta[None, :, None, None])


def _ref_conv(x, w, stride, padding):
    return lax.conv_general_dilated(
        x, w, (stride, stride), [(padding, padding), (padding, padding)],
        dimension_numbers=("NCHW", "OIHW", "NCHW"),
        precision=lax.Precision.HIGHEST)


def reference(x, params, stride, padding):
    out = jax.nn.relu(_ref_bn(_ref_conv(x, params["w1"], stride, padding), *params["bn1"]))
    out = _ref_bn(_ref_conv(out, params["w2"], 1, padding), *params["bn2"])
    sc = _ref_bn(_ref_conv(x, params["w3"], stride, padding), *params["bn3"])
    out = jax.nn.relu(out + sc)
    pooled = jnp.mean(out, axis=(2, 3))                      # (N, C)
    h = jax.nn.relu(pooled @ params["wc"][:, :, 0, 0].T + params["bc"])
    e = h @ params["we"][:, :, 0, 0].T + params["be"]
    s = jax.nn.softmax(e, axis=1)
    return out * s[:, :, None, None]


# --------------------------------------------------------------------------- #
if __name__ == "__main__":
    key = jax.random.PRNGKey(0)
    in_ch, out_ch, k, s, p, ratio = 4, 32, 3, 1, 1, 16
    n, h, w = 2, 16, 16

    ks = jax.random.split(key, 16)

    def bn_params(k1, k2, k3, k4, c):
        gamma = 1.0 + 0.1 * jax.random.normal(k1, (c,), jnp.float32)
        beta = 0.1 * jax.random.normal(k2, (c,), jnp.float32)
        mean = 0.1 * jax.random.normal(k3, (c,), jnp.float32)
        var = jax.random.uniform(k4, (c,), jnp.float32, 0.5, 1.5)
        return (gamma, beta, mean, var)

    params = {
        "w1": 0.1 * jax.random.normal(ks[0], (out_ch, in_ch, k, k), jnp.float32),
        "w2": 0.05 * jax.random.normal(ks[1], (out_ch, out_ch, k, k), jnp.float32),
        "w3": 0.1 * jax.random.normal(ks[2], (out_ch, in_ch, k, k), jnp.float32),
        "bn1": bn_params(ks[3], ks[4], ks[5], ks[6], out_ch),
        "bn2": bn_params(ks[7], ks[8], ks[9], ks[10], out_ch),
        "bn3": bn_params(ks[11], ks[12], ks[13], ks[14], out_ch),
    }
    kse = jax.random.split(ks[15], 5)
    cr = out_ch // ratio
    params["wc"] = 0.2 * jax.random.normal(kse[0], (cr, out_ch, 1, 1), jnp.float32)
    params["bc"] = 0.1 * jax.random.normal(kse[1], (cr,), jnp.float32)
    params["we"] = 0.2 * jax.random.normal(kse[2], (out_ch, cr, 1, 1), jnp.float32)
    params["be"] = 0.1 * jax.random.normal(kse[3], (out_ch,), jnp.float32)

    x = jax.random.normal(kse[4], (n, in_ch, h, w), jnp.float32)

    fwd = jax.jit(functools.partial(res_se_conv_block, stride=s, padding=p))
    out = jax.block_until_ready(fwd(x, params))

    ref = reference(x, params, s, p)
    assert out.shape == ref.shape == (n, out_ch, h, w)
    # MXU inputs are bf16 (f32 accumulation / epilogue) -> bf16-level tolerance.
    if not bool(jnp.allclose(out, ref, rtol=2e-2, atol=2e-3)):
        raise AssertionError("Pallas output mismatch vs JAX reference")
    print("KERNEL_OK")
</pallas_src>

<mosaic_0001>
module attributes {stable_mosaic.version = 11 : i64} {
  func.func @_conv_kernel(%arg0: i32, %arg1: i32, %arg2: memref<1x18x18x4xbf16, #tpu.memory_space<vmem>>, %arg3: memref<3x3x4x32xbf16, #tpu.memory_space<vmem>>, %arg4: memref<3x3x4x32xbf16, #tpu.memory_space<vmem>>, %arg5: memref<1x32xf32, #tpu.memory_space<vmem>>, %arg6: memref<1x32xf32, #tpu.memory_space<vmem>>, %arg7: memref<1x16x16x32xbf16, #tpu.memory_space<vmem>>, %arg8: memref<1x16x16x32xbf16, #tpu.memory_space<vmem>>) attributes {dimension_semantics = [#tpu.dimension_semantics<parallel>, #tpu.dimension_semantics<arbitrary>], iteration_bounds = array<i64: 2, 1>, scalar_prefetch = 0 : i64, scratch_operands = 0 : i64, tpu.core_type = #tpu.core_type<tc>, window_params = [{transform_indices = @transform_0, window_bounds = array<i64: 1, 18, 18, 4>}, {pipeline_mode = #tpu.pipeline_mode<synchronous>, transform_indices = @transform_1, window_bounds = array<i64: 3, 3, 4, 32>}, {pipeline_mode = #tpu.pipeline_mode<synchronous>, transform_indices = @transform_2, window_bounds = array<i64: 3, 3, 4, 32>}, {pipeline_mode = #tpu.pipeline_mode<synchronous>, transform_indices = @transform_3, window_bounds = array<i64: 1, 32>}, {pipeline_mode = #tpu.pipeline_mode<synchronous>, transform_indices = @transform_4, window_bounds = array<i64: 1, 32>}, {transform_indices = @transform_5, window_bounds = array<i64: 1, 16, 16, 32>}, {transform_indices = @transform_6, window_bounds = array<i64: 1, 16, 16, 32>}]} {
    %c16_i32 = arith.constant 16 : i32
    %0 = arith.muli %arg1, %c16_i32 : i32
    %cst = arith.constant 0.000000e+00 : f32
    %1 = vector.broadcast %cst : f32 to vector<256x32xf32>
    %cst_0 = arith.constant 0.000000e+00 : f32
    %2 = vector.broadcast %cst_0 : f32 to vector<256x32xf32>
    %c0_i32 = arith.constant 0 : i32
    %3 = arith.addi %0, %c0_i32 : i32
    %c0 = arith.constant 0 : index
    %4 = arith.index_cast %3 : i32 to index
    %c0_1 = arith.constant 0 : index
    %c0_2 = arith.constant 0 : index
    %5 = vector.load %arg2[%c0, %4, %c0_1, %c0_2] : memref<1x18x18x4xbf16, #tpu.memory_space<vmem>>, vector<1x16x16x4xbf16>
    %6 = vector.shape_cast %5 : vector<1x16x16x4xbf16> to vector<16x16x4xbf16>
    %7 = vector.shape_cast %6 : vector<16x16x4xbf16> to vector<256x4xbf16>
    %c0_3 = arith.constant 0 : index
    %c0_4 = arith.constant 0 : index
    %c0_5 = arith.constant 0 : index
    %c0_6 = arith.constant 0 : index
    %8 = vector.load %arg3[%c0_3, %c0_4, %c0_5, %c0_6] : memref<3x3x4x32xbf16, #tpu.memory_space<vmem>>, vector<1x1x4x32xbf16>
    %9 = vector.shape_cast %8 : vector<1x1x4x32xbf16> to vector<4x32xbf16>
    %cst_7 = arith.constant dense<0.000000e+00> : vector<256x32xf32>
    %10 = tpu.matmul %7, %9, %cst_7 {dimension_numbers = #tpu.dot_dimension_numbers<[1], [0], [0], [1], [0, 0, 1, 1], [], []>} : vector<256x4xbf16>, vector<4x32xbf16>, vector<256x32xf32> -> vector<256x32xf32>
    %11 = arith.addf %1, %10 : vector<256x32xf32>
    %c0_8 = arith.constant 0 : index
    %c0_9 = arith.constant 0 : index
    %c0_10 = arith.constant 0 : index
    %c0_11 = arith.constant 0 : index
    %12 = vector.load %arg4[%c0_8, %c0_9, %c0_10, %c0_11] : memref<3x3x4x32xbf16, #tpu.memory_space<vmem>>, vector<1x1x4x32xbf16>
    %13 = vector.shape_cast %12 : vector<1x1x4x32xbf16> to vector<4x32xbf16>
    %cst_12 = arith.constant dense<0.000000e+00> : vector<256x32xf32>
    %14 = tpu.matmul %7, %13, %cst_12 {dimension_numbers = #tpu.dot_dimension_numbers<[1], [0], [0], [1], [0, 0, 1, 1], [], []>} : vector<256x4xbf16>, vector<4x32xbf16>, vector<256x32xf32> -> vector<256x32xf32>
    %15 = arith.addf %2, %14 : vector<256x32xf32>
    %c0_i32_13 = arith.constant 0 : i32
    %16 = arith.addi %0, %c0_i32_13 : i32
    %c0_14 = arith.constant 0 : index
    %17 = arith.index_cast %16 : i32 to index
    %c1 = arith.constant 1 : index
    %c0_15 = arith.constant 0 : index
    %18 = vector.load %arg2[%c0_14, %17, %c1, %c0_15] : memref<1x18x18x4xbf16, #tpu.memory_space<vmem>>, vector<1x16x16x4xbf16>
    %19 = vector.shape_cast %18 : vector<1x16x16x4xbf16> to vector<16x16x4xbf16>
    %20 = vector.shape_cast %19 : vector<16x16x4xbf16> to vector<256x4xbf16>
    %c0_16 = arith.constant 0 : index
    %c1_17 = arith.constant 1 : index
    %c0_18 = arith.constant 0 : index
    %c0_19 = arith.constant 0 : index
    %21 = vector.load %arg3[%c0_16, %c1_17, %c0_18, %c0_19] : memref<3x3x4x32xbf16, #tpu.memory_space<vmem>>, vector<1x1x4x32xbf16>
    %22 = vector.shape_cast %21 : vector<1x1x4x32xbf16> to vector<4x32xbf16>
    %cst_20 = arith.constant dense<0.000000e+00> : vector<256x32xf32>
    %23 = tpu.matmul %20, %22, %cst_20 {dimension_numbers = #tpu.dot_dimension_numbers<[1], [0], [0], [1], [0, 0, 1, 1], [], []>} : vector<256x4xbf16>, vector<4x32xbf16>, vector<256x32xf32> -> vector<256x32xf32>
    %24 = arith.addf %11, %23 : vector<256x32xf32>
    %c0_21 = arith.constant 0 : index
    %c1_22 = arith.constant 1 : index
    %c0_23 = arith.constant 0 : index
    %c0_24 = arith.constant 0 : index
    %25 = vector.load %arg4[%c0_21, %c1_22, %c0_23, %c0_24] : memref<3x3x4x32xbf16, #tpu.memory_space<vmem>>, vector<1x1x4x32xbf16>
    %26 = vector.shape_cast %25 : vector<1x1x4x32xbf16> to vector<4x32xbf16>
    %cst_25 = arith.constant dense<0.000000e+00> : vector<256x32xf32>
    %27 = tpu.matmul %20, %26, %cst_25 {dimension_numbers = #tpu.dot_dimension_numbers<[1], [0], [0], [1], [0, 0, 1, 1], [], []>} : vector<256x4xbf16>, vector<4x32xbf16>, vector<256x32xf32> -> vector<256x32xf32>
    %28 = arith.addf %15, %27 : vector<256x32xf32>
    %c0_i32_26 = arith.constant 0 : i32
    %29 = arith.addi %0, %c0_i32_26 : i32
    %c0_27 = arith.constant 0 : index
    %30 = arith.index_cast %29 : i32 to index
    %c2 = arith.constant 2 : index
    %c0_28 = arith.constant 0 : index
    %31 = vector.load %arg2[%c0_27, %30, %c2, %c0_28] : memref<1x18x18x4xbf16, #tpu.memory_space<vmem>>, vector<1x16x16x4xbf16>
    %32 = vector.shape_cast %31 : vector<1x16x16x4xbf16> to vector<16x16x4xbf16>
    %33 = vector.shape_cast %32 : vector<16x16x4xbf16> to vector<256x4xbf16>
    %c0_29 = arith.constant 0 : index
    %c2_30 = arith.constant 2 : index
    %c0_31 = arith.constant 0 : index
    %c0_32 = arith.constant 0 : index
    %34 = vector.load %arg3[%c0_29, %c2_30, %c0_31, %c0_32] : memref<3x3x4x32xbf16, #tpu.memory_space<vmem>>, vector<1x1x4x32xbf16>
    %35 = vector.shape_cast %34 : vector<1x1x4x32xbf16> to vector<4x32xbf16>
    %cst_33 = arith.constant dense<0.000000e+00> : vector<256x32xf32>
    %36 = tpu.matmul %33, %35, %cst_33 {dimension_numbers = #tpu.dot_dimension_numbers<[1], [0], [0], [1], [0, 0, 1, 1], [], []>} : vector<256x4xbf16>, vector<4x32xbf16>, vector<256x32xf32> -> vector<256x32xf32>
    %37 = arith.addf %24, %36 : vector<256x32xf32>
    %c0_34 = arith.constant 0 : index
    %c2_35 = arith.constant 2 : index
    %c0_36 = arith.constant 0 : index
    %c0_37 = arith.constant 0 : index
    %38 = vector.load %arg4[%c0_34, %c2_35, %c0_36, %c0_37] : memref<3x3x4x32xbf16, #tpu.memory_space<vmem>>, vector<1x1x4x32xbf16>
    %39 = vector.shape_cast %38 : vector<1x1x4x32xbf16> to vector<4x32xbf16>
    %cst_38 = arith.constant dense<0.000000e+00> : vector<256x32xf32>
    %40 = tpu.matmul %33, %39, %cst_38 {dimension_numbers = #tpu.dot_dimension_numbers<[1], [0], [0], [1], [0, 0, 1, 1], [], []>} : vector<256x4xbf16>, vector<4x32xbf16>, vector<256x32xf32> -> vector<256x32xf32>
    %41 = arith.addf %28, %40 : vector<256x32xf32>
    %c1_i32 = arith.constant 1 : i32
    %42 = arith.addi %0, %c1_i32 : i32
    %c0_39 = arith.constant 0 : index
    %43 = arith.index_cast %42 : i32 to index
    %c0_40 = arith.constant 0 : index
    %c0_41 = arith.constant 0 : index
    %44 = vector.load %arg2[%c0_39, %43, %c0_40, %c0_41] : memref<1x18x18x4xbf16, #tpu.memory_space<vmem>>, vector<1x16x16x4xbf16>
    %45 = vector.shape_cast %44 : vector<1x16x16x4xbf16> to vector<16x16x4xbf16>
    %46 = vector.shape_cast %45 : vector<16x16x4xbf16> to vector<256x4xbf16>
    %c1_42 = arith.constant 1 : index
    %c0_43 = arith.constant 0 : index
    %c0_44 = arith.constant 0 : index
    %c0_45 = arith.constant 0 : index
    %47 = vector.load %arg3[%c1_42, %c0_43, %c0_44, %c0_45] : memref<3x3x4x32xbf16, #tpu.memory_space<vmem>>, vector<1x1x4x32xbf16>
    %48 = vector.shape_cast %47 : vector<1x1x4x32xbf16> to vector<4x32xbf16>
    %cst_46 = arith.constant dense<0.000000e+00> : vector<256x32xf32>
    %49 = tpu.matmul %46, %48, %cst_46 {dimension_numbers = #tpu.dot_dimension_numbers<[1], [0], [0], [1], [0, 0, 1, 1], [], []>} : vector<256x4xbf16>, vector<4x32xbf16>, vector<256x32xf32> -> vector<256x32xf32>
    %50 = arith.addf %37, %49 : vector<256x32xf32>
    %c1_47 = arith.constant 1 : index
    %c0_48 = arith.constant 0 : index
    %c0_49 = arith.constant 0 : index
    %c0_50 = arith.constant 0 : index
    %51 = vector.load %arg4[%c1_47, %c0_48, %c0_49, %c0_50] : memref<3x3x4x32xbf16, #tpu.memory_space<vmem>>, vector<1x1x4x32xbf16>
    %52 = vector.shape_cast %51 : vector<1x1x4x32xbf16> to vector<4x32xbf16>
    %cst_51 = arith.constant dense<0.000000e+00> : vector<256x32xf32>
    %53 = tpu.matmul %46, %52, %cst_51 {dimension_numbers = #tpu.dot_dimension_numbers<[1], [0], [0], [1], [0, 0, 1, 1], [], []>} : vector<256x4xbf16>, vector<4x32xbf16>, vector<256x32xf32> -> vector<256x32xf32>
    %54 = arith.addf %41, %53 : vector<256x32xf32>
    %c1_i32_52 = arith.constant 1 : i32
    %55 = arith.addi %0, %c1_i32_52 : i32
    %c0_53 = arith.constant 0 : index
    %56 = arith.index_cast %55 : i32 to index
    %c1_54 = arith.constant 1 : index
    %c0_55 = arith.constant 0 : index
    %57 = vector.load %arg2[%c0_53, %56, %c1_54, %c0_55] : memref<1x18x18x4xbf16, #tpu.memory_space<vmem>>, vector<1x16x16x4xbf16>
    %58 = vector.shape_cast %57 : vector<1x16x16x4xbf16> to vector<16x16x4xbf16>
    %59 = vector.shape_cast %58 : vector<16x16x4xbf16> to vector<256x4xbf16>
    %c1_56 = arith.constant 1 : index
    %c1_57 = arith.constant 1 : index
    %c0_58 = arith.constant 0 : index
    %c0_59 = arith.constant 0 : index
    %60 = vector.load %arg3[%c1_56, %c1_57, %c0_58, %c0_59] : memref<3x3x4x32xbf16, #tpu.memory_space<vmem>>, vector<1x1x4x32xbf16>
    %61 = vector.shape_cast %60 : vector<1x1x4x32xbf16> to vector<4x32xbf16>
    %cst_60 = arith.constant dense<0.000000e+00> : vector<256x32xf32>
    %62 = tpu.matmul %59, %61, %cst_60 {dimension_numbers = #tpu.dot_dimension_numbers<[1], [0], [0], [1], [0, 0, 1, 1], [], []>} : vector<256x4xbf16>, vector<4x32xbf16>, vector<256x32xf32> -> vector<256x32xf32>
    %63 = arith.addf %50, %62 : vector<256x32xf32>
    %c1_61 = arith.constant 1 : index
    %c1_62 = arith.constant 1 : index
    %c0_63 = arith.constant 0 : index
    %c0_64 = arith.constant 0 : index
    %64 = vector.load %arg4[%c1_61, %c1_62, %c0_63, %c0_64] : memref<3x3x4x32xbf16, #tpu.memory_space<vmem>>, vector<1x1x4x32xbf16>
    %65 = vector.shape_cast %64 : vector<1x1x4x32xbf16> to vector<4x32xbf16>
    %cst_65 = arith.constant dense<0.000000e+00> : vector<256x32xf32>
    %66 = tpu.matmul %59, %65, %cst_65 {dimension_numbers = #tpu.dot_dimension_numbers<[1], [0], [0], [1], [0, 0, 1, 1], [], []>} : vector<256x4xbf16>, vector<4x32xbf16>, vector<256x32xf32> -> vector<256x32xf32>
    %67 = arith.addf %54, %66 : vector<256x32xf32>
    %c1_i32_66 = arith.constant 1 : i32
    %68 = arith.addi %0, %c1_i32_66 : i32
    %c0_67 = arith.constant 0 : index
    %69 = arith.index_cast %68 : i32 to index
    %c2_68 = arith.constant 2 : index
    %c0_69 = arith.constant 0 : index
    %70 = vector.load %arg2[%c0_67, %69, %c2_68, %c0_69] : memref<1x18x18x4xbf16, #tpu.memory_space<vmem>>, vector<1x16x16x4xbf16>
    %71 = vector.shape_cast %70 : vector<1x16x16x4xbf16> to vector<16x16x4xbf16>
    %72 = vector.shape_cast %71 : vector<16x16x4xbf16> to vector<256x4xbf16>
    %c1_70 = arith.constant 1 : index
    %c2_71 = arith.constant 2 : index
    %c0_72 = arith.constant 0 : index
    %c0_73 = arith.constant 0 : index
    %73 = vector.load %arg3[%c1_70, %c2_71, %c0_72, %c0_73] : memref<3x3x4x32xbf16, #tpu.memory_space<vmem>>, vector<1x1x4x32xbf16>
    %74 = vector.shape_cast %73 : vector<1x1x4x32xbf16> to vector<4x32xbf16>
    %cst_74 = arith.constant dense<0.000000e+00> : vector<256x32xf32>
    %75 = tpu.matmul %72, %74, %cst_74 {dimension_numbers = #tpu.dot_dimension_numbers<[1], [0], [0], [1], [0, 0, 1, 1], [], []>} : vector<256x4xbf16>, vector<4x32xbf16>, vector<256x32xf32> -> vector<256x32xf32>
    %76 = arith.addf %63, %75 : vector<256x32xf32>
    %c1_75 = arith.constant 1 : index
    %c2_76 = arith.constant 2 : index
    %c0_77 = arith.constant 0 : index
    %c0_78 = arith.constant 0 : index
    %77 = vector.load %arg4[%c1_75, %c2_76, %c0_77, %c0_78] : memref<3x3x4x32xbf16, #tpu.memory_space<vmem>>, vector<1x1x4x32xbf16>
    %78 = vector.shape_cast %77 : vector<1x1x4x32xbf16> to vector<4x32xbf16>
    %cst_79 = arith.constant dense<0.000000e+00> : vector<256x32xf32>
    %79 = tpu.matmul %72, %78, %cst_79 {dimension_numbers = #tpu.dot_dimension_numbers<[1], [0], [0], [1], [0, 0, 1, 1], [], []>} : vector<256x4xbf16>, vector<4x32xbf16>, vector<256x32xf32> -> vector<256x32xf32>
    %80 = arith.addf %67, %79 : vector<256x32xf32>
    %c2_i32 = arith.constant 2 : i32
    %81 = arith.addi %0, %c2_i32 : i32
    %c0_80 = arith.constant 0 : index
    %82 = arith.index_cast %81 : i32 to index
    %c0_81 = arith.constant 0 : index
    %c0_82 = arith.constant 0 : index
    %83 = vector.load %arg2[%c0_80, %82, %c0_81, %c0_82] : memref<1x18x18x4xbf16, #tpu.memory_space<vmem>>, vector<1x16x16x4xbf16>
    %84 = vector.shape_cast %83 : vector<1x16x16x4xbf16> to vector<16x16x4xbf16>
    %85 = vector.shape_cast %84 : vector<16x16x4xbf16> to vector<256x4xbf16>
    %c2_83 = arith.constant 2 : index
    %c0_84 = arith.constant 0 : index
    %c0_85 = arith.constant 0 : index
    %c0_86 = arith.constant 0 : index
    %86 = vector.load %arg3[%c2_83, %c0_84, %c0_85, %c0_86] : memref<3x3x4x32xbf16, #tpu.memory_space<vmem>>, vector<1x1x4x32xbf16>
    %87 = vector.shape_cast %86 : vector<1x1x4x32xbf16> to vector<4x32xbf16>
    %cst_87 = arith.constant dense<0.000000e+00> : vector<256x32xf32>
    %88 = tpu.matmul %85, %87, %cst_87 {dimension_numbers = #tpu.dot_dimension_numbers<[1], [0], [0], [1], [0, 0, 1, 1], [], []>} : vector<256x4xbf16>, vector<4x32xbf16>, vector<256x32xf32> -> vector<256x32xf32>
    %89 = arith.addf %76, %88 : vector<256x32xf32>
    %c2_88 = arith.constant 2 : index
    %c0_89 = arith.constant 0 : index
    %c0_90 = arith.constant 0 : index
    %c0_91 = arith.constant 0 : index
    %90 = vector.load %arg4[%c2_88, %c0_89, %c0_90, %c0_91] : memref<3x3x4x32xbf16, #tpu.memory_space<vmem>>, vector<1x1x4x32xbf16>
    %91 = vector.shape_cast %90 : vector<1x1x4x32xbf16> to vector<4x32xbf16>
    %cst_92 = arith.constant dense<0.000000e+00> : vector<256x32xf32>
    %92 = tpu.matmul %85, %91, %cst_92 {dimension_numbers = #tpu.dot_dimension_numbers<[1], [0], [0], [1], [0, 0, 1, 1], [], []>} : vector<256x4xbf16>, vector<4x32xbf16>, vector<256x32xf32> -> vector<256x32xf32>
    %93 = arith.addf %80, %92 : vector<256x32xf32>
    %c2_i32_93 = arith.constant 2 : i32
    %94 = arith.addi %0, %c2_i32_93 : i32
    %c0_94 = arith.constant 0 : index
    %95 = arith.index_cast %94 : i32 to index
    %c1_95 = arith.constant 1 : index
    %c0_96 = arith.constant 0 : index
    %96 = vector.load %arg2[%c0_94, %95, %c1_95, %c0_96] : memref<1x18x18x4xbf16, #tpu.memory_space<vmem>>, vector<1x16x16x4xbf16>
    %97 = vector.shape_cast %96 : vector<1x16x16x4xbf16> to vector<16x16x4xbf16>
    %98 = vector.shape_cast %97 : vector<16x16x4xbf16> to vector<256x4xbf16>
    %c2_97 = arith.constant 2 : index
    %c1_98 = arith.constant 1 : index
    %c0_99 = arith.constant 0 : index
    %c0_100 = arith.constant 0 : index
    %99 = vector.load %arg3[%c2_97, %c1_98, %c0_99, %c0_100] : memref<3x3x4x32xbf16, #tpu.memory_space<vmem>>, vector<1x1x4x32xbf16>
    %100 = vector.shape_cast %99 : vector<1x1x4x32xbf16> to vector<4x32xbf16>
    %cst_101 = arith.constant dense<0.000000e+00> : vector<256x32xf32>
    %101 = tpu.matmul %98, %100, %cst_101 {dimension_numbers = #tpu.dot_dimension_numbers<[1], [0], [0], [1], [0, 0, 1, 1], [], []>} : vector<256x4xbf16>, vector<4x32xbf16>, vector<256x32xf32> -> vector<256x32xf32>
    %102 = arith.addf %89, %101 : vector<256x32xf32>
    %c2_102 = arith.constant 2 : index
    %c1_103 = arith.constant 1 : index
    %c0_104 = arith.constant 0 : index
    %c0_105 = arith.constant 0 : index
    %103 = vector.load %arg4[%c2_102, %c1_103, %c0_104, %c0_105] : memref<3x3x4x32xbf16, #tpu.memory_space<vmem>>, vector<1x1x4x32xbf16>
    %104 = vector.shape_cast %103 : vector<1x1x4x32xbf16> to vector<4x32xbf16>
    %cst_106 = arith.constant dense<0.000000e+00> : vector<256x32xf32>
    %105 = tpu.matmul %98, %104, %cst_106 {dimension_numbers = #tpu.dot_dimension_numbers<[1], [0], [0], [1], [0, 0, 1, 1], [], []>} : vector<256x4xbf16>, vector<4x32xbf16>, vector<256x32xf32> -> vector<256x32xf32>
    %106 = arith.addf %93, %105 : vector<256x32xf32>
    %c2_i32_107 = arith.constant 2 : i32
    %107 = arith.addi %0, %c2_i32_107 : i32
    %c0_108 = arith.constant 0 : index
    %108 = arith.index_cast %107 : i32 to index
    %c2_109 = arith.constant 2 : index
    %c0_110 = arith.constant 0 : index
    %109 = vector.load %arg2[%c0_108, %108, %c2_109, %c0_110] : memref<1x18x18x4xbf16, #tpu.memory_space<vmem>>, vector<1x16x16x4xbf16>
    %110 = vector.shape_cast %109 : vector<1x16x16x4xbf16> to vector<16x16x4xbf16>
    %111 = vector.shape_cast %110 : vector<16x16x4xbf16> to vector<256x4xbf16>
    %c2_111 = arith.constant 2 : index
    %c2_112 = arith.constant 2 : index
    %c0_113 = arith.constant 0 : index
    %c0_114 = arith.constant 0 : index
    %112 = vector.load %arg3[%c2_111, %c2_112, %c0_113, %c0_114] : memref<3x3x4x32xbf16, #tpu.memory_space<vmem>>, vector<1x1x4x32xbf16>
    %113 = vector.shape_cast %112 : vector<1x1x4x32xbf16> to vector<4x32xbf16>
    %cst_115 = arith.constant dense<0.000000e+00> : vector<256x32xf32>
    %114 = tpu.matmul %111, %113, %cst_115 {dimension_numbers = #tpu.dot_dimension_numbers<[1], [0], [0], [1], [0, 0, 1, 1], [], []>} : vector<256x4xbf16>, vector<4x32xbf16>, vector<256x32xf32> -> vector<256x32xf32>
    %115 = arith.addf %102, %114 : vector<256x32xf32>
    %c2_116 = arith.constant 2 : index
    %c2_117 = arith.constant 2 : index
    %c0_118 = arith.constant 0 : index
    %c0_119 = arith.constant 0 : index
    %116 = vector.load %arg4[%c2_116, %c2_117, %c0_118, %c0_119] : memref<3x3x4x32xbf16, #tpu.memory_space<vmem>>, vector<1x1x4x32xbf16>
    %117 = vector.shape_cast %116 : vector<1x1x4x32xbf16> to vector<4x32xbf16>
    %cst_120 = arith.constant dense<0.000000e+00> : vector<256x32xf32>
    %118 = tpu.matmul %111, %117, %cst_120 {dimension_numbers = #tpu.dot_dimension_numbers<[1], [0], [0], [1], [0, 0, 1, 1], [], []>} : vector<256x4xbf16>, vector<4x32xbf16>, vector<256x32xf32> -> vector<256x32xf32>
    %119 = arith.addf %106, %118 : vector<256x32xf32>
    %c0_121 = arith.constant 0 : index
    %c0_122 = arith.constant 0 : index
    %120 = vector.load %arg5[%c0_121, %c0_122] : memref<1x32xf32, #tpu.memory_space<vmem>>, vector<1x32xf32>
    %121 = vector.broadcast %120 : vector<1x32xf32> to vector<256x32xf32>
    %122 = arith.addf %115, %121 : vector<256x32xf32>
    %cst_123 = arith.constant 0.000000e+00 : f32
    %123 = vector.broadcast %cst_123 : f32 to vector<256x32xf32>
    %124 = arith.maximumf %122, %123 : vector<256x32xf32>
    %125 = vector.shape_cast %124 : vector<256x32xf32> to vector<16x16x32xf32>
    %126 = arith.truncf %125 : vector<16x16x32xf32> to vector<16x16x32xbf16>
    %c0_124 = arith.constant 0 : index
    %c0_125 = arith.constant 0 : index
    %c0_126 = arith.constant 0 : index
    %c0_127 = arith.constant 0 : index
    %127 = vector.load %arg7[%c0_124, %c0_125, %c0_126, %c0_127] : memref<1x16x16x32xbf16, #tpu.memory_space<vmem>>, vector<1x16x16x32xbf16>
    %128 = vector.shape_cast %127 : vector<1x16x16x32xbf16> to vector<16x16x32xbf16>
    %129 = vector.shape_cast %126 : vector<16x16x32xbf16> to vector<1x16x16x32xbf16>
    tpu.vector_store %arg7[%c0_124, %c0_125, %c0_126, %c0_127], %129 {strides = array<i32>} : memref<1x16x16x32xbf16, #tpu.memory_space<vmem>>, vector<1x16x16x32xbf16>,
    %c0_128 = arith.constant 0 : index
    %c0_129 = arith.constant 0 : index
    %130 = vector.load %arg6[%c0_128, %c0_129] : memref<1x32xf32, #tpu.memory_space<vmem>>, vector<1x32xf32>
    %131 = vector.broadcast %130 : vector<1x32xf32> to vector<256x32xf32>
    %132 = arith.addf %119, %131 : vector<256x32xf32>
    %133 = vector.shape_cast %132 : vector<256x32xf32> to vector<16x16x32xf32>
    %134 = arith.truncf %133 : vector<16x16x32xf32> to vector<16x16x32xbf16>
    %c0_130 = arith.constant 0 : index
    %c0_131 = arith.constant 0 : index
    %c0_132 = arith.constant 0 : index
    %c0_133 = arith.constant 0 : index
    %135 = vector.load %arg8[%c0_130, %c0_131, %c0_132, %c0_133] : memref<1x16x16x32xbf16, #tpu.memory_space<vmem>>, vector<1x16x16x32xbf16>
    %136 = vector.shape_cast %135 : vector<1x16x16x32xbf16> to vector<16x16x32xbf16>
    %137 = vector.shape_cast %134 : vector<16x16x32xbf16> to vector<1x16x16x32xbf16>
    tpu.vector_store %arg8[%c0_130, %c0_131, %c0_132, %c0_133], %137 {strides = array<i32>} : memref<1x16x16x32xbf16, #tpu.memory_space<vmem>>, vector<1x16x16x32xbf16>,
    return
  }
  func.func @transform_0(%arg0: i32, %arg1: i32) -> (i32, i32, i32, i32) {
    %c0_i32 = arith.constant 0 : i32
    %c0_i32_0 = arith.constant 0 : i32
    %c0_i32_1 = arith.constant 0 : i32
    %c0_i32_2 = arith.constant 0 : i32
    return %arg0, %c0_i32, %c0_i32_0, %c0_i32_1 : i32, i32, i32, i32
  }
  func.func @transform_1(%arg0: i32, %arg1: i32) -> (i32, i32, i32, i32) {
    %c0_i32 = arith.constant 0 : i32
    %c0_i32_0 = arith.constant 0 : i32
    %c0_i32_1 = arith.constant 0 : i32
    %c0_i32_2 = arith.constant 0 : i32
    %c0_i32_3 = arith.constant 0 : i32
    return %c0_i32, %c0_i32_0, %c0_i32_1, %c0_i32_2 : i32, i32, i32, i32
  }
  func.func @transform_2(%arg0: i32, %arg1: i32) -> (i32, i32, i32, i32) {
    %c0_i32 = arith.constant 0 : i32
    %c0_i32_0 = arith.constant 0 : i32
    %c0_i32_1 = arith.constant 0 : i32
    %c0_i32_2 = arith.constant 0 : i32
    %c0_i32_3 = arith.constant 0 : i32
    return %c0_i32, %c0_i32_0, %c0_i32_1, %c0_i32_2 : i32, i32, i32, i32
  }
  func.func @transform_3(%arg0: i32, %arg1: i32) -> (i32, i32) {
    %c0_i32 = arith.constant 0 : i32
    %c0_i32_0 = arith.constant 0 : i32
    %c0_i32_1 = arith.constant 0 : i32
    return %c0_i32, %c0_i32_0 : i32, i32
  }
  func.func @transform_4(%arg0: i32, %arg1: i32) -> (i32, i32) {
    %c0_i32 = arith.constant 0 : i32
    %c0_i32_0 = arith.constant 0 : i32
    %c0_i32_1 = arith.constant 0 : i32
    return %c0_i32, %c0_i32_0 : i32, i32
  }
  func.func @transform_5(%arg0: i32, %arg1: i32) -> (i32, i32, i32, i32) {
    %c0_i32 = arith.constant 0 : i32
    %c0_i32_0 = arith.constant 0 : i32
    %c0_i32_1 = arith.constant 0 : i32
    return %arg0, %arg1, %c0_i32, %c0_i32_0 : i32, i32, i32, i32
  }
  func.func @transform_6(%arg0: i32, %arg1: i32) -> (i32, i32, i32, i32) {
    %c0_i32 = arith.constant 0 : i32
    %c0_i32_0 = arith.constant 0 : i32
    %c0_i32_1 = arith.constant 0 : i32
    return %arg0, %arg1, %c0_i32, %c0_i32_0 : i32, i32, i32, i32
  }
}

module attributes {stable_mosaic.version = 11 : i64} {
  func.func @_conv_kernel(%arg0: i32, %arg1: i32, %arg2: memref<1x18x18x32xbf16, #tpu.memory_space<vmem>>, %arg3: memref<3x3x32x32xbf16, #tpu.memory_space<vmem>>, %arg4: memref<1x32xf32, #tpu.memory_space<vmem>>, %arg5: memref<1x16x16x32xbf16, #tpu.memory_space<vmem>>, %arg6: memref<1x16x16x32xbf16, #tpu.memory_space<vmem>>, %arg7: memref<1x1x1x32xf32, #tpu.memory_space<vmem>>) attributes {dimension_semantics = [#tpu.dimension_semantics<parallel>, #tpu.dimension_semantics<arbitrary>], iteration_bounds = array<i64: 2, 1>, scalar_prefetch = 0 : i64, scratch_operands = 0 : i64, tpu.core_type = #tpu.core_type<tc>, window_params = [{transform_indices = @transform_0, window_bounds = array<i64: 1, 18, 18, 32>}, {pipeline_mode = #tpu.pipeline_mode<synchronous>, transform_indices = @transform_1, window_bounds = array<i64: 3, 3, 32, 32>}, {pipeline_mode = #tpu.pipeline_mode<synchronous>, transform_indices = @transform_2, window_bounds = array<i64: 1, 32>}, {transform_indices = @transform_3, window_bounds = array<i64: 1, 16, 16, 32>}, {transform_indices = @transform_4, window_bounds = array<i64: 1, 16, 16, 32>}, {transform_indices = @transform_5, window_bounds = array<i64: 1, 1, 1, 32>}]} {
    %c16_i32 = arith.constant 16 : i32
    %0 = arith.muli %arg1, %c16_i32 : i32
    %cst = arith.constant 0.000000e+00 : f32
    %1 = vector.broadcast %cst : f32 to vector<256x32xf32>
    %c0_i32 = arith.constant 0 : i32
    %2 = arith.addi %0, %c0_i32 : i32
    %c0 = arith.constant 0 : index
    %3 = arith.index_cast %2 : i32 to index
    %c0_0 = arith.constant 0 : index
    %c0_1 = arith.constant 0 : index
    %4 = vector.load %arg2[%c0, %3, %c0_0, %c0_1] : memref<1x18x18x32xbf16, #tpu.memory_space<vmem>>, vector<1x16x16x32xbf16>
    %5 = vector.shape_cast %4 : vector<1x16x16x32xbf16> to vector<16x16x32xbf16>
    %6 = vector.shape_cast %5 : vector<16x16x32xbf16> to vector<256x32xbf16>
    %c0_2 = arith.constant 0 : index
    %c0_3 = arith.constant 0 : index
    %c0_4 = arith.constant 0 : index
    %c0_5 = arith.constant 0 : index
    %7 = vector.load %arg3[%c0_2, %c0_3, %c0_4, %c0_5] : memref<3x3x32x32xbf16, #tpu.memory_space<vmem>>, vector<1x1x32x32xbf16>
    %8 = vector.shape_cast %7 : vector<1x1x32x32xbf16> to vector<32x32xbf16>
    %cst_6 = arith.constant dense<0.000000e+00> : vector<256x32xf32>
    %9 = tpu.matmul %6, %8, %cst_6 {dimension_numbers = #tpu.dot_dimension_numbers<[1], [0], [0], [1], [0, 0, 1, 1], [], []>} : vector<256x32xbf16>, vector<32x32xbf16>, vector<256x32xf32> -> vector<256x32xf32>
    %10 = arith.addf %1, %9 : vector<256x32xf32>
    %c0_i32_7 = arith.constant 0 : i32
    %11 = arith.addi %0, %c0_i32_7 : i32
    %c0_8 = arith.constant 0 : index
    %12 = arith.index_cast %11 : i32 to index
    %c1 = arith.constant 1 : index
    %c0_9 = arith.constant 0 : index
    %13 = vector.load %arg2[%c0_8, %12, %c1, %c0_9] : memref<1x18x18x32xbf16, #tpu.memory_space<vmem>>, vector<1x16x16x32xbf16>
    %14 = vector.shape_cast %13 : vector<1x16x16x32xbf16> to vector<16x16x32xbf16>
    %15 = vector.shape_cast %14 : vector<16x16x32xbf16> to vector<256x32xbf16>
    %c0_10 = arith.constant 0 : index
    %c1_11 = arith.constant 1 : index
    %c0_12 = arith.constant 0 : index
    %c0_13 = arith.constant 0 : index
    %16 = vector.load %arg3[%c0_10, %c1_11, %c0_12, %c0_13] : memref<3x3x32x32xbf16, #tpu.memory_space<vmem>>, vector<1x1x32x32xbf16>
    %17 = vector.shape_cast %16 : vector<1x1x32x32xbf16> to vector<32x32xbf16>
    %cst_14 = arith.constant dense<0.000000e+00> : vector<256x32xf32>
    %18 = tpu.matmul %15, %17, %cst_14 {dimension_numbers = #tpu.dot_dimension_numbers<[1], [0], [0], [1], [0, 0, 1, 1], [], []>} : vector<256x32xbf16>, vector<32x32xbf16>, vector<256x32xf32> -> vector<256x32xf32>
    %19 = arith.addf %10, %18 : vector<256x32xf32>
    %c0_i32_15 = arith.constant 0 : i32
    %20 = arith.addi %0, %c0_i32_15 : i32
    %c0_16 = arith.constant 0 : index
    %21 = arith.index_cast %20 : i32 to index
    %c2 = arith.constant 2 : index
    %c0_17 = arith.constant 0 : index
    %22 = vector.load %arg2[%c0_16, %21, %c2, %c0_17] : memref<1x18x18x32xbf16, #tpu.memory_space<vmem>>, vector<1x16x16x32xbf16>
    %23 = vector.shape_cast %22 : vector<1x16x16x32xbf16> to vector<16x16x32xbf16>
    %24 = vector.shape_cast %23 : vector<16x16x32xbf16> to vector<256x32xbf16>
    %c0_18 = arith.constant 0 : index
    %c2_19 = arith.constant 2 : index
    %c0_20 = arith.constant 0 : index
    %c0_21 = arith.constant 0 : index
    %25 = vector.load %arg3[%c0_18, %c2_19, %c0_20, %c0_21] : memref<3x3x32x32xbf16, #tpu.memory_space<vmem>>, vector<1x1x32x32xbf16>
    %26 = vector.shape_cast %25 : vector<1x1x32x32xbf16> to vector<32x32xbf16>
    %cst_22 = arith.constant dense<0.000000e+00> : vector<256x32xf32>
    %27 = tpu.matmul %24, %26, %cst_22 {dimension_numbers = #tpu.dot_dimension_numbers<[1], [0], [0], [1], [0, 0, 1, 1], [], []>} : vector<256x32xbf16>, vector<32x32xbf16>, vector<256x32xf32> -> vector<256x32xf32>
    %28 = arith.addf %19, %27 : vector<256x32xf32>
    %c1_i32 = arith.constant 1 : i32
    %29 = arith.addi %0, %c1_i32 : i32
    %c0_23 = arith.constant 0 : index
    %30 = arith.index_cast %29 : i32 to index
    %c0_24 = arith.constant 0 : index
    %c0_25 = arith.constant 0 : index
    %31 = vector.load %arg2[%c0_23, %30, %c0_24, %c0_25] : memref<1x18x18x32xbf16, #tpu.memory_space<vmem>>, vector<1x16x16x32xbf16>
    %32 = vector.shape_cast %31 : vector<1x16x16x32xbf16> to vector<16x16x32xbf16>
    %33 = vector.shape_cast %32 : vector<16x16x32xbf16> to vector<256x32xbf16>
    %c1_26 = arith.constant 1 : index
    %c0_27 = arith.constant 0 : index
    %c0_28 = arith.constant 0 : index
    %c0_29 = arith.constant 0 : index
    %34 = vector.load %arg3[%c1_26, %c0_27, %c0_28, %c0_29] : memref<3x3x32x32xbf16, #tpu.memory_space<vmem>>, vector<1x1x32x32xbf16>
    %35 = vector.shape_cast %34 : vector<1x1x32x32xbf16> to vector<32x32xbf16>
    %cst_30 = arith.constant dense<0.000000e+00> : vector<256x32xf32>
    %36 = tpu.matmul %33, %35, %cst_30 {dimension_numbers = #tpu.dot_dimension_numbers<[1], [0], [0], [1], [0, 0, 1, 1], [], []>} : vector<256x32xbf16>, vector<32x32xbf16>, vector<256x32xf32> -> vector<256x32xf32>
    %37 = arith.addf %28, %36 : vector<256x32xf32>
    %c1_i32_31 = arith.constant 1 : i32
    %38 = arith.addi %0, %c1_i32_31 : i32
    %c0_32 = arith.constant 0 : index
    %39 = arith.index_cast %38 : i32 to index
    %c1_33 = arith.constant 1 : index
    %c0_34 = arith.constant 0 : index
    %40 = vector.load %arg2[%c0_32, %39, %c1_33, %c0_34] : memref<1x18x18x32xbf16, #tpu.memory_space<vmem>>, vector<1x16x16x32xbf16>
    %41 = vector.shape_cast %40 : vector<1x16x16x32xbf16> to vector<16x16x32xbf16>
    %42 = vector.shape_cast %41 : vector<16x16x32xbf16> to vector<256x32xbf16>
    %c1_35 = arith.constant 1 : index
    %c1_36 = arith.constant 1 : index
    %c0_37 = arith.constant 0 : index
    %c0_38 = arith.constant 0 : index
    %43 = vector.load %arg3[%c1_35, %c1_36, %c0_37, %c0_38] : memref<3x3x32x32xbf16, #tpu.memory_space<vmem>>, vector<1x1x32x32xbf16>
    %44 = vector.shape_cast %43 : vector<1x1x32x32xbf16> to vector<32x32xbf16>
    %cst_39 = arith.constant dense<0.000000e+00> : vector<256x32xf32>
    %45 = tpu.matmul %42, %44, %cst_39 {dimension_numbers = #tpu.dot_dimension_numbers<[1], [0], [0], [1], [0, 0, 1, 1], [], []>} : vector<256x32xbf16>, vector<32x32xbf16>, vector<256x32xf32> -> vector<256x32xf32>
    %46 = arith.addf %37, %45 : vector<256x32xf32>
    %c1_i32_40 = arith.constant 1 : i32
    %47 = arith.addi %0, %c1_i32_40 : i32
    %c0_41 = arith.constant 0 : index
    %48 = arith.index_cast %47 : i32 to index
    %c2_42 = arith.constant 2 : index
    %c0_43 = arith.constant 0 : index
    %49 = vector.load %arg2[%c0_41, %48, %c2_42, %c0_43] : memref<1x18x18x32xbf16, #tpu.memory_space<vmem>>, vector<1x16x16x32xbf16>
    %50 = vector.shape_cast %49 : vector<1x16x16x32xbf16> to vector<16x16x32xbf16>
    %51 = vector.shape_cast %50 : vector<16x16x32xbf16> to vector<256x32xbf16>
    %c1_44 = arith.constant 1 : index
    %c2_45 = arith.constant 2 : index
    %c0_46 = arith.constant 0 : index
    %c0_47 = arith.constant 0 : index
    %52 = vector.load %arg3[%c1_44, %c2_45, %c0_46, %c0_47] : memref<3x3x32x32xbf16, #tpu.memory_space<vmem>>, vector<1x1x32x32xbf16>
    %53 = vector.shape_cast %52 : vector<1x1x32x32xbf16> to vector<32x32xbf16>
    %cst_48 = arith.constant dense<0.000000e+00> : vector<256x32xf32>
    %54 = tpu.matmul %51, %53, %cst_48 {dimension_numbers = #tpu.dot_dimension_numbers<[1], [0], [0], [1], [0, 0, 1, 1], [], []>} : vector<256x32xbf16>, vector<32x32xbf16>, vector<256x32xf32> -> vector<256x32xf32>
    %55 = arith.addf %46, %54 : vector<256x32xf32>
    %c2_i32 = arith.constant 2 : i32
    %56 = arith.addi %0, %c2_i32 : i32
    %c0_49 = arith.constant 0 : index
    %57 = arith.index_cast %56 : i32 to index
    %c0_50 = arith.constant 0 : index
    %c0_51 = arith.constant 0 : index
    %58 = vector.load %arg2[%c0_49, %57, %c0_50, %c0_51] : memref<1x18x18x32xbf16, #tpu.memory_space<vmem>>, vector<1x16x16x32xbf16>
    %59 = vector.shape_cast %58 : vector<1x16x16x32xbf16> to vector<16x16x32xbf16>
    %60 = vector.shape_cast %59 : vector<16x16x32xbf16> to vector<256x32xbf16>
    %c2_52 = arith.constant 2 : index
    %c0_53 = arith.constant 0 : index
    %c0_54 = arith.constant 0 : index
    %c0_55 = arith.constant 0 : index
    %61 = vector.load %arg3[%c2_52, %c0_53, %c0_54, %c0_55] : memref<3x3x32x32xbf16, #tpu.memory_space<vmem>>, vector<1x1x32x32xbf16>
    %62 = vector.shape_cast %61 : vector<1x1x32x32xbf16> to vector<32x32xbf16>
    %cst_56 = arith.constant dense<0.000000e+00> : vector<256x32xf32>
    %63 = tpu.matmul %60, %62, %cst_56 {dimension_numbers = #tpu.dot_dimension_numbers<[1], [0], [0], [1], [0, 0, 1, 1], [], []>} : vector<256x32xbf16>, vector<32x32xbf16>, vector<256x32xf32> -> vector<256x32xf32>
    %64 = arith.addf %55, %63 : vector<256x32xf32>
    %c2_i32_57 = arith.constant 2 : i32
    %65 = arith.addi %0, %c2_i32_57 : i32
    %c0_58 = arith.constant 0 : index
    %66 = arith.index_cast %65 : i32 to index
    %c1_59 = arith.constant 1 : index
    %c0_60 = arith.constant 0 : index
    %67 = vector.load %arg2[%c0_58, %66, %c1_59, %c0_60] : memref<1x18x18x32xbf16, #tpu.memory_space<vmem>>, vector<1x16x16x32xbf16>
    %68 = vector.shape_cast %67 : vector<1x16x16x32xbf16> to vector<16x16x32xbf16>
    %69 = vector.shape_cast %68 : vector<16x16x32xbf16> to vector<256x32xbf16>
    %c2_61 = arith.constant 2 : index
    %c1_62 = arith.constant 1 : index
    %c0_63 = arith.constant 0 : index
    %c0_64 = arith.constant 0 : index
    %70 = vector.load %arg3[%c2_61, %c1_62, %c0_63, %c0_64] : memref<3x3x32x32xbf16, #tpu.memory_space<vmem>>, vector<1x1x32x32xbf16>
    %71 = vector.shape_cast %70 : vector<1x1x32x32xbf16> to vector<32x32xbf16>
    %cst_65 = arith.constant dense<0.000000e+00> : vector<256x32xf32>
    %72 = tpu.matmul %69, %71, %cst_65 {dimension_numbers = #tpu.dot_dimension_numbers<[1], [0], [0], [1], [0, 0, 1, 1], [], []>} : vector<256x32xbf16>, vector<32x32xbf16>, vector<256x32xf32> -> vector<256x32xf32>
    %73 = arith.addf %64, %72 : vector<256x32xf32>
    %c2_i32_66 = arith.constant 2 : i32
    %74 = arith.addi %0, %c2_i32_66 : i32
    %c0_67 = arith.constant 0 : index
    %75 = arith.index_cast %74 : i32 to index
    %c2_68 = arith.constant 2 : index
    %c0_69 = arith.constant 0 : index
    %76 = vector.load %arg2[%c0_67, %75, %c2_68, %c0_69] : memref<1x18x18x32xbf16, #tpu.memory_space<vmem>>, vector<1x16x16x32xbf16>
    %77 = vector.shape_cast %76 : vector<1x16x16x32xbf16> to vector<16x16x32xbf16>
    %78 = vector.shape_cast %77 : vector<16x16x32xbf16> to vector<256x32xbf16>
    %c2_70 = arith.constant 2 : index
    %c2_71 = arith.constant 2 : index
    %c0_72 = arith.constant 0 : index
    %c0_73 = arith.constant 0 : index
    %79 = vector.load %arg3[%c2_70, %c2_71, %c0_72, %c0_73] : memref<3x3x32x32xbf16, #tpu.memory_space<vmem>>, vector<1x1x32x32xbf16>
    %80 = vector.shape_cast %79 : vector<1x1x32x32xbf16> to vector<32x32xbf16>
    %cst_74 = arith.constant dense<0.000000e+00> : vector<256x32xf32>
    %81 = tpu.matmul %78, %80, %cst_74 {dimension_numbers = #tpu.dot_dimension_numbers<[1], [0], [0], [1], [0, 0, 1, 1], [], []>} : vector<256x32xbf16>, vector<32x32xbf16>, vector<256x32xf32> -> vector<256x32xf32>
    %82 = arith.addf %73, %81 : vector<256x32xf32>
    %c0_75 = arith.constant 0 : index
    %c0_76 = arith.constant 0 : index
    %83 = vector.load %arg4[%c0_75, %c0_76] : memref<1x32xf32, #tpu.memory_space<vmem>>, vector<1x32xf32>
    %84 = vector.broadcast %83 : vector<1x32xf32> to vector<256x32xf32>
    %85 = arith.addf %82, %84 : vector<256x32xf32>
    %c0_77 = arith.constant 0 : index
    %c0_78 = arith.constant 0 : index
    %c0_79 = arith.constant 0 : index
    %c0_80 = arith.constant 0 : index
    %86 = vector.load %arg5[%c0_77, %c0_78, %c0_79, %c0_80] : memref<1x16x16x32xbf16, #tpu.memory_space<vmem>>, vector<1x16x16x32xbf16>
    %87 = vector.shape_cast %86 : vector<1x16x16x32xbf16> to vector<16x16x32xbf16>
    %88 = vector.shape_cast %87 : vector<16x16x32xbf16> to vector<256x32xbf16>
    %89 = arith.extf %88 : vector<256x32xbf16> to vector<256x32xf32>
    %90 = arith.addf %85, %89 : vector<256x32xf32>
    %cst_81 = arith.constant 0.000000e+00 : f32
    %91 = vector.broadcast %cst_81 : f32 to vector<256x32xf32>
    %92 = arith.maximumf %90, %91 : vector<256x32xf32>
    %cst_82 = arith.constant dense<0.000000e+00> : vector<32xf32>
    %93 = vector.multi_reduction <add>, %92, %cst_82 [0] : vector<256x32xf32> to vector<32xf32>
    %94 = vector.shape_cast %93 : vector<32xf32> to vector<1x32xf32>
    %c0_83 = arith.constant 0 : index
    %c0_84 = arith.constant 0 : index
    %c0_85 = arith.constant 0 : index
    %c0_86 = arith.constant 0 : index
    %95 = vector.load %arg7[%c0_83, %c0_84, %c0_85, %c0_86] : memref<1x1x1x32xf32, #tpu.memory_space<vmem>>, vector<1x1x1x32xf32>
    %96 = vector.shape_cast %95 : vector<1x1x1x32xf32> to vector<1x32xf32>
    %97 = vector.shape_cast %94 : vector<1x32xf32> to vector<1x1x1x32xf32>
    tpu.vector_store %arg7[%c0_83, %c0_84, %c0_85, %c0_86], %97 {strides = array<i32>} : memref<1x1x1x32xf32, #tpu.memory_space<vmem>>, vector<1x1x1x32xf32>,
    %98 = vector.shape_cast %92 : vector<256x32xf32> to vector<16x16x32xf32>
    %99 = arith.truncf %98 : vector<16x16x32xf32> to vector<16x16x32xbf16>
    %c0_87 = arith.constant 0 : index
    %c0_88 = arith.constant 0 : index
    %c0_89 = arith.constant 0 : index
    %c0_90 = arith.constant 0 : index
    %100 = vector.load %arg6[%c0_87, %c0_88, %c0_89, %c0_90] : memref<1x16x16x32xbf16, #tpu.memory_space<vmem>>, vector<1x16x16x32xbf16>
    %101 = vector.shape_cast %100 : vector<1x16x16x32xbf16> to vector<16x16x32xbf16>
    %102 = vector.shape_cast %99 : vector<16x16x32xbf16> to vector<1x16x16x32xbf16>
    tpu.vector_store %arg6[%c0_87, %c0_88, %c0_89, %c0_90], %102 {strides = array<i32>} : memref<1x16x16x32xbf16, #tpu.memory_space<vmem>>, vector<1x16x16x32xbf16>,
    return
  }
  func.func @transform_0(%arg0: i32, %arg1: i32) -> (i32, i32, i32, i32) {
    %c0_i32 = arith.constant 0 : i32
    %c0_i32_0 = arith.constant 0 : i32
    %c0_i32_1 = arith.constant 0 : i32
    %c0_i32_2 = arith.constant 0 : i32
    return %arg0, %c0_i32, %c0_i32_0, %c0_i32_1 : i32, i32, i32, i32
  }
  func.func @transform_1(%arg0: i32, %arg1: i32) -> (i32, i32, i32, i32) {
    %c0_i32 = arith.constant 0 : i32
    %c0_i32_0 = arith.constant 0 : i32
    %c0_i32_1 = arith.constant 0 : i32
    %c0_i32_2 = arith.constant 0 : i32
    %c0_i32_3 = arith.constant 0 : i32
    return %c0_i32, %c0_i32_0, %c0_i32_1, %c0_i32_2 : i32, i32, i32, i32
  }
  func.func @transform_2(%arg0: i32, %arg1: i32) -> (i32, i32) {
    %c0_i32 = arith.constant 0 : i32
    %c0_i32_0 = arith.constant 0 : i32
    %c0_i32_1 = arith.constant 0 : i32
    return %c0_i32, %c0_i32_0 : i32, i32
  }
  func.func @transform_3(%arg0: i32, %arg1: i32) -> (i32, i32, i32, i32) {
    %c0_i32 = arith.constant 0 : i32
    %c0_i32_0 = arith.constant 0 : i32
    %c0_i32_1 = arith.constant 0 : i32
    return %arg0, %arg1, %c0_i32, %c0_i32_0 : i32, i32, i32, i32
  }
  func.func @transform_4(%arg0: i32, %arg1: i32) -> (i32, i32, i32, i32) {
    %c0_i32 = arith.constant 0 : i32
    %c0_i32_0 = arith.constant 0 : i32
    %c0_i32_1 = arith.constant 0 : i32
    return %arg0, %arg1, %c0_i32, %c0_i32_0 : i32, i32, i32, i32
  }
  func.func @transform_5(%arg0: i32, %arg1: i32) -> (i32, i32, i32, i32) {
    %c0_i32 = arith.constant 0 : i32
    %c0_i32_0 = arith.constant 0 : i32
    %c0_i32_1 = arith.constant 0 : i32
    return %arg0, %arg1, %c0_i32, %c0_i32_0 : i32, i32, i32, i32
  }
}

module attributes {stable_mosaic.version = 11 : i64} {
  func.func @_rescale_kernel(%arg0: i32, %arg1: i32, %arg2: memref<1x16x16x32xbf16, #tpu.memory_space<vmem>>, %arg3: memref<1x1x1x32xf32, #tpu.memory_space<vmem>>, %arg4: memref<1x16x16x32xf32, #tpu.memory_space<vmem>>) attributes {dimension_semantics = [#tpu.dimension_semantics<parallel>, #tpu.dimension_semantics<arbitrary>], iteration_bounds = array<i64: 2, 1>, scalar_prefetch = 0 : i64, scratch_operands = 0 : i64, tpu.core_type = #tpu.core_type<tc>, window_params = [{transform_indices = @transform_0, window_bounds = array<i64: 1, 16, 16, 32>}, {transform_indices = @transform_1, window_bounds = array<i64: 1, 1, 1, 32>}, {transform_indices = @transform_2, window_bounds = array<i64: 1, 16, 16, 32>}]} {
    %c0 = arith.constant 0 : index
    %c0_0 = arith.constant 0 : index
    %c0_1 = arith.constant 0 : index
    %c0_2 = arith.constant 0 : index
    %0 = vector.load %arg2[%c0, %c0_0, %c0_1, %c0_2] : memref<1x16x16x32xbf16, #tpu.memory_space<vmem>>, vector<1x16x16x32xbf16>
    %1 = vector.shape_cast %0 : vector<1x16x16x32xbf16> to vector<16x16x32xbf16>
    %2 = arith.extf %1 : vector<16x16x32xbf16> to vector<16x16x32xf32>
    %c0_3 = arith.constant 0 : index
    %c0_4 = arith.constant 0 : index
    %c0_5 = arith.constant 0 : index
    %c0_6 = arith.constant 0 : index
    %3 = vector.load %arg3[%c0_3, %c0_4, %c0_5, %c0_6] : memref<1x1x1x32xf32, #tpu.memory_space<vmem>>, vector<1x1x1x32xf32>
    %4 = vector.shape_cast %3 : vector<1x1x1x32xf32> to vector<32xf32>
    %5 = vector.shape_cast %4 : vector<32xf32> to vector<1x1x32xf32>
    %6 = vector.broadcast %5 : vector<1x1x32xf32> to vector<16x16x32xf32>
    %7 = arith.mulf %2, %6 : vector<16x16x32xf32>
    %c0_7 = arith.constant 0 : index
    %c0_8 = arith.constant 0 : index
    %c0_9 = arith.constant 0 : index
    %c0_10 = arith.constant 0 : index
    %8 = vector.load %arg4[%c0_7, %c0_8, %c0_9, %c0_10] : memref<1x16x16x32xf32, #tpu.memory_space<vmem>>, vector<1x16x16x32xf32>
    %9 = vector.shape_cast %8 : vector<1x16x16x32xf32> to vector<16x16x32xf32>
    %10 = vector.shape_cast %7 : vector<16x16x32xf32> to vector<1x16x16x32xf32>
    tpu.vector_store %arg4[%c0_7, %c0_8, %c0_9, %c0_10], %10 {strides = array<i32>} : memref<1x16x16x32xf32, #tpu.memory_space<vmem>>, vector<1x16x16x32xf32>,
    return
  }
  func.func @transform_0(%arg0: i32, %arg1: i32) -> (i32, i32, i32, i32) {
    %c0_i32 = arith.constant 0 : i32
    %c0_i32_0 = arith.constant 0 : i32
    %c0_i32_1 = arith.constant 0 : i32
    return %arg0, %arg1, %c0_i32, %c0_i32_0 : i32, i32, i32, i32
  }
  func.func @transform_1(%arg0: i32, %arg1: i32) -> (i32, i32, i32, i32) {
    %c0_i32 = arith.constant 0 : i32
    %c0_i32_0 = arith.constant 0 : i32
    %c0_i32_1 = arith.constant 0 : i32
    %c0_i32_2 = arith.constant 0 : i32
    return %arg0, %c0_i32, %c0_i32_0, %c0_i32_1 : i32, i32, i32, i32
  }
  func.func @transform_2(%arg0: i32, %arg1: i32) -> (i32, i32, i32, i32) {
    %c0_i32 = arith.constant 0 : i32
    %c0_i32_0 = arith.constant 0 : i32
    %c0_i32_1 = arith.constant 0 : i32
    return %arg0, %arg1, %c0_i32, %c0_i32_0 : i32, i32, i32, i32
  }
}

</mosaic_0001>

<bundles_post_ra>
// kernel: res_se_conv_block.5
= control target key start
LH: loop header
LB: loop body
LE: loop exit
PB: predicated region body
PF: predicated region fallthrough
CT: control target
= control target key end

     0   :  { %7 = vsyncpa [#allocation3], 0  ;;  %s925_s0 = inlined_call_operand.vmem [shape: bf16[2,16,16,32], index: 0, kind: input, shape index: {}]   ;;  %s926_s1 = inlined_call_operand.vmem [shape: f32[2,1,1,32], index: 1, kind: input, shape index: {}]   ;;  %s927_s2 = inlined_call_operand.hbm [shape: f32[2,16,16,32], index: 2, kind: output, shape index: {}]  }
   0x1   :  { %9 = vsyncpa [#allocation3 + $0x1], 0  ;;  %s684_s9 = smov 0   ;;  %s686_s10 = smov 0  }
   0x2   :  { %s688_s11 = smov 0   ;;  %s690_s12 = smov 0  }
   0x3   :  { %s692_s13 = smov 0   ;;  %s694_s14 = smov 0  }
   0x4 LB: > { %s434_s15 = sadd.s32 4294967295, %s664_s14   ;;  %s435_s16 = sadd.s32 4294967294, %s664_s14   ;;  %s664_s14 = sphi %s694_s14, %s15_s14   ;;  %s660_s13 = sphi %s692_s13, %s934_s13   ;;  %s656_s12 = sphi %s690_s12, %s933_s12   ;;  %s652_s11 = sphi %s688_s11, %s932_s11   ;;  %s648_s10 = sphi %s686_s10, %s931_s10   ;;  %s644_s9 = sphi %s684_s9, %s930_s9  }
   0x5   : > { %s27_s17 = sadd.s32 1, %s660_s13  ;;  %s90_s18 = sadd.s32 1, %s652_s11 }
   0x6   : > { %p29_p0 = scmp.ge.s32.totalorder %s27_s17, 2  ;;  %p100_p1 = scmp.ne.s32.totalorder %s652_s11, %s648_s10 }
   0x7   : > { %p101_p2 = scmp.eq.s32.totalorder %s434_s15, 1  ;;  %p106_p3 = scmp.ne.s32.totalorder %s648_s10, %s644_s9 }
   0x8   : > { %s936_s17 = smov (%p29_p0, %s27_s17), 0  ;;  %p107_p5 = scmp.eq.s32.totalorder %s435_s16, 1 }
   0x9   : > { %p724_p4 = por %p101_p2, %p100_p1  ;;  %s85_s20 = ssub.s32 %s660_s13, %s936_s17 }
   0xa   : > { %p438_p6 = scmp.ge.s32.totalorder %s664_s14, 1  ;;  %p88_p7 = scmp.eq.s32.totalorder %s85_s20, 0 }
   0xb   : > { %p731_p8 = por %p107_p5, %p106_p3  ;;  %p145_p9 = scmp.lt.s32.totalorder %s664_s14, 3 }
   0xc   : > { %s737_s22 = scalar_select %p88_p7, %s652_s11, %s90_s18  }
   0xd   : > { %p146_p10 = pnand %p438_p6, %p145_p9 }
   0xe   : > { %p176_p11 = scmp.lt.s32.totalorder (!%p146_p10), %s656_s12, 1  ;;  %s172_s23 = sand.u32 (!%p146_p10), 1, %s648_s10   ;;  %vm293_vm0 = vcmask (!%p146_p10), 261120  }
   0xf   : > { %149 = sbr.rel (%p146_p10) target bundleno = 61 (0x3d), region = 28  ;;  %s439_s29 = sshll.u32 (!%p146_p10), %s172_s23, 8 }
  0x10   : > { %s770_s5 = scalar_lea.vmem (!%p146_p10), [#allocation2], %s439_s29  ;;  %s449_s6 = sshll.u32 (!%p146_p10), %s656_s12, 12 }
  0x11   : > { %s343_s7 = sshll.u32 (!%p146_p10), %s770_s5, 4  ;;  %s853_s15 = scalar_lea.hbm (!%p146_p10), %s927_s2, %s449_s6  ;;  %s855_s7 = int_to_ptr.vmem [resolvable:$true] %s343_s7 }
  0x12   : > { %s879_s16 = scalar_lea.sflag (!%p146_p10), [#allocation3], %s172_s23  ;;  %s586_s18 = scalar_lea.vmem (!%p146_p10), %s855_s7, 4096 }
  0x13   : > { %p587_p12 = scmp.ne.s32.totalorder (!%p146_p10), %s855_s7, %s586_s18  ;;  %s666_s20 = smov (!%p146_p10), [#allocation2]  }
  0x15   : > { %p588_p13 = pnand (!%p146_p10), %p587_p12, %p724_p4 }
  0x16   : > { %s177_s24 = scalar_select %p176_p11, %s656_s12, 1 }
  0x17   : > { %p589_p0 = pneg %p588_p13 }
  0x18   : > { %s448_s25 = sshll.u32 %s177_s24, 7  ;;  %s188_s28 = scalar_lea.vmem %s926_s1, %s177_s24 }
  0x19   : > { %s750_s4 = scalar_lea.vmem %s925_s0, %s448_s25  ;;  %v752_v0 = vld [vmem:[%s188_s28] ss:$0 sm:$0xff]  ;;  %s590_s24 = sshll.u32 %s666_s20, 4  ;;  %s591_s24 = int_to_ptr.vmem [resolvable:$false] %s590_s24 }
  0x1a   : > { %v451_v1 = vld [vmem:[%s750_s4] sm:$0xff]   ;;  %v514_v2 = vld [vmem:[%s750_s4 + $0x8] sm:$0xff]   ;;  %v515_v3 = vld [vmem:[%s750_s4 + $0x10] sm:$0xff]   ;;  %s592_s25 = scalar_lea.vmem %s591_s24, 8192  ;;  %p593_p1 = scmp.lt.s32.totalorder %s855_s7, %s591_s24 }
  0x1b   : > { %v452_v4 = vunpack.c.l.bf16 %v451_v1  ;;  %v453_v5 = vunpack.c.h.bf16 %v451_v1  ;;  %v456_v6 = vunpack.c.l.bf16 %v514_v2  ;;  %v457_v7 = vunpack.c.h.bf16 %v514_v2  ;;  %v516_v8 = vld [vmem:[%s750_s4 + $0x18] sm:$0xff]   ;;  %v517_v13 = vld [vmem:[%s750_s4 + $0x20] sm:$0xff]   ;;  %v518_v14 = vld [vmem:[%s750_s4 + $0x28] sm:$0xff]   ;;  %p594_p2 = scmp.lt.s32.totalorder %s592_s25, %s586_s18 }
  0x1c   : > { %v460_v9 = vunpack.c.l.bf16 %v515_v3  ;;  %v461_v10 = vunpack.c.h.bf16 %v515_v3  ;;  %v464_v11 = vunpack.c.l.bf16 %v516_v8  ;;  %v465_v12 = vunpack.c.h.bf16 %v516_v8  ;;  %v519_v19 = vld [vmem:[%s750_s4 + $0x30] sm:$0xff]   ;;  %v520_v20 = vld [vmem:[%s750_s4 + $0x38] sm:$0xff]   ;;  %v521_v33 = vld [vmem:[%s750_s4 + $0x40] sm:$0xff]  }
  0x1d   : > { %v261_v15 = vmul.f32 %v452_v4, %v752_v0  ;;  %v262_v16 = vmul.f32 %v453_v5, %v752_v0  ;;  %v263_v17 = vmul.f32 %v456_v6, %v752_v0  ;;  %v264_v18 = vmul.f32 %v457_v7, %v752_v0  ;;  %v522_v34 = vld [vmem:[%s750_s4 + $0x48] sm:$0xff]   ;;  %v523_v39 = vld [vmem:[%s750_s4 + $0x50] sm:$0xff]   ;;  %v524_v40 = vld [vmem:[%s750_s4 + $0x58] sm:$0xff]   ;;  %p595_p3 = por %p594_p2, %p593_p1 }
  0x1e   : > { %v265_v21 = vmul.f32 %v460_v9, %v752_v0  ;;  %v266_v22 = vmul.f32 %v461_v10, %v752_v0  ;;  %v267_v23 = vmul.f32 %v464_v11, %v752_v0  ;;  %v268_v24 = vmul.f32 %v465_v12, %v752_v0  ;;  %v525_v53 = vld [vmem:[%s750_s4 + $0x60] sm:$0xff]   ;;  %v526_v54 = vld [vmem:[%s750_s4 + $0x68] sm:$0xff]   ;;  %v527_v59 = vld [vmem:[%s750_s4 + $0x70] sm:$0xff]  }
  0x1f   : > { %294 = vst.msk [vmem:[%s770_s5] sm:$0xff] %vm293_vm0, %v261_v15  ;;  %295 = vst.msk [vmem:[%s770_s5 + $0x8] sm:$0xff] %vm293_vm0, %v262_v16  ;;  %v468_v25 = vunpack.c.l.bf16 %v517_v13  ;;  %v469_v26 = vunpack.c.h.bf16 %v517_v13  ;;  %v472_v27 = vunpack.c.l.bf16 %v518_v14  ;;  %v473_v28 = vunpack.c.h.bf16 %v518_v14  ;;  %v528_v60 = vld [vmem:[%s750_s4 + $0x78] sm:$0xff]   ;;  %p596_p5 = pnand %p595_p3, %p589_p0 }
  0x20   : > { %296 = vst.msk [vmem:[%s770_s5 + $0x10] sm:$0xff] %vm293_vm0, %v263_v17  ;;  %297 = vst.msk [vmem:[%s770_s5 + $0x18] sm:$0xff] %vm293_vm0, %v264_v18  ;;  %v476_v29 = vunpack.c.l.bf16 %v519_v19  ;;  %v477_v30 = vunpack.c.h.bf16 %v519_v19  ;;  %v480_v31 = vunpack.c.l.bf16 %v520_v20  ;;  %v481_v32 = vunpack.c.h.bf16 %v520_v20 }
  0x21   : > { %298 = vst.msk [vmem:[%s770_s5 + $0x20] sm:$0xff] %vm293_vm0, %v265_v21  ;;  %299 = vst.msk [vmem:[%s770_s5 + $0x28] sm:$0xff] %vm293_vm0, %v266_v22  ;;  %v269_v35 = vmul.f32 %v468_v25, %v752_v0  ;;  %v270_v36 = vmul.f32 %v469_v26, %v752_v0  ;;  %v271_v37 = vmul.f32 %v472_v27, %v752_v0  ;;  %v484_v45 = vunpack.c.l.bf16 %v521_v33 }
  0x22   : > { %300 = vst.msk [vmem:[%s770_s5 + $0x30] sm:$0xff] %vm293_vm0, %v267_v23  ;;  %301 = vst.msk [vmem:[%s770_s5 + $0x38] sm:$0xff] %vm293_vm0, %v268_v24  ;;  %v272_v38 = vmul.f32 %v473_v28, %v752_v0  ;;  %v273_v41 = vmul.f32 %v476_v29, %v752_v0  ;;  %v274_v42 = vmul.f32 %v477_v30, %v752_v0  ;;  %v485_v46 = vunpack.c.h.bf16 %v521_v33 }
  0x23   : > { %v275_v43 = vmul.f32 %v480_v31, %v752_v0  ;;  %v276_v44 = vmul.f32 %v481_v32, %v752_v0  ;;  %302 = vst.msk [vmem:[%s770_s5 + $0x40] sm:$0xff] %vm293_vm0, %v269_v35  ;;  %303 = vst.msk [vmem:[%s770_s5 + $0x48] sm:$0xff] %vm293_vm0, %v270_v36  ;;  %v488_v47 = vunpack.c.l.bf16 %v522_v34  ;;  %v489_v48 = vunpack.c.h.bf16 %v522_v34 }
  0x24   : > { %304 = vst.msk [vmem:[%s770_s5 + $0x50] sm:$0xff] %vm293_vm0, %v271_v37  ;;  %305 = vst.msk [vmem:[%s770_s5 + $0x58] sm:$0xff] %vm293_vm0, %v272_v38  ;;  %v492_v49 = vunpack.c.l.bf16 %v523_v39  ;;  %v493_v50 = vunpack.c.h.bf16 %v523_v39  ;;  %v496_v51 = vunpack.c.l.bf16 %v524_v40  ;;  %v497_v52 = vunpack.c.h.bf16 %v524_v40 }
  0x25   : > { %306 = vst.msk [vmem:[%s770_s5 + $0x60] sm:$0xff] %vm293_vm0, %v273_v41  ;;  %307 = vst.msk [vmem:[%s770_s5 + $0x68] sm:$0xff] %vm293_vm0, %v274_v42  ;;  %v277_v55 = vmul.f32 %v484_v45, %v752_v0  ;;  %v278_v56 = vmul.f32 %v485_v46, %v752_v0  ;;  %v279_v57 = vmul.f32 %v488_v47, %v752_v0  ;;  %v500_v2 = vunpack.c.l.bf16 %v525_v53 }
  0x26   : > { %308 = vst.msk [vmem:[%s770_s5 + $0x70] sm:$0xff] %vm293_vm0, %v275_v43  ;;  %309 = vst.msk [vmem:[%s770_s5 + $0x78] sm:$0xff] %vm293_vm0, %v276_v44  ;;  %v280_v58 = vmul.f32 %v489_v48, %v752_v0  ;;  %v281_v61 = vmul.f32 %v492_v49, %v752_v0  ;;  %v282_v62 = vmul.f32 %v493_v50, %v752_v0  ;;  %v501_v3 = vunpack.c.h.bf16 %v525_v53 }
  0x27   : > { %v283_v63 = vmul.f32 %v496_v51, %v752_v0  ;;  %v284_v1 = vmul.f32 %v497_v52, %v752_v0  ;;  %310 = vst.msk [vmem:[%s770_s5 + $0x80] sm:$0xff] %vm293_vm0, %v277_v55  ;;  %311 = vst.msk [vmem:[%s770_s5 + $0x88] sm:$0xff] %vm293_vm0, %v278_v56  ;;  %v504_v4 = vunpack.c.l.bf16 %v526_v54  ;;  %v505_v5 = vunpack.c.h.bf16 %v526_v54 }
  0x28   : > { %312 = vst.msk [vmem:[%s770_s5 + $0x90] sm:$0xff] %vm293_vm0, %v279_v57  ;;  %313 = vst.msk [vmem:[%s770_s5 + $0x98] sm:$0xff] %vm293_vm0, %v280_v58  ;;  %v508_v6 = vunpack.c.l.bf16 %v527_v59  ;;  %v509_v7 = vunpack.c.h.bf16 %v527_v59  ;;  %v512_v8 = vunpack.c.l.bf16 %v528_v60  ;;  %v513_v9 = vunpack.c.h.bf16 %v528_v60 }
  0x29   : > { %314 = vst.msk [vmem:[%s770_s5 + $0xa0] sm:$0xff] %vm293_vm0, %v281_v61  ;;  %315 = vst.msk [vmem:[%s770_s5 + $0xa8] sm:$0xff] %vm293_vm0, %v282_v62  ;;  %v285_v10 = vmul.f32 %v500_v2, %v752_v0  ;;  %v286_v11 = vmul.f32 %v501_v3, %v752_v0  ;;  %v287_v12 = vmul.f32 %v504_v4, %v752_v0 }
  0x2a   : > { %316 = vst.msk [vmem:[%s770_s5 + $0xb0] sm:$0xff] %vm293_vm0, %v283_v63  ;;  %317 = vst.msk [vmem:[%s770_s5 + $0xb8] sm:$0xff] %vm293_vm0, %v284_v1  ;;  %v288_v13 = vmul.f32 %v505_v5, %v752_v0  ;;  %v289_v14 = vmul.f32 %v508_v6, %v752_v0  ;;  %v290_v15 = vmul.f32 %v509_v7, %v752_v0 }
  0x2b   : > { %v291_v16 = vmul.f32 %v512_v8, %v752_v0  ;;  %v292_v17 = vmul.f32 %v513_v9, %v752_v0  ;;  %318 = vst.msk [vmem:[%s770_s5 + $0xc0] sm:$0xff] %vm293_vm0, %v285_v10  ;;  %319 = vst.msk [vmem:[%s770_s5 + $0xc8] sm:$0xff] %vm293_vm0, %v286_v11 }
  0x2c   : > { %320 = vst.msk [vmem:[%s770_s5 + $0xd0] sm:$0xff] %vm293_vm0, %v287_v12  ;;  %321 = vst.msk [vmem:[%s770_s5 + $0xd8] sm:$0xff] %vm293_vm0, %v288_v13 }
  0x2d   : > { %322 = vst.msk [vmem:[%s770_s5 + $0xe0] sm:$0xff] %vm293_vm0, %v289_v14  ;;  %323 = vst.msk [vmem:[%s770_s5 + $0xe8] sm:$0xff] %vm293_vm0, %v290_v15 }
  0x2e   : > { %324 = vst.msk [vmem:[%s770_s5 + $0xf0] sm:$0xff] %vm293_vm0, %v291_v16  ;;  %325 = vst.msk [vmem:[%s770_s5 + $0xf8] sm:$0xff] %vm293_vm0, %v292_v17 }
  0x2f   : > { %599 = shalt.err (!%p596_p5)
}
  0x30   : > { %s600_s23 = scalar_lea.hbm %s853_s15, 4096  ;;  %s604_s28 = scalar_lea.hbm %s927_s2, 8192 }
  0x31   : > { %p601_p6 = scmp.ne.s32.totalorder %s853_s15, %s600_s23  ;;  %p605_p10 = scmp.lt.u32.totalorder %s853_s15, %s927_s2 }
  0x32   : > { %p606_p11 = scmp.lt.u32.totalorder %s604_s28, %s600_s23  ;;  %p608_p13 = scmp.lt.u32.totalorder %s600_s23, %s853_s15 }
  0x33   : > { %p602_p7 = pnand %p601_p6, %p724_p4 }
  0x34   : > { %p607_p12 = por %p606_p11, %p605_p10 }
  0x35   : > { %p603_p9 = pneg %p602_p7 }
  0x36   : > { %p609_p0 = por %p608_p13, %p607_p12 }
  0x38   : > { %p610_p1 = pnand %p609_p0, %p603_p9 }
  0x3a   : > { %613 = shalt.err (!%p610_p1)
}
  0x3b   : > { %s667_s3 = smov 128   ;;  %s668_s4 = smov 8  }
  0x3c   : > { %529 = dma.vmem_to_hbm [thread:$0]  (%p724_p4), %s855_s7, 4096, %s853_s15, %s879_s16, %s667_s3, %s667_s3, %s668_s4  }
  0x3d PF: > { %p535_p2 = scmp.ge.s32.totalorder %s664_s14, 2  ;;  %s358_s5 = sand.u32 1, %s644_s9  }
  0x3e   : > { %s359_s6 = scalar_lea.sflag [#allocation3], %s358_s5 }
  0x3f   : > { %p532_p3 = pnand %p535_p2, %p731_p8 }
  0x41   : > { %639 = dma.done.wait (!%p532_p3), %s359_s6, 4096  }
  0x42   : > { %641 = vsyncadd (!%p532_p3), %s359_s6, 4294963200  ;;  %s15_s14 = sadd.s32 1, %s664_s14   ;;  %s930_s9 = smov %s648_s10 }
  0x43   : > { %p12_p5 = scmp.ge.s32.totalorder %s15_s14, 4   ;;  %s931_s10 = smov %s652_s11 }
  0x44   : > { %s932_s11 = smov %s737_s22  ;;  %s933_s12 = smov %s660_s13 }
  0x45   : > { %s934_s13 = smov %s936_s17  ;;  %14 = sbr.rel (!%p12_p5) target bundleno = 4 (0x4), region = 66 }
  0x4c   :  { %364 = vsyncpa [#allocation3], 1 }
  0x4d   :  { %366 = vsyncpa [#allocation3 + $0x1], 1 }

// kernel: res_se_conv_block.4
= control target key start
LH: loop header
LB: loop body
LE: loop exit
PB: predicated region body
PF: predicated region fallthrough
CT: control target
= control target key end

     0   :  { %s7223_s18 = smov 0   ;;  %s7225_s19 = smov 0   ;;  %s9176_s0 = inlined_call_operand.vmem [shape: bf16[2,18,18,32], index: 0, kind: input, shape index: {}]   ;;  %s9177_s1 = inlined_call_operand.vmem [shape: bf16[3,3,32,32], index: 1, kind: input, shape index: {}]   ;;  %s9178_s2 = inlined_call_operand.vmem [shape: f32[1,32], index: 2, kind: input, shape index: {}]   ;;  %s9179_s3 = inlined_call_operand.vmem [shape: bf16[2,16,16,32], index: 3, kind: input, shape index: {}]   ;;  %s9180_s4 = inlined_call_operand.vmem [shape: bf16[2,16,16,32], index: 4, kind: output, shape index: {0}]   ;;  %s9181_s5 = inlined_call_operand.vmem [shape: f32[2,1,1,32], index: 5, kind: output, shape index: {1}]  }
   0x1   :  { %s7227_s20 = smov 0  }
   0x2 LB: > { %s28_s21 = sadd.s32 1, %s7187_s19  ;;  %p5539_p0 = scmp.ge.s32.totalorder %s7191_s20, 1  ;;  %s7191_s20 = sphi %s7227_s20, %s16_s20   ;;  %s7187_s19 = sphi %s7225_s19, %s9250_s19   ;;  %s7183_s18 = sphi %s7223_s18, %s9249_s18  }
   0x3   : > { %p30_p1 = scmp.ge.s32.totalorder %s28_s21, 2  ;;  %p224_p2 = scmp.lt.s32.totalorder %s7191_s20, 3 }
   0x5   : > { %s9252_s21 = smov (%p30_p1, %s28_s21), 0  ;;  %p225_p3 = pnand %p5539_p0, %p224_p2 }
   0x7   : > { %228 = sbr.rel (%p225_p3) target bundleno = 609 (0x261), region = 36 }
   0xe   : > { %v7042_v0 = vld [vmem:[%s9177_s1 + $0x10] sm:$0xff]   ;;  %p273_p4 = scmp.lt.s32.totalorder %s7183_s18, 1  ;;  %v7043_v1 = vld [vmem:[%s9177_s1 + $0x40] sm:$0xff]   ;;  %v7044_v2 = vld [vmem:[%s9177_s1 + $0x18] sm:$0xff]   ;;  %vm363_vm0 = vsmask.f32 3328 }
   0xf   : > { %6433 = vmatprep.subr.bf16.mxu1 %v7042_v0  ;;  %6577 = vmatprep.subr.bf16.mxu0 %v7043_v1  ;;  %v7045_v3 = vld [vmem:[%s9177_s1 + $0x48] sm:$0xff]   ;;  %v7259_v4 = vld [vmem:[%s9177_s1] sm:$0xff]   ;;  %vm364_vm1 = vsmask.f32 7440  ;;  %v7269_v5 = vld [vmem:[%s9177_s1 + $0x50] sm:$0xff]   ;;  %vm815_vm3 = vcmask 261120  }
  0x10   : > { %s9254_s18 = smov (!%p273_p4, %s7183_s18), 1  ;;  %6434 = vmatpush3.bf16.msra.mxu1 %v7042_v0  ;;  %6578 = vmatpush3.bf16.msra.mxu0 %v7043_v1  ;;  %vm7289_vm2 = vmor %vm363_vm0, %vm364_vm1  ;;  %vm1374_vm4 = vcmask 1042432   ;;  %vm1375_vm5 = vcmask 1046532   ;;  %vm5349_vm7 = vcmask 257024   ;;  %vm5219_vm8 = vcmask 253952  }
  0x11   : > { %6435 = vmatprep.subr.bf16.mxu1 %v7044_v2  ;;  %s7017_s30 = smul.u32 216, %s9254_s18  ;;  %6579 = vmatprep.subr.bf16.mxu0 %v7045_v3  ;;  %vm7517_vm6 = vmor %vm1374_vm4, %vm1375_vm5  ;;  %s305_s13 = scalar_lea.vmem %s9181_s5, %s9254_s18 }
  0x13   : > { %s7264_s10 = scalar_lea.vmem %s9176_s0, %s7017_s30 }
  0x14   : > { %6436 = vmatpush3.bf16.msra.mxu1 %v7044_v2  ;;  %v311_v6 = vld [vmem:[%s7264_s10] sm:$0xf]  ;;  %v312_v7 = vld [vmem:[%s7264_s10 + $0x4] sm:$0xf]  ;;  %v347_v8 = vld [vmem:[%s7264_s10 + $0x8] sm:$0x1]  ;;  %6580 = vmatpush3.bf16.msra.mxu0 %v7045_v3 }
  0x15   : > { %v367_v9 = vshrl.u32 %v311_v6, 16  ;;  %v370_v10 = vshll.u32 %v311_v6, 16  ;;  %v376_v11 = vshll.u32 %v312_v7, 16  ;;  %v380_v12 = vshrl.u32 %v312_v7, 16  ;;  %6469 = vmatprep.subr.bf16.mxu1 %v7259_v4  ;;  %v5741_v13 = vld [vmem:[%s7264_s10 + $0xc] sm:$0xf]  ;;  %6613 = vmatprep.subr.bf16.mxu0 %v7269_v5 }
  0x16   : > { %v386_v14 = vshll.u32 %v347_v8, 16  ;;  %v7277_v15 = vld [vmem:[%s7264_s10 + $0x10] sm:$0xf]  ;;  %v7280_v16 = vld [vmem:[%s7264_s10 + $0x14] sm:$0x1]  ;;  %v2218_v22 = vshrl.u32 %v5741_v13, 16 }
  0x17   : > { %v369_v17 = vrot.slane %v367_v9, 4  ;;  %v372_v18 = vrot.slane %v370_v10, 5  ;;  %v378_v19 = vrot.slane %v376_v11, 5  ;;  %v382_v20 = vrot.slane %v380_v12, 4  ;;  %v313_v29 = vld [vmem:[%s7264_s10 + $0xc] sm:$0xf] }
  0x18   : > { %v388_v21 = vrot.slane %v386_v14, 5  ;;  %v2221_v23 = vshll.u32 %v5741_v13, 16  ;;  %v2227_v24 = vshll.u32 %v7277_v15, 16  ;;  %v2231_v27 = vshrl.u32 %v7277_v15, 16  ;;  %v314_v34 = vld [vmem:[%s7264_s10 + $0x10] sm:$0xf] }
  0x19   : > { %v373_v25 = vor.u32 %v372_v18, %v369_v17  ;;  %v383_v26 = vor.u32 %v382_v20, %v378_v19  ;;  %v2237_v28 = vshll.u32 %v7280_v16, 16  ;;  %v2220_v31 = vrot.slane %v2218_v22, 4  ;;  %v348_v40 = vld [vmem:[%s7264_s10 + $0x14] sm:$0x1]  ;;  %v5744_v51 = vld [vmem:[%s7264_s10 + $0x18] sm:$0xf] }
  0x1a   : > { %v2223_v32 = vrot.slane %v2221_v23, 5  ;;  %v2229_v33 = vrot.slane %v2227_v24, 5  ;;  %v2233_v37 = vrot.slane %v2231_v27, 4  ;;  %v391_v41 = vshrl.u32 %v313_v29, 16  ;;  %v7301_v56 = vld [vmem:[%s7264_s10 + $0x1c] sm:$0xf] }
  0x1b   : > { %v374_v35 = vrot.slane %v373_v25, 4  ;;  %v384_v36 = vrot.slane %v383_v26, 4  ;;  %v2239_v39 = vrot.slane %v2237_v28, 5  ;;  %v394_v42 = vshll.u32 %v313_v29, 16  ;;  %v7309_v61 = vld [vmem:[%s7264_s10 + $0x20] sm:$0x1] }
  0x1c   : > { %v2224_v38 = vor.u32 %v2223_v32, %v2220_v31  ;;  %v2234_v45 = vor.u32 %v2233_v37, %v2229_v33  ;;  %v400_v46 = vshll.u32 %v314_v34, 16  ;;  %v393_v49 = vrot.slane %v391_v41, 4  ;;  %v315_v12 = vld [vmem:[%s7264_s10 + $0x18] sm:$0xf]  ;;  %v349_v26 = vld [vmem:[%s7264_s10 + $0x20] sm:$0x1] }
  0x1d   : > { %v379_v43 = vsel %vm7289_vm2, %v374_v35, %v378_v19  ;;  %v389_v44 = vsel %vm7289_vm2, %v384_v36, %v388_v21  ;;  %v396_v50 = vrot.slane %v394_v42, 5  ;;  %v404_v54 = vshrl.u32 %v314_v34, 16  ;;  %v316_v19 = vld [vmem:[%s7264_s10 + $0x1c] sm:$0xf]  ;;  %v5747_v34 = vld [vmem:[%s7264_s10 + $0x24] sm:$0xf] }
  0x1e   : > { %v5549_v47 = vcombine.low %v379_v43, %v389_v44  ;;  %v2225_v48 = vrot.slane %v2224_v38, 4  ;;  %v2235_v52 = vrot.slane %v2234_v45, 4  ;;  %v402_v53 = vrot.slane %v400_v46, 5 }
  0x1f   : > { %v410_v55 = vshll.u32 %v348_v40, 16  ;;  %v2973_v58 = vrot.slane %v7277_v15, 5  ;;  %v2976_v59 = vrot.slane %v7280_v16, 5  ;;  %v397_v60 = vor.u32 %v396_v50, %v393_v49  ;;  %v7049_v40 = vld [vmem:[%s9177_s1 + $0x8] sm:$0xff]   ;;  %v7048_v50 = vld [vmem:[%s9177_s1 + $0x58] sm:$0xff]  }
  0x20   : > { %6437 = vmatprep.mubr.msk.bf16.mxu1 %vm815_vm3, %v5549_v47  ;;  %v2230_v57 = vsel %vm7289_vm2, %v2225_v48, %v2229_v33  ;;  %v2240_v62 = vsel %vm7289_vm2, %v2235_v52, %v2239_v39  ;;  %v406_v63 = vrot.slane %v404_v54, 4  ;;  %v2242_v1 = vshrl.u32 %v5744_v51, 16  ;;  %v7332_v39 = vld [vmem:[%s7264_s10 + $0x28] sm:$0xf]  ;;  %v7341_v47 = vld [vmem:[%s7264_s10 + $0x2c] sm:$0x1] }
  0x21   : > { %v412_v0 = vrot.slane %v410_v55, 5  ;;  %v5793_v2 = vcombine.low %v2230_v57, %v2240_v62  ;;  %v398_v3 = vrot.slane %v397_v60, 4  ;;  %v2245_v6 = vshll.u32 %v5744_v51, 16  ;;  %v317_v55 = vld [vmem:[%s7264_s10 + $0x24] sm:$0xf] }
  0x22   : > { %v2251_v7 = vshll.u32 %v7301_v56, 16  ;;  %v407_v8 = vor.u32 %v406_v63, %v402_v53  ;;  %v2244_v9 = vrot.slane %v2242_v1, 4  ;;  %v2255_v10 = vshrl.u32 %v7301_v56, 16  ;;  %v7052_v1 = vld [vmem:[%s9177_s1 + $0x20] sm:$0xff]  }
  0x23   : > { %v2261_v11 = vshll.u32 %v7309_v61, 16  ;;  %6581 = vmatprep.mubr.msk.bf16.mxu0 %vm815_vm3, %v5793_v2  ;;  %v403_v13 = vsel %vm7289_vm2, %v398_v3, %v402_v53  ;;  %v2247_v14 = vrot.slane %v2245_v6, 5  ;;  %v2980_v18 = vrot.slane %v7301_v56, 5 }
  0x24   : > { %v2253_v17 = vrot.slane %v2251_v7, 5  ;;  %v408_v20 = vrot.slane %v407_v8, 4  ;;  %v2257_v21 = vrot.slane %v2255_v10, 4  ;;  %v2983_v23 = vrot.slane %v7309_v61, 5 }
  0x25   : > { %v2263_v22 = vrot.slane %v2261_v11, 5  ;;  %v2248_v24 = vor.u32 %v2247_v14, %v2244_v9  ;;  %v7325_v25 = vrot.slane %v2980_v18, 4  ;;  %v415_v27 = vshrl.u32 %v315_v12, 16  ;;  %v350_v9 = vld [vmem:[%s7264_s10 + $0x2c] sm:$0x1] }
  0x26   : > { %v418_v28 = vshll.u32 %v315_v12, 16  ;;  %v413_v29 = vsel %vm7289_vm2, %v408_v20, %v412_v0  ;;  %v2258_v31 = vor.u32 %v2257_v21, %v2253_v17  ;;  %v424_v32 = vshll.u32 %v316_v19, 16  ;;  %v318_v0 = vld [vmem:[%s7264_s10 + $0x28] sm:$0xf] }
  0x27   : > { %v428_v33 = vshrl.u32 %v316_v19, 16  ;;  %v5550_v35 = vcombine.low %v403_v13, %v413_v29  ;;  %v2249_v36 = vrot.slane %v2248_v24, 4  ;;  %v417_v37 = vrot.slane %v415_v27, 4  ;;  %v5750_v19 = vld [vmem:[%s7264_s10 + $0x30] sm:$0xf] }
  0x28   : > { %v420_v38 = vrot.slane %v418_v28, 5  ;;  %v2259_v41 = vrot.slane %v2258_v31, 4  ;;  %v426_v42 = vrot.slane %v424_v32, 5  ;;  %v434_v44 = vshll.u32 %v349_v26, 16  ;;  %v7366_v26 = vld [vmem:[%s7264_s10 + $0x34] sm:$0xf] }
  0x29   : > { %v430_v43 = vrot.slane %v428_v33, 4  ;;  %6438 = vmatmul.mubr.msk.bf16.vlgmr.msra.gmra.mrb[0].mxu1 %vm815_vm3, %v5550_v35  ;;  %v2254_v45 = vsel %vm7289_vm2, %v2249_v36, %v2253_v17  ;;  %v2266_v48 = vshrl.u32 %v5747_v34, 16  ;;  %v2269_v49 = vshll.u32 %v5747_v34, 16  ;;  %v7377_v34 = vld [vmem:[%s7264_s10 + $0x38] sm:$0x1] }
  0x2a   : > { %v421_v46 = vor.u32 %v420_v38, %v417_v37  ;;  %6470 = vmatpush3.bf16.msra.mxu1 %v7259_v4  ;;  %v2264_v51 = vsel %vm7289_vm2, %v2259_v41, %v2263_v22  ;;  %v436_v53 = vrot.slane %v434_v44, 5  ;;  %v2275_v54 = vshll.u32 %v7332_v39, 16 }
  0x2b   : > { %v431_v52 = vor.u32 %v430_v43, %v426_v42  ;;  %v5794_v57 = vcombine.low %v2254_v45, %v2264_v51  ;;  %v2268_v62 = vrot.slane %v2266_v48, 4  ;;  %v2271_v63 = vrot.slane %v2269_v49, 5  ;;  %6471 = vmatprep.subr.bf16.mxu1 %v7049_v40 }
  0x2c   : > { %v422_v60 = vrot.slane %v421_v46, 4  ;;  %v2277_v2 = vrot.slane %v2275_v54, 5  ;;  %v2279_v3 = vshrl.u32 %v7332_v39, 16  ;;  %v2285_v6 = vshll.u32 %v7341_v47, 16  ;;  %v319_v46 = vld [vmem:[%s7264_s10 + $0x30] sm:$0xf] }
  0x2d   : > { %v432_v4 = vrot.slane %v431_v52, 4  ;;  %6582 = vmatmul.mubr.msk.bf16.vlgmr.msra.gmra.mrb[0].mxu0 %vm815_vm3, %v5794_v57  ;;  %v2272_v8 = vor.u32 %v2271_v63, %v2268_v62  ;;  %v439_v10 = vshrl.u32 %v317_v55, 16  ;;  %v442_v11 = vshll.u32 %v317_v55, 16 }
  0x2e   : > { %v427_v7 = vsel %vm7289_vm2, %v422_v60, %v426_v42  ;;  %6614 = vmatpush3.bf16.msra.mxu0 %v7269_v5  ;;  %v2281_v13 = vrot.slane %v2279_v3, 4  ;;  %v2287_v14 = vrot.slane %v2285_v6, 5  ;;  %v448_v17 = vshll.u32 %v318_v0, 16  ;;  %6472 = vmatpush3.bf16.msra.mxu1 %v7049_v40  ;;  %v7371_v5 = vld [vmem:[%s9177_s1 + $0x60] sm:$0xff]   ;;  %v351_v60 = vld [vmem:[%s7264_s10 + $0x38] sm:$0x1] }
  0x2f   : > { %v437_v12 = vsel %vm7289_vm2, %v432_v4, %v436_v53  ;;  %v2273_v21 = vrot.slane %v2272_v8, 4  ;;  %v441_v22 = vrot.slane %v439_v10, 4  ;;  %v444_v24 = vrot.slane %v442_v11, 5  ;;  %6615 = vmatprep.subr.bf16.mxu0 %v7048_v50  ;;  %6505 = vmatprep.subr.bf16.mxu1 %v7052_v1  ;;  %v320_v53 = vld [vmem:[%s7264_s10 + $0x34] sm:$0xf] }
  0x30   : > { %v5551_v20 = vcombine.low %v427_v7, %v437_v12  ;;  %v2282_v27 = vor.u32 %v2281_v13, %v2277_v2  ;;  %v450_v28 = vrot.slane %v448_v17, 5  ;;  %v452_v29 = vshrl.u32 %v318_v0, 16  ;;  %v5753_v7 = vld [vmem:[%s7264_s10 + $0x3c] sm:$0xf]  ;;  %v7395_v12 = vld [vmem:[%s7264_s10 + $0x40] sm:$0xf] }
  0x31   : > { %v458_v31 = vshll.u32 %v350_v9, 16  ;;  %v2278_v32 = vsel %vm7289_vm2, %v2273_v21, %v2277_v2  ;;  %v445_v33 = vor.u32 %v444_v24, %v441_v22  ;;  %v2290_v35 = vshrl.u32 %v5750_v19, 16  ;;  %v321_v21 = vld [vmem:[%s7264_s10 + $0x3c] sm:$0xf] }
  0x32   : > { %6441 = vmatprep.mubr.msk.bf16.mxu1 %vm815_vm3, %v5551_v20  ;;  %v2293_v36 = vshll.u32 %v5750_v19, 16  ;;  %v2283_v37 = vrot.slane %v2282_v27, 4  ;;  %v454_v38 = vrot.slane %v452_v29, 4  ;;  %v2299_v41 = vshll.u32 %v7366_v26, 16  ;;  %6616 = vmatpush3.bf16.msra.mxu0 %v7048_v50  ;;  %v7400_v20 = vld [vmem:[%s7264_s10 + $0x44] sm:$0x1] }
  0x33   : > { %v460_v40 = vrot.slane %v458_v31, 5  ;;  %v446_v42 = vrot.slane %v445_v33, 4  ;;  %v2292_v43 = vrot.slane %v2290_v35, 4  ;;  %v2303_v45 = vshrl.u32 %v7366_v26, 16  ;;  %6649 = vmatprep.subr.bf16.mxu0 %v7371_v5 }
  0x34   : > { %v2295_v44 = vrot.slane %v2293_v36, 5  ;;  %v2288_v48 = vsel %vm7289_vm2, %v2283_v37, %v2287_v14  ;;  %v455_v49 = vor.u32 %v454_v38, %v450_v28  ;;  %v2301_v51 = vrot.slane %v2299_v41, 5 }
  0x35   : > { %v2309_v52 = vshll.u32 %v7377_v34, 16  ;;  %v5795_v54 = vcombine.low %v2278_v32, %v2288_v48  ;;  %v451_v50 = vsel %vm7289_vm2, %v446_v42, %v450_v28  ;;  %v2305_v57 = vrot.slane %v2303_v45, 4 }
  0x36   : > { %v2296_v55 = vor.u32 %v2295_v44, %v2292_v43  ;;  %v456_v62 = vrot.slane %v455_v49, 4  ;;  %v463_v0 = vshrl.u32 %v319_v46, 16  ;;  %v466_v1 = vshll.u32 %v319_v46, 16 }
  0x37   : > { %v2311_v63 = vrot.slane %v2309_v52, 5  ;;  %6585 = vmatprep.mubr.msk.bf16.mxu0 %vm815_vm3, %v5795_v54  ;;  %v2306_v2 = vor.u32 %v2305_v57, %v2301_v51  ;;  %v472_v3 = vshll.u32 %v320_v53, 16  ;;  %v476_v6 = vshrl.u32 %v320_v53, 16  ;;  %v352_v54 = vld [vmem:[%s7264_s10 + $0x44] sm:$0x1] }
  0x38   : > { %v2297_v4 = vrot.slane %v2296_v55, 4  ;;  %v461_v8 = vsel %vm7289_vm2, %v456_v62, %v460_v40  ;;  %v465_v9 = vrot.slane %v463_v0, 4  ;;  %v468_v10 = vrot.slane %v466_v1, 5  ;;  %v322_v40 = vld [vmem:[%s7264_s10 + $0x40] sm:$0xf] }
  0x39   : > { %v482_v11 = vshll.u32 %v351_v60, 16  ;;  %v5552_v13 = vcombine.low %v451_v50, %v461_v8  ;;  %v2307_v17 = vrot.slane %v2306_v2, 4  ;;  %v474_v19 = vrot.slane %v472_v3, 5  ;;  %v5756_v55 = vld [vmem:[%s7264_s10 + $0x48] sm:$0xf] }
  0x3a   : > { %v2302_v14 = vsel %vm7289_vm2, %v2297_v4, %v2301_v51  ;;  %v469_v22 = vor.u32 %v468_v10, %v465_v9  ;;  %v478_v24 = vrot.slane %v476_v6, 4  ;;  %v2314_v28 = vshrl.u32 %v5753_v7, 16  ;;  %v7418_v0 = vld [vmem:[%s7264_s10 + $0x4c] sm:$0xf] }
  0x3b   : > { %v484_v27 = vrot.slane %v482_v11, 5  ;;  %6442 = vmatmul.mubr.msk.bf16.gmra.mrb[4].mxu1 %vm815_vm3, %v5552_v13  ;;  %v2312_v29 = vsel %vm7289_vm2, %v2307_v17, %v2311_v63  ;;  %v2317_v31 = vshll.u32 %v5753_v7, 16  ;;  %v2323_v32 = vshll.u32 %v7395_v12, 16  ;;  %v7426_v13 = vld [vmem:[%s7264_s10 + $0x50] sm:$0x1] }
  0x3c   : > { %v2327_v33 = vshrl.u32 %v7395_v12, 16  ;;  %v5796_v35 = vcombine.low %v2302_v14, %v2312_v29  ;;  %v470_v36 = vrot.slane %v469_v22, 4  ;;  %v479_v37 = vor.u32 %v478_v24, %v474_v19 }
  0x3d   : > { %v2316_v38 = vrot.slane %v2314_v28, 4  ;;  %v2319_v41 = vrot.slane %v2317_v31, 5  ;;  %v2325_v42 = vrot.slane %v2323_v32, 5  ;;  %v2333_v44 = vshll.u32 %v7400_v20, 16  ;;  %v7433_v28 = vld [vmem:[%s7264_s10 + $0x4c] sm:$0xf] }
  0x3e   : > { %v2329_v43 = vrot.slane %v2327_v33, 4  ;;  %6586 = vmatmul.mubr.msk.bf16.gmra.mrb[4].mxu0 %vm815_vm3, %v5796_v35  ;;  %v475_v45 = vsel %vm7289_vm2, %v470_v36, %v474_v19  ;;  %v480_v46 = vrot.slane %v479_v37, 4  ;;  %v487_v48 = vshrl.u32 %v321_v21, 16  ;;  %v7430_v19 = vld [vmem:[%s7264_s10 + $0x48] sm:$0xf] }
  0x3f   : > { %v490_v49 = vshll.u32 %v321_v21, 16  ;;  %v2320_v51 = vor.u32 %v2319_v41, %v2316_v38  ;;  %v2335_v53 = vrot.slane %v2333_v44, 5  ;;  %v496_v50 = vshll.u32 %v322_v40, 16  ;;  %v353_v38 = vld [vmem:[%s7264_s10 + $0x50] sm:$0x1] }
  0x40   : > { %v2330_v52 = vor.u32 %v2329_v43, %v2325_v42  ;;  %v485_v57 = vsel %vm7289_vm2, %v480_v46, %v484_v27  ;;  %v489_v60 = vrot.slane %v487_v48, 4  ;;  %v500_v63 = vshrl.u32 %v322_v40, 16 }
  0x41   : > { %v492_v62 = vrot.slane %v490_v49, 5  ;;  %v5553_v1 = vcombine.low %v475_v45, %v485_v57  ;;  %v2321_v4 = vrot.slane %v2320_v51, 4  ;;  %v498_v3 = vrot.slane %v496_v50, 5  ;;  %v5759_v45 = vld [vmem:[%s7264_s10 + $0x54] sm:$0xf] }
  0x42   : > { %v2331_v2 = vrot.slane %v2330_v52, 4  ;;  %v502_v7 = vrot.slane %v500_v63, 4  ;;  %v506_v8 = vshll.u32 %v352_v54, 16  ;;  %v2338_v9 = vshrl.u32 %v5756_v55, 16 }
  0x43   : > { %v493_v6 = vor.u32 %v492_v62, %v489_v60  ;;  %6445 = vmatprep.mubr.msk.bf16.mxu1 %vm815_vm3, %v5553_v1  ;;  %v2326_v10 = vsel %vm7289_vm2, %v2321_v4, %v2325_v42  ;;  %v2341_v14 = vshll.u32 %v5756_v55, 16  ;;  %v2347_v17 = vshll.u32 %v7418_v0, 16  ;;  %v7449_v55 = vld [vmem:[%s7264_s10 + $0x58] sm:$0xf] }
  0x44   : > { %v2336_v11 = vsel %vm7289_vm2, %v2331_v2, %v2335_v53  ;;  %v503_v24 = vor.u32 %v502_v7, %v498_v3  ;;  %v508_v27 = vrot.slane %v506_v8, 5  ;;  %v2340_v29 = vrot.slane %v2338_v9, 4 }
  0x45   : > { %v5797_v21 = vcombine.low %v2326_v10, %v2336_v11  ;;  %v494_v22 = vrot.slane %v493_v6, 4  ;;  %v2343_v31 = vrot.slane %v2341_v14, 5  ;;  %v2349_v32 = vrot.slane %v2347_v17, 5  ;;  %v7459_v11 = vld [vmem:[%s7264_s10 + $0x54] sm:$0xf] }
  0x46   : > { %v2351_v33 = vshrl.u32 %v7418_v0, 16  ;;  %v504_v36 = vrot.slane %v503_v24, 4  ;;  %v2357_v37 = vshll.u32 %v7426_v13, 16  ;;  %v511_v40 = vshrl.u32 %v7430_v19, 16  ;;  %v7465_v24 = vld [vmem:[%s7264_s10 + $0x58] sm:$0xf] }
  0x47   : > { %6589 = vmatprep.mubr.msk.bf16.mxu0 %vm815_vm3, %v5797_v21  ;;  %v499_v35 = vsel %vm7289_vm2, %v494_v22, %v498_v3  ;;  %v2344_v41 = vor.u32 %v2343_v31, %v2340_v29  ;;  %v514_v43 = vshll.u32 %v7430_v19, 16  ;;  %v520_v44 = vshll.u32 %v7433_v28, 16  ;;  %v7455_v3 = vld [vmem:[%s7264_s10 + $0x5c] sm:$0x1] }
  0x48   : > { %v2353_v42 = vrot.slane %v2351_v33, 4  ;;  %v509_v46 = vsel %vm7289_vm2, %v504_v36, %v508_v27  ;;  %v2359_v48 = vrot.slane %v2357_v37, 5  ;;  %v513_v49 = vrot.slane %v511_v40, 4  ;;  %v354_v37 = vld [vmem:[%s7264_s10 + $0x5c] sm:$0x1] }
  0x49   : > { %v524_v51 = vshrl.u32 %v7433_v28, 16  ;;  %v5554_v52 = vcombine.low %v499_v35, %v509_v46  ;;  %v2345_v53 = vrot.slane %v2344_v41, 4  ;;  %v516_v50 = vrot.slane %v514_v43, 5 }
  0x4a   : > { %v2354_v54 = vor.u32 %v2353_v42, %v2349_v32  ;;  %v522_v57 = vrot.slane %v520_v44, 5  ;;  %v530_v62 = vshll.u32 %v353_v38, 16  ;;  %v2362_v63 = vshrl.u32 %v5759_v45, 16  ;;  %v5762_v44 = vld [vmem:[%s7264_s10 + $0x60] sm:$0xf] }
  0x4b   : > { %v526_v60 = vrot.slane %v524_v51, 4  ;;  %6446 = vmatmul.mubr.msk.bf16.gmra.mrb[8].mxu1 %vm815_vm3, %v5554_v52  ;;  %v2350_v1 = vsel %vm7289_vm2, %v2345_v53, %v2349_v32  ;;  %v517_v2 = vor.u32 %v516_v50, %v513_v49  ;;  %v2365_v6 = vshll.u32 %v5759_v45, 16  ;;  %v7479_v51 = vld [vmem:[%s7264_s10 + $0x64] sm:$0xf] }
  0x4c   : > { %v2355_v4 = vrot.slane %v2354_v54, 4  ;;  %v532_v8 = vrot.slane %v530_v62, 5  ;;  %v2364_v9 = vrot.slane %v2362_v63, 4  ;;  %v2371_v10 = vshll.u32 %v7449_v55, 16 }
  0x4d   : > { %v527_v7 = vor.u32 %v526_v60, %v522_v57  ;;  %v518_v17 = vrot.slane %v517_v2, 4  ;;  %v2367_v21 = vrot.slane %v2365_v6, 5  ;;  %v2375_v22 = vshrl.u32 %v7449_v55, 16  ;;  %v7486_v60 = vld [vmem:[%s7264_s10 + $0x60] sm:$0xf] }
  0x4e   : > { %v2360_v14 = vsel %vm7289_vm2, %v2355_v4, %v2359_v48  ;;  %v2373_v31 = vrot.slane %v2371_v10, 5  ;;  %v2381_v32 = vshll.u32 %v7455_v3, 16  ;;  %v535_v38 = vshrl.u32 %v7459_v11, 16 }
  0x4f   : > { %v5798_v27 = vcombine.low %v2350_v1, %v2360_v14  ;;  %v528_v29 = vrot.slane %v527_v7, 4  ;;  %v523_v33 = vsel %vm7289_vm2, %v518_v17, %v522_v57  ;;  %v2368_v35 = vor.u32 %v2367_v21, %v2364_v9  ;;  %v7483_v57 = vld [vmem:[%s7264_s10 + $0x68] sm:$0x1]  ;;  %v7496_v21 = vld [vmem:[%s7264_s10 + $0x64] sm:$0xf] }
  0x50   : > { %v2377_v36 = vrot.slane %v2375_v22, 4  ;;  %v2383_v41 = vrot.slane %v2381_v32, 5  ;;  %v538_v42 = vshll.u32 %v7459_v11, 16  ;;  %v544_v43 = vshll.u32 %v7465_v24, 16  ;;  %v355_v32 = vld [vmem:[%s7264_s10 + $0x68] sm:$0x1] }
  0x51   : > { %6590 = vmatmul.mubr.msk.bf16.gmra.mrb[8].mxu0 %vm815_vm3, %v5798_v27  ;;  %v533_v40 = vsel %vm7289_vm2, %v528_v29, %v532_v8  ;;  %v2369_v46 = vrot.slane %v2368_v35, 4  ;;  %v537_v49 = vrot.slane %v535_v38, 4  ;;  %v548_v54 = vshrl.u32 %v7465_v24, 16 }
  0x52   : > { %v5555_v45 = vcombine.low %v523_v33, %v533_v40  ;;  %v2378_v48 = vor.u32 %v2377_v36, %v2373_v31  ;;  %v540_v52 = vrot.slane %v538_v42, 5  ;;  %v546_v53 = vrot.slane %v544_v43, 5 }
  0x53   : > { %v554_v50 = vshll.u32 %v354_v37, 16  ;;  %v2374_v62 = vsel %vm7289_vm2, %v2369_v46, %v2373_v31  ;;  %v2386_v1 = vshrl.u32 %v5762_v44, 16  ;;  %v2389_v4 = vshll.u32 %v5762_v44, 16 }
  0x54   : > { %6449 = vmatprep.mubr.msk.bf16.mxu1 %vm815_vm3, %v5555_v45  ;;  %v2379_v63 = vrot.slane %v2378_v48, 4  ;;  %v541_v2 = vor.u32 %v540_v52, %v537_v49  ;;  %v550_v6 = vrot.slane %v548_v54, 4  ;;  %v2395_v8 = vshll.u32 %v7479_v51, 16  ;;  %v5827_v48 = vld [vmem:[%s7264_s10 + $0xc] sm:$0xe] }
  0x55   : > { %v556_v7 = vrot.slane %v554_v50, 5  ;;  %v2388_v10 = vrot.slane %v2386_v1, 4  ;;  %v2391_v14 = vrot.slane %v2389_v4, 5  ;;  %v2399_v17 = vshrl.u32 %v7479_v51, 16 }
  0x56   : > { %v2384_v9 = vsel %vm7289_vm2, %v2379_v63, %v2383_v41  ;;  %v542_v27 = vrot.slane %v541_v2, 4  ;;  %v551_v29 = vor.u32 %v550_v6, %v546_v53  ;;  %v2397_v31 = vrot.slane %v2395_v8, 5 }
  0x57   : > { %v5799_v22 = vcombine.low %v2374_v62, %v2384_v9  ;;  %v2392_v33 = vor.u32 %v2391_v14, %v2388_v10  ;;  %v2401_v35 = vrot.slane %v2399_v17, 4  ;;  %v2405_v36 = vshll.u32 %v7483_v57, 16  ;;  %v7511_v62 = vld [vmem:[%s7264_s10 + $0x6c] sm:$0xf]  ;;  %v7524_v10 = vld [vmem:[%s7264_s10 + $0x70] sm:$0xf] }
  0x58   : > { %v559_v37 = vshrl.u32 %v7486_v60, 16  ;;  %v547_v38 = vsel %vm7289_vm2, %v542_v27, %v546_v53  ;;  %v552_v40 = vrot.slane %v551_v29, 4  ;;  %v562_v41 = vshll.u32 %v7486_v60, 16 }
  0x59   : > { %6593 = vmatprep.mubr.msk.bf16.mxu0 %vm815_vm3, %v5799_v22  ;;  %v568_v42 = vshll.u32 %v7496_v21, 16  ;;  %v2393_v43 = vrot.slane %v2392_v33, 4  ;;  %v2402_v44 = vor.u32 %v2401_v35, %v2397_v31  ;;  %v2407_v45 = vrot.slane %v2405_v36, 5  ;;  %v356_v35 = vld [vmem:[%s7264_s10 + $0x74] sm:$0x1] }
  0x5a   : > { %v561_v46 = vrot.slane %v559_v37, 4  ;;  %v557_v49 = vsel %vm7289_vm2, %v552_v40, %v556_v7  ;;  %v564_v52 = vrot.slane %v562_v41, 5  ;;  %v572_v50 = vshrl.u32 %v7496_v21, 16  ;;  %v5828_v36 = vld [vmem:[%s7264_s10 + $0x18] sm:$0xe] }
  0x5b   : > { %v570_v54 = vrot.slane %v568_v42, 5  ;;  %v5556_v53 = vcombine.low %v547_v38, %v557_v49  ;;  %v2398_v63 = vsel %vm7289_vm2, %v2393_v43, %v2397_v31  ;;  %v2403_v1 = vrot.slane %v2402_v44, 4  ;;  %v7543_v42 = vld [vmem:[%s7264_s10 + $0x78] sm:$0xf] }
  0x5c   : > { %v578_v4 = vshll.u32 %v355_v32, 16  ;;  %v565_v6 = vor.u32 %v564_v52, %v561_v46  ;;  %v574_v7 = vrot.slane %v572_v50, 4  ;;  %v5843_v8 = vrot.slane %v5827_v48, 9  ;;  %v357_v50 = vld [vmem:[%s7264_s10 + $0x80] sm:$0x1] }
  0x5d   : > { %v2975_v9 = vrot.slane %v2973_v58, 4  ;;  %6450 = vmatmul.mubr.msk.bf16.gmra.mrb[12].mxu1 %vm815_vm3, %v5556_v53  ;;  %v2408_v14 = vsel %vm7289_vm2, %v2403_v1, %v2407_v45  ;;  %v583_v22 = vshrl.u32 %v7511_v62, 16  ;;  %v586_v27 = vshll.u32 %v7511_v62, 16 }
  0x5e   : > { %v580_v17 = vrot.slane %v578_v4, 5  ;;  %v5800_v29 = vcombine.low %v2398_v63, %v2408_v14  ;;  %v566_v31 = vrot.slane %v565_v6, 4  ;;  %v575_v32 = vor.u32 %v574_v7, %v570_v54  ;;  %v5829_v7 = vld [vmem:[%s7264_s10 + $0x24] sm:$0xe] }
  0x5f   : > { %v2974_v33 = vsel %vm7517_vm6, %v5843_v8, %v2973_v58  ;;  %v2977_v37 = vsel %vm7517_vm6, %v2975_v9, %v2976_v59  ;;  %v585_v38 = vrot.slane %v583_v22, 4  ;;  %v588_v40 = vrot.slane %v586_v27, 5  ;;  %v7574_v22 = vld [vmem:[%s7264_s10 + $0x84] sm:$0xf] }
  0x60   : > { %v592_v41 = vshll.u32 %v7524_v10, 16  ;;  %6594 = vmatmul.mubr.msk.bf16.gmra.mrb[12].mxu0 %vm815_vm3, %v5800_v29  ;;  %v571_v15 = vsel %vm7289_vm2, %v566_v31, %v570_v54  ;;  %v576_v58 = vrot.slane %v575_v32, 4  ;;  %v5863_v43 = vcombine.low %v2974_v33, %v2977_v37  ;;  %v7558_v54 = vld [vmem:[%s7264_s10 + $0x7c] sm:$0xf]  ;;  %v7581_v33 = vld [vmem:[%s7264_s10 + $0x88] sm:$0xf] }
  0x61   : > { %v596_v16 = vshrl.u32 %v7524_v10, 16  ;;  %v589_v44 = vor.u32 %v588_v40, %v585_v38  ;;  %v602_v45 = vshll.u32 %v356_v35, 16  ;;  %v5844_v46 = vrot.slane %v5828_v36, 9  ;;  %v358_v40 = vld [vmem:[%s7264_s10 + $0x8c] sm:$0x1] }
  0x62   : > { %v594_v59 = vrot.slane %v592_v41, 5  ;;  %v581_v48 = vsel %vm7289_vm2, %v576_v58, %v580_v17  ;;  %6617 = vmatprep.mubr.msk.bf16.mxu0 %vm815_vm3, %v5863_v43  ;;  %v2984_v52 = vsel %vm7517_vm6, %v7325_v25, %v2983_v23  ;;  %v607_v53 = vshrl.u32 %v7543_v42, 16 }
  0x63   : > { %v598_v49 = vrot.slane %v596_v16, 4  ;;  %v5557_v63 = vcombine.low %v571_v15, %v581_v48  ;;  %v590_v1 = vrot.slane %v589_v44, 4  ;;  %v604_v4 = vrot.slane %v602_v45, 5 }
  0x64   : > { %v2981_v6 = vsel %vm7517_vm6, %v5844_v46, %v2980_v18  ;;  %v609_v9 = vrot.slane %v607_v53, 4  ;;  %v610_v23 = vshll.u32 %v7543_v42, 16  ;;  %v616_v14 = vshll.u32 %v7558_v54, 16  ;;  %v7053_v18 = vld [vmem:[%s9177_s1 + $0x68] sm:$0xff]  }
  0x65   : > { %v599_v61 = vor.u32 %v598_v49, %v594_v59  ;;  %v5864_v8 = vcombine.low %v2981_v6, %v2984_v52  ;;  %6453 = vmatprep.mubr.msk.bf16.mxu1 %vm815_vm3, %v5557_v63  ;;  %v595_v25 = vsel %vm7289_vm2, %v590_v1, %v594_v59  ;;  %v620_v56 = vshrl.u32 %v7558_v54, 16  ;;  %v7599_v52 = vld [vmem:[%s7264_s10 + $0x90] sm:$0xf] }
  0x66   : > { %v626_v17 = vshll.u32 %v357_v50, 16  ;;  %v612_v29 = vrot.slane %v610_v23, 5  ;;  %v5845_v31 = vrot.slane %v5829_v7, 9  ;;  %v2987_v32 = vrot.slane %v7332_v39, 5  ;;  %v5830_v39 = vld [vmem:[%s7264_s10 + $0x30] sm:$0xe] }
  0x67   : > { %v600_v27 = vrot.slane %v599_v61, 4  ;;  %v618_v35 = vrot.slane %v616_v14, 5  ;;  %v622_v36 = vrot.slane %v620_v56, 4  ;;  %v2990_v38 = vrot.slane %v7341_v47, 5 }
  0x68   : > { %v628_v37 = vrot.slane %v626_v17, 5  ;;  %6618 = vmatmul.mubr.msk.bf16.vlgmr.msra.gmra.mrb[0].mxu0 %vm815_vm3, %v5864_v8  ;;  %v613_v15 = vor.u32 %v612_v29, %v609_v9  ;;  %v2988_v58 = vsel %vm7517_vm6, %v5845_v31, %v2987_v32  ;;  %v2989_v43 = vrot.slane %v2987_v32, 4  ;;  %v359_v9 = vld [vmem:[%s7264_s10 + $0x98] sm:$0x1]  ;;  %v5831_v32 = vld [vmem:[%s7264_s10 + $0x3c] sm:$0xe] }
  0x69   : > { %v605_v41 = vsel %vm7289_vm2, %v600_v27, %v604_v4  ;;  %6650 = vmatpush3.bf16.msra.mxu0 %v7371_v5  ;;  %v623_v44 = vor.u32 %v622_v36, %v618_v35  ;;  %v631_v47 = vshrl.u32 %v7574_v22, 16  ;;  %v634_v59 = vshll.u32 %v7574_v22, 16  ;;  %v7604_v5 = vld [vmem:[%s9177_s1 + $0x70] sm:$0xff]  }
  0x6a   : > { %v5558_v16 = vcombine.low %v595_v25, %v605_v41  ;;  %v614_v45 = vrot.slane %v613_v15, 4  ;;  %v2991_v46 = vsel %vm7517_vm6, %v2989_v43, %v2990_v38  ;;  %v640_v48 = vshll.u32 %v7581_v33, 16  ;;  %6651 = vmatprep.subr.bf16.mxu0 %v7053_v18  ;;  %v7608_v4 = vld [vmem:[%s7264_s10 + $0x94] sm:$0xf]  ;;  %v7631_v15 = vld [vmem:[%s7264_s10 + $0xa0] sm:$0xf] }
  0x6b   : > { %v644_v49 = vshrl.u32 %v7581_v33, 16  ;;  %v624_v50 = vrot.slane %v623_v44, 4  ;;  %v5865_v53 = vcombine.low %v2988_v58, %v2991_v46  ;;  %v633_v63 = vrot.slane %v631_v47, 4 }
  0x6c   : > { %6454 = vmatmul.mubr.msk.bf16.gmra.mrb[16].mxu1 %vm815_vm3, %v5558_v16  ;;  %v636_v1 = vrot.slane %v634_v59, 5  ;;  %v619_v6 = vsel %vm7289_vm2, %v614_v45, %v618_v35  ;;  %v642_v7 = vrot.slane %v640_v48, 5  ;;  %v650_v8 = vshll.u32 %v358_v40, 16  ;;  %v7624_v40 = vld [vmem:[%s7264_s10 + $0x9c] sm:$0xf] }
  0x6d   : > { %v646_v61 = vrot.slane %v644_v49, 4  ;;  %v629_v23 = vsel %vm7289_vm2, %v624_v50, %v628_v37  ;;  %6621 = vmatprep.mubr.msk.bf16.mxu0 %vm815_vm3, %v5865_v53  ;;  %v5846_v14 = vrot.slane %v5830_v39, 9  ;;  %v2994_v56 = vrot.slane %v7366_v26, 5  ;;  %6652 = vmatpush3.bf16.msra.mxu0 %v7053_v18  ;;  %v360_v53 = vld [vmem:[%s7264_s10 + $0xa4] sm:$0x1] }
  0x6e   : > { %v637_v25 = vor.u32 %v636_v1, %v633_v63  ;;  %v5559_v17 = vcombine.low %v619_v6, %v629_v23  ;;  %v652_v29 = vrot.slane %v650_v8, 5  ;;  %v2997_v31 = vrot.slane %v7377_v34, 5  ;;  %6685 = vmatprep.subr.bf16.mxu0 %v7604_v5  ;;  %v5832_v63 = vld [vmem:[%s7264_s10 + $0x48] sm:$0xe] }
  0x6f   : > { %v647_v27 = vor.u32 %v646_v61, %v642_v7  ;;  %v2995_v36 = vsel %vm7517_vm6, %v5846_v14, %v2994_v56  ;;  %v2996_v37 = vrot.slane %v2994_v56, 4  ;;  %v655_v38 = vshrl.u32 %v7599_v52, 16 }
  0x70   : > { %v638_v35 = vrot.slane %v637_v25, 4  ;;  %6457 = vmatprep.mubr.msk.bf16.mxu1 %vm815_vm3, %v5559_v17  ;;  %v658_v18 = vshll.u32 %v7599_v52, 16  ;;  %v664_v34 = vshll.u32 %v7608_v4, 16  ;;  %v668_v41 = vshrl.u32 %v7608_v4, 16 }
  0x71   : > { %v648_v26 = vrot.slane %v647_v27, 4  ;;  %v2998_v43 = vsel %vm7517_vm6, %v2996_v37, %v2997_v31  ;;  %v657_v39 = vrot.slane %v655_v38, 4  ;;  %v674_v16 = vshll.u32 %v359_v9, 16  ;;  %v7652_v27 = vld [vmem:[%s7264_s10 + $0xa8] sm:$0xf] }
  0x72   : > { %v643_v58 = vsel %vm7289_vm2, %v638_v35, %v642_v7  ;;  %v5866_v47 = vcombine.low %v2995_v36, %v2998_v43  ;;  %v660_v59 = vrot.slane %v658_v18, 5  ;;  %v666_v45 = vrot.slane %v664_v34, 5  ;;  %v7655_v35 = vld [vmem:[%s7264_s10 + $0xac] sm:$0xf] }
  0x73   : > { %v653_v44 = vsel %vm7289_vm2, %v648_v26, %v652_v29  ;;  %v670_v48 = vrot.slane %v668_v41, 4  ;;  %v676_v49 = vrot.slane %v674_v16, 5  ;;  %v5847_v50 = vrot.slane %v5831_v32, 9 }
  0x74   : > { %v5560_v46 = vcombine.low %v643_v58, %v653_v44  ;;  %6622 = vmatmul.mubr.msk.bf16.gmra.mrb[4].mxu0 %vm815_vm3, %v5866_v47  ;;  %v661_v1 = vor.u32 %v660_v59, %v657_v39  ;;  %v3001_v6 = vrot.slane %v7395_v12, 5  ;;  %v3004_v7 = vrot.slane %v7400_v20, 5  ;;  %v361_v47 = vld [vmem:[%s7264_s10 + $0xb0] sm:$0x1]  ;;  %v5833_v59 = vld [vmem:[%s7264_s10 + $0x54] sm:$0xe] }
  0x75   : > { %v679_v61 = vshrl.u32 %v7624_v40, 16  ;;  %v671_v8 = vor.u32 %v670_v48, %v666_v45  ;;  %v682_v9 = vshll.u32 %v7624_v40, 16  ;;  %v688_v23 = vshll.u32 %v7631_v15, 16 }
  0x76   : > { %6458 = vmatmul.mubr.msk.bf16.gmra.mrb[20].mxu1 %vm815_vm3, %v5560_v46  ;;  %v692_v25 = vshrl.u32 %v7631_v15, 16  ;;  %v662_v14 = vrot.slane %v661_v1, 4  ;;  %v3002_v56 = vsel %vm7517_vm6, %v5847_v50, %v3001_v6  ;;  %v3003_v17 = vrot.slane %v3001_v6, 4 }
  0x77   : > { %v681_v12 = vrot.slane %v679_v61, 4  ;;  %v672_v20 = vrot.slane %v671_v8, 4  ;;  %v684_v29 = vrot.slane %v682_v9, 5  ;;  %v690_v31 = vrot.slane %v688_v23, 5  ;;  %v7680_v61 = vld [vmem:[%s7264_s10 + $0xb4] sm:$0xf] }
  0x78   : > { %v694_v32 = vrot.slane %v692_v25, 4  ;;  %v667_v36 = vsel %vm7289_vm2, %v662_v14, %v666_v45  ;;  %v3005_v37 = vsel %vm7517_vm6, %v3003_v17, %v3004_v7  ;;  %v698_v38 = vshll.u32 %v360_v53, 16  ;;  %v7685_v14 = vld [vmem:[%s7264_s10 + $0xb8] sm:$0xf] }
  0x79   : > { %v5848_v26 = vrot.slane %v5832_v63, 9  ;;  %v677_v18 = vsel %vm7289_vm2, %v672_v20, %v676_v49  ;;  %v5867_v34 = vcombine.low %v3002_v56, %v3005_v37  ;;  %v685_v41 = vor.u32 %v684_v29, %v681_v12  ;;  %v362_v29 = vld [vmem:[%s7264_s10 + $0xbc] sm:$0x1] }
  0x7a   : > { %v695_v58 = vor.u32 %v694_v32, %v690_v31  ;;  %v5561_v43 = vcombine.low %v667_v36, %v677_v18  ;;  %v700_v39 = vrot.slane %v698_v38, 5  ;;  %v3008_v16 = vrot.slane %v7418_v0, 5  ;;  %v5834_v38 = vld [vmem:[%s7264_s10 + $0x60] sm:$0xe] }
  0x7b   : > { %v3011_v44 = vrot.slane %v7426_v13, 5  ;;  %6625 = vmatprep.mubr.msk.bf16.mxu0 %vm815_vm3, %v5867_v34  ;;  %v686_v45 = vrot.slane %v685_v41, 4  ;;  %v703_v48 = vshrl.u32 %v7652_v27, 16  ;;  %v706_v49 = vshll.u32 %v7652_v27, 16 }
  0x7c   : > { %v696_v46 = vrot.slane %v695_v58, 4  ;;  %6461 = vmatprep.mubr.msk.bf16.mxu1 %vm815_vm3, %v5561_v43  ;;  %v3009_v50 = vsel %vm7517_vm6, %v5848_v26, %v3008_v16  ;;  %v3010_v0 = vrot.slane %v3008_v16, 4  ;;  %v712_v13 = vshll.u32 %v7655_v35, 16  ;;  %v5766_v16 = vld [vmem:[%s7264_s10 + $0x70] sm:$0xf] }
  0x7d   : > { %v716_v53 = vshrl.u32 %v7655_v35, 16  ;;  %v691_v63 = vsel %vm7289_vm2, %v686_v45, %v690_v31  ;;  %v705_v6 = vrot.slane %v703_v48, 4  ;;  %v708_v7 = vrot.slane %v706_v49, 5 }
  0x7e   : > { %v701_v1 = vsel %vm7289_vm2, %v696_v46, %v700_v39  ;;  %v3012_v9 = vsel %vm7517_vm6, %v3010_v0, %v3011_v44  ;;  %v714_v23 = vrot.slane %v712_v13, 5  ;;  %v722_v12 = vshll.u32 %v361_v47, 16  ;;  %v5835_v46 = vld [vmem:[%s7264_s10 + $0x6c] sm:$0xe] }
  0x7f   : > { %v5562_v8 = vcombine.low %v691_v63, %v701_v1  ;;  %v718_v25 = vrot.slane %v716_v53, 4  ;;  %v5868_v56 = vcombine.low %v3009_v50, %v3012_v9  ;;  %v709_v17 = vor.u32 %v708_v7, %v705_v6 }
  0x80   : > { %v5849_v20 = vrot.slane %v5833_v59, 9  ;;  %v3015_v32 = vrot.slane %v7449_v55, 5  ;;  %v3018_v36 = vrot.slane %v7455_v3, 5  ;;  %v727_v37 = vshrl.u32 %v7680_v61, 16  ;;  %v5767_v3 = vld [vmem:[%s7264_s10 + $0x74] sm:$0x1] }
  0x81   : > { %6462 = vmatmul.mubr.msk.bf16.gmra.mrb[24].mxu1 %vm815_vm3, %v5562_v8  ;;  %v719_v31 = vor.u32 %v718_v25, %v714_v23  ;;  %6626 = vmatmul.mubr.msk.bf16.gmra.mrb[8].mxu0 %vm815_vm3, %v5868_v56  ;;  %v710_v26 = vrot.slane %v709_v17, 4  ;;  %v724_v18 = vrot.slane %v722_v12, 5  ;;  %v730_v34 = vshll.u32 %v7680_v61, 16  ;;  %v5836_v12 = vld [vmem:[%s7264_s10 + $0x78] sm:$0xe] }
  0x82   : > { %v736_v41 = vshll.u32 %v7685_v14, 16  ;;  %v3016_v43 = vsel %vm7517_vm6, %v5849_v20, %v3015_v32  ;;  %v3017_v39 = vrot.slane %v3015_v32, 4  ;;  %v729_v55 = vrot.slane %v727_v37, 4 }
  0x83   : > { %v720_v58 = vrot.slane %v719_v31, 4  ;;  %v715_v44 = vsel %vm7289_vm2, %v710_v26, %v714_v23  ;;  %v732_v47 = vrot.slane %v730_v34, 5  ;;  %v740_v45 = vshrl.u32 %v7685_v14, 16  ;;  %v7726_v26 = vld [vmem:[%s7264_s10 + $0x4] sm:$0xf] }
  0x84   : > { %v738_v59 = vrot.slane %v736_v41, 5  ;;  %v3019_v49 = vsel %vm7517_vm6, %v3017_v39, %v3018_v36  ;;  %v746_v50 = vshll.u32 %v362_v29, 16  ;;  %v5850_v0 = vrot.slane %v5834_v38, 9  ;;  %v7720_v36 = vld [vmem:[%s7264_s10 + $0x7c] sm:$0xf] }
  0x85   : > { %v725_v48 = vsel %vm7289_vm2, %v720_v58, %v724_v18  ;;  %v5869_v53 = vcombine.low %v3016_v43, %v3019_v49  ;;  %v733_v63 = vor.u32 %v732_v47, %v729_v55  ;;  %v742_v1 = vrot.slane %v740_v45, 4  ;;  %v7108_v38 = vld [vmem:[%s7264_s10] sm:$0xf]  ;;  %v5837_v41 = vld [vmem:[%s7264_s10 + $0x84] sm:$0xe] }
  0x86   : > { %v5563_v13 = vcombine.low %v715_v44, %v725_v48  ;;  %v748_v6 = vrot.slane %v746_v50, 5  ;;  %v3022_v7 = vrot.slane %v7479_v51, 5  ;;  %v3025_v8 = vrot.slane %v7483_v57, 5  ;;  %v7730_v34 = vld [vmem:[%s7264_s10 + $0x80] sm:$0x1] }
  0x87   : > { %v5851_v9 = vrot.slane %v5835_v46, 9  ;;  %6629 = vmatprep.mubr.msk.bf16.mxu0 %vm815_vm3, %v5869_v53  ;;  %v734_v23 = vrot.slane %v733_v63, 4  ;;  %v743_v25 = vor.u32 %v742_v1, %v738_v59  ;;  %v3029_v56 = vrot.slane %v5766_v16, 5  ;;  %v5772_v16 = vld [vmem:[%s7264_s10 + $0x88] sm:$0xf] }
  0x88   : > { %6465 = vmatprep.mubr.msk.bf16.mxu1 %vm815_vm3, %v5563_v13  ;;  %v3032_v17 = vrot.slane %v5767_v3, 5  ;;  %v3023_v51 = vsel %vm7517_vm6, %v5850_v0, %v3022_v7  ;;  %v3024_v20 = vrot.slane %v3022_v7, 4  ;;  %v5583_v18 = vcombine.low %v7108_v38, %v7726_v26  ;;  %v5773_v3 = vld [vmem:[%s7264_s10 + $0x8c] sm:$0x1]  ;;  %v5776_v0 = vld [vmem:[%s7264_s10 + $0x98] sm:$0x1] }
  0x89   : > { %v739_v57 = vsel %vm7289_vm2, %v734_v23, %v738_v59  ;;  %v744_v29 = vrot.slane %v743_v25, 4  ;;  %v3030_v31 = vsel %vm7517_vm6, %v5851_v9, %v3029_v56  ;;  %v3031_v32 = vrot.slane %v3029_v56, 4  ;;  %v5775_v59 = vld [vmem:[%s7264_s10 + $0x94] sm:$0xf]  ;;  %v5838_v13 = vld [vmem:[%s7264_s10 + $0x90] sm:$0xe] }
  0x8a   : > { %v3026_v37 = vsel %vm7517_vm6, %v3024_v20, %v3025_v8  ;;  %v5852_v55 = vrot.slane %v5836_v12, 9  ;;  %v3036_v45 = vrot.slane %v7720_v36, 5  ;;  %v3039_v46 = vrot.slane %v7730_v34, 5  ;;  %v5779_v9 = vld [vmem:[%s7264_s10 + $0xa4] sm:$0x1] }
  0x8b   : > { %v749_v58 = vsel %vm7289_vm2, %v744_v29, %v748_v6  ;;  %v5870_v43 = vcombine.low %v3023_v51, %v3026_v37  ;;  %v3033_v39 = vsel %vm7517_vm6, %v3031_v32, %v3032_v17  ;;  %v5853_v48 = vrot.slane %v5837_v41, 9  ;;  %v5778_v6 = vld [vmem:[%s7264_s10 + $0xa0] sm:$0xf]  ;;  %v5839_v23 = vld [vmem:[%s7264_s10 + $0x9c] sm:$0xe] }
  0x8c   : > { %v5564_v44 = vcombine.low %v739_v57, %v749_v58  ;;  %v5871_v47 = vcombine.low %v3030_v31, %v3033_v39  ;;  %v3043_v49 = vrot.slane %v5772_v16, 5  ;;  %v3046_v50 = vrot.slane %v5773_v3, 5  ;;  %v7110_v25 = vld [vmem:[%s7264_s10 + $0xc] sm:$0xf]  ;;  %v7757_v56 = vld [vmem:[%s7264_s10 + $0x10] sm:$0xf] }
  0x8d   : > { %6630 = vmatmul.mubr.msk.bf16.gmra.mrb[12].mxu0 %vm815_vm3, %v5870_v43  ;;  %v3037_v53 = vsel %vm7517_vm6, %v5852_v55, %v3036_v45  ;;  %v3038_v63 = vrot.slane %v3036_v45, 4  ;;  %v3050_v1 = vrot.slane %v5775_v59, 5  ;;  %v5584_v17 = vcombine.low %v7110_v25, %v7757_v56  ;;  %v7112_v37 = vld [vmem:[%s7264_s10 + $0x18] sm:$0xf]  ;;  %v7766_v38 = vld [vmem:[%s7264_s10 + $0x1c] sm:$0xf] }
  0x8e   : > { %6466 = vmatmul.mubr.msk.bf16.gmra.mrb[28].mxu1 %vm815_vm3, %v5564_v44  ;;  %6633 = vmatprep.mubr.msk.bf16.mxu0 %vm815_vm3, %v5871_v47  ;;  %v3044_v7 = vsel %vm7517_vm6, %v5853_v48, %v3043_v49  ;;  %v3045_v8 = vrot.slane %v3043_v49, 4  ;;  %v5854_v51 = vrot.slane %v5838_v13, 9  ;;  %v3053_v20 = vrot.slane %v5776_v0, 5  ;;  %v5781_v39 = vld [vmem:[%s7264_s10 + $0xac] sm:$0xf]  ;;  %v7114_v45 = vld [vmem:[%s9177_s1 + $0x20] sm:$0xff]  }
  0x8f   : > { %6473 = vmatprep.mubr.msk.bf16.mxu1 %vm815_vm3, %v5583_v18  ;;  %v3040_v12 = vsel %vm7517_vm6, %v3038_v63, %v3039_v46  ;;  %v3052_v31 = vrot.slane %v3050_v1, 4  ;;  %v3057_v32 = vrot.slane %v5778_v6, 5  ;;  %v5585_v18 = vcombine.low %v7112_v37, %v7766_v38  ;;  %v5784_v16 = vld [vmem:[%s7264_s10 + $0xb8] sm:$0xf]  ;;  %v7062_v3 = vld [vmem:[%s9177_s1 + $0x28] sm:$0xff]   ;;  %v7796_v63 = vld [vmem:[%s9177_s1 + $0x30] sm:$0xff]  }
  0x90   : > { %v5872_v57 = vcombine.low %v3037_v53, %v3040_v12  ;;  %v3047_v29 = vsel %vm7517_vm6, %v3045_v8, %v3046_v50  ;;  %v5855_v58 = vrot.slane %v5839_v23, 9  ;;  %v3060_v43 = vrot.slane %v5779_v9, 5  ;;  %v5782_v49 = vld [vmem:[%s7264_s10 + $0xb0] sm:$0x1]  ;;  %v5840_v50 = vld [vmem:[%s7264_s10 + $0xa8] sm:$0xe] }
  0x91   : > { %v5873_v41 = vcombine.low %v3044_v7, %v3047_v29  ;;  %v3059_v55 = vrot.slane %v3057_v32, 4  ;;  %v3051_v44 = vsel %vm7517_vm6, %v5854_v51, %v3050_v1  ;;  %v3054_v47 = vsel %vm7517_vm6, %v3052_v31, %v3053_v20  ;;  %v5785_v13 = vld [vmem:[%s7264_s10 + $0xbc] sm:$0x1]  ;;  %v5841_v53 = vld [vmem:[%s7264_s10 + $0xb4] sm:$0xe] }
  0x92   : > { %v3064_v59 = vrot.slane %v5781_v39, 5  ;;  %v3058_v46 = vsel %vm7517_vm6, %v5855_v58, %v3057_v32  ;;  %v3071_v0 = vrot.slane %v5784_v16, 5  ;;  %v7115_v1 = vld [vmem:[%s7264_s10 + $0x24] sm:$0xf]  ;;  %v7800_v6 = vld [vmem:[%s7264_s10 + $0x28] sm:$0xf]  ;;  %v5874_v8 = vcombine.low %v3051_v44, %v3054_v47 }
  0x93   : > { %v3061_v48 = vsel %vm7517_vm6, %v3059_v55, %v3060_v43  ;;  %v5586_v7 = vcombine.low %v7115_v1, %v7800_v6  ;;  %v5856_v23 = vrot.slane %v5840_v50, 9  ;;  %v7117_v12 = vld [vmem:[%s7264_s10 + $0x30] sm:$0xf]  ;;  %v7805_v51 = vld [vmem:[%s7264_s10 + $0x34] sm:$0xf]  ;;  %v3074_v31 = vrot.slane %v5785_v13, 5 }
  0x94   : > { %v5875_v9 = vcombine.low %v3058_v46, %v3061_v48  ;;  %v3066_v25 = vrot.slane %v3064_v59, 4  ;;  %v5587_v20 = vcombine.low %v7117_v12, %v7805_v51  ;;  %v3073_v29 = vrot.slane %v3071_v0, 4  ;;  %v5787_v32 = vld [vmem:[%s7264_s10 + $0xc4] sm:$0xf]  ;;  %v5788_v55 = vld [vmem:[%s7264_s10 + $0xc8] sm:$0x1] }
  0x95   : > { %6634 = vmatmul.mubr.msk.bf16.gmra.mrb[16].mxu0 %vm815_vm3, %v5872_v57  ;;  %v5857_v57 = vrot.slane %v5841_v53, 9  ;;  %v3065_v37 = vsel %vm7517_vm6, %v5856_v23, %v3064_v59  ;;  %v3078_v58 = vrot.slane %v5787_v32, 5  ;;  %v7119_v44 = vld [vmem:[%s7264_s10 + $0x3c] sm:$0xf]  ;;  %v7826_v47 = vld [vmem:[%s7264_s10 + $0x40] sm:$0xf]  ;;  %v5590_v53 = vcombine.low %v7459_v11, %v7465_v24 }
  0x96   : > { %6474 = vmatmul.mubr.msk.bf16.vlgmr.msra.gmra.mrb[0].mxu1 %vm815_vm3, %v5584_v17  ;;  %6637 = vmatprep.mubr.msk.bf16.mxu0 %vm815_vm3, %v5873_v41  ;;  %v3067_v17 = vrot.slane %v5782_v49, 5  ;;  %v5842_v41 = vld [vmem:[%s7264_s10 + $0xc0] sm:$0xe]  ;;  %v3075_v39 = vsel %vm7517_vm6, %v3073_v29, %v3074_v31  ;;  %v5588_v59 = vcombine.low %v7119_v44, %v7826_v47  ;;  %v3081_v48 = vrot.slane %v5788_v55, 5  ;;  %v7063_v1 = vld [vmem:[%s7264_s10 + $0x18] sm:$0xff]  }
  0x97   : > { %6506 = vmatpush3.bf16.msra.mxu1 %v7114_v45  ;;  %6477 = vmatprep.mubr.msk.bf16.mxu1 %vm815_vm3, %v5585_v18  ;;  %v3072_v43 = vsel %vm7517_vm6, %v5857_v57, %v3071_v0  ;;  %v3080_v46 = vrot.slane %v3078_v58, 4  ;;  %v5589_v49 = vcombine.low %v7430_v19, %v7433_v28  ;;  %v2443_v13 = vshll.u32 %v7720_v36, 16  ;;  %v1326_v11 = vld [vmem:[%s7264_s10] sm:$0xe]  ;;  %v1328_v24 = vld [vmem:[%s7264_s10 + $0x18] sm:$0xe] }
  0x98   : > { %6507 = vmatprep.subr.bf16.mxu1 %v7062_v3  ;;  %v3068_v18 = vsel %vm7517_vm6, %v3066_v25, %v3067_v17  ;;  %v5877_v45 = vcombine.low %v3072_v43, %v3075_v39  ;;  %v2447_v19 = vshrl.u32 %v7720_v36, 16  ;;  %v1327_v25 = vld [vmem:[%s7264_s10 + $0xc] sm:$0xe]  ;;  %v7121_v17 = vld [vmem:[%s7264_s10 + $0x14] sm:$0x1]  ;;  %v2453_v31 = vshll.u32 %v7730_v34, 16 }
  0x99   : > { %v5876_v16 = vcombine.low %v3065_v37, %v3068_v18  ;;  %v3082_v0 = vsel %vm7517_vm6, %v3080_v46, %v3081_v48  ;;  %v1389_v12 = vrot.slane %v7121_v17, 5  ;;  %v1400_v32 = vrot.slane %v7800_v6, 5  ;;  %v7066_v18 = vld [vmem:[%s7264_s10 + $0x24] sm:$0xff]   ;;  %v7068_v43 = vld [vmem:[%s7264_s10 + $0x30] sm:$0xff]   ;;  %v7123_v55 = vld [vmem:[%s7264_s10 + $0x20] sm:$0x1] }
  0x9a   : > { %v2449_v23 = vrot.slane %v2447_v19, 4  ;;  %v5592_v37 = vcombine.low %v7511_v62, %v7524_v10  ;;  %v5595_v34 = vcombine.low %v7599_v52, %v7608_v4  ;;  %v5617_v39 = vrot.slane %v1326_v11, 9  ;;  %v1330_v62 = vld [vmem:[%s7264_s10 + $0x30] sm:$0xe]  ;;  %v7081_v44 = vld [vmem:[%s9177_s1 + $0x78] sm:$0xff]  }
  0x9b   : > { %6508 = vmatpush3.bf16.msra.mxu1 %v7062_v3  ;;  %v5858_v3 = vrot.slane %v5842_v41, 9  ;;  %v1329_v41 = vld [vmem:[%s7264_s10 + $0x24] sm:$0xe]  ;;  %v5619_v6 = vrot.slane %v1328_v24, 9  ;;  %v7124_v46 = vld [vmem:[%s7264_s10 + $0x2c] sm:$0x1] }
  0x9c   : > { %6541 = vmatprep.subr.bf16.mxu1 %v7796_v63  ;;  %v1403_v48 = vrot.slane %v7124_v46, 5  ;;  %v5967_v24 = vld [vmem:[%s7264_s10 + $0x18] sm:$0xf] }
  0x9d   : > { %6638 = vmatmul.mubr.msk.bf16.gmra.mrb[20].mxu0 %vm815_vm3, %v5874_v8  ;;  %v3079_v50 = vsel %vm7517_vm6, %v5858_v3, %v3078_v58  ;;  %v5591_v8 = vcombine.low %v7486_v60, %v7496_v21  ;;  %v1379_v60 = vrot.slane %v7726_v26, 5  ;;  %v5618_v21 = vrot.slane %v1327_v25, 9  ;;  %v5975_v3 = vld [vmem:[%s7264_s10 + $0x38] sm:$0x1] }
  0x9e   : > { %6478 = vmatmul.mubr.msk.bf16.gmra.mrb[4].mxu1 %vm815_vm3, %v5586_v7  ;;  %6641 = vmatprep.mubr.msk.bf16.mxu0 %vm815_vm3, %v5875_v9  ;;  %v5878_v28 = vcombine.low %v3079_v50, %v3082_v0  ;;  %v1386_v7 = vrot.slane %v7757_v56, 5  ;;  %v7847_v9 = vrot.slane %v2443_v13, 5  ;;  %v1393_v56 = vrot.slane %v7766_v38, 5  ;;  %v7125_v13 = vld [vmem:[%s7264_s10 + $0x38] sm:$0x1] }
  0x9f   : > { %6481 = vmatprep.mubr.msk.bf16.mxu1 %vm815_vm3, %v5587_v20  ;;  %v7122_v20 = vld [vmem:[%s7264_s10 + $0x8] sm:$0x1]  ;;  %v5593_v26 = vcombine.low %v7543_v42, %v7558_v54  ;;  %v5594_v38 = vcombine.low %v7574_v22, %v7581_v33  ;;  %v1407_v58 = vrot.slane %v7805_v51, 5  ;;  %v1381_v10 = vrot.slane %v1379_v60, 4 }
  0xa0   : > { %9198 = vst [vmem:[#allocation2_spill] sm:$0xff] %v7847_v9  ;;  %v1388_v36 = vrot.slane %v1386_v7, 4  ;;  %v1382_v57 = vrot.slane %v7122_v20, 5  ;;  %v2450_v29 = vor.u32 %v2449_v23, %v7847_v9  ;;  %v7879_v42 = vsel %vm7517_vm6, %v5618_v21, %v1386_v7  ;;  %v7911_v23 = vld [vmem:[%s7264_s10 + $0x48] sm:$0xe] }
  0xa1   : > { %v1395_v51 = vrot.slane %v1393_v56, 4  ;;  %v5621_v50 = vrot.slane %v1330_v62, 9  ;;  %v1409_v0 = vrot.slane %v1407_v58, 4  ;;  %v1410_v19 = vrot.slane %v7125_v13, 5  ;;  %v7072_v21 = vld [vmem:[%s7264_s10 + $0x48] sm:$0xff]  }
  0xa2   : > { %v7883_v54 = vsel %vm7517_vm6, %v1388_v36, %v1389_v12  ;;  %v7906_v7 = vsel %vm7517_vm6, %v5617_v39, %v1379_v60  ;;  %v7913_v25 = vrot.slane %v2450_v29, 4  ;;  %v7920_v17 = vsel %vm7517_vm6, %v1381_v10, %v1382_v57  ;;  %v7934_v60 = vld [vmem:[%s9177_s1 + $0x80] sm:$0xff]   ;;  %v7126_v57 = vld [vmem:[%s7264_s10 + $0x4c] sm:$0xf]  ;;  %v5971_v13 = vld [vmem:[%s7264_s10 + $0x28] sm:$0xf] }
  0xa3   : > { %v7924_v12 = vsel %vm7517_vm6, %v5619_v6, %v1393_v56  ;;  %v1414_v20 = vrot.slane %v7826_v47, 5  ;;  %v1421_v29 = vrot.slane %v7126_v57, 5  ;;  %v7962_v39 = vld [vmem:[%s7264_s10 + $0x60] sm:$0xe]  ;;  %v5969_v47 = vld [vmem:[%s7264_s10 + $0x20] sm:$0x1] }
  0xa4   : > { %9200 = vst [vmem:[#allocation4_spill] sm:$0xff] %v7913_v25  ;;  %v5623_v10 = vrot.slane %v7911_v23, 9  ;;  %v5974_v62 = vld [vmem:[%s7264_s10 + $0x34] sm:$0xf] }
  0xa5   : > { %6642 = vmatmul.mubr.msk.bf16.gmra.mrb[24].mxu0 %vm815_vm3, %v5876_v16  ;;  %v1396_v16 = vrot.slane %v7123_v55, 5  ;;  %v3812_v55 = vshrl.u32 %v5967_v24, 16  ;;  %v1416_v46 = vrot.slane %v1414_v20, 4  ;;  %v3869_v6 = vshll.u32 %v5974_v62, 16  ;;  %v7134_v9 = vld [vmem:[%s7264_s10 + $0x74] sm:$0x1] }
  0xa6   : > { %6482 = vmatmul.mubr.msk.bf16.gmra.mrb[8].mxu1 %vm815_vm3, %v5588_v59  ;;  %6645 = vmatprep.mubr.msk.bf16.mxu0 %vm815_vm3, %v5877_v45  ;;  %v5620_v59 = vrot.slane %v1329_v41, 9  ;;  %v1402_v45 = vrot.slane %v1400_v32, 4  ;;  %v7127_v41 = vld [vmem:[%s7264_s10 + $0x44] sm:$0x1]  ;;  %v8005_v33 = vsel %vm7517_vm6, %v5623_v10, %v1421_v29  ;;  %v3845_v10 = vshll.u32 %v5971_v13, 16 }
  0xa7   : > { %6485 = vmatprep.mubr.msk.bf16.mxu1 %vm815_vm3, %v5589_v49  ;;  %v7928_v11 = vsel %vm7517_vm6, %v1395_v51, %v1396_v16  ;;  %v3815_v16 = vshll.u32 %v5967_v24, 16  ;;  %v7982_v24 = vld [vmem:[%s7264_s10 + $0x5c] sm:$0x1] }
  0xa8   : > { %v7939_v36 = vsel %vm7517_vm6, %v5620_v59, %v1400_v32  ;;  %v7943_v56 = vsel %vm7517_vm6, %v1402_v45, %v1403_v48  ;;  %v5970_v45 = vld [vmem:[%s7264_s10 + $0x24] sm:$0xf]  ;;  %v1423_v48 = vrot.slane %v1421_v29, 4  ;;  %v8028_v25 = vrot.slane %v3845_v10, 5 }
  0xa9   : > { %v3836_v4 = vshrl.u32 %v5970_v45, 16 }
  0xab   : > { %v3838_v49 = vrot.slane %v3836_v4, 4  ;;  %v7078_v4 = vld [vmem:[%s7264_s10 + $0x6c] sm:$0xff]  }
  0xad   : > { %6646 = vmatmul.mubr.msk.bf16.gmra.mrb[28].mxu0 %vm815_vm3, %v5878_v28  ;;  %v7896_v28 = vld [vmem:[%s7264_s10 + $0x3c] sm:$0xe] }
  0xae   : > { %6486 = vmatmul.mubr.msk.bf16.gmra.mrb[12].mxu1 %vm815_vm3, %v5590_v53  ;;  %6653 = vmatprep.mubr.msk.bf16.mxu0 %vm815_vm3, %v7063_v1  ;;  %v7898_v53 = vrot.slane %v2453_v31, 5  ;;  %v7948_v31 = vld [vmem:[%s7264_s10 + $0x54] sm:$0xe]  ;;  %v5622_v32 = vrot.slane %v7896_v28, 9  ;;  %v7129_v28 = vld [vmem:[%s7264_s10 + $0x58] sm:$0xf] }
  0xaf   : > { %6489 = vmatprep.mubr.msk.bf16.mxu1 %vm815_vm3, %v5591_v8  ;;  %v1428_v23 = vrot.slane %v7129_v28, 5  ;;  %v3817_v28 = vrot.slane %v3815_v16, 5  ;;  %v7132_v16 = vld [vmem:[%s7264_s10 + $0x70] sm:$0xf]  ;;  %v3873_v1 = vshrl.u32 %v5974_v62, 16 }
  0xb0   : > { %9199 = vst [vmem:[#allocation3_spill] sm:$0xff] %v7898_v53  ;;  %v8001_v22 = vsel %vm7517_vm6, %v5622_v32, %v1414_v20  ;;  %v1335_v32 = vld [vmem:[%s7264_s10 + $0x6c] sm:$0xe]  ;;  %v1442_v29 = vrot.slane %v7132_v16, 5 }
  0xb1   : > { %v1430_v20 = vrot.slane %v1428_v23, 4  ;;  %v5626_v57 = vrot.slane %v1335_v32, 9 }
  0xb5   : > { %6654 = vmatmul.mubr.msk.bf16.vlgmr.msra.gmra.mrb[0].mxu0 %vm815_vm3, %v7066_v18  ;;  %v7953_v18 = vsel %vm7517_vm6, %v5621_v50, %v1407_v58  ;;  %v7128_v50 = vld [vmem:[%s7264_s10 + $0x50] sm:$0x1] }
  0xb6   : > { %6490 = vmatmul.mubr.msk.bf16.gmra.mrb[16].mxu1 %vm815_vm3, %v5592_v37  ;;  %6686 = vmatpush3.bf16.msra.mxu0 %v7604_v5  ;;  %v7070_v5 = vld [vmem:[%s7264_s10 + $0x3c] sm:$0xff]  }
  0xb7   : > { %6493 = vmatprep.mubr.msk.bf16.mxu1 %vm815_vm3, %v5593_v26  ;;  %6657 = vmatprep.mubr.msk.bf16.mxu0 %vm815_vm3, %v7068_v43  ;;  %v5968_v37 = vld [vmem:[%s7264_s10 + $0x1c] sm:$0xf]  ;;  %v7957_v26 = vsel %vm7517_vm6, %v1409_v0, %v1410_v19  ;;  %v1417_v43 = vrot.slane %v7127_v41, 5  ;;  %v1424_v0 = vrot.slane %v7128_v50, 5  ;;  %v5624_v19 = vrot.slane %v7948_v31, 9 }
  0xb8   : > { %6687 = vmatprep.subr.bf16.mxu0 %v7081_v44  ;;  %v3821_v51 = vshll.u32 %v5968_v37, 16  ;;  %v3825_v59 = vshrl.u32 %v5968_v37, 16  ;;  %v5625_v37 = vrot.slane %v7962_v39, 9  ;;  %v5973_v41 = vld [vmem:[%s7264_s10 + $0x30] sm:$0xf]  ;;  %v3814_v50 = vrot.slane %v3812_v55, 4 }
  0xb9   : > { %v7074_v39 = vld [vmem:[%s7264_s10 + $0x54] sm:$0xff]   ;;  %v8012_v55 = vsel %vm7517_vm6, %v1416_v46, %v1417_v43  ;;  %v8016_v52 = vsel %vm7517_vm6, %v1423_v48, %v1424_v0  ;;  %v3860_v43 = vshrl.u32 %v5973_v41, 16  ;;  %v3863_v46 = vshll.u32 %v5973_v41, 16  ;;  %v5972_v0 = vld [vmem:[%s7264_s10 + $0x2c] sm:$0x1] }
  0xba   : > { %6688 = vmatpush3.bf16.msra.mxu0 %v7081_v44  ;;  %v3831_v44 = vshll.u32 %v5969_v47, 16  ;;  %v7076_v47 = vld [vmem:[%s7264_s10 + $0x60] sm:$0xff]   ;;  %v3818_v8 = vor.u32 %v3817_v28, %v3814_v50  ;;  %v9201_v50 = vcombine.low %v7624_v40, %v7631_v15  ;;  %v3855_v32 = vshll.u32 %v5972_v0, 16 }
  0xbb   : > { %6721 = vmatprep.subr.bf16.mxu0 %v7934_v60  ;;  %v3865_v28 = vrot.slane %v3863_v46, 5  ;;  %v7136_v46 = vld [vmem:[%s7264_s10 + $0x88] sm:$0xf] }
  0xbc   : > { %v3819_v40 = vrot.slane %v3818_v8, 4  ;;  %v1336_v8 = vld [vmem:[%s7264_s10 + $0x78] sm:$0xe]  ;;  %v3857_v0 = vrot.slane %v3855_v32, 5 }
  0xbd   : > { %6658 = vmatmul.mubr.msk.bf16.gmra.mrb[4].mxu0 %vm815_vm3, %v7070_v5  ;;  %v7131_v5 = vld [vmem:[%s7264_s10 + $0x64] sm:$0xf] }
  0xbe   : > { %6494 = vmatmul.mubr.msk.bf16.gmra.mrb[20].mxu1 %vm815_vm3, %v5594_v38  ;;  %6661 = vmatprep.mubr.msk.bf16.mxu0 %vm815_vm3, %v7072_v21  ;;  %v1435_v31 = vrot.slane %v7131_v5, 5  ;;  %v8007_v38 = vrot.slane %v3821_v51, 5  ;;  %v3827_v21 = vrot.slane %v3825_v59, 4  ;;  %v3849_v51 = vshrl.u32 %v5971_v13, 16  ;;  %v7133_v5 = vld [vmem:[%s7264_s10 + $0x68] sm:$0x1] }
  0xbf   : > { %6497 = vmatprep.mubr.msk.bf16.mxu1 %vm815_vm3, %v5595_v34  ;;  %v3839_v34 = vshll.u32 %v5970_v45, 16  ;;  %v1438_v58 = vrot.slane %v7133_v5, 5  ;;  %v8023_v45 = vrot.slane %v3831_v44, 5  ;;  %v1444_v13 = vrot.slane %v1442_v29, 4 }
  0xc0   : > { %v1437_v59 = vrot.slane %v1435_v31, 4  ;;  %v3828_v48 = vor.u32 %v3827_v21, %v8007_v38  ;;  %v1445_v5 = vrot.slane %v7134_v9, 5  ;;  %v3851_v41 = vrot.slane %v3849_v51, 4 }
  0xc1   : > { %v3841_v16 = vrot.slane %v3839_v34, 5  ;;  %v8039_v44 = vsel %vm7517_vm6, %v5624_v19, %v1428_v23  ;;  %v3862_v9 = vrot.slane %v3860_v43, 4  ;;  %v8045_v21 = vrot.slane %v3869_v6, 5  ;;  %v7135_v6 = vld [vmem:[%s7264_s10 + $0x7c] sm:$0xf] }
  0xc2   : > { %v3829_v15 = vrot.slane %v3828_v48, 4  ;;  %v8052_v23 = vsel %vm7517_vm6, %v5625_v37, %v1435_v31  ;;  %v1449_v10 = vrot.slane %v7135_v6, 5  ;;  %v3879_v51 = vshll.u32 %v5975_v3, 16  ;;  %v7080_v43 = vld [vmem:[%s7264_s10 + $0x78] sm:$0xff]  }
  0xc3   : > { %v3842_v34 = vor.u32 %v3841_v16, %v3838_v49  ;;  %v8066_v49 = vsel %vm7517_vm6, %v1437_v59, %v1438_v58  ;;  %v8074_v37 = vsel %vm7517_vm6, %v1444_v13, %v1445_v5  ;;  %v3866_v31 = vor.u32 %v3865_v28, %v3862_v9  ;;  %v7137_v13 = vld [vmem:[%s7264_s10 + $0x80] sm:$0x1]  ;;  %v1339_v6 = vld [vmem:[%s7264_s10 + $0x9c] sm:$0xe] }
  0xc4   : > { %v3824_v3 = vsel %vm7289_vm2, %v3819_v40, %v8007_v38  ;;  %v3834_v58 = vsel %vm7289_vm2, %v3829_v15, %v8023_v45  ;;  %v1456_v48 = vrot.slane %v7136_v46, 5  ;;  %v5627_v16 = vrot.slane %v1336_v8, 9  ;;  %v7138_v40 = vld [vmem:[%s7264_s10 + $0x8c] sm:$0x1] }
  0xc5   : > { %6662 = vmatmul.mubr.msk.bf16.gmra.mrb[8].mxu0 %vm815_vm3, %v7074_v39  ;;  %v9202_v39 = vcombine.low %v7652_v27, %v7655_v35  ;;  %v9203_v27 = vrot.slane %v7982_v24, 5  ;;  %v8070_v24 = vsel %vm7517_vm6, %v5626_v57, %v1442_v29  ;;  %v5976_v57 = vld [vmem:[%s7264_s10 + $0x3c] sm:$0xf]  ;;  %v3843_v29 = vrot.slane %v3842_v34, 4 }
  0xc6   : > { %6498 = vmatmul.mubr.msk.bf16.gmra.mrb[24].mxu1 %vm815_vm3, %v9201_v50  ;;  %6665 = vmatprep.mubr.msk.bf16.mxu0 %vm815_vm3, %v7076_v47  ;;  %v3875_v47 = vrot.slane %v3873_v1, 4  ;;  %v3852_v1 = vor.u32 %v3851_v41, %v8028_v25  ;;  %v1452_v5 = vrot.slane %v7137_v13, 5  ;;  %v8088_v41 = vld [vmem:[%s7264_s10 + $0x40] sm:$0xf]  ;;  %v1451_v50 = vrot.slane %v1449_v10, 4 }
  0xc7   : > { %6501 = vmatprep.mubr.msk.bf16.mxu1 %vm815_vm3, %v9202_v39  ;;  %v8058_v35 = vsel %vm7517_vm6, %v1430_v20, %v9203_v27  ;;  %v1337_v20 = vld [vmem:[%s7264_s10 + $0x84] sm:$0xe]  ;;  %9204 = vst [vmem:[#allocation5_spill] sm:$0xff] %v8088_v41  ;;  %v3881_v9 = vrot.slane %v3879_v51, 5  ;;  %v9205_v28 = vcombine.low %v7680_v61, %v7685_v14  ;;  %v3867_v39 = vrot.slane %v3866_v31, 4  ;;  %v7083_v51 = vld [vmem:[%s7264_s10 + $0x90] sm:$0xff]  }
  0xc8   : > { %v3876_v59 = vor.u32 %v3875_v47, %v8045_v21  ;;  %v3853_v38 = vrot.slane %v3852_v1, 4  ;;  %v5628_v45 = vrot.slane %v1337_v20, 9  ;;  %v1459_v15 = vrot.slane %v7138_v40, 5  ;;  %v7082_v1 = vld [vmem:[%s7264_s10 + $0x84] sm:$0xff]  }
  0xc9   : > { %v3884_v47 = vshrl.u32 %v5976_v57, 16  ;;  %v3887_v34 = vshll.u32 %v5976_v57, 16  ;;  %v1458_v27 = vrot.slane %v1456_v48, 4  ;;  %v3893_v61 = vshll.u32 %v8088_v41, 16 }
  0xca   : > { %v3877_v32 = vrot.slane %v3876_v59, 4  ;;  %v3897_v14 = vshrl.u32 %v8088_v41, 16  ;;  %v3858_v31 = vsel %vm7289_vm2, %v3853_v38, %v3857_v0  ;;  %v8120_v20 = vsel %vm7517_vm6, %v5627_v16, %v1449_v10  ;;  %v8128_v59 = vld [vmem:[%s7264_s10 + $0x4c] sm:$0xf]  ;;  %v5982_v10 = vld [vmem:[%s7264_s10 + $0x54] sm:$0xf] }
  0xcb   : > { %v3872_v46 = vsel %vm7289_vm2, %v3867_v39, %v8045_v21  ;;  %v3886_v57 = vrot.slane %v3884_v47, 4  ;;  %v8139_v0 = vld [vmem:[%s7264_s10 + $0x58] sm:$0xf]  ;;  %v8151_v21 = vld [vmem:[%s7264_s10 + $0x44] sm:$0x1]  ;;  %v3917_v39 = vshll.u32 %v8128_v59, 16 }
  0xcc   : > { %v7089_v16 = vld [vmem:[%s9177_s1 + $0x38] sm:$0xff]   ;;  %v3882_v13 = vsel %vm7289_vm2, %v3877_v32, %v3881_v9  ;;  %9207 = vst [vmem:[#allocation6_spill] sm:$0xff] %v8151_v21  ;;  %v3899_v38 = vrot.slane %v3897_v14, 4  ;;  %v3921_v40 = vshrl.u32 %v8128_v59, 16  ;;  %v3932_v9 = vshrl.u32 %v5982_v10, 16 }
  0xcd   : > { %6666 = vmatmul.mubr.msk.bf16.gmra.mrb[12].mxu0 %vm815_vm3, %v7078_v4  ;;  %v9206_v4 = vcombine.low %v7906_v7, %v7920_v17  ;;  %v8108_v7 = vcombine.low %v3824_v3, %v3834_v58  ;;  %v8124_v3 = vsel %vm7517_vm6, %v1451_v50, %v1452_v5  ;;  %v5979_v58 = vld [vmem:[%s7264_s10 + $0x48] sm:$0xf]  ;;  %v8148_v5 = vsel %vm7517_vm6, %v1458_v27, %v1459_v15  ;;  %v8156_v50 = vld [vmem:[%s7264_s10 + $0x90] sm:$0xe]  ;;  %v7139_v27 = vld [vmem:[%s7264_s10 + $0x94] sm:$0xf] }
  0xce   : > { %6502 = vmatmul.mubr.msk.bf16.gmra.mrb[28].mxu1 %vm815_vm3, %v9205_v28  ;;  %6669 = vmatprep.mubr.msk.bf16.mxu0 %vm815_vm3, %v7080_v43  ;;  %v3848_v43 = vsel %vm7289_vm2, %v3843_v29, %v8028_v25  ;;  %v8135_v25 = vsel %vm7517_vm6, %v5628_v45, %v1456_v48  ;;  %v3889_v29 = vrot.slane %v3887_v34, 5  ;;  %v8153_v48 = vrot.slane %v3893_v61, 5  ;;  %v7144_v41 = vld [vmem:[%s7264_s10 + $0xa4] sm:$0x1] }
  0xcf   : > { %6509 = vmatprep.mubr.msk.bf16.mxu1 %vm815_vm3, %v9206_v4  ;;  %v3908_v45 = vshrl.u32 %v5979_v58, 16  ;;  %v3911_v28 = vshll.u32 %v5979_v58, 16  ;;  %v3935_v47 = vshll.u32 %v5982_v10, 16  ;;  %v3941_v15 = vshll.u32 %v8139_v0, 16  ;;  %v5985_v58 = vld [vmem:[%s7264_s10 + $0x60] sm:$0xf] }
  0xd0   : > { %v3945_v34 = vshrl.u32 %v8139_v0, 16  ;;  %v9208_v4 = vcombine.low %v7879_v42, %v7883_v54  ;;  %v8168_v32 = vcombine.low %v3848_v43, %v3858_v31  ;;  %v8172_v61 = vcombine.low %v3872_v46, %v3882_v13  ;;  %v8185_v31 = vld [vmem:[%s7264_s10 + $0x50] sm:$0x1]  ;;  %v8191_v10 = vld [vmem:[%s7264_s10 + $0x64] sm:$0xf] }
  0xd1   : > { %v3903_v14 = vshll.u32 %v8151_v21, 16  ;;  %v9209_v42 = vcombine.low %v7924_v12, %v7928_v11  ;;  %v3913_v46 = vrot.slane %v3911_v28, 5  ;;  %v8188_v12 = vrot.slane %v3917_v39, 5  ;;  %v7140_v28 = vld [vmem:[%s7264_s10 + $0x98] sm:$0x1] }
  0xd2   : > { %v3923_v11 = vrot.slane %v3921_v40, 4  ;;  %v3934_v13 = vrot.slane %v3932_v9, 4  ;;  %v1466_v17 = vrot.slane %v7140_v28, 5  ;;  %v3927_v39 = vshll.u32 %v8185_v31, 16  ;;  %v8203_v40 = vld [vmem:[%s7264_s10 + $0x5c] sm:$0x1] }
  0xd3   : > { %v8197_v54 = vrot.slane %v3903_v14, 5  ;;  %v3956_v8 = vshrl.u32 %v5985_v58, 16  ;;  %v3959_v19 = vshll.u32 %v5985_v58, 16  ;;  %v3965_v9 = vshll.u32 %v8191_v10, 16  ;;  %v7141_v14 = vld [vmem:[%s7264_s10 + $0xa0] sm:$0xf] }
  0xd4   : > { %v1470_v28 = vrot.slane %v7141_v14, 5  ;;  %v3929_v14 = vrot.slane %v3927_v39, 5  ;;  %v5630_v43 = vrot.slane %v1339_v6, 9  ;;  %v1473_v6 = vrot.slane %v7144_v41, 5 }
  0xd5   : > { %6670 = vmatmul.mubr.msk.bf16.gmra.mrb[16].mxu0 %vm815_vm3, %v7082_v1  ;;  %v3890_v1 = vor.u32 %v3889_v29, %v3886_v57  ;;  %v7084_v57 = vld [vmem:[%s7264_s10 + $0x9c] sm:$0xff]   ;;  %v7085_v29 = vld [vmem:[%s7264_s10 + $0xa8] sm:$0xff]  }
  0xd6   : > { %6510 = vmatmul.mubr.msk.bf16.vlgmr.msra.gmra.mrb[0].mxu1 %vm815_vm3, %v9208_v4  ;;  %6673 = vmatprep.mubr.msk.bf16.mxu0 %vm815_vm3, %v7083_v51  ;;  %v3900_v51 = vor.u32 %v3899_v38, %v8153_v48  ;;  %v3937_v38 = vrot.slane %v3935_v47, 5  ;;  %v8195_v4 = vrot.slane %v3941_v15, 5  ;;  %v3969_v47 = vshrl.u32 %v8191_v10, 16 }
  0xd7   : > { %6542 = vmatpush3.bf16.msra.mxu1 %v7796_v63  ;;  %6513 = vmatprep.mubr.msk.bf16.mxu1 %vm815_vm3, %v9209_v42  ;;  %v3910_v63 = vrot.slane %v3908_v45, 4  ;;  %v3947_v42 = vrot.slane %v3945_v34, 4  ;;  %v1463_v45 = vrot.slane %v7139_v27, 5  ;;  %v8208_v15 = vrot.slane %v3890_v1, 4 }
  0xd8   : > { %6543 = vmatprep.subr.bf16.mxu1 %v7089_v16  ;;  %v3924_v27 = vor.u32 %v3923_v11, %v8188_v12  ;;  %v3901_v58 = vrot.slane %v3900_v51, 4  ;;  %v3938_v62 = vor.u32 %v3937_v38, %v3934_v13  ;;  %v7143_v51 = vld [vmem:[%s7264_s10 + $0xac] sm:$0xf]  ;;  %v9212_v38 = vcombine.low %v7953_v18, %v7957_v26 }
  0xd9   : > { %v3914_v34 = vor.u32 %v3913_v46, %v3910_v63  ;;  %v3948_v1 = vor.u32 %v3947_v42, %v8195_v4  ;;  %v3951_v63 = vshll.u32 %v8203_v40, 16  ;;  %v9211_v46 = vcombine.low %v7939_v36, %v7943_v56 }
  0xda   : > { %v1465_v11 = vrot.slane %v1463_v45, 4  ;;  %v1477_v13 = vrot.slane %v7143_v51, 5  ;;  %v3958_v36 = vrot.slane %v3956_v8, 4  ;;  %v3961_v56 = vrot.slane %v3959_v19, 5  ;;  %v7086_v51 = vld [vmem:[%s7264_s10 + $0xb4] sm:$0xff]   ;;  %v7087_v8 = vld [vmem:[%s7264_s10 + $0xc0] sm:$0xff]  }
  0xdb   : > { %6544 = vmatpush3.bf16.msra.mxu1 %v7089_v16  ;;  %v8215_v16 = vld [vmem:[%s9177_s1 + $0x40] sm:$0xff]   ;;  %v8232_v42 = vrot.slane %v3965_v9, 5  ;;  %v3925_v21 = vrot.slane %v3924_v27, 4  ;;  %v1472_v39 = vrot.slane %v1470_v28, 4  ;;  %v3939_v18 = vrot.slane %v3938_v62, 4 }
  0xdc   : > { %9210 = vst [vmem:[#allocation7_spill] sm:$0xff] %v8215_v16  ;;  %6757 = vmatprep.subr.bf16.mxu1 %v8215_v16  ;;  %v8236_v16 = vld [vmem:[%s7264_s10 + $0x68] sm:$0x1]  ;;  %v3949_v26 = vrot.slane %v3948_v1, 4  ;;  %v3896_v19 = vsel %vm7289_vm2, %v8208_v15, %v8153_v48  ;;  %v9214_v9 = vrot.slane %v8156_v50, 9  ;;  %v3906_v62 = vsel %vm7289_vm2, %v3901_v58, %v8197_v54 }
  0xdd   : > { %6674 = vmatmul.mubr.msk.bf16.gmra.mrb[20].mxu0 %vm815_vm3, %v7084_v57  ;;  %v1340_v57 = vld [vmem:[%s7264_s10 + $0xa8] sm:$0xe]  ;;  %9213 = vst [vmem:[#allocation8_spill] sm:$0xff] %v8236_v16  ;;  %v3962_v1 = vor.u32 %v3961_v56, %v3958_v36  ;;  %v1341_v48 = vld [vmem:[%s7264_s10 + $0xb4] sm:$0xe]  ;;  %v8260_v50 = vsel %vm7517_vm6, %v1465_v11, %v1466_v17  ;;  %v8267_v54 = vsel %vm7517_vm6, %v5630_v43, %v1470_v28 }
  0xde   : > { %6514 = vmatmul.mubr.msk.bf16.gmra.mrb[4].mxu1 %vm815_vm3, %v9211_v46  ;;  %6677 = vmatprep.mubr.msk.bf16.mxu0 %vm815_vm3, %v7085_v29  ;;  %v3971_v46 = vrot.slane %v3969_v47, 4  ;;  %v3915_v29 = vrot.slane %v3914_v34, 4  ;;  %v5631_v53 = vrot.slane %v1340_v57, 9  ;;  %v8248_v41 = vsel %vm7517_vm6, %v9214_v9, %v1463_v45  ;;  %v7145_v34 = vld [vmem:[%s7264_s10 + $0xb0] sm:$0x1] }
  0xdf   : > { %6517 = vmatprep.mubr.msk.bf16.mxu1 %vm815_vm3, %v9212_v38  ;;  %v3953_v38 = vrot.slane %v3951_v63, 5  ;;  %v1479_v47 = vrot.slane %v1477_v13, 4  ;;  %v1480_v27 = vrot.slane %v7145_v34, 5  ;;  %v3975_v57 = vshll.u32 %v8236_v16, 16  ;;  %v5988_v15 = vld [vmem:[%s7264_s10 + $0x6c] sm:$0xf] }
  0xe0   : > { %v3972_v63 = vor.u32 %v3971_v46, %v8232_v42  ;;  %v3920_v45 = vsel %vm7289_vm2, %v3915_v29, %v8188_v12  ;;  %v8271_v58 = vsel %vm7517_vm6, %v1472_v39, %v1473_v6  ;;  %v3930_v36 = vsel %vm7289_vm2, %v3925_v21, %v3929_v14  ;;  %v7146_v11 = vld [vmem:[%s7264_s10 + $0xb8] sm:$0xf] }
  0xe1   : > { %v3944_v17 = vsel %vm7289_vm2, %v3939_v18, %v8195_v4  ;;  %v3954_v12 = vsel %vm7289_vm2, %v3949_v26, %v3953_v38  ;;  %v8283_v43 = vsel %vm7517_vm6, %v5631_v53, %v1477_v13  ;;  %v9216_v28 = vcombine.low %v8001_v22, %v8012_v55  ;;  %v8296_v53 = vld [vmem:[%s7264_s10 + $0x70] sm:$0xf]  ;;  %v8320_v18 = vld [vmem:[%s7264_s10 + $0x7c] sm:$0xf]  ;;  %v5994_v26 = vld [vmem:[%s7264_s10 + $0x84] sm:$0xf] }
  0xe2   : > { %9215 = vst [vmem:[#allocation9_spill] sm:$0xff] %v8283_v43  ;;  %v8292_v21 = vsel %vm7517_vm6, %v1479_v47, %v1480_v27  ;;  %v5632_v4 = vrot.slane %v1341_v48, 9  ;;  %v1484_v14 = vrot.slane %v7146_v11, 5  ;;  %9218 = vst [vmem:[#allocation11_spill] sm:$0xff] %v8296_v53  ;;  %v3980_v13 = vshrl.u32 %v5988_v15, 16  ;;  %v7088_v38 = vld [vmem:[%s7264_s10 + $0xcc] sm:$0xff]  }
  0xe3   : > { %9217 = vst [vmem:[#allocation10_spill] sm:$0xff] %v8292_v21  ;;  %v9219_v22 = vcombine.low %v8005_v33, %v8016_v52  ;;  %v8302_v55 = vcombine.low %v3896_v19, %v3906_v62  ;;  %v8304_v56 = vrot.slane %v3962_v1, 4  ;;  %v8306_v46 = vrot.slane %v3972_v63, 4  ;;  %v5991_v52 = vld [vmem:[%s7264_s10 + $0x78] sm:$0xf]  ;;  %9220 = vst [vmem:[#allocation12_spill] sm:$0xff] %v8320_v18 }
  0xe4   : > { %v8308_v29 = vrot.slane %v3975_v57, 5  ;;  %v8312_v6 = vcombine.low %v3920_v45, %v3930_v36  ;;  %v8316_v33 = vcombine.low %v3944_v17, %v3954_v12  ;;  %v8327_v19 = vld [vmem:[%s7264_s10 + $0xbc] sm:$0x1]  ;;  %v3983_v47 = vshll.u32 %v5988_v15, 16  ;;  %v8332_v27 = vld [vmem:[%s7264_s10 + $0x88] sm:$0xf] }
  0xe5   : > { %6678 = vmatmul.mubr.msk.bf16.gmra.mrb[24].mxu0 %vm815_vm3, %v7086_v51  ;;  %v3989_v34 = vshll.u32 %v8296_v53, 16  ;;  %9221 = vst [vmem:[#allocation13_spill] sm:$0xff] %v8332_v27  ;;  %v8336_v62 = vsel %vm7517_vm6, %v5632_v4, %v1484_v14  ;;  %v8338_v1 = vrot.slane %v1484_v14, 4  ;;  %v8340_v63 = vrot.slane %v3980_v13, 4  ;;  %v5997_v48 = vld [vmem:[%s7264_s10 + $0x90] sm:$0xf] }
  0xe6   : > { %6518 = vmatmul.mubr.msk.bf16.gmra.mrb[8].mxu1 %vm815_vm3, %v9216_v28  ;;  %6681 = vmatprep.mubr.msk.bf16.mxu0 %vm815_vm3, %v7087_v8  ;;  %v3993_v57 = vshrl.u32 %v8296_v53, 16  ;;  %v4004_v36 = vshrl.u32 %v5991_v52, 16  ;;  %v4007_v17 = vshll.u32 %v5991_v52, 16  ;;  %v8353_v12 = vld [vmem:[%s7264_s10 + $0x94] sm:$0xf]  ;;  %v4013_v4 = vshll.u32 %v8320_v18, 16 }
  0xe7   : > { %6521 = vmatprep.mubr.msk.bf16.mxu1 %vm815_vm3, %v9219_v22  ;;  %9222 = vst [vmem:[#allocation14_spill] sm:$0xff] %v8353_v12  ;;  %v8356_v28 = vld [vmem:[%s7264_s10 + $0x74] sm:$0x1]  ;;  %v4017_v11 = vshrl.u32 %v8320_v18, 16  ;;  %v4028_v14 = vshrl.u32 %v5994_v26, 16  ;;  %v4031_v13 = vshll.u32 %v5994_v26, 16  ;;  %v9224_v15 = vcombine.low %v8039_v44, %v8058_v35 }
  0xe8   : > { %9223 = vst [vmem:[#allocation15_spill] sm:$0xff] %v8356_v28  ;;  %v4037_v22 = vshll.u32 %v8332_v27, 16  ;;  %v4041_v8 = vshrl.u32 %v8332_v27, 16  ;;  %v4052_v51 = vshrl.u32 %v5997_v48, 16  ;;  %v4055_v52 = vshll.u32 %v5997_v48, 16 }
  0xe9   : > { %v3985_v45 = vrot.slane %v3983_v47, 5  ;;  %v8369_v26 = vrot.slane %v3989_v34, 5  ;;  %v4061_v39 = vshll.u32 %v8353_v12, 16  ;;  %v4065_v9 = vshrl.u32 %v8353_v12, 16  ;;  %v6000_v34 = vld [vmem:[%s7264_s10 + $0x9c] sm:$0xf] }
  0xea   : > { %v9225_v48 = vcombine.low %v8052_v23, %v8066_v49  ;;  %v3995_v44 = vrot.slane %v3993_v57, 4  ;;  %v3999_v35 = vshll.u32 %v8356_v28, 16  ;;  %v4009_v47 = vrot.slane %v4007_v17, 5  ;;  %v8385_v18 = vld [vmem:[%s7264_s10 + $0x8c] sm:$0x1] }
  0xeb   : > { %v4019_v27 = vrot.slane %v4017_v11, 4  ;;  %v4030_v53 = vrot.slane %v4028_v14, 4  ;;  %v4033_v12 = vrot.slane %v4031_v13, 5  ;;  %v8387_v21 = vrot.slane %v4037_v22, 5  ;;  %v8393_v57 = vld [vmem:[%s7264_s10 + $0x98] sm:$0x1] }
  0xec   : > { %v4043_v23 = vrot.slane %v4041_v8, 4  ;;  %v4054_v49 = vrot.slane %v4052_v51, 4  ;;  %v4057_v43 = vrot.slane %v4055_v52, 5  ;;  %v8395_v28 = vrot.slane %v4061_v39, 5  ;;  %v7092_v51 = vld [vmem:[%s9177_s1 + $0x88] sm:$0xff]  }
  0xed   : > { %6682 = vmatmul.mubr.msk.bf16.gmra.mrb[28].mxu0 %vm815_vm3, %v7088_v38  ;;  %v8372_v38 = vld [vmem:[%s7264_s10 + $0x80] sm:$0x1]  ;;  %v4076_v17 = vshrl.u32 %v6000_v34, 16  ;;  %v3986_v11 = vor.u32 %v3985_v45, %v8340_v63  ;;  %v3996_v16 = vor.u32 %v3995_v44, %v8369_v26  ;;  %v4034_v22 = vor.u32 %v4033_v12, %v4030_v53 }
  0xee   : > { %6522 = vmatmul.mubr.msk.bf16.gmra.mrb[12].mxu1 %vm815_vm3, %v9224_v15  ;;  %6689 = vmatprep.mubr.msk.bf16.mxu0 %vm815_vm3, %v8108_v7  ;;  %v4006_v7 = vrot.slane %v4004_v36, 4  ;;  %v8382_v15 = vrot.slane %v4013_v4, 5  ;;  %v4067_v36 = vrot.slane %v4065_v9, 4  ;;  %v4079_v4 = vshll.u32 %v6000_v34, 16 }
  0xef   : > { %6525 = vmatprep.mubr.msk.bf16.mxu1 %vm815_vm3, %v9225_v48  ;;  %v8390_v48 = vld [vmem:[%s7264_s10 + $0xa0] sm:$0xf]  ;;  %v4023_v13 = vshll.u32 %v8372_v38, 16  ;;  %v4044_v63 = vor.u32 %v4043_v23, %v8387_v21  ;;  %v4047_v45 = vshll.u32 %v8385_v18, 16  ;;  %v4058_v52 = vor.u32 %v4057_v43, %v4054_v49 }
  0xf0   : > { %v4010_v14 = vor.u32 %v4009_v47, %v4006_v7  ;;  %v4020_v8 = vor.u32 %v4019_v27, %v8382_v15  ;;  %v4085_v39 = vshll.u32 %v8390_v48, 16  ;;  %v4089_v9 = vshrl.u32 %v8390_v48, 16 }
  0xf1   : > { %v4071_v27 = vshll.u32 %v8393_v57, 16  ;;  %v9226_v44 = vcombine.low %v8070_v24, %v8074_v37  ;;  %v4001_v53 = vrot.slane %v3999_v35, 5  ;;  %v4068_v12 = vor.u32 %v4067_v36, %v8395_v28 }
  0xf2   : > { %v4078_v7 = vrot.slane %v4076_v17, 4  ;;  %v9227_v47 = vcombine.low %v8120_v20, %v8124_v3  ;;  %v3987_v43 = vrot.slane %v3986_v11, 4  ;;  %v3997_v24 = vrot.slane %v3996_v16, 4  ;;  %v8430_v16 = vld [vmem:[%s7264_s10 + $0xac] sm:$0xf] }
  0xf3   : > { %v4011_v37 = vrot.slane %v4010_v14, 4  ;;  %v4025_v34 = vrot.slane %v4023_v13, 5  ;;  %v4021_v35 = vrot.slane %v4020_v8, 4  ;;  %v4035_v23 = vrot.slane %v4034_v22, 4 }
  0xf4   : > { %v8424_v49 = vrot.slane %v4085_v39, 5  ;;  %v4091_v36 = vrot.slane %v4089_v9, 4  ;;  %v4045_v17 = vrot.slane %v4044_v63, 4  ;;  %v4049_v20 = vrot.slane %v4047_v45, 5 }
  0xf5   : > { %6690 = vmatmul.mubr.msk.bf16.vlgmr.msra.gmra.mrb[0].mxu0 %vm815_vm3, %v8168_v32  ;;  %v4081_v32 = vrot.slane %v4079_v4, 5  ;;  %v4059_v3 = vrot.slane %v4058_v52, 4  ;;  %v4073_v4 = vrot.slane %v4071_v27, 5  ;;  %v9228_v8 = vrot.slane %v8327_v19, 5 }
  0xf6   : > { %6526 = vmatmul.mubr.msk.bf16.gmra.mrb[16].mxu1 %vm815_vm3, %v9226_v44  ;;  %6722 = vmatpush3.bf16.msra.mxu0 %v7934_v60  ;;  %v6003_v60 = vld [vmem:[%s7264_s10 + $0xa8] sm:$0xf]  ;;  %v8427_v44 = vld [vmem:[%s7264_s10 + $0xa4] sm:$0x1]  ;;  %v3992_v39 = vsel %vm7289_vm2, %v3987_v43, %v8369_v26  ;;  %v4016_v9 = vsel %vm7289_vm2, %v4011_v37, %v8382_v15  ;;  %v4026_v19 = vsel %vm7289_vm2, %v4021_v35, %v4025_v34  ;;  %v4109_v52 = vshll.u32 %v8430_v16, 16 }
  0xf7   : > { %6529 = vmatprep.mubr.msk.bf16.mxu1 %vm815_vm3, %v9227_v47  ;;  %6693 = vmatprep.mubr.msk.bf16.mxu0 %vm815_vm3, %v8172_v61  ;;  %v4069_v61 = vrot.slane %v4068_v12, 4  ;;  %v4082_v11 = vor.u32 %v4081_v32, %v4078_v7  ;;  %v4100_v14 = vshrl.u32 %v6003_v60, 16  ;;  %v4103_v13 = vshll.u32 %v6003_v60, 16 }
  0xf8   : > { %6723 = vmatprep.subr.bf16.mxu0 %v7092_v51  ;;  %v8437_v22 = vsel %vm7517_vm6, %v8338_v1, %v9228_v8  ;;  %v4040_v1 = vsel %vm7289_vm2, %v4035_v23, %v8387_v21  ;;  %v4092_v63 = vor.u32 %v4091_v36, %v8424_v49  ;;  %v4095_v45 = vshll.u32 %v8427_v44, 16  ;;  %v6057_v21 = vld [vmem:[%s7264_s10 + $0x48] sm:$0xe]  ;;  %v6060_v8 = vld [vmem:[%s7264_s10 + $0x6c] sm:$0xe] }
  0xf9   : > { %v4050_v26 = vsel %vm7289_vm2, %v4045_v17, %v4049_v20  ;;  %v4064_v15 = vsel %vm7289_vm2, %v4059_v3, %v8395_v28  ;;  %v4113_v27 = vshrl.u32 %v8430_v16, 16  ;;  %v4083_v12 = vrot.slane %v4082_v11, 4  ;;  %v8473_v28 = vld [vmem:[%s7264_s10 + $0xb0] sm:$0x1] }
  0xfa   : > { %6724 = vmatpush3.bf16.msra.mxu0 %v7092_v51  ;;  %v4002_v51 = vsel %vm7289_vm2, %v3997_v24, %v4001_v53  ;;  %v9229_v53 = vcombine.low %v8135_v25, %v8148_v5  ;;  %v4102_v7 = vrot.slane %v4100_v14, 4  ;;  %v4105_v32 = vrot.slane %v4103_v13, 5 }
  0xfb   : > { %v9230_v47 = vcombine.low %v8248_v41, %v8260_v50  ;;  %v9231_v25 = vsel %vm7289_vm2, %v8306_v46, %v8308_v29  ;;  %v9232_v5 = vsel %vm7289_vm2, %v8304_v56, %v8232_v42  ;;  %v5652_v43 = vcombine.low %v8336_v62, %v8437_v22  ;;  %v6006_v50 = vld [vmem:[%s7264_s10 + $0xb4] sm:$0xf] }
  0xfc   : > { %v8491_v24 = vcombine.low %v3992_v39, %v4002_v51  ;;  %v8493_v41 = vcombine.low %v4016_v9, %v4026_v19  ;;  %v8496_v37 = vcombine.low %v4040_v1, %v4050_v26  ;;  %v4093_v34 = vrot.slane %v4092_v63, 4  ;;  %v6058_v29 = vld [vmem:[%s7264_s10 + $0x54] sm:$0xe] }
  0xfd   : > { %6694 = vmatmul.mubr.msk.bf16.gmra.mrb[4].mxu0 %vm815_vm3, %v8302_v55  ;;  %v4074_v55 = vsel %vm7289_vm2, %v4069_v61, %v4073_v4  ;;  %v4097_v60 = vrot.slane %v4095_v45, 5  ;;  %v6073_v46 = vrot.slane %v6057_v21, 9  ;;  %v8501_v42 = vrot.slane %v4109_v52, 5  ;;  %v6059_v4 = vld [vmem:[%s7264_s10 + $0x60] sm:$0xe]  ;;  %v9234_v45 = vld [vmem:[#allocation8_spill] sm:$0xff] }
  0xfe   : > { %6530 = vmatmul.mubr.msk.bf16.gmra.mrb[20].mxu1 %vm815_vm3, %v9229_v53  ;;  %6697 = vmatprep.mubr.msk.bf16.mxu0 %vm815_vm3, %v8312_v6  ;;  %v6025_v6 = vcombine.low %v9232_v5, %v9231_v25  ;;  %v8499_v35 = vcombine.low %v4064_v15, %v4074_v55  ;;  %v4115_v56 = vrot.slane %v4113_v27, 4  ;;  %v4119_v23 = vshll.u32 %v8473_v28, 16  ;;  %v9235_v52 = vld [vmem:[#allocation9_spill] sm:$0xff]  ;;  %v9236_v27 = vld [vmem:[#allocation10_spill] sm:$0xff]  ;;  %v9238_v53 = vld [vmem:[#allocation11_spill] sm:$0xff] }
  0xff   : > { %6533 = vmatprep.mubr.msk.bf16.mxu1 %vm815_vm3, %v9230_v47  ;;  %v4088_v36 = vsel %vm7289_vm2, %v4083_v12, %v8424_v49  ;;  %v4106_v17 = vor.u32 %v4105_v32, %v4102_v7  ;;  %v4595_v20 = vrot.slane %v8128_v59, 5  ;;  %v4598_v3 = vrot.slane %v8185_v31, 5  ;;  %v8523_v31 = vld [vmem:[%s7264_s10 + $0xb8] sm:$0xf]  ;;  %v9239_v12 = vld [vmem:[#allocation15_spill] sm:$0xff] }
 0x100   : > { %v4124_v61 = vshrl.u32 %v6006_v50, 16  ;;  %v6074_v11 = vrot.slane %v6058_v29, 9  ;;  %v4602_v14 = vrot.slane %v8139_v0, 5  ;;  %v4605_v13 = vrot.slane %v8203_v40, 5  ;;  %v6009_v32 = vld [vmem:[%s7264_s10 + $0xc0] sm:$0xf] }
 0x101   : > { %v4098_v39 = vsel %vm7289_vm2, %v4093_v34, %v4097_v60  ;;  %v4127_v51 = vshll.u32 %v6006_v50, 16  ;;  %v8517_v49 = vsel %vm7517_vm6, %v6073_v46, %v4595_v20  ;;  %v4597_v9 = vrot.slane %v4595_v20, 4  ;;  %v6061_v46 = vld [vmem:[%s7264_s10 + $0x78] sm:$0xe] }
 0x102   : > { %v4116_v59 = vor.u32 %v4115_v56, %v8501_v42  ;;  %v8527_v0 = vsel %vm7517_vm6, %v6074_v11, %v4602_v14  ;;  %v4604_v40 = vrot.slane %v4602_v14, 4  ;;  %v6075_v19 = vrot.slane %v6059_v4, 9  ;;  %v7091_v4 = vld [vmem:[%s7264_s10 + $0xc] sm:$0xff]  }
 0x103   : > { %v9233_v1 = vcombine.low %v8267_v54, %v8271_v58  ;;  %v4609_v63 = vrot.slane %v8191_v10, 5  ;;  %v4612_v26 = vrot.slane %v9234_v45, 5  ;;  %v6076_v15 = vrot.slane %v6060_v8, 9 }
 0x104   : > { %v9237_v21 = vcombine.low %v9235_v52, %v9236_v27  ;;  %v8548_v58 = vsel %vm7517_vm6, %v4604_v40, %v4605_v13  ;;  %v4616_v55 = vrot.slane %v9238_v53, 5  ;;  %v4619_v10 = vrot.slane %v9239_v12, 5  ;;  %v8585_v13 = vld [vmem:[%s7264_s10 + $0xc4] sm:$0xf]  ;;  %v9241_v52 = vld [vmem:[#allocation3_spill] sm:$0xff]  ;;  %v9242_v27 = vld [vmem:[#allocation4_spill] sm:$0xff] }
 0x105   : > { %6698 = vmatmul.mubr.msk.bf16.gmra.mrb[8].mxu0 %vm815_vm3, %v8316_v33  ;;  %v8536_v33 = vsel %vm7517_vm6, %v4597_v9, %v4598_v3  ;;  %v4133_v7 = vshll.u32 %v8523_v31, 16  ;;  %v6094_v47 = vcombine.low %v8527_v0, %v8548_v58  ;;  %v8558_v25 = vsel %vm7517_vm6, %v6075_v19, %v4609_v63  ;;  %v5768_v3 = vld [vmem:[%s7264_s10 + $0x78] sm:$0xf]  ;;  %v9240_v19 = vld [vmem:[#allocation12_spill] sm:$0xff]  ;;  %v7159_v58 = vld [vmem:[%s7264_s10 + $0xa0] sm:$0xf] }
 0x106   : > { %6534 = vmatmul.mubr.msk.bf16.gmra.mrb[24].mxu1 %vm815_vm3, %v9233_v1  ;;  %6701 = vmatprep.mubr.msk.bf16.mxu0 %vm815_vm3, %v6025_v6  ;;  %v6093_v54 = vcombine.low %v8517_v49, %v8536_v33  ;;  %v4611_v5 = vrot.slane %v4609_v63, 4  ;;  %v8560_v6 = vrot.slane %v4119_v23, 5  ;;  %v4137_v50 = vshrl.u32 %v8523_v31, 16  ;;  %v9243_v12 = vld [vmem:[#allocation13_spill] sm:$0xff] }
 0x107   : > { %6537 = vmatprep.mubr.msk.bf16.mxu1 %vm815_vm3, %v9237_v21  ;;  %v8565_v34 = vsel %vm7517_vm6, %v6076_v15, %v4616_v55  ;;  %v4618_v60 = vrot.slane %v4616_v55, 4  ;;  %v8568_v29 = vcombine.low %v4088_v36, %v4098_v39  ;;  %v8570_v56 = vrot.slane %v4106_v17, 4 }
 0x108   : > { %v8572_v20 = vrot.slane %v4124_v61, 4  ;;  %v8576_v23 = vsel %vm7517_vm6, %v4611_v5, %v4612_v26  ;;  %v8580_v11 = vrot.slane %v4116_v59, 4  ;;  %v8582_v14 = vrot.slane %v4127_v51, 5  ;;  %v6062_v59 = vld [vmem:[%s7264_s10 + $0x84] sm:$0xe] }
 0x109   : > { %v6095_v36 = vcombine.low %v8558_v25, %v8576_v23  ;;  %v8591_v17 = vsel %vm7517_vm6, %v4618_v60, %v4619_v10  ;;  %v8593_v61 = vrot.slane %v4133_v7, 5  ;;  %v4148_v8 = vshrl.u32 %v6009_v32, 16  ;;  %v8601_v51 = vld [vmem:[%s7264_s10 + $0xbc] sm:$0x1]  ;;  %v6012_v5 = vld [vmem:[%s7264_s10 + $0xcc] sm:$0xf] }
 0x10a   : > { %v6096_v39 = vcombine.low %v8565_v34, %v8591_v17  ;;  %v6077_v9 = vrot.slane %v6061_v46, 9  ;;  %v4151_v40 = vshll.u32 %v6009_v32, 16  ;;  %v4623_v1 = vrot.slane %v9240_v19, 5  ;;  %v7093_v46 = vld [vmem:[%s7264_s10 + $0x18] sm:$0xff]   ;;  %v6063_v19 = vld [vmem:[%s7264_s10 + $0x90] sm:$0xe] }
 0x10b   : > { %v4626_v63 = vrot.slane %v8372_v38, 5  ;;  %v2434_v45 = vshrl.u32 %v5768_v3, 16  ;;  %v4157_v26 = vshll.u32 %v8585_v13, 16  ;;  %v2437_v15 = vshll.u32 %v5768_v3, 16  ;;  %v7163_v17 = vld [vmem:[%s7264_s10 + $0xac] sm:$0xf] }
 0x10c   : > { %v2456_v38 = vsel %vm7289_vm2, %v9242_v27, %v9241_v52  ;;  %v8620_v62 = vsel %vm7517_vm6, %v6077_v9, %v4623_v1  ;;  %v4625_v22 = vrot.slane %v4623_v1, 4  ;;  %v4139_v21 = vrot.slane %v4137_v50, 4  ;;  %v9244_v27 = vld [vmem:[#allocation14_spill] sm:$0xff] }
 0x10d   : > { %6702 = vmatmul.mubr.msk.bf16.gmra.mrb[12].mxu0 %vm815_vm3, %v8491_v24  ;;  %v4161_v24 = vshrl.u32 %v8585_v13, 16  ;;  %v4143_v53 = vshll.u32 %v8601_v51, 16  ;;  %v2439_v55 = vrot.slane %v2437_v15, 5  ;;  %v4630_v10 = vrot.slane %v9243_v12, 5 }
 0x10e   : > { %6538 = vmatmul.mubr.msk.bf16.gmra.mrb[28].mxu1 %vm815_vm3, %v5652_v43  ;;  %6705 = vmatprep.mubr.msk.bf16.mxu0 %vm815_vm3, %v8493_v41  ;;  %v2436_v43 = vrot.slane %v2434_v45, 4  ;;  %v6078_v41 = vrot.slane %v6062_v59, 9  ;;  %v4112_v7 = vsel %vm7289_vm2, %v8570_v56, %v8501_v42  ;;  %v4130_v32 = vor.u32 %v8582_v14, %v8572_v20  ;;  %v7094_v42 = vld [vmem:[%s7264_s10 + $0x24] sm:$0xff]   ;;  %v8644_v14 = vld [vmem:[%s7264_s10 + $0xd0] sm:$0xf] }
 0x10f   : > { %6545 = vmatprep.mubr.msk.bf16.mxu1 %vm815_vm3, %v7091_v4  ;;  %v8633_v60 = vsel %vm7517_vm6, %v4625_v22, %v4626_v63  ;;  %v4633_v50 = vrot.slane %v8385_v18, 5  ;;  %v4150_v3 = vrot.slane %v4148_v8, 4  ;;  %v4153_v4 = vrot.slane %v4151_v40, 5  ;;  %v8656_v40 = vld [vmem:[%s7264_s10 + $0xc8] sm:$0x1] }
 0x110   : > { %v6097_v9 = vcombine.low %v8620_v62, %v8633_v60  ;;  %v2440_v59 = vor.u32 %v2439_v55, %v2436_v43  ;;  %v8641_v56 = vrot.slane %v4157_v26, 5  ;;  %v4163_v20 = vrot.slane %v4161_v24, 4  ;;  %v9245_v43 = vld [vmem:[#allocation2_spill] sm:$0xff] }
 0x111   : > { %v8648_v1 = vsel %vm7517_vm6, %v6078_v41, %v4630_v10  ;;  %v4632_v63 = vrot.slane %v4630_v10, 4  ;;  %v4122_v18 = vsel %vm7289_vm2, %v8580_v11, %v8560_v6  ;;  %v4140_v8 = vor.u32 %v4139_v21, %v8593_v61  ;;  %v9246_v21 = vld [vmem:[#allocation7_spill] sm:$0xff] }
 0x112   : > { %v4172_v45 = vshrl.u32 %v6012_v5, 16  ;;  %v2441_v26 = vrot.slane %v2440_v59, 4  ;;  %v4175_v24 = vshll.u32 %v6012_v5, 16  ;;  %v6079_v52 = vrot.slane %v6063_v19, 9 }
 0x113   : > { %v8662_v15 = vsel %vm7517_vm6, %v4632_v63, %v4633_v50  ;;  %v4637_v22 = vrot.slane %v9244_v27, 5  ;;  %v4181_v6 = vshll.u32 %v8644_v14, 16  ;;  %v4185_v11 = vshrl.u32 %v8644_v14, 16  ;;  %v7148_v50 = vld [vmem:[%s9177_s1 + $0x48] sm:$0xff]   ;;  %v7095_v63 = vld [vmem:[%s7264_s10 + $0x30] sm:$0xff]  }
 0x114   : > { %v6098_v41 = vcombine.low %v8648_v1, %v8662_v15  ;;  %v4154_v55 = vor.u32 %v4153_v4, %v4150_v3  ;;  %v4167_v12 = vshll.u32 %v8656_v40, 16  ;;  %v4145_v5 = vrot.slane %v4143_v53, 5  ;;  %v8692_v53 = vld [vmem:[%s7264_s10 + $0xd4] sm:$0x1] }
 0x115   : > { %6706 = vmatmul.mubr.msk.bf16.gmra.mrb[16].mxu0 %vm815_vm3, %v8496_v37  ;;  %v2446_v37 = vsel %vm7289_vm2, %v2441_v26, %v9245_v43  ;;  %v4639_v59 = vrot.slane %v4637_v22, 4  ;;  %v4640_v3 = vrot.slane %v8393_v57, 5  ;;  %v6031_v4 = vcombine.low %v4112_v7, %v4122_v18 }
 0x116   : > { %6546 = vmatmul.mubr.msk.bf16.vlgmr.msra.gmra.mrb[0].mxu1 %vm815_vm3, %v7093_v46  ;;  %6709 = vmatprep.mubr.msk.bf16.mxu0 %vm815_vm3, %v8499_v35  ;;  %v4164_v35 = vor.u32 %v4163_v20, %v8641_v56  ;;  %v8679_v10 = vcombine.low %v2446_v37, %v2456_v38  ;;  %v8686_v46 = vsel %vm7517_vm6, %v6079_v52, %v4637_v22  ;;  %v4131_v19 = vrot.slane %v4130_v32, 4  ;;  %v6064_v38 = vld [vmem:[%s7264_s10 + $0x9c] sm:$0xe] }
 0x117   : > { %6759 = vmatpush3.bf16.msra.mxu1 %v9246_v21  ;;  %6549 = vmatprep.mubr.msk.bf16.mxu1 %vm815_vm3, %v7094_v42  ;;  %v4141_v42 = vrot.slane %v4140_v8, 4  ;;  %v4174_v20 = vrot.slane %v4172_v45, 4  ;;  %v4177_v26 = vrot.slane %v4175_v24, 5  ;;  %v8694_v27 = vrot.slane %v4181_v6, 5  ;;  %v7096_v52 = vld [vmem:[%s7264_s10 + $0x3c] sm:$0xff]  }
 0x118   : > { %6758 = vmatprep.subr.bf16.mxu1 %v7148_v50  ;;  %v4187_v43 = vrot.slane %v4185_v11, 4  ;;  %v8698_v37 = vsel %vm7517_vm6, %v4639_v59, %v4640_v3  ;;  %v4155_v22 = vrot.slane %v4154_v55, 4  ;;  %v4165_v57 = vrot.slane %v4164_v35, 4  ;;  %v6053_v21 = vld [vmem:[%s7264_s10 + $0x18] sm:$0xe] }
 0x119   : > { %v4169_v7 = vrot.slane %v4167_v12, 5  ;;  %v6099_v32 = vcombine.low %v8686_v46, %v8698_v37  ;;  %v6080_v18 = vrot.slane %v6064_v38, 9  ;;  %v4644_v8 = vrot.slane %v8390_v48, 5  ;;  %v7149_v12 = vld [vmem:[%s7264_s10 + $0x1c] sm:$0xf] }
 0x11a   : > { %v4136_v45 = vsel %vm7289_vm2, %v4131_v19, %v8593_v61  ;;  %v4146_v24 = vsel %vm7289_vm2, %v4141_v42, %v4145_v5  ;;  %v4191_v6 = vshll.u32 %v8692_v53, 16  ;;  %v4647_v11 = vrot.slane %v8427_v44, 5  ;;  %v6065_v59 = vld [vmem:[%s7264_s10 + $0xa8] sm:$0xe] }
 0x11b   : > { %6760 = vmatpush3.bf16.msra.mxu1 %v7148_v50  ;;  %v4178_v48 = vor.u32 %v4177_v26, %v4174_v20  ;;  %v8719_v61 = vsel %vm7517_vm6, %v6080_v18, %v4644_v8  ;;  %v4646_v55 = vrot.slane %v4644_v8, 4  ;;  %v4160_v44 = vsel %vm7289_vm2, %v4155_v22, %v8641_v56  ;;  %v7097_v20 = vld [vmem:[%s7264_s10 + $0x48] sm:$0xff]   ;;  %v7150_v26 = vld [vmem:[%s7264_s10 + $0x20] sm:$0x1]  ;;  %v6066_v8 = vld [vmem:[%s7264_s10 + $0xb4] sm:$0xe] }
 0x11c   : > { %v4170_v35 = vsel %vm7289_vm2, %v4165_v57, %v4169_v7  ;;  %v4567_v5 = vrot.slane %v7149_v12, 5  ;;  %v6032_v3 = vcombine.low %v4136_v45, %v4146_v24  ;;  %v6069_v19 = vrot.slane %v6053_v21, 9  ;;  %v6055_v12 = vld [vmem:[%s7264_s10 + $0x30] sm:$0xe] }
 0x11d   : > { %6710 = vmatmul.mubr.msk.bf16.gmra.mrb[20].mxu0 %vm815_vm3, %v8568_v29  ;;  %v4188_v29 = vor.u32 %v4187_v43, %v8694_v27  ;;  %v8730_v50 = vsel %vm7517_vm6, %v4646_v55, %v4647_v11  ;;  %v6033_v56 = vcombine.low %v4160_v44, %v4170_v35  ;;  %v4179_v38 = vrot.slane %v4178_v48, 4  ;;  %v6054_v11 = vld [vmem:[%s7264_s10 + $0x24] sm:$0xe]  ;;  %v7151_v48 = vld [vmem:[%s7264_s10 + $0x28] sm:$0xf] }
 0x11e   : > { %6550 = vmatmul.mubr.msk.bf16.gmra.mrb[4].mxu1 %vm815_vm3, %v7095_v63  ;;  %6713 = vmatprep.mubr.msk.bf16.mxu0 %vm815_vm3, %v6031_v4  ;;  %v4193_v4 = vrot.slane %v4191_v6, 5  ;;  %v6100_v42 = vcombine.low %v8719_v61, %v8730_v50  ;;  %v4570_v43 = vrot.slane %v7150_v26, 5  ;;  %v4569_v22 = vrot.slane %v4567_v5, 4  ;;  %v7152_v55 = vld [vmem:[%s7264_s10 + $0x34] sm:$0xf] }
 0x11f   : > { %6553 = vmatprep.mubr.msk.bf16.mxu1 %vm815_vm3, %v7096_v52  ;;  %v4189_v63 = vrot.slane %v4188_v29, 4  ;;  %v7098_v52 = vld [vmem:[%s7264_s10 + $0x54] sm:$0xff]   ;;  %v6081_v57 = vrot.slane %v6065_v59, 9  ;;  %v4651_v7 = vrot.slane %v8430_v16, 5  ;;  %v4654_v18 = vrot.slane %v8473_v28, 5 }
 0x120   : > { %v4184_v16 = vsel %vm7289_vm2, %v4179_v38, %v8694_v27  ;;  %v4568_v6 = vsel %vm7517_vm6, %v6069_v19, %v4567_v5  ;;  %v4574_v29 = vrot.slane %v7151_v48, 5  ;;  %v4571_v21 = vsel %vm7517_vm6, %v4569_v22, %v4570_v43  ;;  %v7153_v19 = vld [vmem:[%s7264_s10 + $0x2c] sm:$0x1]  ;;  %v7099_v38 = vld [vmem:[%s7264_s10 + $0x60] sm:$0xff]   ;;  %v7168_v61 = vld [vmem:[%s7264_s10 + $0xc8] sm:$0x1] }
 0x121   : > { %v8744_v45 = vsel %vm7517_vm6, %v6081_v57, %v4651_v7  ;;  %v4653_v24 = vrot.slane %v4651_v7, 4  ;;  %v4194_v28 = vsel %vm7289_vm2, %v4189_v63, %v4193_v4  ;;  %v4581_v44 = vrot.slane %v7152_v55, 5  ;;  %v7100_v22 = vld [vmem:[%s7264_s10 + $0x6c] sm:$0xff]  }
 0x122   : > { %v6082_v35 = vrot.slane %v6066_v8, 9  ;;  %v4658_v59 = vrot.slane %v8523_v31, 5  ;;  %v6070_v4 = vrot.slane %v6054_v11, 9  ;;  %v6089_v63 = vcombine.low %v4568_v6, %v4571_v21  ;;  %v7154_v31 = vld [vmem:[%s7264_s10 + $0x38] sm:$0x1] }
 0x123   : > { %v8763_v27 = vsel %vm7517_vm6, %v4653_v24, %v4654_v18  ;;  %v4576_v26 = vrot.slane %v4574_v29, 4  ;;  %v6071_v57 = vrot.slane %v6055_v12, 9  ;;  %v4583_v7 = vrot.slane %v4581_v44, 4  ;;  %v6067_v8 = vld [vmem:[%s7264_s10 + $0xc0] sm:$0xe]  ;;  %v9247_v6 = vld [vmem:[#allocation5_spill] sm:$0xff] }
 0x124   : > { %v6101_v5 = vcombine.low %v8744_v45, %v8763_v27  ;;  %v8774_v43 = vsel %vm7517_vm6, %v6082_v35, %v4658_v59  ;;  %v4584_v18 = vrot.slane %v7154_v31, 5  ;;  %v4588_v11 = vrot.slane %v9247_v6, 5  ;;  %v6056_v35 = vld [vmem:[%s7264_s10 + $0x3c] sm:$0xe]  ;;  %v7155_v6 = vld [vmem:[%s7264_s10 + $0x70] sm:$0xf] }
 0x125   : > { %6714 = vmatmul.mubr.msk.bf16.gmra.mrb[24].mxu0 %vm815_vm3, %v6032_v3  ;;  %v6034_v3 = vcombine.low %v4184_v16, %v4194_v28  ;;  %v4575_v16 = vsel %vm7517_vm6, %v6070_v4, %v4574_v29  ;;  %v6083_v48 = vrot.slane %v6067_v8, 9  ;;  %v4582_v21 = vsel %vm7517_vm6, %v6071_v57, %v4581_v44  ;;  %v5765_v4 = vld [vmem:[%s7264_s10 + $0x6c] sm:$0xf] }
 0x126   : > { %6554 = vmatmul.mubr.msk.bf16.gmra.mrb[8].mxu1 %vm815_vm3, %v7097_v20  ;;  %6717 = vmatprep.mubr.msk.bf16.mxu0 %vm815_vm3, %v6033_v56  ;;  %v4577_v20 = vrot.slane %v7153_v19, 5  ;;  %v4661_v56 = vrot.slane %v8601_v51, 5  ;;  %v4585_v55 = vsel %vm7517_vm6, %v4583_v7, %v4584_v18  ;;  %v4665_v12 = vrot.slane %v8585_v13, 5 }
 0x127   : > { %6557 = vmatprep.mubr.msk.bf16.mxu1 %vm815_vm3, %v7098_v52  ;;  %v4660_v52 = vrot.slane %v4658_v59, 4  ;;  %v4668_v29 = vrot.slane %v8656_v40, 5  ;;  %v6068_v59 = vld [vmem:[%s7264_s10 + $0xcc] sm:$0xe]  ;;  %v4590_v44 = vrot.slane %v4588_v11, 4  ;;  %v2410_v57 = vshrl.u32 %v5765_v4, 16 }
 0x128   : > { %v4578_v28 = vsel %vm7517_vm6, %v4576_v26, %v4577_v20  ;;  %v8805_v19 = vsel %vm7517_vm6, %v6083_v48, %v4665_v12  ;;  %v4667_v20 = vrot.slane %v4665_v12, 4  ;;  %v9248_v26 = vld [vmem:[#allocation6_spill] sm:$0xff]  ;;  %v6084_v40 = vrot.slane %v6068_v59, 9 }
 0x129   : > { %v8781_v24 = vsel %vm7517_vm6, %v4660_v52, %v4661_v56  ;;  %v7101_v56 = vld [vmem:[%s7264_s10 + $0x78] sm:$0xff]   ;;  %v4591_v52 = vrot.slane %v9248_v26, 5  ;;  %v2413_v7 = vshll.u32 %v5765_v4, 16  ;;  %v4672_v18 = vrot.slane %v8644_v14, 5 }
 0x12a   : > { %v6102_v51 = vcombine.low %v8774_v43, %v8781_v24  ;;  %v8812_v13 = vsel %vm7517_vm6, %v4667_v20, %v4668_v29  ;;  %v4675_v8 = vrot.slane %v8692_v53, 5  ;;  %v2419_v48 = vshll.u32 %v7155_v6, 16  ;;  %v7103_v29 = vld [vmem:[%s7264_s10 + $0x90] sm:$0xff]   ;;  %v7104_v20 = vld [vmem:[%s7264_s10 + $0x9c] sm:$0xff]  }
 0x12b   : > { %v6103_v31 = vcombine.low %v8805_v19, %v8812_v13  ;;  %v8829_v14 = vsel %vm7517_vm6, %v6084_v40, %v4672_v18  ;;  %v4674_v53 = vrot.slane %v4672_v18, 4  ;;  %v5774_v18 = vld [vmem:[%s7264_s10 + $0x90] sm:$0xf]  ;;  %v2597_v50 = vshll.u32 %v7168_v61, 16 }
 0x12c   : > { %v2421_v59 = vrot.slane %v2419_v48, 5 }
 0x12d   : > { %6718 = vmatmul.mubr.msk.bf16.gmra.mrb[28].mxu0 %vm815_vm3, %v6034_v3  ;;  %v6090_v3 = vcombine.low %v4575_v16, %v4578_v28  ;;  %v4592_v28 = vsel %vm7517_vm6, %v4590_v44, %v4591_v52 }
 0x12e   : > { %6558 = vmatmul.mubr.msk.bf16.gmra.mrb[12].mxu1 %vm815_vm3, %v7099_v38  ;;  %6725 = vmatprep.mubr.msk.bf16.mxu0 %vm815_vm3, %v6089_v63  ;;  %v6091_v38 = vcombine.low %v4582_v21, %v4585_v55  ;;  %v6072_v63 = vrot.slane %v6056_v35, 9  ;;  %v2423_v21 = vshrl.u32 %v7155_v6, 16  ;;  %v2412_v55 = vrot.slane %v2410_v57, 4  ;;  %v7106_v6 = vld [vmem:[%s7264_s10 + $0xb4] sm:$0xff]  }
 0x12f   : > { %6561 = vmatprep.mubr.msk.bf16.mxu1 %vm815_vm3, %v7100_v22  ;;  %v7102_v22 = vld [vmem:[%s7264_s10 + $0x84] sm:$0xff]   ;;  %v2415_v35 = vrot.slane %v2413_v7, 5 }
 0x130   : > { %v4589_v16 = vsel %vm7517_vm6, %v6072_v63, %v4588_v11  ;;  %v8833_v11 = vsel %vm7517_vm6, %v4674_v53, %v4675_v8  ;;  %v7156_v63 = vld [vmem:[%s7264_s10 + $0x74] sm:$0x1]  ;;  %v7105_v8 = vld [vmem:[%s7264_s10 + $0xa8] sm:$0xff]   ;;  %v2482_v53 = vshrl.u32 %v5774_v18, 16 }
 0x131   : > { %v6092_v12 = vcombine.low %v4589_v16, %v4592_v28  ;;  %v6104_v4 = vcombine.low %v8829_v14, %v8833_v11  ;;  %v2429_v44 = vshll.u32 %v7156_v63, 16  ;;  %v5777_v28 = vld [vmem:[%s7264_s10 + $0x9c] sm:$0xf]  ;;  %v7160_v63 = vld [vmem:[%s7264_s10 + $0x8c] sm:$0x1] }
 0x133   : > { %v2431_v49 = vrot.slane %v2429_v44, 5  ;;  %v2477_v44 = vshll.u32 %v7160_v63, 16 }
 0x135   : > { %6726 = vmatmul.mubr.msk.bf16.vlgmr.msra.gmra.mrb[0].mxu0 %vm815_vm3, %v6090_v3  ;;  %v2425_v3 = vrot.slane %v2423_v21, 4 }
 0x136   : > { %6562 = vmatmul.mubr.msk.bf16.gmra.mrb[16].mxu1 %vm815_vm3, %v7101_v56  ;;  %6729 = vmatprep.mubr.msk.bf16.mxu0 %vm815_vm3, %v6091_v38  ;;  %v5771_v56 = vld [vmem:[%s7264_s10 + $0x84] sm:$0xf]  ;;  %v2416_v38 = vor.u32 %v2415_v35, %v2412_v55  ;;  %v2485_v55 = vshll.u32 %v5774_v18, 16 }
 0x137   : > { %6565 = vmatprep.mubr.msk.bf16.mxu1 %vm815_vm3, %v7102_v22  ;;  %v2426_v2 = vor.u32 %v2425_v3, %v2421_v59  ;;  %v2458_v26 = vshrl.u32 %v5771_v56, 16  ;;  %v2461_v52 = vshll.u32 %v5771_v56, 16  ;;  %v7157_v22 = vld [vmem:[%s7264_s10 + $0x88] sm:$0xf]  ;;  %v2509_v56 = vshll.u32 %v5777_v28, 16 }
 0x138   : > { %v2467_v40 = vshll.u32 %v7157_v22, 16  ;;  %v2471_v57 = vshrl.u32 %v7157_v22, 16  ;;  %v2417_v7 = vrot.slane %v2416_v38, 4  ;;  %v2515_v38 = vshll.u32 %v7159_v58, 16 }
 0x139   : > { %v2427_v16 = vrot.slane %v2426_v2, 4  ;;  %v2460_v33 = vrot.slane %v2458_v26, 4  ;;  %v2484_v26 = vrot.slane %v2482_v53, 4  ;;  %v2487_v25 = vrot.slane %v2485_v55, 5  ;;  %v7162_v55 = vld [vmem:[%s7264_s10 + $0xa4] sm:$0x1] }
 0x13a   : > { %v8853_v48 = vrot.slane %v2467_v40, 5  ;;  %v2473_v21 = vrot.slane %v2471_v57, 4  ;;  %v2422_v35 = vsel %vm7289_vm2, %v2417_v7, %v2421_v59  ;;  %v2511_v22 = vrot.slane %v2509_v56, 5  ;;  %v7107_v40 = vld [vmem:[%s7264_s10 + $0xc0] sm:$0xff]  }
 0x13b   : > { %v2432_v59 = vsel %vm7289_vm2, %v2427_v16, %v2431_v49  ;;  %v8876_v18 = vrot.slane %v2515_v38, 5  ;;  %v5780_v16 = vld [vmem:[%s7264_s10 + $0xa8] sm:$0xf] }
 0x13c   : > { %v2474_v2 = vor.u32 %v2473_v21, %v8853_v48  ;;  %v5801_v57 = vcombine.low %v2422_v35, %v2432_v59  ;;  %v2525_v35 = vshll.u32 %v7162_v55, 16  ;;  %v2533_v34 = vshll.u32 %v5780_v16, 16 }
 0x13d   : > { %6730 = vmatmul.mubr.msk.bf16.gmra.mrb[4].mxu0 %vm815_vm3, %v6092_v12  ;;  %v7158_v12 = vld [vmem:[%s7264_s10 + $0x94] sm:$0xf] }
 0x13e   : > { %6566 = vmatmul.mubr.msk.bf16.gmra.mrb[20].mxu1 %vm815_vm3, %v7103_v29  ;;  %6733 = vmatprep.mubr.msk.bf16.mxu0 %vm815_vm3, %v6093_v54  ;;  %v2463_v54 = vrot.slane %v2461_v52, 5  ;;  %v2491_v29 = vshll.u32 %v7158_v12, 16  ;;  %v2495_v3 = vshrl.u32 %v7158_v12, 16  ;;  %v2475_v49 = vrot.slane %v2474_v2, 4 }
 0x13f   : > { %6569 = vmatprep.mubr.msk.bf16.mxu1 %vm815_vm3, %v7104_v20  ;;  %v2506_v20 = vshrl.u32 %v5777_v28, 16  ;;  %v7161_v28 = vld [vmem:[%s7264_s10 + $0x98] sm:$0x1]  ;;  %v2530_v12 = vshrl.u32 %v5780_v16, 16  ;;  %v5786_v16 = vld [vmem:[%s7264_s10 + $0xc0] sm:$0xf] }
 0x140   : > { %v2464_v0 = vor.u32 %v2463_v54, %v2460_v33  ;;  %v8873_v23 = vrot.slane %v2491_v29, 5  ;;  %v2479_v33 = vrot.slane %v2477_v44, 5  ;;  %v2488_v54 = vor.u32 %v2487_v25, %v2484_v26  ;;  %v5783_v29 = vld [vmem:[%s7264_s10 + $0xb4] sm:$0xf] }
 0x141   : > { %v2508_v52 = vrot.slane %v2506_v20, 4  ;;  %v2543_v20 = vshrl.u32 %v7163_v17, 16  ;;  %v2554_v62 = vshrl.u32 %v5783_v29, 16  ;;  %v2557_v60 = vshll.u32 %v5783_v29, 16 }
 0x142   : > { %v2465_v7 = vrot.slane %v2464_v0, 4  ;;  %v2480_v59 = vsel %vm7289_vm2, %v2475_v49, %v2479_v33  ;;  %v2489_v0 = vrot.slane %v2488_v54, 4  ;;  %v2527_v44 = vrot.slane %v2525_v35, 5 }
 0x143   : > { %v2512_v53 = vor.u32 %v2511_v22, %v2508_v52  ;;  %v2532_v26 = vrot.slane %v2530_v12, 4  ;;  %v2545_v22 = vrot.slane %v2543_v20, 4  ;;  %v7167_v12 = vld [vmem:[%s7264_s10 + $0xbc] sm:$0x1] }
 0x144   : > { %v2470_v56 = vsel %vm7289_vm2, %v2465_v7, %v8853_v48  ;;  %v2494_v49 = vsel %vm7289_vm2, %v2489_v0, %v8873_v23  ;;  %v2573_v46 = vshll.u32 %v7167_v12, 16 }
 0x145   : > { %6734 = vmatmul.mubr.msk.bf16.gmra.mrb[8].mxu0 %vm815_vm3, %v6094_v47  ;;  %v2519_v47 = vshrl.u32 %v7159_v58, 16  ;;  %v2513_v63 = vrot.slane %v2512_v53, 4  ;;  %v5803_v48 = vcombine.low %v2470_v56, %v2480_v59 }
 0x146   : > { %6570 = vmatmul.mubr.msk.bf16.gmra.mrb[24].mxu1 %vm815_vm3, %v7105_v8  ;;  %6737 = vmatprep.mubr.msk.bf16.mxu0 %vm815_vm3, %v6095_v36  ;;  %v2497_v36 = vrot.slane %v2495_v3, 4 }
 0x147   : > { %6573 = vmatprep.mubr.msk.bf16.mxu1 %vm815_vm3, %v7106_v6  ;;  %v2521_v8 = vrot.slane %v2519_v47, 4  ;;  %v2501_v6 = vshll.u32 %v7161_v28, 16  ;;  %v2518_v54 = vsel %vm7289_vm2, %v2513_v63, %v8876_v18  ;;  %v2599_v63 = vrot.slane %v2597_v50, 5 }
 0x148   : > { %v2498_v21 = vor.u32 %v2497_v36, %v8873_v23  ;;  %v2535_v36 = vrot.slane %v2533_v34, 5  ;;  %v7165_v23 = vld [vmem:[%s7264_s10 + $0xb0] sm:$0x1] }
 0x149   : > { %v2522_v3 = vor.u32 %v2521_v8, %v8876_v18  ;;  %v2503_v58 = vrot.slane %v2501_v6, 5  ;;  %v2549_v28 = vshll.u32 %v7165_v23, 16  ;;  %v2578_v6 = vshrl.u32 %v5786_v16, 16 }
 0x14a   : > { %v2499_v2 = vrot.slane %v2498_v21, 4  ;;  %v2536_v15 = vor.u32 %v2535_v36, %v2532_v26  ;;  %v2581_v18 = vshll.u32 %v5786_v16, 16  ;;  %v7166_v21 = vld [vmem:[%s7264_s10 + $0xc4] sm:$0xf] }
 0x14b   : > { %v2523_v25 = vrot.slane %v2522_v3, 4  ;;  %v2587_v53 = vshll.u32 %v7166_v21, 16  ;;  %v2591_v55 = vshrl.u32 %v7166_v21, 16  ;;  %v2551_v34 = vrot.slane %v2549_v28, 5 }
 0x14c   : > { %v2504_v33 = vsel %vm7289_vm2, %v2499_v2, %v2503_v58  ;;  %v2537_v29 = vrot.slane %v2536_v15, 4  ;;  %v2575_v58 = vrot.slane %v2573_v46, 5 }
 0x14d   : > { %6738 = vmatmul.mubr.msk.bf16.gmra.mrb[12].mxu0 %vm815_vm3, %v6096_v39  ;;  %v2539_v39 = vshll.u32 %v7163_v17, 16  ;;  %v2528_v1 = vsel %vm7289_vm2, %v2523_v25, %v2527_v44  ;;  %v5804_v37 = vcombine.low %v2494_v49, %v2504_v33  ;;  %v2580_v17 = vrot.slane %v2578_v6, 4  ;;  %v8995_v49 = vld [vmem:[%s9178_s2] ss:$0 sm:$0xff] }
 0x14e   : > { %6574 = vmatmul.mubr.msk.bf16.gmra.mrb[28].mxu1 %vm815_vm3, %v7107_v40  ;;  %6741 = vmatprep.mubr.msk.bf16.mxu0 %vm815_vm3, %v6097_v9  ;;  %v7164_v9 = vld [vmem:[%s7264_s10 + $0xb8] sm:$0xf]  ;;  %v2556_v40 = vrot.slane %v2554_v62, 4  ;;  %v2589_v20 = vrot.slane %v2587_v53, 5  ;;  %v2593_v56 = vrot.slane %v2591_v55, 4  ;;  %s6158_s10 = sshll.u32 %s9254_s18, 7 }
 0x14f   : > { %6597 = vmatprep.mubr.msk.bf16.mxu1 %vm815_vm3, %v5801_v57  ;;  %v2563_v38 = vshll.u32 %v7164_v9, 16  ;;  %v2567_v47 = vshrl.u32 %v7164_v9, 16  ;;  %v2541_v52 = vrot.slane %v2539_v39, 5  ;;  %v2559_v57 = vrot.slane %v2557_v60, 5  ;;  %s8986_s29 = scalar_lea.vmem %s9179_s3, %s6158_s10  ;;  %s9008_s9 = scalar_lea.vmem %s9180_s4, %s6158_s10 }
 0x150   : > { %v2583_v39 = vrot.slane %v2581_v18, 5  ;;  %v6258_v46 = vld [vmem:[%s8986_s29 + $0x18] sm:$0xff]  }
 0x151   : > { %v2565_v7 = vrot.slane %v2563_v38, 5  ;;  %v2569_v8 = vrot.slane %v2567_v47, 4  ;;  %v2542_v62 = vsel %vm7289_vm2, %v2537_v29, %v2541_v52  ;;  %v2594_v38 = vor.u32 %v2593_v56, %v2589_v20 }
 0x152   : > { %v2584_v9 = vor.u32 %v2583_v39, %v2580_v17  ;;  %v6206_v56 = vunpack.c.l.bf16 %v6258_v46 }
 0x153   : > { %v2570_v35 = vor.u32 %v2569_v8, %v2565_v7  ;;  %v2595_v2 = vrot.slane %v2594_v38, 4  ;;  %v6193_v8 = vld [vmem:[%s8986_s29] sm:$0xff]  }
 0x154   : > { %v2585_v47 = vrot.slane %v2584_v9, 4  ;;  %v6207_v9 = vunpack.c.h.bf16 %v6258_v46 }
 0x155   : > { %6742 = vmatmul.mubr.msk.bf16.gmra.mrb[16].mxu0 %vm815_vm3, %v6098_v41  ;;  %v2546_v41 = vor.u32 %v2545_v22, %v2541_v52  ;;  %v2571_v0 = vrot.slane %v2570_v35, 4  ;;  %v2600_v26 = vsel %vm7289_vm2, %v2595_v2, %v2599_v63 }
 0x156   : > { %6598 = vmatmul.mubr.msk.bf16.vlgmr.msra.gmra.mrb[16].mxu1 %vm815_vm3, %v8679_v10  ;;  %6745 = vmatprep.mubr.msk.bf16.mxu0 %vm815_vm3, %v6099_v32  ;;  %v2560_v10 = vor.u32 %v2559_v57, %v2556_v40  ;;  %v5805_v32 = vcombine.low %v2518_v54, %v2528_v1  ;;  %v2590_v44 = vsel %vm7289_vm2, %v2585_v47, %v2589_v20 }
 0x157   : > { %6601 = vmatprep.mubr.msk.bf16.mxu1 %vm815_vm3, %v5803_v48  ;;  %v2547_v3 = vrot.slane %v2546_v41, 4  ;;  %v2576_v45 = vsel %vm7289_vm2, %v2571_v0, %v2575_v58  ;;  %v5808_v25 = vcombine.low %v2590_v44, %v2600_v26  ;;  %v6194_v41 = vunpack.c.l.bf16 %v6193_v8 }
 0x158   : > { %v2561_v59 = vrot.slane %v2560_v10, 4  ;;  %v6195_v10 = vunpack.c.h.bf16 %v6193_v8  ;;  %v6259_v8 = vld [vmem:[%s8986_s29 + $0x20] sm:$0xff]  }
 0x159   : > { %v2552_v60 = vsel %vm7289_vm2, %v2547_v3, %v2551_v34 }
 0x15a   : > { %v5806_v27 = vcombine.low %v2542_v62, %v2552_v60 }
 0x15d   : > { %6746 = vmatmul.mubr.msk.bf16.gmra.mrb[20].mxu0 %vm815_vm3, %v6100_v42  ;;  %v2566_v42 = vsel %vm7289_vm2, %v2561_v59, %v2565_v7  ;;  %v6256_v7 = vld [vmem:[%s8986_s29 + $0x8] sm:$0xff]  }
 0x15e   : > { %6602 = vmatmul.mubr.msk.bf16.gmra.mrb[20].mxu1 %vm815_vm3, %v5804_v37  ;;  %6749 = vmatprep.mubr.msk.bf16.mxu0 %vm815_vm3, %v6101_v5  ;;  %v5807_v5 = vcombine.low %v2566_v42, %v2576_v45  ;;  %v6198_v54 = vunpack.c.l.bf16 %v6256_v7  ;;  %v6199_v18 = vunpack.c.h.bf16 %v6256_v7  ;;  %v6257_v37 = vld [vmem:[%s8986_s29 + $0x10] sm:$0xff]  }
 0x15f   : > { %6605 = vmatprep.mubr.msk.bf16.mxu1 %vm815_vm3, %v5805_v32  ;;  %v6202_v59 = vunpack.c.l.bf16 %v6257_v37  ;;  %v6203_v45 = vunpack.c.h.bf16 %v6257_v37 }
 0x165   : > { %6750 = vmatmul.mubr.msk.bf16.gmra.mrb[24].mxu0 %vm815_vm3, %v6102_v51 }
 0x166   : > { %6606 = vmatmul.mubr.msk.bf16.gmra.mrb[24].mxu1 %vm815_vm3, %v5806_v27  ;;  %6753 = vmatprep.mubr.msk.bf16.mxu0 %vm815_vm3, %v6103_v31 }
 0x167   : > { %6609 = vmatprep.mubr.msk.bf16.mxu1 %vm815_vm3, %v5807_v5 }
 0x16d   : > { %6754 = vmatmul.mubr.msk.bf16.gmra.mrb[28].mxu0 %vm815_vm3, %v6104_v4 }
 0x16e   : > { %6610 = vmatmul.mubr.msk.bf16.gmra.mrb[28].mxu1 %vm815_vm3, %v5808_v25 }
 0x1e9   : > { %v6547_v43 = vpop.f32.mrb[0].mxu1 }
 0x1ea   : > { %v2010_v24 = vpop.f32.mrb[1].mxu1 }
 0x1eb   : > { %v6548_v51 = vpop.f32.mrb[2].mxu1 }
 0x1ec   : > { %v2013_v19 = vpop.f32.mrb[3].mxu1 }
 0x1f1   : > { %v6551_v13 = vpop.f32.mrb[4].mxu1 }
 0x1f2   : > { %v2026_v31 = vpop.f32.mrb[5].mxu1 }
 0x1f3   : > { %v6552_v36 = vpop.f32.mrb[6].mxu1 }
 0x1f4   : > { %v8964_v52 = vpop.f32.mrb[7].mxu1 }
 0x1f9   : > { %v8966_v30 = vpop.f32.mrb[8].mxu1 }
 0x1fa   : > { %v8968_v22 = vpop.f32.mrb[9].mxu1 }
 0x1fb   : > { %v8970_v48 = vpop.f32.mrb[10].mxu1 }
 0x1fc   : > { %v8972_v14 = vpop.f32.mrb[11].mxu1 }
 0x201   : > { %v8975_v11 = vpop.f32.mrb[12].mxu1 }
 0x202   : > { %v8977_v4 = vpop.f32.mrb[13].mxu1 }
 0x203   : > { %v8979_v40 = vpop.f32.mrb[14].mxu1 }
 0x204   : > { %v8988_v57 = vpop.f32.mrb[15].mxu1 }
 0x208   : > { %v6727_v16 = vpop.f32.mrb[0].mxu0 }
 0x209   : > { %v6761_v33 = vadd.f32 %v6727_v16, %v6547_v43  ;;  %v4824_v1 = vpop.f32.mrb[1].mxu0 }
 0x20a   : > { %v6762_v15 = vadd.f32 %v4824_v1, %v2010_v24  ;;  %v6728_v23 = vpop.f32.mrb[2].mxu0 }
 0x20b   : > { %v4992_v28 = vadd.f32 %v6761_v33, %v8995_v49  ;;  %v6763_v6 = vadd.f32 %v6728_v23, %v6548_v51  ;;  %v4827_v21 = vpop.f32.mrb[3].mxu0 }
 0x20c   : > { %v4990_v53 = vadd.f32 %v6762_v15, %v8995_v49  ;;  %v6764_v55 = vadd.f32 %v4827_v21, %v2013_v19 }
 0x20d   : > { %v5088_v35 = vadd.f32 %v6198_v54, %v4992_v28  ;;  %v4993_v12 = vadd.f32 %v6763_v6, %v8995_v49 }
 0x20e   : > { %v5086_v32 = vadd.f32 %v6194_v41, %v4990_v53  ;;  %v4991_v29 = vadd.f32 %v6764_v55, %v8995_v49  ;;  %v6210_v53 = vunpack.c.l.bf16 %v6259_v8 }
 0x20f   : > { %v5120_v3 = vmax.f32 %v5088_v35, 0.0  ;;  %v5089_v34 = vadd.f32 %v6199_v18, %v4993_v12 }
 0x210   : > { %v5118_v17 = vmax.f32 %v5086_v32, 0.0  ;;  %v5087_v39 = vadd.f32 %v6195_v10, %v4991_v29  ;;  %v6731_v20 = vpop.f32.mrb[4].mxu0 }
 0x211   : > { %v6162_v0 = vpack.c.bf16 %v5120_v3, %v5120_v3  ;;  %v5121_v58 = vmax.f32 %v5089_v34, 0.0  ;;  %v6765_v62 = vadd.f32 %v6731_v20, %v6551_v13  ;;  %v4840_v60 = vpop.f32.mrb[5].mxu0  ;;  %v6260_v13 = vld [vmem:[%s8986_s29 + $0x28] sm:$0xff]  }
 0x212   : > { %v6160_v38 = vpack.c.bf16 %v5118_v17, %v5118_v17  ;;  %v5119_v61 = vmax.f32 %v5087_v39, 0.0  ;;  %v6766_v50 = vadd.f32 %v4840_v60, %v2026_v31  ;;  %v6732_v42 = vpop.f32.mrb[6].mxu0  ;;  %v5150_v27 = vsel %vm815_vm3, %v5118_v17, 0.0 }
 0x213   : > { %5352 = vst.msk [vmem:[%s9008_s9 + $0x8] sm:$0xf] %vm5349_vm7, %v6162_v0  ;;  %v6163_v5 = vpack.c.bf16 %v5121_v58, %v5121_v58  ;;  %v4996_v47 = vadd.f32 %v6765_v62, %v8995_v49  ;;  %v6767_v2 = vadd.f32 %v6732_v42, %v6552_v36  ;;  %v4843_v63 = vpop.f32.mrb[7].mxu0  ;;  %v5153_v31 = vsel %vm815_vm3, %v5120_v3, 0.0 }
 0x214   : > { %5350 = vst.msk [vmem:[%s9008_s9] sm:$0xf] %vm5349_vm7, %v6160_v38  ;;  %v5151_v44 = vsel %vm815_vm3, %v5119_v61, 0.0  ;;  %v6161_v26 = vpack.c.bf16 %v5119_v61, %v5119_v61  ;;  %v4994_v25 = vadd.f32 %v6766_v50, %v8995_v49  ;;  %v6768_v43 = vadd.f32 %v4843_v63, %v8964_v52  ;;  %v6261_v50 = vld [vmem:[%s8986_s29 + $0x30] sm:$0xff]  }
 0x215   : > { %5353 = vst.msk [vmem:[%s9008_s9 + $0xc] sm:$0xf] %vm5349_vm7, %v6163_v5  ;;  %v5152_v24 = vadd.f32 %v5151_v44, %v5150_v27  ;;  %v5092_v51 = vadd.f32 %v6206_v56, %v4996_v47  ;;  %v4997_v19 = vadd.f32 %v6767_v2, %v8995_v49  ;;  %v5155_v52 = vsel %vm815_vm3, %v5121_v58, 0.0  ;;  %v6262_v58 = vld [vmem:[%s8986_s29 + $0x38] sm:$0xff]  }
 0x216   : > { %5351 = vst.msk [vmem:[%s9008_s9 + $0x4] sm:$0xf] %vm5349_vm7, %v6161_v26  ;;  %v5090_v36 = vadd.f32 %v6202_v59, %v4994_v25  ;;  %v4995_v7 = vadd.f32 %v6768_v43, %v8995_v49  ;;  %v6214_v23 = vunpack.c.l.bf16 %v6260_v13  ;;  %v6215_v3 = vunpack.c.h.bf16 %v6260_v13 }
 0x217   : > { %v5154_v16 = vadd.f32 %v5153_v31, %v5152_v24  ;;  %v5124_v33 = vmax.f32 %v5092_v51, 0.0  ;;  %v5093_v54 = vadd.f32 %v6207_v9, %v4997_v19  ;;  %v6218_v51 = vunpack.c.l.bf16 %v6261_v50 }
 0x218   : > { %v5122_v1 = vmax.f32 %v5090_v36, 0.0  ;;  %v5091_v15 = vadd.f32 %v6203_v45, %v4995_v7  ;;  %v6735_v41 = vpop.f32.mrb[8].mxu0 }
 0x219   : > { %v6166_v28 = vpack.c.bf16 %v5124_v33, %v5124_v33  ;;  %v5156_v6 = vadd.f32 %v5155_v52, %v5154_v16  ;;  %v5125_v18 = vmax.f32 %v5093_v54, 0.0  ;;  %v4856_v21 = vpop.f32.mrb[9].mxu0  ;;  %v6769_v12 = vadd.f32 %v6735_v41, %v8966_v30 }
 0x21a   : > { %v5157_v55 = vsel %vm815_vm3, %v5122_v1, 0.0  ;;  %v6164_v10 = vpack.c.bf16 %v5122_v1, %v5122_v1  ;;  %v5123_v35 = vmax.f32 %v5091_v15, 0.0  ;;  %v6736_v46 = vpop.f32.mrb[10].mxu0  ;;  %v6770_v29 = vadd.f32 %v4856_v21, %v8968_v22 }
 0x21b   : > { %5356 = vst.msk [vmem:[%s9008_s9 + $0x18] sm:$0xf] %vm5349_vm7, %v6166_v28  ;;  %v5158_v37 = vadd.f32 %v5157_v55, %v5156_v6  ;;  %v6167_v32 = vpack.c.bf16 %v5125_v18, %v5125_v18  ;;  %v4859_v34 = vpop.f32.mrb[11].mxu0  ;;  %v5000_v20 = vadd.f32 %v6769_v12, %v8995_v49  ;;  %v6771_v30 = vadd.f32 %v6736_v46, %v8970_v48  ;;  %v6263_v46 = vld [vmem:[%s8986_s29 + $0x40] sm:$0xff]  }
 0x21c   : > { %5354 = vst.msk [vmem:[%s9008_s9 + $0x10] sm:$0xf] %vm5349_vm7, %v6164_v10  ;;  %v5159_v17 = vsel %vm815_vm3, %v5123_v35, 0.0  ;;  %v6165_v39 = vpack.c.bf16 %v5123_v35, %v5123_v35  ;;  %v4998_v59 = vadd.f32 %v6770_v29, %v8995_v49  ;;  %v6772_v0 = vadd.f32 %v4859_v34, %v8972_v14 }
 0x21d   : > { %5357 = vst.msk [vmem:[%s9008_s9 + $0x1c] sm:$0xf] %vm5349_vm7, %v6167_v32  ;;  %v5160_v56 = vadd.f32 %v5159_v17, %v5158_v37  ;;  %v6211_v22 = vunpack.c.h.bf16 %v6259_v8  ;;  %v5161_v62 = vsel %vm815_vm3, %v5124_v33, 0.0  ;;  %v5096_v60 = vadd.f32 %v6214_v23, %v5000_v20 }
 0x21e   : > { %5355 = vst.msk [vmem:[%s9008_s9 + $0x14] sm:$0xf] %vm5349_vm7, %v6165_v39  ;;  %v5001_v9 = vadd.f32 %v6771_v30, %v8995_v49  ;;  %v5094_v61 = vadd.f32 %v6210_v53, %v4998_v59  ;;  %v4999_v48 = vadd.f32 %v6772_v0, %v8995_v49  ;;  %v5163_v42 = vsel %vm815_vm3, %v5125_v18, 0.0  ;;  %v6264_v18 = vld [vmem:[%s8986_s29 + $0x48] sm:$0xff]  }
 0x21f   : > { %v5162_v38 = vadd.f32 %v5161_v62, %v5160_v56  ;;  %v5128_v45 = vmax.f32 %v5096_v60, 0.0  ;;  %v6222_v14 = vunpack.c.l.bf16 %v6262_v58  ;;  %v6223_v54 = vunpack.c.h.bf16 %v6262_v58 }
 0x220   : > { %v5097_v27 = vadd.f32 %v6215_v3, %v5001_v9  ;;  %v6739_v5 = vpop.f32.mrb[12].mxu0  ;;  %v5126_v47 = vmax.f32 %v5094_v61, 0.0  ;;  %v5095_v63 = vadd.f32 %v6211_v22, %v4999_v48  ;;  %v6219_v6 = vunpack.c.h.bf16 %v6261_v50 }
 0x221   : > { %v5164_v2 = vadd.f32 %v5163_v42, %v5162_v38  ;;  %v6773_v44 = vadd.f32 %v6739_v5, %v8975_v11  ;;  %v4872_v26 = vpop.f32.mrb[13].mxu0  ;;  %v6170_v25 = vpack.c.bf16 %v5128_v45, %v5128_v45  ;;  %v5169_v21 = vsel %vm815_vm3, %v5128_v45, 0.0 }
 0x222   : > { %v5129_v43 = vmax.f32 %v5097_v27, 0.0  ;;  %v6774_v24 = vadd.f32 %v4872_v26, %v8977_v4  ;;  %v6740_v19 = vpop.f32.mrb[14].mxu0  ;;  %v5165_v13 = vsel %vm815_vm3, %v5126_v47, 0.0  ;;  %v6168_v31 = vpack.c.bf16 %v5126_v47, %v5126_v47  ;;  %v6266_v26 = vld [vmem:[%s8986_s29 + $0x58] sm:$0xff]  }
 0x223   : > { %v5127_v36 = vmax.f32 %v5095_v63, 0.0  ;;  %v5004_v7 = vadd.f32 %v6773_v44, %v8995_v49  ;;  %v4875_v8 = vpop.f32.mrb[15].mxu0  ;;  %5360 = vst.msk [vmem:[%s9008_s9 + $0x28] sm:$0xf] %vm5349_vm7, %v6170_v25  ;;  %v5166_v11 = vadd.f32 %v5165_v13, %v5164_v2  ;;  %v6775_v15 = vadd.f32 %v6740_v19, %v8979_v40 }
 0x224   : > { %v6171_v16 = vpack.c.bf16 %v5129_v43, %v5129_v43  ;;  %v5002_v33 = vadd.f32 %v6774_v24, %v8995_v49  ;;  %5358 = vst.msk [vmem:[%s9008_s9 + $0x20] sm:$0xf] %vm5349_vm7, %v6168_v31  ;;  %v6776_v28 = vadd.f32 %v4875_v8, %v8988_v57  ;;  %v5171_v37 = vsel %vm815_vm3, %v5129_v43, 0.0 }
 0x225   : > { %v5167_v4 = vsel %vm815_vm3, %v5127_v36, 0.0  ;;  %v6169_v52 = vpack.c.bf16 %v5127_v36, %v5127_v36  ;;  %v5100_v1 = vadd.f32 %v6222_v14, %v5004_v7  ;;  %v5005_v55 = vadd.f32 %v6775_v15, %v8995_v49  ;;  %v6265_v36 = vld [vmem:[%s8986_s29 + $0x50] sm:$0xff]  }
 0x226   : > { %5361 = vst.msk [vmem:[%s9008_s9 + $0x2c] sm:$0xf] %vm5349_vm7, %v6171_v16  ;;  %v5168_v41 = vadd.f32 %v5167_v4, %v5166_v11  ;;  %v5098_v23 = vadd.f32 %v6218_v51, %v5002_v33  ;;  %v5003_v40 = vadd.f32 %v6776_v28, %v8995_v49  ;;  %v6230_v3 = vunpack.c.l.bf16 %v6264_v18 }
 0x227   : > { %5359 = vst.msk [vmem:[%s9008_s9 + $0x24] sm:$0xf] %vm5349_vm7, %v6169_v52  ;;  %v5132_v53 = vmax.f32 %v5100_v1, 0.0  ;;  %v5101_v57 = vadd.f32 %v6223_v54, %v5005_v55  ;;  %v6226_v62 = vunpack.c.l.bf16 %v6263_v46  ;;  %v6231_v50 = vunpack.c.h.bf16 %v6264_v18 }
 0x228   : > { %v5170_v10 = vadd.f32 %v5169_v21, %v5168_v41  ;;  %v5130_v35 = vmax.f32 %v5098_v23, 0.0  ;;  %v6743_v12 = vpop.f32.mrb[16].mxu0  ;;  %v5099_v30 = vadd.f32 %v6219_v6, %v5003_v40  ;;  %v6227_v14 = vunpack.c.h.bf16 %v6263_v46 }
 0x229   : > { %v6174_v32 = vpack.c.bf16 %v5132_v53, %v5132_v53  ;;  %v6599_v29 = vpop.f32.mrb[16].mxu1  ;;  %v4888_v34 = vpop.f32.mrb[17].mxu0  ;;  %v5133_v0 = vmax.f32 %v5101_v57, 0.0  ;;  %v5177_v51 = vsel %vm815_vm3, %v5132_v53, 0.0  ;;  %v6238_v33 = vunpack.c.l.bf16 %v6266_v26 }
 0x22a   : > { %v5172_v17 = vadd.f32 %v5171_v37, %v5170_v10  ;;  %v5173_v39 = vsel %vm815_vm3, %v5130_v35, 0.0  ;;  %v6172_v20 = vpack.c.bf16 %v5130_v35, %v5130_v35  ;;  %v2812_v56 = vpop.f32.mrb[17].mxu1  ;;  %v6744_v59 = vpop.f32.mrb[18].mxu0  ;;  %v6777_v22 = vadd.f32 %v6743_v12, %v6599_v29 }
 0x22b   : > { %5364 = vst.msk [vmem:[%s9008_s9 + $0x38] sm:$0xf] %vm5349_vm7, %v6174_v32  ;;  %v6778_v58 = vadd.f32 %v4888_v34, %v2812_v56  ;;  %v6600_v60 = vpop.f32.mrb[18].mxu1  ;;  %v4891_v9 = vpop.f32.mrb[19].mxu0  ;;  %v5131_v61 = vmax.f32 %v5099_v30, 0.0  ;;  %v6175_v45 = vpack.c.bf16 %v5133_v0, %v5133_v0  ;;  %v5179_v4 = vsel %vm815_vm3, %v5133_v0, 0.0 }
 0x22c   : > { %v5174_v38 = vadd.f32 %v5173_v39, %v5172_v17  ;;  %5362 = vst.msk [vmem:[%s9008_s9 + $0x30] sm:$0xf] %vm5349_vm7, %v6172_v20  ;;  %v6779_v48 = vadd.f32 %v6744_v59, %v6600_v60  ;;  %v2815_v42 = vpop.f32.mrb[19].mxu1  ;;  %v5008_v27 = vadd.f32 %v6777_v22, %v8995_v49  ;;  %v6234_v21 = vunpack.c.l.bf16 %v6265_v36  ;;  %v6267_v22 = vld [vmem:[%s8986_s29 + $0x60] sm:$0xff]  }
 0x22d   : > { %v5006_v5 = vadd.f32 %v6778_v58, %v8995_v49  ;;  %v5175_v47 = vsel %vm815_vm3, %v5131_v61, 0.0  ;;  %v6173_v2 = vpack.c.bf16 %v5131_v61, %v5131_v61  ;;  %v6780_v44 = vadd.f32 %v4891_v9, %v2815_v42  ;;  %5365 = vst.msk [vmem:[%s9008_s9 + $0x3c] sm:$0xf] %vm5349_vm7, %v6175_v45 }
 0x22e   : > { %v5009_v63 = vadd.f32 %v6779_v48, %v8995_v49  ;;  %v5176_v25 = vadd.f32 %v5175_v47, %v5174_v38  ;;  %v5104_v43 = vadd.f32 %v6230_v3, %v5008_v27  ;;  %v6239_v12 = vunpack.c.h.bf16 %v6266_v26  ;;  %v9096_v3 = vld [vmem:[%s8986_s29 + $0x68] sm:$0xff]  }
 0x22f   : > { %v5102_v24 = vadd.f32 %v6226_v62, %v5006_v5  ;;  %5363 = vst.msk [vmem:[%s9008_s9 + $0x34] sm:$0xf] %vm5349_vm7, %v6173_v2  ;;  %v5007_v13 = vadd.f32 %v6780_v44, %v8995_v49  ;;  %v6235_v20 = vunpack.c.h.bf16 %v6265_v36  ;;  %v6246_v9 = vunpack.c.l.bf16 %v9096_v3 }
 0x230   : > { %v5105_v19 = vadd.f32 %v6231_v50, %v5009_v63  ;;  %v6747_v31 = vpop.f32.mrb[20].mxu0  ;;  %v5178_v7 = vadd.f32 %v5177_v51, %v5176_v25  ;;  %v5136_v8 = vmax.f32 %v5104_v43, 0.0  ;;  %v6242_v2 = vunpack.c.l.bf16 %v6267_v22 }
 0x231   : > { %v5134_v11 = vmax.f32 %v5102_v24, 0.0  ;;  %v6603_v16 = vpop.f32.mrb[20].mxu1  ;;  %v4904_v54 = vpop.f32.mrb[21].mxu0  ;;  %v5103_v1 = vadd.f32 %v6227_v14, %v5007_v13  ;;  %v6247_v24 = vunpack.c.h.bf16 %v9096_v3 }
 0x232   : > { %v5137_v52 = vmax.f32 %v5105_v19, 0.0  ;;  %v6781_v15 = vadd.f32 %v6747_v31, %v6603_v16  ;;  %v2828_v41 = vpop.f32.mrb[21].mxu1  ;;  %v6748_v23 = vpop.f32.mrb[22].mxu0  ;;  %v6178_v28 = vpack.c.bf16 %v5136_v8, %v5136_v8  ;;  %v5180_v6 = vadd.f32 %v5179_v4, %v5178_v7 }
 0x233   : > { %v5181_v18 = vsel %vm815_vm3, %v5134_v11, 0.0  ;;  %v6604_v53 = vpop.f32.mrb[22].mxu1  ;;  %v4907_v55 = vpop.f32.mrb[23].mxu0  ;;  %v6176_v10 = vpack.c.bf16 %v5134_v11, %v5134_v11  ;;  %v5135_v40 = vmax.f32 %v5103_v1, 0.0  ;;  %v6782_v57 = vadd.f32 %v4904_v54, %v2828_v41  ;;  %v9118_v54 = vld [vmem:[%s8986_s29 + $0x78] sm:$0xff]  }
 0x234   : > { %v6179_v35 = vpack.c.bf16 %v5137_v52, %v5137_v52  ;;  %v2831_v46 = vpop.f32.mrb[23].mxu1  ;;  %5368 = vst.msk [vmem:[%s9008_s9 + $0x48] sm:$0xf] %vm5349_vm7, %v6178_v28  ;;  %v5182_v37 = vadd.f32 %v5181_v18, %v5180_v6  ;;  %v5012_v32 = vadd.f32 %v6781_v15, %v8995_v49  ;;  %v6783_v29 = vadd.f32 %v6748_v23, %v6604_v53  ;;  %v6269_v18 = vld [vmem:[%s8986_s29 + $0x70] sm:$0xff]  }
 0x235   : > { %5366 = vst.msk [vmem:[%s9008_s9 + $0x40] sm:$0xf] %vm5349_vm7, %v6176_v10  ;;  %v5183_v34 = vsel %vm815_vm3, %v5135_v40, 0.0  ;;  %v6177_v17 = vpack.c.bf16 %v5135_v40, %v5135_v40  ;;  %v6784_v39 = vadd.f32 %v4907_v55, %v2831_v46  ;;  %v5010_v59 = vadd.f32 %v6782_v57, %v8995_v49 }
 0x236   : > { %5369 = vst.msk [vmem:[%s9008_s9 + $0x4c] sm:$0xf] %vm5349_vm7, %v6179_v35  ;;  %v5184_v30 = vadd.f32 %v5183_v34, %v5182_v37  ;;  %v5108_v56 = vadd.f32 %v6238_v33, %v5012_v32  ;;  %v5013_v0 = vadd.f32 %v6783_v29, %v8995_v49  ;;  %v5185_v58 = vsel %vm815_vm3, %v5136_v8, 0.0 }
 0x237   : > { %5367 = vst.msk [vmem:[%s9008_s9 + $0x44] sm:$0xf] %vm5349_vm7, %v6177_v17  ;;  %v5011_v62 = vadd.f32 %v6784_v39, %v8995_v49  ;;  %v5106_v48 = vadd.f32 %v6234_v21, %v5010_v59  ;;  %v5187_v27 = vsel %vm815_vm3, %v5137_v52, 0.0  ;;  %v6243_v15 = vunpack.c.h.bf16 %v6267_v22 }
 0x238   : > { %v6751_v60 = vpop.f32.mrb[24].mxu0  ;;  %v5186_v38 = vadd.f32 %v5185_v58, %v5184_v30  ;;  %v5140_v61 = vmax.f32 %v5108_v56, 0.0  ;;  %v5109_v50 = vadd.f32 %v6239_v12, %v5013_v0  ;;  %v6254_v10 = vunpack.c.l.bf16 %v9118_v54 }
 0x239   : > { %v6607_v42 = vpop.f32.mrb[24].mxu1  ;;  %v4920_v45 = vpop.f32.mrb[25].mxu0  ;;  %v5107_v5 = vadd.f32 %v6235_v20, %v5011_v62  ;;  %v5138_v26 = vmax.f32 %v5106_v48, 0.0  ;;  %v6250_v17 = vunpack.c.l.bf16 %v6269_v18 }
 0x23a   : > { %v6785_v14 = vadd.f32 %v6751_v60, %v6607_v42  ;;  %v2844_v47 = vpop.f32.mrb[25].mxu1  ;;  %v6752_v63 = vpop.f32.mrb[26].mxu0  ;;  %v6182_v44 = vpack.c.bf16 %v5140_v61, %v5140_v61  ;;  %v5188_v25 = vadd.f32 %v5187_v27, %v5186_v38  ;;  %v5141_v19 = vmax.f32 %v5109_v50, 0.0 }
 0x23b   : > { %v6608_v43 = vpop.f32.mrb[26].mxu1  ;;  %v4923_v51 = vpop.f32.mrb[27].mxu0  ;;  %v5139_v13 = vmax.f32 %v5107_v5, 0.0  ;;  %v6786_v36 = vadd.f32 %v4920_v45, %v2844_v47  ;;  %v5189_v8 = vsel %vm815_vm3, %v5138_v26, 0.0  ;;  %v6180_v11 = vpack.c.bf16 %v5138_v26, %v5138_v26 }
 0x23c   : > { %v5016_v31 = vadd.f32 %v6785_v14, %v8995_v49  ;;  %v2847_v7 = vpop.f32.mrb[27].mxu1  ;;  %5372 = vst.msk [vmem:[%s9008_s9 + $0x58] sm:$0xf] %vm5349_vm7, %v6182_v44  ;;  %v6787_v16 = vadd.f32 %v6752_v63, %v6608_v43  ;;  %v5190_v4 = vadd.f32 %v5189_v8, %v5188_v25  ;;  %v6183_v52 = vpack.c.bf16 %v5141_v19, %v5141_v19 }
 0x23d   : > { %v6788_v33 = vadd.f32 %v4923_v51, %v2847_v7  ;;  %v5191_v1 = vsel %vm815_vm3, %v5139_v13, 0.0  ;;  %5370 = vst.msk [vmem:[%s9008_s9 + $0x50] sm:$0xf] %vm5349_vm7, %v6180_v11  ;;  %v6181_v41 = vpack.c.bf16 %v5139_v13, %v5139_v13  ;;  %v5014_v28 = vadd.f32 %v6786_v36, %v8995_v49 }
 0x23e   : > { %v5112_v23 = vadd.f32 %v6246_v9, %v5016_v31  ;;  %v5017_v6 = vadd.f32 %v6787_v16, %v8995_v49  ;;  %5373 = vst.msk [vmem:[%s9008_s9 + $0x5c] sm:$0xf] %vm5349_vm7, %v6183_v52  ;;  %v5192_v21 = vadd.f32 %v5191_v1, %v5190_v4  ;;  %v5193_v35 = vsel %vm815_vm3, %v5140_v61, 0.0 }
 0x23f   : > { %v5015_v53 = vadd.f32 %v6788_v33, %v8995_v49  ;;  %5371 = vst.msk [vmem:[%s9008_s9 + $0x54] sm:$0xf] %vm5349_vm7, %v6181_v41  ;;  %v5110_v12 = vadd.f32 %v6242_v2, %v5014_v28  ;;  %v5195_v20 = vsel %vm815_vm3, %v5141_v19, 0.0  ;;  %v6255_v42 = vunpack.c.h.bf16 %v9118_v54 }
 0x240   : > { %v6755_v55 = vpop.f32.mrb[28].mxu0  ;;  %v5144_v40 = vmax.f32 %v5112_v23, 0.0  ;;  %v5113_v46 = vadd.f32 %v6247_v24, %v5017_v6  ;;  %v5194_v57 = vadd.f32 %v5193_v35, %v5192_v21  ;;  %v6251_v44 = vunpack.c.h.bf16 %v6269_v18 }
 0x241   : > { %v6611_v37 = vpop.f32.mrb[28].mxu1  ;;  %v4936_v32 = vpop.f32.mrb[29].mxu0  ;;  %v5111_v29 = vadd.f32 %v6243_v15, %v5015_v53  ;;  %v5142_v56 = vmax.f32 %v5110_v12, 0.0 }
 0x242   : > { %v6789_v3 = vadd.f32 %v6755_v55, %v6611_v37  ;;  %v2860_v34 = vpop.f32.mrb[29].mxu1  ;;  %v6756_v39 = vpop.f32.mrb[30].mxu0  ;;  %v6186_v30 = vpack.c.bf16 %v5144_v40, %v5144_v40  ;;  %v5145_v59 = vmax.f32 %v5113_v46, 0.0  ;;  %v5196_v58 = vadd.f32 %v5195_v20, %v5194_v57 }
 0x243   : > { %v6612_v0 = vpop.f32.mrb[30].mxu1  ;;  %v4939_v22 = vpop.f32.mrb[31].mxu0  ;;  %v5143_v62 = vmax.f32 %v5111_v29, 0.0  ;;  %v6790_v9 = vadd.f32 %v4936_v32, %v2860_v34  ;;  %v5197_v61 = vsel %vm815_vm3, %v5142_v56, 0.0  ;;  %v6184_v48 = vpack.c.bf16 %v5142_v56, %v5142_v56 }
 0x244   : > { %v5020_v60 = vadd.f32 %v6789_v3, %v8995_v49  ;;  %v2863_v38 = vpop.f32.mrb[31].mxu1  ;;  %5376 = vst.msk [vmem:[%s9008_s9 + $0x68] sm:$0xf] %vm5349_vm7, %v6186_v30  ;;  %v6187_v50 = vpack.c.bf16 %v5145_v59, %v5145_v59  ;;  %v5198_v45 = vadd.f32 %v5197_v61, %v5196_v58  ;;  %v6791_v2 = vadd.f32 %v6756_v39, %v6612_v0 }
 0x245   : > { %v5199_v27 = vsel %vm815_vm3, %v5143_v62, 0.0  ;;  %v6185_v5 = vpack.c.bf16 %v5143_v62, %v5143_v62  ;;  %5374 = vst.msk [vmem:[%s9008_s9 + $0x60] sm:$0xf] %vm5349_vm7, %v6184_v48  ;;  %v5018_v47 = vadd.f32 %v6790_v9, %v8995_v49  ;;  %v6792_v63 = vadd.f32 %v4939_v22, %v2863_v38 }
 0x246   : > { %v5116_v14 = vadd.f32 %v6254_v10, %v5020_v60  ;;  %5377 = vst.msk [vmem:[%s9008_s9 + $0x6c] sm:$0xf] %vm5349_vm7, %v6187_v50  ;;  %v5200_v26 = vadd.f32 %v5199_v27, %v5198_v45  ;;  %v5201_v43 = vsel %vm815_vm3, %v5144_v40, 0.0  ;;  %v5021_v51 = vadd.f32 %v6791_v2, %v8995_v49 }
 0x247   : > { %5375 = vst.msk [vmem:[%s9008_s9 + $0x64] sm:$0xf] %vm5349_vm7, %v6185_v5  ;;  %v5114_v24 = vadd.f32 %v6250_v17, %v5018_v47  ;;  %v5019_v19 = vadd.f32 %v6792_v63, %v8995_v49  ;;  %v5203_v36 = vsel %vm815_vm3, %v5145_v59, 0.0 }
 0x248   : > { %v5148_v25 = vmax.f32 %v5116_v14, 0.0  ;;  %v5202_v13 = vadd.f32 %v5201_v43, %v5200_v26  ;;  %v5117_v8 = vadd.f32 %v6255_v42, %v5021_v51 }
 0x249   : > { %v5146_v7 = vmax.f32 %v5114_v24, 0.0  ;;  %v5115_v11 = vadd.f32 %v6251_v44, %v5019_v19 }
 0x24a   : > { %v6190_v31 = vpack.c.bf16 %v5148_v25, %v5148_v25  ;;  %v5204_v16 = vadd.f32 %v5203_v36, %v5202_v13  ;;  %v5149_v4 = vmax.f32 %v5117_v8, 0.0  ;;  %v5209_v28 = vsel %vm815_vm3, %v5148_v25, 0.0 }
 0x24b   : > { %v5205_v33 = vsel %vm815_vm3, %v5146_v7, 0.0  ;;  %v6188_v54 = vpack.c.bf16 %v5146_v7, %v5146_v7  ;;  %v5147_v52 = vmax.f32 %v5115_v11, 0.0 }
 0x24c   : > { %5380 = vst.msk [vmem:[%s9008_s9 + $0x78] sm:$0xf] %vm5349_vm7, %v6190_v31  ;;  %v5206_v1 = vadd.f32 %v5205_v33, %v5204_v16  ;;  %v6191_v49 = vpack.c.bf16 %v5149_v4, %v5149_v4  ;;  %v5211_v18 = vsel %vm815_vm3, %v5149_v4, 0.0 }
 0x24d   : > { %5378 = vst.msk [vmem:[%s9008_s9 + $0x70] sm:$0xf] %vm5349_vm7, %v6188_v54  ;;  %v5207_v15 = vsel %vm815_vm3, %v5147_v52, 0.0  ;;  %v6189_v41 = vpack.c.bf16 %v5147_v52, %v5147_v52 }
 0x24e   : > { %v5208_v23 = vadd.f32 %v5207_v15, %v5206_v1  ;;  %5381 = vst.msk [vmem:[%s9008_s9 + $0x7c] sm:$0xf] %vm5349_vm7, %v6191_v49 }
 0x24f   : > { %5379 = vst.msk [vmem:[%s9008_s9 + $0x74] sm:$0xf] %vm5349_vm7, %v6189_v41 }
 0x250   : > { %v5210_v6 = vadd.f32 %v5209_v28, %v5208_v23 }
 0x252   : > { %v5212_v21 = vadd.f32 %v5211_v18, %v5210_v6 }
 0x254   : > { %v5213_v53 = vrot.slane %v5212_v21, 4 }
 0x256   : > { %v5214_v55 = vadd.f32 %v5213_v53, %v5212_v21 }
 0x258   : > { %v5215_v10 = vrot.slane %v5214_v55, 2 }
 0x25a   : > { %v5216_v35 = vadd.f32 %v5215_v10, %v5214_v55 }
 0x25c   : > { %v5217_v40 = vrot.slane %v5216_v35, 1 }
 0x25e   : > { %v5218_v12 = vadd.f32 %v5217_v40, %v5216_v35 }
 0x260   : > { %5220 = vst.msk [vmem:[%s305_s13] sm:$0x1] %vm5219_vm8, %v5218_v12 }
 0x261 PF: > { %s16_s20 = sadd.s32 1, %s7191_s20   ;;  %s9249_s18 = smov %s7187_s19 }
 0x262   : > { %p13_p5 = scmp.ge.s32.totalorder %s16_s20, 4   ;;  %s9250_s19 = smov %s9252_s21 }
 0x264   :  { %15 = sbr.rel (!%p13_p5) target bundleno = 2 (0x2), region = 92 }

// kernel: res_se_conv_block.3
= control target key start
LH: loop header
LB: loop body
LE: loop exit
PB: predicated region body
PF: predicated region fallthrough
CT: control target
= control target key end

     0   :  { %s9592_s21 = smov 0   ;;  %s9594_s22 = smov 0   ;;  %s11718_s0 = inlined_call_operand.vmem [shape: bf16[2,18,18,4], index: 0, kind: input, shape index: {}]   ;;  %s11719_s1 = inlined_call_operand.vmem [shape: bf16[3,3,4,32], index: 1, kind: input, shape index: {}]   ;;  %s11720_s2 = inlined_call_operand.vmem [shape: bf16[3,3,4,32], index: 2, kind: input, shape index: {}]   ;;  %s11721_s3 = inlined_call_operand.vmem [shape: f32[1,32], index: 3, kind: input, shape index: {}]   ;;  %s11722_s4 = inlined_call_operand.vmem [shape: f32[1,32], index: 4, kind: input, shape index: {}]   ;;  %s11723_s5 = inlined_call_operand.vmem [shape: bf16[2,16,16,32], index: 5, kind: output, shape index: {0}]   ;;  %s11724_s6 = inlined_call_operand.vmem [shape: bf16[2,16,16,32], index: 6, kind: output, shape index: {1}]  }
   0x1   :  { %s9596_s23 = smov 0  }
   0x2 LB: > { %s29_s24 = sadd.s32 1, %s9551_s22  ;;  %p7178_p0 = scmp.ge.s32.totalorder %s9555_s23, 1  ;;  %s9555_s23 = sphi %s9596_s23, %s17_s23   ;;  %s9551_s22 = sphi %s9594_s22, %s11771_s22   ;;  %s9547_s21 = sphi %s9592_s21, %s11770_s21  }
   0x3   : > { %p31_p1 = scmp.ge.s32.totalorder %s29_s24, 2  ;;  %p231_p2 = scmp.lt.s32.totalorder %s9555_s23, 3 }
   0x5   : > { %s11773_s24 = smov (%p31_p1, %s29_s24), 0  ;;  %p232_p3 = pnand %p7178_p0, %p231_p2 }
   0x7   : > { %235 = sbr.rel (%p232_p3) target bundleno = 829 (0x33d), region = 40 }
   0xe   : > { %v7184_v0 = vld [vmem:[%s11719_s1 + $0x2] sm:$0x3]  ;;  %vm844_vm0 = vcmask 1041408   ;;  %p276_p4 = scmp.lt.s32.totalorder %s9547_s21, 1  ;;  %v340_v4 = vld [vmem:[%s11719_s1] sm:$0x3] }
   0xf   : > { %v7249_v1 = vld [vmem:[%s11720_s2 + $0x2] sm:$0x3]  ;;  %9436 = vmatprep.subr.msk.bf16.mxu0 %vm844_vm0, %v7184_v0  ;;  %v846_v2 = vsel %vm844_vm0, %v7184_v0, 0  ;;  %v341_v5 = vld [vmem:[%s11720_s2] sm:$0x3]  ;;  %vm795_vm3 = vcmask 31744  }
  0x10   : > { %9438 = vmatprep.subr.msk.bf16.mxu1 %vm844_vm0, %v7249_v1  ;;  %v1304_v3 = vsel %vm844_vm0, %v7249_v1, 0  ;;  %8313 = vmatpush3.bf16.msra.mxu0 %v846_v2  ;;  %s11775_s21 = smov (!%p276_p4, %s9547_s21), 1  ;;  %vm358_vm1 = vsmask.f32 3328  ;;  %vm359_vm2 = vsmask.f32 7440 }
  0x11   : > { %8381 = vmatpush3.bf16.msra.mxu1 %v1304_v3  ;;  %9437 = vmatprep.subr.msk.bf16.mxu0 %vm844_vm0, %v340_v4  ;;  %s9454_s9 = smul.u32 216, %s11775_s21  ;;  %v9657_v17 = vsel %vm844_vm0, %v340_v4, 0  ;;  %vm9669_vm4 = vmor %vm358_vm1, %vm359_vm2  ;;  %v1468_v35 = vsel %vm844_vm0, %v341_v5, 0  ;;  %vm1679_vm5 = vcmask 1042432   ;;  %vm1680_vm6 = vcmask 1046532   ;;  %s7940_s29 = sshll.u32 %s11775_s21, 7 }
  0x12   : > { %9439 = vmatprep.subr.msk.bf16.mxu1 %vm844_vm0, %v341_v5  ;;  %vm10023_vm7 = vmor %vm1679_vm5, %vm1680_vm6  ;;  %vm6789_vm8 = vcmask 257024   ;;  %s11512_s8 = scalar_lea.vmem %s11724_s6, %s7940_s29  ;;  %s11521_s10 = scalar_lea.vmem %s11723_s5, %s7940_s29 }
  0x13   : > { %s9634_s12 = scalar_lea.vmem %s11718_s0, %s9454_s9 }
  0x14   : > { %v9637_v6 = vld [vmem:[%s9634_s12] sm:$0xf]  ;;  %v9640_v7 = vld [vmem:[%s9634_s12 + $0x4] sm:$0xf]  ;;  %v342_v8 = vld [vmem:[%s9634_s12 + $0x8] sm:$0x1] }
  0x15   : > { %v362_v9 = vshrl.u32 %v9637_v6, 16  ;;  %v365_v10 = vshll.u32 %v9637_v6, 16  ;;  %v371_v11 = vshll.u32 %v9640_v7, 16  ;;  %v375_v12 = vshrl.u32 %v9640_v7, 16  ;;  %v9648_v13 = vld [vmem:[%s9634_s12 + $0xc] sm:$0xf] }
  0x16   : > { %v381_v14 = vshll.u32 %v342_v8, 16  ;;  %v9651_v15 = vld [vmem:[%s9634_s12 + $0x10] sm:$0xf]  ;;  %v9654_v16 = vld [vmem:[%s9634_s12 + $0x14] sm:$0x1]  ;;  %v386_v23 = vshrl.u32 %v9648_v13, 16 }
  0x17   : > { %v364_v18 = vrot.slane %v362_v9, 4  ;;  %v367_v19 = vrot.slane %v365_v10, 5  ;;  %v373_v20 = vrot.slane %v371_v11, 5  ;;  %v377_v21 = vrot.slane %v375_v12, 4  ;;  %v9665_v30 = vld [vmem:[%s9634_s12 + $0x18] sm:$0xf] }
  0x18   : > { %v383_v22 = vrot.slane %v381_v14, 5  ;;  %v389_v24 = vshll.u32 %v9648_v13, 16  ;;  %v395_v25 = vshll.u32 %v9651_v15, 16  ;;  %v399_v28 = vshrl.u32 %v9651_v15, 16  ;;  %v9675_v36 = vld [vmem:[%s9634_s12 + $0x1c] sm:$0xf] }
  0x19   : > { %v368_v26 = vor.u32 %v367_v19, %v364_v18  ;;  %v378_v27 = vor.u32 %v377_v21, %v373_v20  ;;  %v405_v29 = vshll.u32 %v9654_v16, 16  ;;  %v388_v32 = vrot.slane %v386_v23, 4  ;;  %v344_v43 = vld [vmem:[%s9634_s12 + $0x20] sm:$0x1]  ;;  %v9687_v50 = vld [vmem:[%s9634_s12 + $0x24] sm:$0xf] }
  0x1a   : > { %v391_v33 = vrot.slane %v389_v24, 5  ;;  %v397_v34 = vrot.slane %v395_v25, 5  ;;  %v401_v39 = vrot.slane %v399_v28, 4  ;;  %v410_v44 = vshrl.u32 %v9665_v30, 16  ;;  %v9690_v55 = vld [vmem:[%s9634_s12 + $0x28] sm:$0xf] }
  0x1b   : > { %v369_v37 = vrot.slane %v368_v26, 4  ;;  %v379_v38 = vrot.slane %v378_v27, 4  ;;  %v407_v42 = vrot.slane %v405_v29, 5  ;;  %v413_v45 = vshll.u32 %v9665_v30, 16  ;;  %v345_v62 = vld [vmem:[%s9634_s12 + $0x2c] sm:$0x1] }
  0x1c   : > { %v392_v41 = vor.u32 %v391_v33, %v388_v32  ;;  %v402_v48 = vor.u32 %v401_v39, %v397_v34  ;;  %v419_v49 = vshll.u32 %v9675_v36, 16  ;;  %v412_v53 = vrot.slane %v410_v44, 4  ;;  %v9704_v5 = vld [vmem:[%s9634_s12 + $0x30] sm:$0xf]  ;;  %v9709_v8 = vld [vmem:[%s11719_s1 + $0x4] sm:$0x3] }
  0x1d   : > { %v374_v46 = vsel %vm9669_vm4, %v369_v37, %v373_v20  ;;  %v384_v47 = vsel %vm9669_vm4, %v379_v38, %v383_v22  ;;  %v415_v54 = vrot.slane %v413_v45, 5  ;;  %v423_v58 = vshrl.u32 %v9675_v36, 16  ;;  %v9712_v14 = vld [vmem:[%s9634_s12 + $0x34] sm:$0xf]  ;;  %v9718_v22 = vld [vmem:[%s11720_s2 + $0x4] sm:$0x3] }
  0x1e   : > { %v7185_v51 = vcombine.low %v374_v46, %v384_v47  ;;  %v393_v52 = vrot.slane %v392_v41, 4  ;;  %v403_v56 = vrot.slane %v402_v48, 4  ;;  %v421_v57 = vrot.slane %v419_v49, 5  ;;  %v9725_v25 = vld [vmem:[%s9634_s12 + $0x38] sm:$0x1] }
  0x1f   : > { %v429_v59 = vshll.u32 %v344_v43, 16  ;;  %v416_v61 = vor.u32 %v415_v54, %v412_v53  ;;  %v434_v63 = vshrl.u32 %v9687_v50, 16  ;;  %v437_v0 = vshll.u32 %v9687_v50, 16  ;;  %v9733_v41 = vld [vmem:[%s9634_s12 + $0x3c] sm:$0xf] }
  0x20   : > { %8314 = vmatprep.mubr.msk.bf16.mxu0 %vm795_vm3, %v7185_v51  ;;  %8382 = vmatprep.mubr.msk.bf16.mxu1 %vm795_vm3, %v7185_v51  ;;  %v398_v60 = vsel %vm9669_vm4, %v393_v52, %v397_v34  ;;  %v408_v1 = vsel %vm9669_vm4, %v403_v56, %v407_v42  ;;  %v425_v2 = vrot.slane %v423_v58, 4  ;;  %v443_v4 = vshll.u32 %v9690_v55, 16  ;;  %v9743_v44 = vld [vmem:[%s9634_s12 + $0x40] sm:$0xf]  ;;  %v9748_v49 = vld [vmem:[%s9634_s12 + $0x44] sm:$0x1] }
  0x21   : > { %v431_v3 = vrot.slane %v429_v59, 5  ;;  %v7186_v9 = vcombine.low %v398_v60, %v408_v1  ;;  %v417_v10 = vrot.slane %v416_v61, 4  ;;  %v436_v11 = vrot.slane %v434_v63, 4  ;;  %v9757_v60 = vld [vmem:[%s9634_s12 + $0x48] sm:$0xf] }
  0x22   : > { %v439_v12 = vrot.slane %v437_v0, 5  ;;  %v426_v18 = vor.u32 %v425_v2, %v421_v57  ;;  %v445_v19 = vrot.slane %v443_v4, 5  ;;  %v447_v20 = vshrl.u32 %v9690_v55, 16  ;;  %v9763_v1 = vld [vmem:[%s9634_s12 + $0x4c] sm:$0xf] }
  0x23   : > { %v453_v21 = vshll.u32 %v345_v62, 16  ;;  %8315 = vmatmul.mubr.msk.bf16.vlgmr.msra.gmra.mrb[0].mxu0 %vm795_vm3, %v7186_v9  ;;  %8383 = vmatmul.mubr.msk.bf16.vlgmr.msra.gmra.mrb[0].mxu1 %vm795_vm3, %v7186_v9  ;;  %v422_v23 = vsel %vm9669_vm4, %v417_v10, %v421_v57  ;;  %v458_v26 = vshrl.u32 %v9704_v5, 16  ;;  %v461_v27 = vshll.u32 %v9704_v5, 16 }
  0x24   : > { %v440_v24 = vor.u32 %v439_v12, %v436_v11  ;;  %8347 = vmatpush3.bf16.msra.mxu0 %v9657_v17  ;;  %8415 = vmatpush3.bf16.msra.mxu1 %v1468_v35  ;;  %v427_v28 = vrot.slane %v426_v18, 4  ;;  %v449_v29 = vrot.slane %v447_v20, 4  ;;  %v467_v33 = vshll.u32 %v9712_v14, 16  ;;  %v9768_v18 = vld [vmem:[%s9634_s12 + $0x50] sm:$0x1] }
  0x25   : > { %v455_v32 = vrot.slane %v453_v21, 5  ;;  %v460_v37 = vrot.slane %v458_v26, 4  ;;  %v463_v38 = vrot.slane %v461_v27, 5  ;;  %v471_v39 = vshrl.u32 %v9712_v14, 16  ;;  %9440 = vmatprep.subr.msk.bf16.mxu0 %vm844_vm0, %v9709_v8  ;;  %9441 = vmatprep.subr.msk.bf16.mxu1 %vm844_vm0, %v9718_v22  ;;  %11740 = vst [vmem:[#allocation2_spill] sm:$0xff] %v9768_v18 }
  0x26   : > { %v441_v34 = vrot.slane %v440_v24, 4  ;;  %v432_v17 = vsel %vm9669_vm4, %v427_v28, %v431_v3  ;;  %v450_v35 = vor.u32 %v449_v29, %v445_v19  ;;  %v469_v42 = vrot.slane %v467_v33, 5  ;;  %v9779_v26 = vld [vmem:[%s9634_s12 + $0x54] sm:$0xf]  ;;  %v9782_v33 = vld [vmem:[%s9634_s12 + $0x58] sm:$0xf] }
  0x27   : > { %v477_v43 = vshll.u32 %v9725_v25, 16  ;;  %v7187_v45 = vcombine.low %v422_v23, %v432_v17  ;;  %v464_v47 = vor.u32 %v463_v38, %v460_v37  ;;  %v473_v48 = vrot.slane %v471_v39, 4 }
  0x28   : > { %v446_v46 = vsel %vm9669_vm4, %v441_v34, %v445_v19  ;;  %v451_v51 = vrot.slane %v450_v35, 4  ;;  %v482_v53 = vshrl.u32 %v9733_v41, 16  ;;  %v485_v54 = vshll.u32 %v9733_v41, 16 }
  0x29   : > { %v479_v52 = vrot.slane %v477_v43, 5  ;;  %8318 = vmatprep.mubr.msk.bf16.mxu0 %vm795_vm3, %v7187_v45  ;;  %8386 = vmatprep.mubr.msk.bf16.mxu1 %vm795_vm3, %v7187_v45  ;;  %v465_v56 = vrot.slane %v464_v47, 4  ;;  %v474_v57 = vor.u32 %v473_v48, %v469_v42  ;;  %v491_v58 = vshll.u32 %v9743_v44, 16  ;;  %v9792_v48 = vld [vmem:[%s9634_s12 + $0x5c] sm:$0x1] }
  0x2a   : > { %v495_v59 = vshrl.u32 %v9743_v44, 16  ;;  %v456_v61 = vsel %vm9669_vm4, %v451_v51, %v455_v32  ;;  %v484_v62 = vrot.slane %v482_v53, 4  ;;  %v487_v63 = vrot.slane %v485_v54, 5  ;;  %11741 = vst [vmem:[#allocation3_spill] sm:$0xff] %v9792_v48 }
  0x2b   : > { %v501_v0 = vshll.u32 %v9748_v49, 16  ;;  %v7188_v2 = vcombine.low %v446_v46, %v456_v61  ;;  %v470_v3 = vsel %vm9669_vm4, %v465_v56, %v469_v42  ;;  %v475_v4 = vrot.slane %v474_v57, 4 }
  0x2c   : > { %v493_v9 = vrot.slane %v491_v58, 5  ;;  %v488_v10 = vor.u32 %v487_v63, %v484_v62  ;;  %v497_v11 = vrot.slane %v495_v59, 4  ;;  %v506_v19 = vshrl.u32 %v9757_v60, 16  ;;  %v9802_v58 = vld [vmem:[%s9634_s12 + $0x64] sm:$0xf] }
  0x2d   : > { %v503_v12 = vrot.slane %v501_v0, 5  ;;  %8319 = vmatmul.mubr.msk.bf16.gmra.mrb[4].mxu0 %vm795_vm3, %v7188_v2  ;;  %8387 = vmatmul.mubr.msk.bf16.gmra.mrb[4].mxu1 %vm795_vm3, %v7188_v2  ;;  %v480_v20 = vsel %vm9669_vm4, %v475_v4, %v479_v52  ;;  %v509_v21 = vshll.u32 %v9757_v60, 16  ;;  %v515_v23 = vshll.u32 %v9763_v1, 16  ;;  %v9796_v52 = vld [vmem:[%s9634_s12 + $0x60] sm:$0xf] }
  0x2e   : > { %v519_v24 = vshrl.u32 %v9763_v1, 16  ;;  %v7189_v27 = vcombine.low %v470_v3, %v480_v20  ;;  %v489_v28 = vrot.slane %v488_v10, 4  ;;  %v498_v29 = vor.u32 %v497_v11, %v493_v9  ;;  %v9813_v11 = vld [vmem:[%s9634_s12 + $0x68] sm:$0x1]  ;;  %v9818_v20 = vld [vmem:[%s9634_s12 + $0x6c] sm:$0xf] }
  0x2f   : > { %v508_v32 = vrot.slane %v506_v19, 4  ;;  %v511_v34 = vrot.slane %v509_v21, 5  ;;  %v517_v37 = vrot.slane %v515_v23, 5  ;;  %v525_v39 = vshll.u32 %v9768_v18, 16  ;;  %11742 = vst [vmem:[#allocation4_spill] sm:$0xff] %v9813_v11 }
  0x30   : > { %v521_v38 = vrot.slane %v519_v24, 4  ;;  %8322 = vmatprep.mubr.msk.bf16.mxu0 %vm795_vm3, %v7189_v27  ;;  %8390 = vmatprep.mubr.msk.bf16.mxu1 %vm795_vm3, %v7189_v27  ;;  %v494_v17 = vsel %vm9669_vm4, %v489_v28, %v493_v9  ;;  %v499_v35 = vrot.slane %v498_v29, 4  ;;  %v530_v42 = vshrl.u32 %v9779_v26, 16  ;;  %v9821_v28 = vld [vmem:[%s9634_s12 + $0x70] sm:$0xf] }
  0x31   : > { %v533_v43 = vshll.u32 %v9779_v26, 16  ;;  %v512_v45 = vor.u32 %v511_v34, %v508_v32  ;;  %v527_v47 = vrot.slane %v525_v39, 5  ;;  %v539_v51 = vshll.u32 %v9782_v33, 16 }
  0x32   : > { %v522_v46 = vor.u32 %v521_v38, %v517_v37  ;;  %v504_v53 = vsel %vm9669_vm4, %v499_v35, %v503_v12  ;;  %v532_v54 = vrot.slane %v530_v42, 4  ;;  %v543_v57 = vshrl.u32 %v9782_v33, 16  ;;  %v9830_v35 = vld [vmem:[%s9634_s12 + $0x74] sm:$0x1] }
  0x33   : > { %v535_v56 = vrot.slane %v533_v43, 5  ;;  %v7190_v59 = vcombine.low %v494_v17, %v504_v53  ;;  %v513_v61 = vrot.slane %v512_v45, 4  ;;  %v541_v63 = vrot.slane %v539_v51, 5  ;;  %11743 = vst [vmem:[#allocation5_spill] sm:$0xff] %v9830_v35  ;;  %v9836_v51 = vld [vmem:[%s9634_s12 + $0x78] sm:$0xf] }
  0x34   : > { %v523_v62 = vrot.slane %v522_v46, 4  ;;  %v545_v2 = vrot.slane %v543_v57, 4  ;;  %v549_v3 = vshll.u32 %v9792_v48, 16  ;;  %v554_v4 = vshrl.u32 %v9796_v52, 16 }
  0x35   : > { %v536_v0 = vor.u32 %v535_v56, %v532_v54  ;;  %8323 = vmatmul.mubr.msk.bf16.gmra.mrb[8].mxu0 %vm795_vm3, %v7190_v59  ;;  %8391 = vmatmul.mubr.msk.bf16.gmra.mrb[8].mxu1 %vm795_vm3, %v7190_v59  ;;  %v518_v9 = vsel %vm9669_vm4, %v513_v61, %v517_v37  ;;  %v557_v12 = vshll.u32 %v9796_v52, 16  ;;  %v563_v19 = vshll.u32 %v9802_v58, 16 }
  0x36   : > { %v528_v10 = vsel %vm9669_vm4, %v523_v62, %v527_v47  ;;  %v546_v24 = vor.u32 %v545_v2, %v541_v63  ;;  %v551_v27 = vrot.slane %v549_v3, 5  ;;  %v556_v29 = vrot.slane %v554_v4, 4  ;;  %v9845_v2 = vld [vmem:[%s9634_s12 + $0x80] sm:$0x1] }
  0x37   : > { %v7191_v21 = vcombine.low %v518_v9, %v528_v10  ;;  %v537_v23 = vrot.slane %v536_v0, 4  ;;  %v559_v32 = vrot.slane %v557_v12, 5  ;;  %v565_v34 = vrot.slane %v563_v19, 5  ;;  %v9842_v0 = vld [vmem:[%s9634_s12 + $0x7c] sm:$0xf]  ;;  %11744 = vst [vmem:[#allocation6_spill] sm:$0xff] %v9845_v2 }
  0x38   : > { %v567_v37 = vshrl.u32 %v9802_v58, 16  ;;  %v547_v39 = vrot.slane %v546_v24, 4  ;;  %v573_v17 = vshll.u32 %v9813_v11, 16  ;;  %v578_v42 = vshrl.u32 %v9818_v20, 16  ;;  %v9850_v12 = vld [vmem:[%s9634_s12 + $0x84] sm:$0xf] }
  0x39   : > { %8326 = vmatprep.mubr.msk.bf16.mxu0 %vm795_vm3, %v7191_v21  ;;  %8394 = vmatprep.mubr.msk.bf16.mxu1 %vm795_vm3, %v7191_v21  ;;  %v542_v38 = vsel %vm9669_vm4, %v537_v23, %v541_v63  ;;  %v560_v43 = vor.u32 %v559_v32, %v556_v29  ;;  %v581_v46 = vshll.u32 %v9818_v20, 16  ;;  %v587_v47 = vshll.u32 %v9821_v28, 16 }
  0x3a   : > { %v569_v45 = vrot.slane %v567_v37, 4  ;;  %v552_v53 = vsel %vm9669_vm4, %v547_v39, %v551_v27  ;;  %v575_v54 = vrot.slane %v573_v17, 5  ;;  %v580_v56 = vrot.slane %v578_v42, 4  ;;  %v9858_v27 = vld [vmem:[%s9634_s12 + $0x88] sm:$0xf] }
  0x3b   : > { %v591_v57 = vshrl.u32 %v9821_v28, 16  ;;  %v7192_v59 = vcombine.low %v542_v38, %v552_v53  ;;  %v561_v61 = vrot.slane %v560_v43, 4  ;;  %v583_v63 = vrot.slane %v581_v46, 5  ;;  %v9865_v43 = vld [vmem:[%s9634_s12 + $0x8c] sm:$0x1] }
  0x3c   : > { %v570_v62 = vor.u32 %v569_v45, %v565_v34  ;;  %v589_v3 = vrot.slane %v587_v47, 5  ;;  %v597_v9 = vshll.u32 %v9830_v35, 16  ;;  %v602_v10 = vshrl.u32 %v9836_v51, 16  ;;  %11745 = vst [vmem:[#allocation7_spill] sm:$0xff] %v9865_v43  ;;  %v9944_v35 = vld [vmem:[%s9634_s12 + $0xbc] sm:$0x1] }
  0x3d   : > { %v593_v4 = vrot.slane %v591_v57, 4  ;;  %8327 = vmatmul.mubr.msk.bf16.gmra.mrb[12].mxu0 %vm795_vm3, %v7192_v59  ;;  %8395 = vmatmul.mubr.msk.bf16.gmra.mrb[12].mxu1 %vm795_vm3, %v7192_v59  ;;  %v566_v19 = vsel %vm9669_vm4, %v561_v61, %v565_v34  ;;  %v584_v23 = vor.u32 %v583_v63, %v580_v56  ;;  %v605_v24 = vshll.u32 %v9836_v51, 16  ;;  %v9869_v56 = vld [vmem:[%s9634_s12 + $0x90] sm:$0xf] }
  0x3e   : > { %v571_v21 = vrot.slane %v570_v62, 4  ;;  %v599_v32 = vrot.slane %v597_v9, 5  ;;  %v604_v37 = vrot.slane %v602_v10, 4  ;;  %v611_v38 = vshll.u32 %v9842_v0, 16  ;;  %v9875_v62 = vld [vmem:[%s9634_s12 + $0x94] sm:$0xf] }
  0x3f   : > { %v594_v29 = vor.u32 %v593_v4, %v589_v3  ;;  %v585_v17 = vrot.slane %v584_v23, 4  ;;  %v607_v42 = vrot.slane %v605_v24, 5  ;;  %v615_v34 = vshrl.u32 %v9842_v0, 16 }
  0x40   : > { %v576_v39 = vsel %vm9669_vm4, %v571_v21, %v575_v54  ;;  %v613_v47 = vrot.slane %v611_v38, 5  ;;  %v621_v53 = vshll.u32 %v9845_v2, 16  ;;  %v626_v54 = vshrl.u32 %v9850_v12, 16 }
  0x41   : > { %v7193_v45 = vcombine.low %v566_v19, %v576_v39  ;;  %v595_v46 = vrot.slane %v594_v29, 4  ;;  %v590_v57 = vsel %vm9669_vm4, %v585_v17, %v589_v3  ;;  %v608_v59 = vor.u32 %v607_v42, %v604_v37  ;;  %v9886_v39 = vld [vmem:[%s9634_s12 + $0x98] sm:$0x1]  ;;  %v9889_v17 = vld [vmem:[%s9634_s12 + $0x9c] sm:$0xf] }
  0x42   : > { %v617_v61 = vrot.slane %v615_v34, 4  ;;  %v623_v4 = vrot.slane %v621_v53, 5  ;;  %v629_v9 = vshll.u32 %v9850_v12, 16  ;;  %v635_v3 = vshll.u32 %v9858_v27, 16  ;;  %11746 = vst [vmem:[#allocation8_spill] sm:$0xff] %v9886_v39 }
  0x43   : > { %8330 = vmatprep.mubr.msk.bf16.mxu0 %vm795_vm3, %v7193_v45  ;;  %8398 = vmatprep.mubr.msk.bf16.mxu1 %vm795_vm3, %v7193_v45  ;;  %v600_v63 = vsel %vm9669_vm4, %v595_v46, %v599_v32  ;;  %v609_v19 = vrot.slane %v608_v59, 4  ;;  %v628_v23 = vrot.slane %v626_v54, 4  ;;  %v639_v37 = vshrl.u32 %v9858_v27, 16 }
  0x44   : > { %v7194_v10 = vcombine.low %v590_v57, %v600_v63  ;;  %v618_v21 = vor.u32 %v617_v61, %v613_v47  ;;  %v631_v24 = vrot.slane %v629_v9, 5  ;;  %v637_v29 = vrot.slane %v635_v3, 5 }
  0x45   : > { %v645_v38 = vshll.u32 %v9865_v43, 16  ;;  %v614_v32 = vsel %vm9669_vm4, %v609_v19, %v613_v47  ;;  %v650_v34 = vshrl.u32 %v9869_v56, 16  ;;  %v653_v45 = vshll.u32 %v9869_v56, 16  ;;  %v9902_v47 = vld [vmem:[%s9634_s12 + $0xa0] sm:$0xf] }
  0x46   : > { %8331 = vmatmul.mubr.msk.bf16.gmra.mrb[16].mxu0 %vm795_vm3, %v7194_v10  ;;  %8399 = vmatmul.mubr.msk.bf16.gmra.mrb[16].mxu1 %vm795_vm3, %v7194_v10  ;;  %v619_v42 = vrot.slane %v618_v21, 4  ;;  %v632_v46 = vor.u32 %v631_v24, %v628_v23  ;;  %v641_v53 = vrot.slane %v639_v37, 4  ;;  %v659_v59 = vshll.u32 %v9875_v62, 16  ;;  %v9905_v23 = vld [vmem:[%s9634_s12 + $0xa4] sm:$0x1] }
  0x47   : > { %v647_v57 = vrot.slane %v645_v38, 5  ;;  %v652_v54 = vrot.slane %v650_v34, 4  ;;  %v655_v63 = vrot.slane %v653_v45, 5  ;;  %v663_v9 = vshrl.u32 %v9875_v62, 16  ;;  %11747 = vst [vmem:[#allocation9_spill] sm:$0xff] %v9905_v23 }
  0x48   : > { %v624_v61 = vsel %vm9669_vm4, %v619_v42, %v623_v4  ;;  %v633_v10 = vrot.slane %v632_v46, 4  ;;  %v642_v19 = vor.u32 %v641_v53, %v637_v29  ;;  %v661_v21 = vrot.slane %v659_v59, 5  ;;  %v9910_v4 = vld [vmem:[%s9634_s12 + $0xa8] sm:$0xf]  ;;  %v9919_v46 = vld [vmem:[%s9634_s12 + $0xac] sm:$0xf] }
  0x49   : > { %v7195_v3 = vcombine.low %v614_v32, %v624_v61  ;;  %v656_v24 = vor.u32 %v655_v63, %v652_v54  ;;  %v665_v37 = vrot.slane %v663_v9, 4  ;;  %v669_v38 = vshll.u32 %v9886_v39, 16 }
  0x4a   : > { %v674_v40 = vshrl.u32 %v9889_v17, 16  ;;  %v638_v32 = vsel %vm9669_vm4, %v633_v10, %v637_v29  ;;  %v643_v42 = vrot.slane %v642_v19, 4  ;;  %v677_v34 = vshll.u32 %v9889_v17, 16  ;;  %v9925_v29 = vld [vmem:[%s9634_s12 + $0xb0] sm:$0x1] }
  0x4b   : > { %8334 = vmatprep.mubr.msk.bf16.mxu0 %vm795_vm3, %v7195_v3  ;;  %8402 = vmatprep.mubr.msk.bf16.mxu1 %vm795_vm3, %v7195_v3  ;;  %v683_v45 = vshll.u32 %v9902_v47, 16  ;;  %v657_v53 = vrot.slane %v656_v24, 4  ;;  %v666_v59 = vor.u32 %v665_v37, %v661_v21  ;;  %v671_v61 = vrot.slane %v669_v38, 5  ;;  %11748 = vst [vmem:[#allocation10_spill] sm:$0xff] %v9925_v29 }
  0x4c   : > { %v676_v54 = vrot.slane %v674_v40, 4  ;;  %v648_v63 = vsel %vm9669_vm4, %v643_v42, %v647_v57  ;;  %v679_v9 = vrot.slane %v677_v34, 5  ;;  %v687_v3 = vshrl.u32 %v9902_v47, 16 }
  0x4d   : > { %v685_v39 = vrot.slane %v683_v45, 5  ;;  %v7196_v10 = vcombine.low %v638_v32, %v648_v63  ;;  %v662_v19 = vsel %vm9669_vm4, %v657_v53, %v661_v21  ;;  %v667_v43 = vrot.slane %v666_v59, 4  ;;  %v338_v45 = vld [vmem:[%s9634_s12 + $0xb4] sm:$0xf] }
  0x4e   : > { %v693_v24 = vshll.u32 %v9905_v23, 16  ;;  %v680_v37 = vor.u32 %v679_v9, %v676_v54  ;;  %v689_v40 = vrot.slane %v687_v3, 4  ;;  %v698_v38 = vshrl.u32 %v9910_v4, 16  ;;  %v9940_v9 = vld [vmem:[%s9634_s12 + $0xb8] sm:$0xf] }
  0x4f   : > { %v701_v57 = vshll.u32 %v9910_v4, 16  ;;  %8335 = vmatmul.mubr.msk.bf16.gmra.mrb[20].mxu0 %vm795_vm3, %v7196_v10  ;;  %8403 = vmatmul.mubr.msk.bf16.gmra.mrb[20].mxu1 %vm795_vm3, %v7196_v10  ;;  %v672_v32 = vsel %vm9669_vm4, %v667_v43, %v671_v61  ;;  %v707_v21 = vshll.u32 %v9919_v46, 16  ;;  %v711_v34 = vshrl.u32 %v9919_v46, 16 }
  0x50   : > { %v695_v42 = vrot.slane %v693_v24, 5  ;;  %v7197_v53 = vcombine.low %v662_v19, %v672_v32  ;;  %v681_v59 = vrot.slane %v680_v37, 4  ;;  %v690_v54 = vor.u32 %v689_v40, %v685_v39 }
  0x51   : > { %v700_v63 = vrot.slane %v698_v38, 4  ;;  %v703_v3 = vrot.slane %v701_v57, 5  ;;  %v709_v23 = vrot.slane %v707_v21, 5  ;;  %v713_v2 = vrot.slane %v711_v34, 4 }
  0x52   : > { %v717_v10 = vshll.u32 %v9925_v29, 16  ;;  %8338 = vmatprep.mubr.msk.bf16.mxu0 %vm795_vm3, %v7197_v53  ;;  %8406 = vmatprep.mubr.msk.bf16.mxu1 %vm795_vm3, %v7197_v53  ;;  %v686_v43 = vsel %vm9669_vm4, %v681_v59, %v685_v39  ;;  %v691_v61 = vrot.slane %v690_v54, 4  ;;  %v722_v19 = vshrl.u32 %v338_v45, 16 }
  0x53   : > { %v725_v24 = vshll.u32 %v338_v45, 16  ;;  %v704_v37 = vor.u32 %v703_v3, %v700_v63  ;;  %v714_v40 = vor.u32 %v713_v2, %v709_v23  ;;  %v731_v57 = vshll.u32 %v9940_v9, 16 }
  0x54   : > { %v719_v38 = vrot.slane %v717_v10, 5  ;;  %v696_v32 = vsel %vm9669_vm4, %v691_v61, %v695_v42  ;;  %v724_v21 = vrot.slane %v722_v19, 4  ;;  %v735_v29 = vshrl.u32 %v9940_v9, 16 }
  0x55   : > { %v727_v34 = vrot.slane %v725_v24, 5  ;;  %v7198_v11 = vcombine.low %v686_v43, %v696_v32  ;;  %v705_v53 = vrot.slane %v704_v37, 4  ;;  %v715_v48 = vrot.slane %v714_v40, 4  ;;  %v1636_v32 = vld [vmem:[%s9634_s12 + $0x3c] sm:$0xe] }
  0x56   : > { %v733_v18 = vrot.slane %v731_v57, 5  ;;  %v737_v59 = vrot.slane %v735_v29, 4  ;;  %v741_v54 = vshll.u32 %v9944_v35, 16  ;;  %v9957_v2 = vcombine.low %v9648_v13, %v9651_v15 }
  0x57   : > { %v728_v39 = vor.u32 %v727_v34, %v724_v21  ;;  %v1694_v63 = vrot.slane %v9654_v16, 5  ;;  %8339 = vmatmul.mubr.msk.bf16.gmra.mrb[24].mxu0 %vm795_vm3, %v7198_v11  ;;  %8407 = vmatmul.mubr.msk.bf16.gmra.mrb[24].mxu1 %vm795_vm3, %v7198_v11  ;;  %v710_v42 = vsel %vm9669_vm4, %v705_v53, %v709_v23  ;;  %v720_v3 = vsel %vm9669_vm4, %v715_v48, %v719_v38  ;;  %v1632_v48 = vld [vmem:[%s9634_s12 + $0xc] sm:$0xe]  ;;  %v1637_v34 = vld [vmem:[%s9634_s12 + $0x48] sm:$0xe] }
  0x58   : > { %v7199_v29 = vcombine.low %v710_v42, %v720_v3  ;;  %v738_v43 = vor.u32 %v737_v59, %v733_v18  ;;  %v743_v61 = vrot.slane %v741_v54, 5  ;;  %v7217_v13 = vcombine.low %v9637_v6, %v9640_v7 }
  0x59   : > { %v729_v10 = vrot.slane %v728_v39, 4  ;;  %v9970_v16 = vcombine.low %v9704_v5, %v9712_v14  ;;  %v9974_v11 = vcombine.low %v9733_v41, %v9743_v44  ;;  %v9978_v23 = vcombine.low %v9757_v60, %v9763_v1  ;;  %v1638_v39 = vld [vmem:[%s9634_s12 + $0x54] sm:$0xe] }
  0x5a   : > { %8342 = vmatprep.mubr.msk.bf16.mxu0 %vm795_vm3, %v7199_v29  ;;  %8410 = vmatprep.mubr.msk.bf16.mxu1 %vm795_vm3, %v7199_v29  ;;  %v739_v7 = vrot.slane %v738_v43, 4  ;;  %v9987_v5 = vcombine.low %v9779_v26, %v9782_v33  ;;  %v9991_v41 = vcombine.low %v9796_v52, %v9802_v58  ;;  %v9995_v60 = vcombine.low %v9818_v20, %v9821_v28  ;;  %v10058_v43 = vld [vmem:[%s11719_s1 + $0x6] sm:$0x3] }
  0x5b   : > { %v734_v6 = vsel %vm9669_vm4, %v729_v10, %v733_v18  ;;  %v9999_v19 = vcombine.low %v9836_v51, %v9842_v0  ;;  %v10003_v18 = vcombine.low %v9850_v12, %v9858_v27  ;;  %v10007_v26 = vcombine.low %v9869_v56, %v9875_v62  ;;  %v1639_v10 = vld [vmem:[%s9634_s12 + $0x60] sm:$0xe]  ;;  %v11499_v56 = vld [vmem:[%s11721_s3] ss:$0 sm:$0xff] }
  0x5c   : > { %v744_v52 = vsel %vm9669_vm4, %v739_v7, %v743_v61  ;;  %v10013_v20 = vcombine.low %v9889_v17, %v9902_v47  ;;  %v10017_v51 = vcombine.low %v9910_v4, %v9919_v46  ;;  %v10020_v12 = vcombine.low %v338_v45, %v9940_v9  ;;  %v1635_v4 = vld [vmem:[%s9634_s12 + $0x30] sm:$0xe] }
  0x5d   : > { %v7200_v24 = vcombine.low %v734_v6, %v744_v52  ;;  %v7283_v37 = vrot.slane %v1632_v48, 9  ;;  %v11751_v17 = vrot.slane %v9651_v15, 5  ;;  %v7286_v53 = vrot.slane %v1635_v4, 9  ;;  %v11753_v6 = vld [vmem:[#allocation2_spill] sm:$0xff] }
  0x5e   : > { %v1893_v59 = vsel %vm844_vm0, %v9709_v8, 0  ;;  %v1712_v54 = vrot.slane %v9712_v14, 5  ;;  %v1715_v15 = vrot.slane %v9725_v25, 5  ;;  %v7287_v42 = vrot.slane %v1636_v32, 9  ;;  %v10063_v8 = vld [vmem:[%s11720_s2 + $0x6] sm:$0x3] }
  0x5f   : > { %v1693_v40 = vrot.slane %v11751_v17, 4  ;;  %8343 = vmatmul.mubr.msk.bf16.gmra.mrb[28].mxu0 %vm795_vm3, %v7200_v24  ;;  %8411 = vmatmul.mubr.msk.bf16.gmra.mrb[28].mxu1 %vm795_vm3, %v7200_v24  ;;  %v11752_v45 = vmov %v11751_v17  ;;  %v2091_v3 = vsel %vm844_vm0, %v9718_v22, 0  ;;  %v1719_v29 = vrot.slane %v9743_v44, 5  ;;  %v1641_v17 = vld [vmem:[%s9634_s12 + $0x78] sm:$0xe] }
  0x60   : > { %8348 = vmatprep.mubr.msk.bf16.mxu0 %vm795_vm3, %v7217_v13  ;;  %8416 = vmatprep.mubr.msk.bf16.mxu1 %vm795_vm3, %v7217_v13  ;;  %v1692_v38 = vsel %vm10023_vm7, %v7283_v37, %v11752_v45  ;;  %v1713_v14 = vsel %vm10023_vm7, %v7286_v53, %v1712_v54  ;;  %v1714_v22 = vrot.slane %v1712_v54, 4  ;;  %v1722_v25 = vrot.slane %v9748_v49, 5 }
  0x61   : > { %v1695_v57 = vsel %vm10023_vm7, %v1693_v40, %v1694_v63  ;;  %v7219_v63 = vcombine.low %v9665_v30, %v9675_v36  ;;  %v7288_v30 = vrot.slane %v1637_v34, 9  ;;  %v1640_v36 = vld [vmem:[%s9634_s12 + $0x6c] sm:$0xe]  ;;  %v1720_v44 = vsel %vm10023_vm7, %v7287_v42, %v1719_v29  ;;  %v11755_v34 = vld [vmem:[#allocation4_spill] sm:$0xff] }
  0x62   : > { %v10041_v21 = vcombine.low %v1692_v38, %v1695_v57  ;;  %v1721_v61 = vrot.slane %v1719_v29, 4  ;;  %v1726_v13 = vrot.slane %v9763_v1, 5  ;;  %v7220_v48 = vcombine.low %v9687_v50, %v9690_v55  ;;  %v11754_v40 = vld [vmem:[#allocation3_spill] sm:$0xff]  ;;  %v1642_v38 = vld [vmem:[%s9634_s12 + $0x84] sm:$0xe]  ;;  %v11756_v29 = vld [vmem:[#allocation5_spill] sm:$0xff] }
  0x63   : > { %v1716_v49 = vsel %vm10023_vm7, %v1714_v22, %v1715_v15  ;;  %v1729_v7 = vrot.slane %v11753_v6, 5  ;;  %v7289_v52 = vrot.slane %v1638_v39, 9  ;;  %v1733_v55 = vrot.slane %v9782_v33, 5  ;;  %v1643_v42 = vld [vmem:[%s9634_s12 + $0x90] sm:$0xe] }
  0x64   : > { %v10081_v24 = vcombine.low %v1713_v14, %v1716_v49  ;;  %v1723_v1 = vsel %vm10023_vm7, %v1721_v61, %v1722_v25  ;;  %v1728_v37 = vrot.slane %v1726_v13, 4  ;;  %v1736_v4 = vrot.slane %v11754_v40, 5  ;;  %v11757_v61 = vld [vmem:[#allocation6_spill] sm:$0xff] }
  0x65   : > { %v10090_v50 = vcombine.low %v1720_v44, %v1723_v1  ;;  %v7290_v45 = vrot.slane %v1639_v10, 9  ;;  %v1740_v32 = vrot.slane %v9802_v58, 5  ;;  %v1743_v53 = vrot.slane %v11755_v34, 5  ;;  %v1644_v58 = vld [vmem:[%s9634_s12 + $0x9c] sm:$0xe] }
  0x66   : > { %v1730_v57 = vsel %vm10023_vm7, %v1728_v37, %v1729_v7  ;;  %v7291_v39 = vrot.slane %v1640_v36, 9  ;;  %v1735_v54 = vrot.slane %v1733_v55, 4  ;;  %v1747_v15 = vrot.slane %v9821_v28, 5 }
  0x67   : > { %8349 = vmatmul.mubr.msk.bf16.vlgmr.msra.gmra.mrb[0].mxu0 %vm795_vm3, %v9957_v2  ;;  %8417 = vmatmul.mubr.msk.bf16.vlgmr.msra.gmra.mrb[0].mxu1 %vm795_vm3, %v9957_v2  ;;  %v1727_v2 = vsel %vm10023_vm7, %v7288_v30, %v1726_v13  ;;  %v1750_v10 = vrot.slane %v11756_v29, 5  ;;  %v7292_v14 = vrot.slane %v1641_v17, 9  ;;  %v1754_v36 = vrot.slane %v9842_v0, 5 }
  0x68   : > { %8449 = vmatpush3.bf16.msra.mxu0 %v1893_v59  ;;  %8483 = vmatpush3.bf16.msra.mxu1 %v2091_v3  ;;  %v10103_v33 = vcombine.low %v1727_v2, %v1730_v57  ;;  %v1734_v59 = vsel %vm10023_vm7, %v7289_v52, %v1733_v55  ;;  %v1741_v3 = vsel %vm10023_vm7, %v7290_v45, %v1740_v32  ;;  %v1749_v30 = vrot.slane %v1747_v15, 4  ;;  %v11758_v2 = vld [vmem:[#allocation7_spill] sm:$0xff]  ;;  %v11759_v45 = vld [vmem:[#allocation8_spill] sm:$0xff] }
  0x69   : > { %8352 = vmatprep.mubr.msk.bf16.mxu0 %vm795_vm3, %v7219_v63  ;;  %8420 = vmatprep.mubr.msk.bf16.mxu1 %vm795_vm3, %v7219_v63  ;;  %v1742_v63 = vrot.slane %v1740_v32, 4  ;;  %v1737_v22 = vsel %vm10023_vm7, %v1735_v54, %v1736_v4  ;;  %v1748_v25 = vsel %vm10023_vm7, %v7291_v39, %v1747_v15  ;;  %v1757_v13 = vrot.slane %v11757_v61, 5  ;;  %v1645_v55 = vld [vmem:[%s9634_s12 + $0xa8] sm:$0xe]  ;;  %v11760_v54 = vld [vmem:[#allocation9_spill] sm:$0xff] }
  0x6a   : > { %9442 = vmatprep.subr.msk.bf16.mxu0 %vm844_vm0, %v10058_v43  ;;  %9443 = vmatprep.subr.msk.bf16.mxu1 %vm844_vm0, %v10063_v8  ;;  %v10118_v44 = vcombine.low %v1734_v59, %v1737_v22  ;;  %v7293_v49 = vrot.slane %v1642_v38, 9  ;;  %v1751_v7 = vsel %vm10023_vm7, %v1749_v30, %v1750_v10  ;;  %v1755_v0 = vsel %vm10023_vm7, %v7292_v14, %v1754_v36  ;;  %v11761_v14 = vld [vmem:[#allocation10_spill] sm:$0xff] }
  0x6b   : > { %v1744_v28 = vsel %vm10023_vm7, %v1742_v63, %v1743_v53  ;;  %v1756_v52 = vrot.slane %v1754_v36, 4  ;;  %v10135_v1 = vcombine.low %v1748_v25, %v1751_v7  ;;  %v1764_v37 = vrot.slane %v11758_v2, 5  ;;  %v1646_v53 = vld [vmem:[%s9634_s12 + $0xb4] sm:$0xe]  ;;  %v9529_v2 = vld [vmem:[%s9634_s12 + $0x1c] sm:$0xf] }
  0x6c   : > { %v10125_v6 = vcombine.low %v1741_v3, %v1744_v28  ;;  %v7294_v17 = vrot.slane %v1643_v42, 9  ;;  %v1768_v4 = vrot.slane %v9875_v62, 5  ;;  %v1771_v38 = vrot.slane %v11759_v45, 5 }
  0x6d   : > { %v1758_v40 = vsel %vm10023_vm7, %v1756_v52, %v1757_v13  ;;  %v7295_v57 = vrot.slane %v1644_v58, 9  ;;  %v1778_v15 = vrot.slane %v11760_v54, 5  ;;  %v7296_v42 = vrot.slane %v1645_v55, 9 }
  0x6e   : > { %v10144_v32 = vcombine.low %v1755_v0, %v1758_v40  ;;  %v1769_v39 = vsel %vm10023_vm7, %v7294_v17, %v1768_v4  ;;  %v1770_v59 = vrot.slane %v1768_v4, 4  ;;  %v1782_v29 = vrot.slane %v9919_v46, 5  ;;  %v1633_v17 = vld [vmem:[%s9634_s12 + $0x18] sm:$0xe]  ;;  %v9530_v4 = vld [vmem:[%s9634_s12 + $0x20] sm:$0x1] }
  0x6f   : > { %8353 = vmatmul.mubr.msk.bf16.gmra.mrb[4].mxu0 %vm795_vm3, %v7220_v48  ;;  %8421 = vmatmul.mubr.msk.bf16.gmra.mrb[4].mxu1 %vm795_vm3, %v7220_v48  ;;  %v1761_v48 = vrot.slane %v9858_v27, 5  ;;  %v1775_v27 = vrot.slane %v9902_v47, 5  ;;  %v1785_v58 = vrot.slane %v11761_v14, 5  ;;  %v7297_v22 = vrot.slane %v1646_v53, 9 }
  0x70   : > { %8356 = vmatprep.mubr.msk.bf16.mxu0 %vm795_vm3, %v9970_v16  ;;  %8424 = vmatprep.mubr.msk.bf16.mxu1 %vm795_vm3, %v9970_v16  ;;  %v1772_v47 = vsel %vm10023_vm7, %v1770_v59, %v1771_v38  ;;  %v1783_v36 = vsel %vm10023_vm7, %v7296_v42, %v1782_v29  ;;  %v1784_v28 = vrot.slane %v1782_v29, 4  ;;  %v1789_v61 = vrot.slane %v9940_v9, 5  ;;  %v7478_v42 = vld [vmem:[%s11719_s1 + $0x8] sm:$0x3]  ;;  %v10348_v29 = vld [vmem:[%s9634_s12 + $0x4c] sm:$0xf] }
  0x71   : > { %v1762_v16 = vsel %vm10023_vm7, %v7293_v49, %v1761_v48  ;;  %v1763_v34 = vrot.slane %v1761_v48, 4  ;;  %v1776_v3 = vsel %vm10023_vm7, %v7295_v57, %v1775_v27  ;;  %v1777_v63 = vrot.slane %v1775_v27, 4  ;;  %v1634_v57 = vld [vmem:[%s9634_s12 + $0x24] sm:$0xe] }
  0x72   : > { %v10163_v25 = vcombine.low %v1769_v39, %v1772_v47  ;;  %v1792_v13 = vrot.slane %v9944_v35, 5  ;;  %v1786_v49 = vsel %vm10023_vm7, %v1784_v28, %v1785_v58  ;;  %v1791_v0 = vrot.slane %v1789_v61, 4  ;;  %v9532_v39 = vld [vmem:[%s9634_s12 + $0x2c] sm:$0x1]  ;;  %v7533_v47 = vld [vmem:[%s9634_s12 + $0x48] sm:$0xe] }
  0x73   : > { %v1765_v62 = vsel %vm10023_vm7, %v1763_v34, %v1764_v37  ;;  %v1779_v30 = vsel %vm10023_vm7, %v1777_v63, %v1778_v15  ;;  %v10183_v7 = vcombine.low %v1783_v36, %v1786_v49  ;;  %v1698_v37 = vrot.slane %v9529_v2, 5  ;;  %v9499_v63 = vld [vmem:[%s9634_s12 + $0x3c] sm:$0xff]   ;;  %v9501_v28 = vld [vmem:[%s9634_s12 + $0x54] sm:$0xff]   ;;  %v10372_v49 = vld [vmem:[%s9634_s12 + $0x68] sm:$0x1] }
  0x74   : > { %v10158_v10 = vcombine.low %v1762_v16, %v1765_v62  ;;  %v10173_v46 = vcombine.low %v1776_v3, %v1779_v30  ;;  %v1793_v9 = vsel %vm10023_vm7, %v1791_v0, %v1792_v13  ;;  %v1701_v45 = vrot.slane %v9530_v4, 5  ;;  %v7511_v62 = vld [vmem:[%s11720_s2 + $0x8] sm:$0x3]  ;;  %v9498_v3 = vld [vmem:[%s9634_s12 + $0x30] sm:$0xff]   ;;  %v10369_v13 = vld [vmem:[%s9634_s12 + $0x64] sm:$0xf] }
  0x75   : > { %v1700_v40 = vrot.slane %v1698_v37, 4  ;;  %v7285_v27 = vrot.slane %v1634_v57, 9  ;;  %v1708_v59 = vrot.slane %v9532_v39, 5  ;;  %v2651_v54 = vsel %vm844_vm0, %v10063_v8, 0  ;;  %v9500_v30 = vld [vmem:[%s9634_s12 + $0x48] sm:$0xff]  }
  0x76   : > { %v3871_v14 = vrot.slane %v10348_v29, 5  ;;  %v3888_v0 = vrot.slane %v10372_v49, 5 }
  0x77   : > { %8357 = vmatmul.mubr.msk.bf16.gmra.mrb[8].mxu0 %vm795_vm3, %v9974_v11  ;;  %8425 = vmatmul.mubr.msk.bf16.gmra.mrb[8].mxu1 %vm795_vm3, %v9974_v11  ;;  %v1790_v11 = vsel %vm10023_vm7, %v7297_v22, %v1789_v61  ;;  %v1702_v34 = vsel %vm10023_vm7, %v1700_v40, %v1701_v45  ;;  %v7549_v22 = vrot.slane %v7533_v47, 9  ;;  %v7537_v45 = vld [vmem:[%s9634_s12 + $0x78] sm:$0xe] }
  0x78   : > { %8360 = vmatprep.mubr.msk.bf16.mxu0 %vm795_vm3, %v9978_v23  ;;  %8428 = vmatprep.mubr.msk.bf16.mxu1 %vm795_vm3, %v9978_v23  ;;  %v10189_v35 = vcombine.low %v1790_v11, %v1793_v9  ;;  %v9527_v23 = vld [vmem:[%s9634_s12 + $0x4] sm:$0xf]  ;;  %v3885_v11 = vrot.slane %v10369_v13, 5  ;;  %v7553_v57 = vrot.slane %v7537_v45, 9  ;;  %v10458_v45 = vld [vmem:[%s9634_s12 + $0x34] sm:$0xf] }
  0x79   : > { %v3872_v36 = vsel %vm10023_vm7, %v7549_v22, %v3871_v14  ;;  %v10437_v22 = vld [vmem:[%s9634_s12 + $0x98] sm:$0x1] }
  0x7f   : > { %8361 = vmatmul.mubr.msk.bf16.gmra.mrb[12].mxu0 %vm795_vm3, %v9987_v5  ;;  %8429 = vmatmul.mubr.msk.bf16.gmra.mrb[12].mxu1 %vm795_vm3, %v9987_v5  ;;  %v1684_v5 = vrot.slane %v9527_v23, 5  ;;  %v9502_v23 = vld [vmem:[%s9634_s12 + $0x60] sm:$0xff]  }
  0x80   : > { %8364 = vmatprep.mubr.msk.bf16.mxu0 %vm795_vm3, %v9991_v41  ;;  %8432 = vmatprep.mubr.msk.bf16.mxu1 %vm795_vm3, %v9991_v41  ;;  %v1631_v41 = vld [vmem:[%s9634_s12] sm:$0xe] }
  0x81   : > { %v7282_v52 = vrot.slane %v1631_v41, 9  ;;  %v1686_v48 = vrot.slane %v1684_v5, 4 }
  0x87   : > { %8365 = vmatmul.mubr.msk.bf16.gmra.mrb[16].mxu0 %vm795_vm3, %v9995_v60  ;;  %8433 = vmatmul.mubr.msk.bf16.gmra.mrb[16].mxu1 %vm795_vm3, %v9995_v60  ;;  %v9528_v60 = vld [vmem:[%s9634_s12 + $0x8] sm:$0x1] }
  0x88   : > { %8368 = vmatprep.mubr.msk.bf16.mxu0 %vm795_vm3, %v9999_v19  ;;  %8436 = vmatprep.mubr.msk.bf16.mxu1 %vm795_vm3, %v9999_v19  ;;  %v1687_v19 = vrot.slane %v9528_v60, 5  ;;  %v9503_v60 = vld [vmem:[%s9634_s12 + $0x6c] sm:$0xff]  }
  0x8f   : > { %8369 = vmatmul.mubr.msk.bf16.gmra.mrb[20].mxu0 %vm795_vm3, %v10003_v18  ;;  %8437 = vmatmul.mubr.msk.bf16.gmra.mrb[20].mxu1 %vm795_vm3, %v10003_v18  ;;  %v1685_v18 = vsel %vm10023_vm7, %v7282_v52, %v1684_v5  ;;  %v7430_v5 = vld [vmem:[%s9634_s12 + $0xc] sm:$0xf] }
  0x90   : > { %8372 = vmatprep.mubr.msk.bf16.mxu0 %vm795_vm3, %v10007_v26  ;;  %8440 = vmatprep.mubr.msk.bf16.mxu1 %vm795_vm3, %v10007_v26  ;;  %v1688_v26 = vsel %vm10023_vm7, %v1686_v48, %v1687_v19  ;;  %v10385_v19 = vld [vmem:[%s9634_s12 + $0x10] sm:$0xf]  ;;  %v7433_v48 = vld [vmem:[%s9634_s12 + $0x18] sm:$0xf]  ;;  %v2898_v2 = vshll.u32 %v7430_v5, 16 }
  0x91   : > { %v7299_v55 = vcombine.low %v1685_v18, %v1688_v26  ;;  %v2895_v26 = vshrl.u32 %v7430_v5, 16  ;;  %v2919_v40 = vshrl.u32 %v7433_v48, 16  ;;  %v2922_v4 = vshll.u32 %v7433_v48, 16 }
  0x92   : > { %v2900_v39 = vrot.slane %v2898_v2, 5 }
  0x97   : > { %8373 = vmatmul.mubr.msk.bf16.gmra.mrb[24].mxu0 %vm795_vm3, %v10013_v20  ;;  %8441 = vmatmul.mubr.msk.bf16.gmra.mrb[24].mxu1 %vm795_vm3, %v10013_v20  ;;  %v7284_v20 = vrot.slane %v1633_v17, 9  ;;  %v2908_v17 = vshrl.u32 %v10385_v19, 16 }
  0x98   : > { %8376 = vmatprep.mubr.msk.bf16.mxu0 %vm795_vm3, %v10017_v51  ;;  %8444 = vmatprep.mubr.msk.bf16.mxu1 %vm795_vm3, %v10017_v51  ;;  %v9531_v51 = vld [vmem:[%s9634_s12 + $0x28] sm:$0xf] }
  0x99   : > { %v1705_v38 = vrot.slane %v9531_v51, 5  ;;  %v1699_v16 = vsel %vm10023_vm7, %v7284_v20, %v1698_v37  ;;  %v2904_v37 = vshll.u32 %v10385_v19, 16  ;;  %v10400_v20 = vld [vmem:[%s9634_s12 + $0x80] sm:$0x1] }
  0x9a   : > { %v7301_v15 = vcombine.low %v1699_v16, %v1702_v34  ;;  %v2897_v16 = vrot.slane %v2895_v26, 4  ;;  %v10408_v34 = vld [vmem:[%s9634_s12 + $0x1c] sm:$0xf] }
  0x9b   : > { %v1707_v53 = vrot.slane %v1705_v38, 4 }
  0x9d   : > { %v1709_v8 = vsel %vm10023_vm7, %v1707_v53, %v1708_v59  ;;  %v9504_v53 = vld [vmem:[%s9634_s12 + $0x78] sm:$0xff]   ;;  %v10411_v59 = vrot.slane %v2904_v37, 5 }
  0x9e   : > { %v9507_v37 = vld [vmem:[%s9634_s12 + $0x9c] sm:$0xff]  }
  0x9f   : > { %8377 = vmatmul.mubr.msk.bf16.gmra.mrb[28].mxu0 %vm795_vm3, %v10020_v12  ;;  %8445 = vmatmul.mubr.msk.bf16.gmra.mrb[28].mxu1 %vm795_vm3, %v10020_v12  ;;  %v2453_v12 = vsel %vm844_vm0, %v10058_v43, 0  ;;  %v1706_v43 = vsel %vm10023_vm7, %v7285_v27, %v1705_v38  ;;  %v3902_v38 = vrot.slane %v10400_v20, 5 }
  0xa0   : > { %8450 = vmatprep.mubr.msk.bf16.mxu0 %vm795_vm3, %v7299_v55  ;;  %8484 = vmatprep.mubr.msk.bf16.mxu1 %vm795_vm3, %v7299_v55  ;;  %v10397_v55 = vld [vmem:[%s9634_s12 + $0x7c] sm:$0xf] }
  0xa1   : > { %v3899_v51 = vrot.slane %v10397_v55, 5 }
  0xa3   : > { %v3901_v27 = vrot.slane %v3899_v51, 4 }
  0xa7   : > { %8451 = vmatmul.mubr.msk.bf16.vlgmr.msra.gmra.mrb[0].mxu0 %vm795_vm3, %v10041_v21  ;;  %8485 = vmatmul.mubr.msk.bf16.vlgmr.msra.gmra.mrb[0].mxu1 %vm795_vm3, %v10041_v21  ;;  %v7302_v21 = vcombine.low %v1706_v43, %v1709_v8  ;;  %v2924_v43 = vrot.slane %v2922_v4, 5  ;;  %v3903_v8 = vsel %vm10023_vm7, %v3901_v27, %v3902_v38 }
  0xa8   : > { %8517 = vmatpush3.bf16.msra.mxu0 %v2453_v12  ;;  %8551 = vmatpush3.bf16.msra.mxu1 %v2651_v54  ;;  %v2910_v12 = vrot.slane %v2908_v17, 4  ;;  %v7436_v54 = vld [vmem:[%s9634_s12 + $0x24] sm:$0xf] }
  0xa9   : > { %8454 = vmatprep.mubr.msk.bf16.mxu0 %vm795_vm3, %v7301_v15  ;;  %8488 = vmatprep.mubr.msk.bf16.mxu1 %vm795_vm3, %v7301_v15  ;;  %v3900_v15 = vsel %vm10023_vm7, %v7553_v57, %v3899_v51 }
  0xaa   : > { %9444 = vmatprep.subr.msk.bf16.mxu0 %vm844_vm0, %v7478_v42  ;;  %9445 = vmatprep.subr.msk.bf16.mxu1 %vm844_vm0, %v7511_v62  ;;  %v2911_v47 = vor.u32 %v2910_v12, %v10411_v59 }
  0xaf   : > { %8455 = vmatmul.mubr.msk.bf16.gmra.mrb[4].mxu0 %vm795_vm3, %v7302_v21  ;;  %8489 = vmatmul.mubr.msk.bf16.gmra.mrb[4].mxu1 %vm795_vm3, %v7302_v21  ;;  %v10420_v21 = vld [vmem:[%s9634_s12 + $0x14] sm:$0x1] }
  0xb0   : > { %8458 = vmatprep.mubr.msk.bf16.mxu0 %vm795_vm3, %v10081_v24  ;;  %8492 = vmatprep.mubr.msk.bf16.mxu1 %vm795_vm3, %v10081_v24  ;;  %v9495_v24 = vld [vmem:[%s9634_s12 + $0xc] sm:$0xff]  }
  0xb7   : > { %8459 = vmatmul.mubr.msk.bf16.gmra.mrb[8].mxu0 %vm795_vm3, %v10090_v50  ;;  %8493 = vmatmul.mubr.msk.bf16.gmra.mrb[8].mxu1 %vm795_vm3, %v10090_v50  ;;  %v9496_v50 = vld [vmem:[%s9634_s12 + $0x18] sm:$0xff]  }
  0xb8   : > { %8462 = vmatprep.mubr.msk.bf16.mxu0 %vm795_vm3, %v10103_v33  ;;  %8496 = vmatprep.mubr.msk.bf16.mxu1 %vm795_vm3, %v10103_v33  ;;  %v3377_v33 = vsel %vm844_vm0, %v7478_v42, 0  ;;  %v9505_v42 = vld [vmem:[%s9634_s12 + $0x84] sm:$0xff]  }
  0xbf   : > { %8463 = vmatmul.mubr.msk.bf16.gmra.mrb[12].mxu0 %vm795_vm3, %v10118_v44  ;;  %8497 = vmatmul.mubr.msk.bf16.gmra.mrb[12].mxu1 %vm795_vm3, %v10118_v44  ;;  %v3575_v44 = vsel %vm844_vm0, %v7511_v62, 0  ;;  %v2921_v62 = vrot.slane %v2919_v40, 4  ;;  %v2912_v40 = vrot.slane %v2911_v47, 4 }
  0xc0   : > { %8466 = vmatprep.mubr.msk.bf16.mxu0 %vm795_vm3, %v10125_v6  ;;  %8500 = vmatprep.mubr.msk.bf16.mxu1 %vm795_vm3, %v10125_v6  ;;  %v9497_v6 = vld [vmem:[%s9634_s12 + $0x24] sm:$0xff]  }
  0xc7   : > { %8467 = vmatmul.mubr.msk.bf16.gmra.mrb[16].mxu0 %vm795_vm3, %v10135_v1  ;;  %8501 = vmatmul.mubr.msk.bf16.gmra.mrb[16].mxu1 %vm795_vm3, %v10135_v1  ;;  %v10330_v1 = vld [vmem:[%s11719_s1 + $0xa] sm:$0x3] }
  0xc8   : > { %8470 = vmatprep.mubr.msk.bf16.mxu0 %vm795_vm3, %v10144_v32  ;;  %8504 = vmatprep.mubr.msk.bf16.mxu1 %vm795_vm3, %v10144_v32  ;;  %v10335_v32 = vld [vmem:[%s11720_s2 + $0xa] sm:$0x3] }
  0xcf   : > { %8471 = vmatmul.mubr.msk.bf16.gmra.mrb[20].mxu0 %vm795_vm3, %v10158_v10  ;;  %8505 = vmatmul.mubr.msk.bf16.gmra.mrb[20].mxu1 %vm795_vm3, %v10158_v10  ;;  %v10351_v10 = vld [vmem:[%s9634_s12 + $0x50] sm:$0x1] }
  0xd0   : > { %8474 = vmatprep.mubr.msk.bf16.mxu0 %vm795_vm3, %v10163_v25  ;;  %8508 = vmatprep.mubr.msk.bf16.mxu1 %vm795_vm3, %v10163_v25  ;;  %v3874_v58 = vrot.slane %v10351_v10, 5  ;;  %v3873_v25 = vrot.slane %v3871_v14, 4  ;;  %v7439_v14 = vld [vmem:[%s9634_s12 + $0x30] sm:$0xf] }
  0xd1   : > { %v2967_v5 = vshrl.u32 %v7439_v14, 16 }
  0xd7   : > { %8475 = vmatmul.mubr.msk.bf16.gmra.mrb[24].mxu0 %vm795_vm3, %v10173_v46  ;;  %8509 = vmatmul.mubr.msk.bf16.gmra.mrb[24].mxu1 %vm795_vm3, %v10173_v46  ;;  %v3875_v46 = vsel %vm10023_vm7, %v3873_v25, %v3874_v58  ;;  %v10434_v58 = vld [vmem:[%s9634_s12 + $0x94] sm:$0xf]  ;;  %v2914_v25 = vshll.u32 %v10420_v21, 16 }
  0xd8   : > { %8478 = vmatprep.mubr.msk.bf16.mxu0 %vm795_vm3, %v10183_v7  ;;  %8512 = vmatprep.mubr.msk.bf16.mxu1 %vm795_vm3, %v10183_v7  ;;  %v10364_v61 = vcombine.low %v3872_v36, %v3875_v46  ;;  %v7535_v7 = vld [vmem:[%s9634_s12 + $0x60] sm:$0xe]  ;;  %v7539_v36 = vld [vmem:[%s9634_s12 + $0x90] sm:$0xe]  ;;  %v3916_v46 = vrot.slane %v10437_v22, 5 }
  0xd9   : > { %v7551_v9 = vrot.slane %v7535_v7, 9  ;;  %v10446_v7 = vld [vmem:[%s9634_s12 + $0x20] sm:$0x1]  ;;  %v2916_v38 = vrot.slane %v2914_v25, 5 }
  0xda   : > { %v2938_v4 = vshll.u32 %v10446_v7, 16 }
  0xdb   : > { %v3886_v41 = vsel %vm10023_vm7, %v7551_v9, %v3885_v11 }
  0xdf   : > { %8479 = vmatmul.mubr.msk.bf16.gmra.mrb[28].mxu0 %vm795_vm3, %v10189_v35  ;;  %8513 = vmatmul.mubr.msk.bf16.gmra.mrb[28].mxu1 %vm795_vm3, %v10189_v35  ;;  %v3887_v35 = vrot.slane %v3885_v11, 4 }
  0xe0   : > { %8518 = vmatprep.mubr.msk.bf16.mxu0 %vm795_vm3, %v9495_v24  ;;  %8552 = vmatprep.mubr.msk.bf16.mxu1 %vm795_vm3, %v9495_v24  ;;  %v2928_v24 = vshll.u32 %v10408_v34, 16 }
  0xe1   : > { %v3889_v52 = vsel %vm10023_vm7, %v3887_v35, %v3888_v0  ;;  %v7555_v35 = vrot.slane %v7539_v36, 9 }
  0xe2   : > { %v10390_v18 = vcombine.low %v3886_v41, %v3889_v52  ;;  %v10448_v11 = vrot.slane %v2928_v24, 5  ;;  %v2970_v41 = vshll.u32 %v7439_v14, 16  ;;  %v9506_v52 = vld [vmem:[%s9634_s12 + $0x90] sm:$0xff]   ;;  %v2917_v14 = vsel %vm9669_vm4, %v2912_v40, %v2916_v38 }
  0xe3   : > { %v10480_v24 = vld [vmem:[%s9634_s12 + $0xb0] sm:$0x1] }
  0xe4   : > { %v3930_v47 = vrot.slane %v10480_v24, 5 }
  0xe7   : > { %8519 = vmatmul.mubr.msk.bf16.vlgmr.msra.gmra.mrb[0].mxu0 %vm795_vm3, %v9496_v50  ;;  %8553 = vmatmul.mubr.msk.bf16.vlgmr.msra.gmra.mrb[0].mxu1 %vm795_vm3, %v9496_v50  ;;  %v2932_v50 = vshrl.u32 %v10408_v34, 16 }
  0xe8   : > { %8585 = vmatpush3.bf16.msra.mxu0 %v3377_v33  ;;  %8619 = vmatpush3.bf16.msra.mxu1 %v3575_v44  ;;  %v10424_v33 = vcombine.low %v3900_v15, %v3903_v8  ;;  %v10427_v44 = vld [vmem:[%s9634_s12 + $0x28] sm:$0xf]  ;;  %v2972_v15 = vrot.slane %v2970_v41, 5  ;;  %v10477_v8 = vld [vmem:[%s9634_s12 + $0xac] sm:$0xf] }
  0xe9   : > { %8522 = vmatprep.mubr.msk.bf16.mxu0 %vm795_vm3, %v9497_v6  ;;  %8556 = vmatprep.mubr.msk.bf16.mxu1 %vm795_vm3, %v9497_v6  ;;  %v2943_v6 = vshrl.u32 %v7436_v54, 16  ;;  %v2934_v0 = vrot.slane %v2932_v50, 4  ;;  %v2952_v9 = vshll.u32 %v10427_v44, 16  ;;  %v7442_v41 = vld [vmem:[%s9634_s12 + $0x3c] sm:$0xf] }
  0xea   : > { %9446 = vmatprep.subr.msk.bf16.mxu0 %vm844_vm0, %v10330_v1  ;;  %9447 = vmatprep.subr.msk.bf16.mxu1 %vm844_vm0, %v10335_v32 }
  0xeb   : > { %v2945_v48 = vrot.slane %v2943_v6, 4  ;;  %v10487_v6 = vrot.slane %v2938_v4, 5 }
  0xef   : > { %8523 = vmatmul.mubr.msk.bf16.gmra.mrb[4].mxu0 %vm795_vm3, %v9498_v3  ;;  %8557 = vmatmul.mubr.msk.bf16.gmra.mrb[4].mxu1 %vm795_vm3, %v9498_v3  ;;  %v2946_v3 = vshll.u32 %v7436_v54, 16  ;;  %v2969_v54 = vrot.slane %v2967_v5, 4 }
  0xf0   : > { %8526 = vmatprep.mubr.msk.bf16.mxu0 %vm795_vm3, %v9499_v63  ;;  %8560 = vmatprep.mubr.msk.bf16.mxu1 %vm795_vm3, %v9499_v63  ;;  %v2901_v63 = vor.u32 %v2900_v39, %v2897_v16  ;;  %v2935_v16 = vor.u32 %v2934_v0, %v10448_v11  ;;  %v10470_v39 = vrot.slane %v2952_v9, 5  ;;  %v9508_v9 = vld [vmem:[%s9634_s12 + $0xa8] sm:$0xff]  }
  0xf1   : > { %v2948_v26 = vrot.slane %v2946_v3, 5  ;;  %v7541_v3 = vld [vmem:[%s9634_s12 + $0xa8] sm:$0xe] }
  0xf2   : > { %v2902_v17 = vrot.slane %v2901_v63, 4  ;;  %v3927_v63 = vrot.slane %v10477_v8, 5  ;;  %v10494_v25 = vrot.slane %v2935_v16, 4  ;;  %v7557_v36 = vrot.slane %v7541_v3, 9 }
  0xf4   : > { %v2907_v50 = vsel %vm9669_vm4, %v2902_v17, %v10411_v59  ;;  %v3929_v0 = vrot.slane %v3927_v63, 4  ;;  %v2941_v17 = vsel %vm9669_vm4, %v10494_v25, %v10487_v6  ;;  %v10554_v25 = vld [vmem:[%s9634_s12 + $0x44] sm:$0x1] }
  0xf7   : > { %8527 = vmatmul.mubr.msk.bf16.gmra.mrb[8].mxu0 %vm795_vm3, %v9500_v30  ;;  %8561 = vmatmul.mubr.msk.bf16.gmra.mrb[8].mxu1 %vm795_vm3, %v9500_v30  ;;  %v2925_v30 = vor.u32 %v2924_v43, %v2921_v62  ;;  %v2976_v62 = vshll.u32 %v10458_v45, 16  ;;  %v2980_v43 = vshrl.u32 %v10458_v45, 16 }
  0xf8   : > { %8530 = vmatprep.mubr.msk.bf16.mxu0 %vm795_vm3, %v9501_v28  ;;  %8564 = vmatprep.mubr.msk.bf16.mxu1 %vm795_vm3, %v9501_v28  ;;  %v3913_v28 = vrot.slane %v10434_v58, 5 }
  0xf9   : > { %v10462_v57 = vrot.slane %v2925_v30, 4  ;;  %v2982_v5 = vrot.slane %v2980_v43, 4  ;;  %v10541_v43 = vld [vmem:[%s9634_s12 + $0xc4] sm:$0xf] }
  0xfa   : > { %v3914_v2 = vsel %vm10023_vm7, %v7555_v35, %v3913_v28 }
  0xff   : > { %8531 = vmatmul.mubr.msk.bf16.gmra.mrb[12].mxu0 %vm795_vm3, %v9502_v23  ;;  %8565 = vmatmul.mubr.msk.bf16.gmra.mrb[12].mxu1 %vm795_vm3, %v9502_v23  ;;  %v2956_v23 = vshrl.u32 %v10427_v44, 16 }
 0x100   : > { %8534 = vmatprep.mubr.msk.bf16.mxu0 %vm795_vm3, %v9503_v60  ;;  %8568 = vmatprep.mubr.msk.bf16.mxu1 %vm795_vm3, %v9503_v60  ;;  %v3915_v60 = vrot.slane %v3913_v28, 4  ;;  %v10499_v28 = vld [vmem:[%s9634_s12 + $0x38] sm:$0x1] }
 0x101   : > { %v2958_v12 = vrot.slane %v2956_v23, 4  ;;  %v10504_v23 = vrot.slane %v2976_v62, 5  ;;  %v2986_v4 = vshll.u32 %v10499_v28, 16 }
 0x102   : > { %v3917_v51 = vsel %vm10023_vm7, %v3915_v60, %v3916_v46  ;;  %v2973_v46 = vor.u32 %v2972_v15, %v2969_v54  ;;  %v3928_v60 = vsel %vm10023_vm7, %v7557_v36, %v3927_v63  ;;  %v7543_v63 = vld [vmem:[%s9634_s12 + $0xc0] sm:$0xe]  ;;  %v3028_v36 = vshrl.u32 %v10348_v29, 16 }
 0x103   : > { %v10465_v27 = vcombine.low %v3914_v2, %v3917_v51  ;;  %v2959_v59 = vor.u32 %v2958_v12, %v10470_v39  ;;  %v10517_v2 = vld [vmem:[%s9634_s12 + $0x40] sm:$0xf]  ;;  %v7445_v51 = vld [vmem:[%s9634_s12 + $0x48] sm:$0xf]  ;;  %v2994_v12 = vshll.u32 %v7442_v41, 16  ;;  %v2983_v15 = vor.u32 %v2982_v5, %v10504_v23 }
 0x104   : > { %v3004_v62 = vshrl.u32 %v10517_v2, 16  ;;  %v3015_v6 = vshrl.u32 %v7445_v51, 16  ;;  %v3018_v3 = vshll.u32 %v7445_v51, 16 }
 0x105   : > { %11762 = vst [vmem:[#allocation2_spill] sm:$0xff] %v10465_v27  ;;  %v2960_v16 = vrot.slane %v2959_v59, 4  ;;  %v7559_v59 = vrot.slane %v7543_v63, 9 }
 0x106   : > { %v3017_v63 = vrot.slane %v3015_v6, 4  ;;  %v4045_v6 = vsel %vm844_vm0, %v10330_v1, 0 }
 0x107   : > { %8535 = vmatmul.mubr.msk.bf16.gmra.mrb[16].mxu0 %vm795_vm3, %v9504_v53  ;;  %8569 = vmatmul.mubr.msk.bf16.gmra.mrb[16].mxu1 %vm795_vm3, %v9504_v53  ;;  %v10468_v53 = vld [vmem:[%s9634_s12 + $0x2c] sm:$0x1] }
 0x108   : > { %8538 = vmatprep.mubr.msk.bf16.mxu0 %vm795_vm3, %v9505_v42  ;;  %8572 = vmatprep.mubr.msk.bf16.mxu1 %vm795_vm3, %v9505_v42  ;;  %v2949_v42 = vor.u32 %v2948_v26, %v2945_v48  ;;  %v2962_v30 = vshll.u32 %v10468_v53, 16  ;;  %v10510_v48 = vcombine.low %v2907_v50, %v2917_v14  ;;  %v2931_v26 = vsel %vm9669_vm4, %v10462_v57, %v10448_v11  ;;  %v10544_v50 = vld [vmem:[%s9634_s12 + $0xc8] sm:$0x1] }
 0x109   : > { %v10529_v11 = vrot.slane %v2973_v46, 4  ;;  %v2991_v57 = vshrl.u32 %v7442_v41, 16  ;;  %v10551_v14 = vrot.slane %v2986_v4, 5  ;;  %v9510_v41 = vld [vmem:[%s9634_s12 + $0xc0] sm:$0xff]   ;;  %v10567_v4 = vld [vmem:[%s9634_s12 + $0x58] sm:$0xf] }
 0x10a   : > { %v10502_v35 = vrot.slane %v2949_v42, 4  ;;  %v2964_v40 = vrot.slane %v2962_v30, 5  ;;  %v3000_v42 = vshll.u32 %v10517_v2, 16  ;;  %v3024_v30 = vshll.u32 %v10348_v29, 16 }
 0x10b   : > { %v3010_v29 = vshll.u32 %v10554_v25, 16  ;;  %v3048_v27 = vshll.u32 %v10567_v4, 16  ;;  %v2979_v1 = vsel %vm9669_vm4, %v10529_v11, %v10504_v23  ;;  %v10610_v11 = vld [vmem:[%s9634_s12 + $0x70] sm:$0xf] }
 0x10c   : > { %v2955_v54 = vsel %vm9669_vm4, %v10502_v35, %v10470_v39  ;;  %v3941_v39 = vrot.slane %v10541_v43, 5  ;;  %v2965_v46 = vsel %vm9669_vm4, %v2960_v16, %v2964_v40  ;;  %v7448_v35 = vld [vmem:[%s9634_s12 + $0x54] sm:$0xf]  ;;  %v10574_v16 = vrot.slane %v3024_v30, 5 }
 0x10d   : > { %v7481_v30 = vcombine.low %v2955_v54, %v2965_v46  ;;  %v10606_v46 = vrot.slane %v3048_v27, 5 }
 0x10e   : > { %v3943_v5 = vrot.slane %v3941_v39, 4  ;;  %v3942_v51 = vsel %vm10023_vm7, %v7559_v59, %v3941_v39  ;;  %v3052_v39 = vshrl.u32 %v10567_v4, 16  ;;  %v7451_v59 = vld [vmem:[%s9634_s12 + $0x60] sm:$0xf] }
 0x10f   : > { %8539 = vmatmul.mubr.msk.bf16.gmra.mrb[20].mxu0 %vm795_vm3, %v9506_v52  ;;  %8573 = vmatmul.mubr.msk.bf16.gmra.mrb[20].mxu1 %vm795_vm3, %v9506_v52  ;;  %v9509_v52 = vld [vmem:[%s9634_s12 + $0xb4] sm:$0xff]  }
 0x110   : > { %8542 = vmatprep.mubr.msk.bf16.mxu0 %vm795_vm3, %v9507_v37  ;;  %8576 = vmatprep.mubr.msk.bf16.mxu1 %vm795_vm3, %v9507_v37  ;;  %v3931_v37 = vsel %vm10023_vm7, %v3929_v0, %v3930_v47  ;;  %v3944_v47 = vrot.slane %v10544_v50, 5  ;;  %v2993_v0 = vrot.slane %v2991_v57, 4  ;;  %v3030_v57 = vrot.slane %v3028_v36, 4 }
 0x111   : > { %v10527_v38 = vcombine.low %v3928_v60, %v3931_v37  ;;  %v10562_v60 = vrot.slane %v2983_v15, 4  ;;  %v3006_v37 = vrot.slane %v3004_v62, 4  ;;  %v3042_v62 = vshll.u32 %v7448_v35, 16 }
 0x112   : > { %v3945_v40 = vsel %vm10023_vm7, %v3943_v5, %v3944_v47  ;;  %v3012_v36 = vrot.slane %v3010_v29, 5  ;;  %v3076_v29 = vshrl.u32 %v10369_v13, 16 }
 0x113   : > { %11763 = vst [vmem:[#allocation3_spill] sm:$0xff] %v10527_v38  ;;  %v3020_v38 = vrot.slane %v3018_v3, 5  ;;  %v10576_v15 = vcombine.low %v3942_v51, %v3945_v40  ;;  %v4243_v3 = vsel %vm844_vm0, %v10335_v32, 0  ;;  %v2989_v32 = vsel %vm9669_vm4, %v10562_v60, %v10551_v14 }
 0x114   : > { %v3044_v54 = vrot.slane %v3042_v62, 5  ;;  %v3063_v60 = vshrl.u32 %v7451_v59, 16  ;;  %v3066_v51 = vshll.u32 %v7451_v59, 16  ;;  %v7457_v59 = vld [vmem:[%s9634_s12 + $0x78] sm:$0xf] }
 0x115   : > { %11764 = vst [vmem:[#allocation4_spill] sm:$0xff] %v10576_v15 }
 0x117   : > { %8543 = vmatmul.mubr.msk.bf16.gmra.mrb[24].mxu0 %vm795_vm3, %v9508_v9  ;;  %8577 = vmatmul.mubr.msk.bf16.gmra.mrb[24].mxu1 %vm795_vm3, %v9508_v9  ;;  %v2996_v9 = vrot.slane %v2994_v12, 5  ;;  %v3039_v12 = vshrl.u32 %v7448_v35, 16  ;;  %v3034_v35 = vshll.u32 %v10351_v10, 16 }
 0x118   : > { %8546 = vmatprep.mubr.msk.bf16.mxu0 %vm795_vm3, %v9509_v52  ;;  %8580 = vmatprep.mubr.msk.bf16.mxu1 %vm795_vm3, %v9509_v52  ;;  %v10564_v52 = vrot.slane %v3000_v42, 5  ;;  %v7480_v42 = vcombine.low %v2931_v26, %v2941_v17  ;;  %v10588_v17 = vld [vmem:[%s9634_s12 + $0x5c] sm:$0x1] }
 0x119   : > { %v2997_v47 = vor.u32 %v2996_v9, %v2993_v0  ;;  %v3021_v0 = vor.u32 %v3020_v38, %v3017_v63  ;;  %v3031_v9 = vor.u32 %v3030_v57, %v10574_v16  ;;  %v3041_v5 = vrot.slane %v3039_v12, 4 }
 0x11a   : > { %v3007_v26 = vor.u32 %v3006_v37, %v10564_v52  ;;  %v3058_v23 = vshll.u32 %v10588_v17, 16  ;;  %v3072_v38 = vshll.u32 %v10369_v13, 16  ;;  %v10616_v27 = vrot.slane %v3034_v35, 5 }
 0x11b   : > { %v2998_v37 = vrot.slane %v2997_v47, 4  ;;  %v10614_v40 = vrot.slane %v3021_v0, 4  ;;  %v3096_v57 = vshll.u32 %v10610_v11, 16  ;;  %v3100_v12 = vshrl.u32 %v10610_v11, 16 }
 0x11c   : > { %v3008_v14 = vrot.slane %v3007_v26, 4  ;;  %v10620_v62 = vrot.slane %v3031_v9, 4  ;;  %v10623_v26 = vrot.slane %v3058_v23, 5  ;;  %v3065_v9 = vrot.slane %v3063_v60, 4 }
 0x11d   : > { %v3003_v13 = vsel %vm9669_vm4, %v2998_v37, %v10564_v52  ;;  %v3068_v35 = vrot.slane %v3066_v51, 5  ;;  %v3078_v52 = vrot.slane %v3076_v29, 4  ;;  %v10650_v23 = vrot.slane %v3096_v57, 5 }
 0x11e   : > { %v3013_v0 = vsel %vm9669_vm4, %v3008_v14, %v3012_v36  ;;  %v10648_v36 = vld [vmem:[%s9634_s12 + $0x74] sm:$0x1]  ;;  %v3102_v37 = vrot.slane %v3100_v12, 4  ;;  %v3111_v14 = vshrl.u32 %v7457_v59, 16  ;;  %v3114_v60 = vshll.u32 %v7457_v59, 16 }
 0x11f   : > { %8547 = vmatmul.mubr.msk.bf16.gmra.mrb[28].mxu0 %vm795_vm3, %v9510_v41  ;;  %8581 = vmatmul.mubr.msk.bf16.gmra.mrb[28].mxu1 %vm795_vm3, %v9510_v41  ;;  %v3054_v41 = vrot.slane %v3052_v39, 4  ;;  %v3045_v39 = vor.u32 %v3044_v54, %v3041_v5  ;;  %v10636_v5 = vld [vmem:[%s11719_s1 + $0xc] sm:$0x3]  ;;  %v3120_v51 = vshll.u32 %v10397_v55, 16  ;;  %v7483_v29 = vcombine.low %v3003_v13, %v3013_v0 }
 0x120   : > { %8586 = vmatprep.mubr.msk.bf16.mxu0 %vm795_vm3, %v10510_v48  ;;  %8620 = vmatprep.mubr.msk.bf16.mxu1 %vm795_vm3, %v10510_v48  ;;  %v7454_v48 = vld [vmem:[%s9634_s12 + $0x6c] sm:$0xf]  ;;  %v3069_v57 = vor.u32 %v3068_v35, %v3065_v9  ;;  %v3082_v12 = vshll.u32 %v10372_v49, 16  ;;  %v3103_v59 = vor.u32 %v3102_v37, %v10650_v23  ;;  %v3113_v13 = vrot.slane %v3111_v14, 4 }
 0x121   : > { %v3087_v10 = vshrl.u32 %v7454_v48, 16  ;;  %v3090_v63 = vshll.u32 %v7454_v48, 16  ;;  %v3055_v47 = vor.u32 %v3054_v41, %v10606_v46  ;;  %v10641_v48 = vld [vmem:[%s11720_s2 + $0xc] sm:$0x3] }
 0x122   : > { %v3104_v14 = vrot.slane %v3103_v59, 4 }
 0x123   : > { %v3089_v54 = vrot.slane %v3087_v10, 4  ;;  %v3092_v41 = vrot.slane %v3090_v63, 5  ;;  %v3027_v10 = vsel %vm9669_vm4, %v10614_v40, %v10574_v16  ;;  %v3037_v63 = vsel %vm9669_vm4, %v10620_v62, %v10616_v27 }
 0x124   : > { %v3116_v16 = vrot.slane %v3114_v60, 5  ;;  %v10680_v62 = vrot.slane %v3120_v51, 5  ;;  %v7484_v51 = vcombine.low %v3027_v10, %v3037_v63  ;;  %v7466_v10 = vld [vmem:[%s9634_s12 + $0x9c] sm:$0xf]  ;;  %v10703_v63 = vld [vmem:[%s9634_s12 + $0xa0] sm:$0xf] }
 0x126   : > { %v3117_v60 = vor.u32 %v3116_v16, %v3113_v13 }
 0x127   : > { %8587 = vmatmul.mubr.msk.bf16.vlgmr.msra.gmra.mrb[0].mxu0 %vm795_vm3, %v7480_v42  ;;  %8621 = vmatmul.mubr.msk.bf16.vlgmr.msra.gmra.mrb[0].mxu1 %vm795_vm3, %v7480_v42  ;;  %v10643_v42 = vrot.slane %v3072_v38, 5  ;;  %v3124_v38 = vshrl.u32 %v10397_v55, 16 }
 0x128   : > { %8653 = vmatpush3.bf16.msra.mxu0 %v4045_v6  ;;  %8687 = vmatpush3.bf16.msra.mxu1 %v4243_v3  ;;  %v3046_v6 = vrot.slane %v3045_v39, 4  ;;  %v3056_v3 = vrot.slane %v3055_v47, 4  ;;  %v3106_v39 = vshll.u32 %v10648_v36, 16  ;;  %v7460_v47 = vld [vmem:[%s9634_s12 + $0x84] sm:$0xf]  ;;  %v3118_v16 = vrot.slane %v3117_v60, 4 }
 0x129   : > { %8590 = vmatprep.mubr.msk.bf16.mxu0 %vm795_vm3, %v7481_v30  ;;  %8624 = vmatprep.mubr.msk.bf16.mxu1 %vm795_vm3, %v7481_v30  ;;  %v7482_v30 = vcombine.low %v2979_v1, %v2989_v32  ;;  %v3079_v55 = vor.u32 %v3078_v52, %v10643_v42  ;;  %v10671_v1 = vld [vmem:[%s9634_s12 + $0x88] sm:$0xf]  ;;  %v3093_v32 = vor.u32 %v3092_v41, %v3089_v54  ;;  %v3126_v49 = vrot.slane %v3124_v38, 4 }
 0x12a   : > { %9448 = vmatprep.subr.msk.bf16.mxu0 %vm844_vm0, %v10636_v5  ;;  %9449 = vmatprep.subr.msk.bf16.mxu1 %vm844_vm0, %v10641_v48  ;;  %v3051_v40 = vsel %vm9669_vm4, %v3046_v6, %v10606_v46  ;;  %v3061_v27 = vsel %vm9669_vm4, %v3056_v3, %v10623_v26  ;;  %v3135_v0 = vshrl.u32 %v7460_v47, 16  ;;  %v3138_v9 = vshll.u32 %v7460_v47, 16  ;;  %v7463_v3 = vld [vmem:[%s9634_s12 + $0x90] sm:$0xf]  ;;  %v10692_v47 = vld [vmem:[%s9634_s12 + $0x8c] sm:$0x1] }
 0x12b   : > { %v3144_v35 = vshll.u32 %v10671_v1, 16  ;;  %v3148_v52 = vshrl.u32 %v10671_v1, 16  ;;  %v3070_v46 = vrot.slane %v3069_v57, 4  ;;  %v3080_v26 = vrot.slane %v3079_v55, 4 }
 0x12c   : > { %v3084_v54 = vrot.slane %v3082_v12, 5  ;;  %v3108_v41 = vrot.slane %v3106_v39, 5  ;;  %v3094_v37 = vrot.slane %v3093_v32, 4  ;;  %v3130_v6 = vshll.u32 %v10400_v20, 16 }
 0x12d   : > { %v7485_v38 = vcombine.low %v3051_v40, %v3061_v27  ;;  %v3137_v15 = vrot.slane %v3135_v0, 4  ;;  %v10694_v57 = vrot.slane %v3144_v35, 5  ;;  %v3150_v55 = vrot.slane %v3148_v52, 4 }
 0x12e   : > { %v3075_v12 = vsel %vm9669_vm4, %v3070_v46, %v10643_v42  ;;  %v3085_v39 = vsel %vm9669_vm4, %v3080_v26, %v3084_v54  ;;  %v3159_v20 = vshrl.u32 %v7463_v3, 16  ;;  %v3162_v32 = vshll.u32 %v7463_v3, 16 }
 0x12f   : > { %8591 = vmatmul.mubr.msk.bf16.gmra.mrb[4].mxu0 %vm795_vm3, %v7482_v30  ;;  %8625 = vmatmul.mubr.msk.bf16.gmra.mrb[4].mxu1 %vm795_vm3, %v7482_v30  ;;  %v3127_v30 = vor.u32 %v3126_v49, %v10680_v62  ;;  %v3099_v59 = vsel %vm9669_vm4, %v3094_v37, %v10650_v23  ;;  %v3109_v13 = vsel %vm9669_vm4, %v3104_v14, %v3108_v41  ;;  %v3132_v40 = vrot.slane %v3130_v6, 5 }
 0x130   : > { %8594 = vmatprep.mubr.msk.bf16.mxu0 %vm795_vm3, %v7483_v29  ;;  %8628 = vmatprep.mubr.msk.bf16.mxu1 %vm795_vm3, %v7483_v29  ;;  %v3140_v29 = vrot.slane %v3138_v9, 5  ;;  %v3154_v42 = vshll.u32 %v10692_v47, 16  ;;  %v3168_v49 = vshll.u32 %v10434_v58, 16  ;;  %v3172_v0 = vshrl.u32 %v10434_v58, 16 }
 0x131   : > { %v3128_v27 = vrot.slane %v3127_v30, 4  ;;  %v3183_v9 = vshrl.u32 %v7466_v10, 16  ;;  %v3186_v35 = vshll.u32 %v7466_v10, 16  ;;  %v3192_v23 = vshll.u32 %v10703_v63, 16 }
 0x132   : > { %v3196_v52 = vshrl.u32 %v10703_v63, 16  ;;  %v3141_v46 = vor.u32 %v3140_v29, %v3137_v15  ;;  %v3151_v26 = vor.u32 %v3150_v55, %v10694_v57  ;;  %v3161_v58 = vrot.slane %v3159_v20, 4  ;;  %v10728_v15 = vld [vmem:[%s9634_s12 + $0xa4] sm:$0x1] }
 0x133   : > { %v3164_v54 = vrot.slane %v3162_v32, 5  ;;  %v7486_v41 = vcombine.low %v3075_v12, %v3085_v39  ;;  %v7487_v37 = vcombine.low %v3099_v59, %v3109_v13  ;;  %v3123_v14 = vsel %vm9669_vm4, %v3118_v16, %v10680_v62  ;;  %v7469_v12 = vld [vmem:[%s9634_s12 + $0xa8] sm:$0xf] }
 0x134   : > { %v3133_v60 = vsel %vm9669_vm4, %v3128_v27, %v3132_v40  ;;  %v3156_v6 = vrot.slane %v3154_v42, 5  ;;  %v10725_v3 = vrot.slane %v3168_v49, 5  ;;  %v3188_v30 = vrot.slane %v3186_v35, 5  ;;  %v7472_v27 = vld [vmem:[%s9634_s12 + $0xb4] sm:$0xf] }
 0x135   : > { %v10730_v29 = vrot.slane %v3192_v23, 5  ;;  %v3198_v55 = vrot.slane %v3196_v52, 4  ;;  %v3142_v39 = vrot.slane %v3141_v46, 4  ;;  %v3152_v20 = vrot.slane %v3151_v26, 4  ;;  %v10738_v42 = vld [vmem:[%s9634_s12 + $0xb8] sm:$0xf] }
 0x136   : > { %v3165_v62 = vor.u32 %v3164_v54, %v3161_v58  ;;  %v3178_v32 = vshll.u32 %v10437_v22, 16  ;;  %v3202_v10 = vshll.u32 %v10728_v15, 16  ;;  %v7488_v59 = vcombine.low %v3123_v14, %v3133_v60 }
 0x137   : > { %8595 = vmatmul.mubr.msk.bf16.gmra.mrb[8].mxu0 %vm795_vm3, %v7484_v51  ;;  %8629 = vmatmul.mubr.msk.bf16.gmra.mrb[8].mxu1 %vm795_vm3, %v7484_v51  ;;  %v3174_v51 = vrot.slane %v3172_v0, 4  ;;  %v3207_v16 = vshrl.u32 %v7469_v12, 16  ;;  %v3210_v40 = vshll.u32 %v7469_v12, 16  ;;  %v3199_v0 = vor.u32 %v3198_v55, %v10730_v29 }
 0x138   : > { %8598 = vmatprep.mubr.msk.bf16.mxu0 %vm795_vm3, %v7485_v38  ;;  %8632 = vmatprep.mubr.msk.bf16.mxu1 %vm795_vm3, %v7485_v38  ;;  %v3185_v38 = vrot.slane %v3183_v9, 4  ;;  %v3216_v9 = vshll.u32 %v10477_v8, 16  ;;  %v3220_v22 = vshrl.u32 %v10477_v8, 16  ;;  %v3147_v35 = vsel %vm9669_vm4, %v3142_v39, %v10694_v57 }
 0x139   : > { %v3175_v13 = vor.u32 %v3174_v51, %v10725_v3  ;;  %v3157_v23 = vsel %vm9669_vm4, %v3152_v20, %v3156_v6  ;;  %v3166_v52 = vrot.slane %v3165_v62, 4  ;;  %v3180_v46 = vrot.slane %v3178_v32, 5  ;;  %v7475_v62 = vld [vmem:[%s9634_s12 + $0xc0] sm:$0xf] }
 0x13a   : > { %v3189_v49 = vor.u32 %v3188_v30, %v3185_v38  ;;  %v3231_v26 = vshrl.u32 %v7472_v27, 16  ;;  %v3234_v58 = vshll.u32 %v7472_v27, 16  ;;  %v3240_v54 = vshll.u32 %v10738_v42, 16 }
 0x13b   : > { %v3244_v8 = vshrl.u32 %v10738_v42, 16  ;;  %v3204_v14 = vrot.slane %v3202_v10, 5  ;;  %v3212_v60 = vrot.slane %v3210_v40, 5  ;;  %v3200_v38 = vrot.slane %v3199_v0, 4 }
 0x13c   : > { %v3190_v51 = vrot.slane %v3189_v49, 4  ;;  %v3218_v57 = vrot.slane %v3216_v9, 5  ;;  %v3222_v30 = vrot.slane %v3220_v22, 4  ;;  %v7489_v55 = vcombine.low %v3147_v35, %v3157_v23 }
 0x13d   : > { %v3233_v6 = vrot.slane %v3231_v26, 4  ;;  %v3236_v12 = vrot.slane %v3234_v58, 5  ;;  %v3242_v39 = vrot.slane %v3240_v54, 5  ;;  %v3246_v20 = vrot.slane %v3244_v8, 4 }
 0x13e   : > { %v3171_v32 = vsel %vm9669_vm4, %v3166_v52, %v10725_v3  ;;  %v3195_v40 = vsel %vm9669_vm4, %v3190_v51, %v10730_v29  ;;  %v3205_v27 = vsel %vm9669_vm4, %v3200_v38, %v3204_v14  ;;  %v3223_v49 = vor.u32 %v3222_v30, %v3218_v57 }
 0x13f   : > { %8599 = vmatmul.mubr.msk.bf16.gmra.mrb[12].mxu0 %vm795_vm3, %v7486_v41  ;;  %8633 = vmatmul.mubr.msk.bf16.gmra.mrb[12].mxu1 %vm795_vm3, %v7486_v41  ;;  %v3176_v41 = vrot.slane %v3175_v13, 4  ;;  %v3226_v3 = vshll.u32 %v10480_v24, 16  ;;  %v3255_v0 = vshrl.u32 %v7475_v62, 16  ;;  %v3258_v9 = vshll.u32 %v7475_v62, 16 }
 0x140   : > { %8602 = vmatprep.mubr.msk.bf16.mxu0 %vm795_vm3, %v7487_v37  ;;  %8636 = vmatprep.mubr.msk.bf16.mxu1 %vm795_vm3, %v7487_v37  ;;  %v3209_v37 = vrot.slane %v3207_v16, 4  ;;  %v10761_v16 = vld [vmem:[%s9634_s12 + $0xbc] sm:$0x1]  ;;  %v3264_v22 = vshll.u32 %v10541_v43, 16  ;;  %v3237_v35 = vor.u32 %v3236_v12, %v3233_v6  ;;  %v3247_v23 = vor.u32 %v3246_v20, %v3242_v39 }
 0x141   : > { %v3181_v10 = vsel %vm9669_vm4, %v3176_v41, %v3180_v46  ;;  %v3250_v29 = vshll.u32 %v10761_v16, 16  ;;  %v7491_v46 = vcombine.low %v3195_v40, %v3205_v27  ;;  %v3224_v58 = vrot.slane %v3223_v49, 4 }
 0x142   : > { %v3213_v13 = vor.u32 %v3212_v60, %v3209_v37  ;;  %v7490_v52 = vcombine.low %v3171_v32, %v3181_v10  ;;  %v3228_v54 = vrot.slane %v3226_v3, 5  ;;  %v3257_v24 = vrot.slane %v3255_v0, 4 }
 0x143   : > { %v3260_v8 = vrot.slane %v3258_v9, 5  ;;  %v3266_v41 = vrot.slane %v3264_v22, 5  ;;  %v3238_v37 = vrot.slane %v3237_v35, 4  ;;  %v3248_v60 = vrot.slane %v3247_v23, 4  ;;  %v7529_v22 = vld [vmem:[%s9634_s12 + $0x18] sm:$0xe] }
 0x144   : > { %v3214_v26 = vrot.slane %v3213_v13, 4  ;;  %v3252_v51 = vrot.slane %v3250_v29, 5  ;;  %v3229_v38 = vsel %vm9669_vm4, %v3224_v58, %v3228_v54  ;;  %v3274_v6 = vshll.u32 %v10544_v50, 16  ;;  %v7530_v23 = vld [vmem:[%s9634_s12 + $0x24] sm:$0xe] }
 0x145   : > { %v3261_v30 = vor.u32 %v3260_v8, %v3257_v24  ;;  %v3243_v12 = vsel %vm9669_vm4, %v3238_v37, %v3242_v39  ;;  %v3836_v62 = vrot.slane %v10385_v19, 5  ;;  %v3839_v50 = vrot.slane %v10420_v21, 5  ;;  %v7531_v8 = vld [vmem:[%s9634_s12 + $0x30] sm:$0xe]  ;;  %v7532_v37 = vld [vmem:[%s9634_s12 + $0x3c] sm:$0xe] }
 0x146   : > { %v3253_v20 = vsel %vm9669_vm4, %v3248_v60, %v3252_v51  ;;  %v3276_v27 = vrot.slane %v3274_v6, 5  ;;  %v3843_v0 = vrot.slane %v10408_v34, 5  ;;  %v7546_v58 = vrot.slane %v7530_v23, 9 }
 0x147   : > { %8603 = vmatmul.mubr.msk.bf16.gmra.mrb[16].mxu0 %vm795_vm3, %v7488_v59  ;;  %8637 = vmatmul.mubr.msk.bf16.gmra.mrb[16].mxu1 %vm795_vm3, %v7488_v59  ;;  %v3268_v59 = vshrl.u32 %v10541_v43, 16  ;;  %v3219_v43 = vsel %vm9669_vm4, %v3214_v26, %v3218_v57  ;;  %v7528_v57 = vld [vmem:[%s9634_s12 + $0xc] sm:$0xe]  ;;  %v7493_v10 = vcombine.low %v3243_v12, %v3253_v20  ;;  %v3262_v13 = vrot.slane %v3261_v30, 4 }
 0x148   : > { %8606 = vmatprep.mubr.msk.bf16.mxu0 %vm795_vm3, %v7489_v55  ;;  %8640 = vmatprep.mubr.msk.bf16.mxu1 %vm795_vm3, %v7489_v55  ;;  %v7492_v32 = vcombine.low %v3219_v43, %v3229_v38  ;;  %v7544_v49 = vrot.slane %v7528_v57, 9  ;;  %v3838_v3 = vrot.slane %v3836_v62, 4  ;;  %v3846_v26 = vrot.slane %v10446_v7, 5 }
 0x149   : > { %v3270_v14 = vrot.slane %v3268_v59, 4  ;;  %v3267_v19 = vsel %vm9669_vm4, %v3262_v13, %v3266_v41  ;;  %v3850_v59 = vrot.slane %v10427_v44, 5  ;;  %v3853_v54 = vrot.slane %v10468_v53, 5 }
 0x14a   : > { %v3837_v9 = vsel %vm10023_vm7, %v7544_v49, %v3836_v62  ;;  %v3840_v21 = vsel %vm10023_vm7, %v3838_v3, %v3839_v50  ;;  %v3857_v7 = vrot.slane %v10458_v45, 5  ;;  %v4605_v51 = vsel %vm844_vm0, %v10636_v5, 0  ;;  %v10837_v5 = vld [vmem:[%s11719_s1 + $0xe] sm:$0x3] }
 0x14b   : > { %v3271_v55 = vor.u32 %v3270_v14, %v3266_v41  ;;  %v7561_v29 = vcombine.low %v3837_v9, %v3840_v21  ;;  %v3852_v34 = vrot.slane %v3850_v59, 4  ;;  %v3864_v41 = vrot.slane %v10517_v2, 5 }
 0x14c   : > { %v3851_v53 = vsel %vm10023_vm7, %v7546_v58, %v3850_v59  ;;  %v4803_v43 = vsel %vm844_vm0, %v10641_v48, 0  ;;  %v7547_v38 = vrot.slane %v7531_v8, 9  ;;  %v3859_v30 = vrot.slane %v3857_v7, 4  ;;  %v10842_v48 = vld [vmem:[%s11720_s2 + $0xe] sm:$0x3] }
 0x14d   : > { %v3272_v40 = vrot.slane %v3271_v55, 4  ;;  %v3854_v14 = vsel %vm10023_vm7, %v3852_v34, %v3853_v54  ;;  %v3860_v45 = vrot.slane %v10499_v28, 5  ;;  %v7548_v2 = vrot.slane %v7532_v37, 9  ;;  %v11767_v37 = vld [vmem:[#allocation4_spill] sm:$0xff] }
 0x14e   : > { %v7563_v55 = vcombine.low %v3851_v53, %v3854_v14  ;;  %v3866_v6 = vrot.slane %v3864_v41, 4  ;;  %v3867_v12 = vrot.slane %v10554_v25, 5  ;;  %v3858_v28 = vsel %vm10023_vm7, %v7547_v38, %v3857_v7  ;;  %v9511_v14 = vld [vmem:[%s9634_s12 + $0x18] sm:$0xff]   ;;  %v9513_v38 = vld [vmem:[%s9634_s12 + $0x30] sm:$0xff]  }
 0x14f   : > { %8607 = vmatmul.mubr.msk.bf16.gmra.mrb[20].mxu0 %vm795_vm3, %v7490_v52  ;;  %8641 = vmatmul.mubr.msk.bf16.gmra.mrb[20].mxu1 %vm795_vm3, %v7490_v52  ;;  %v3277_v39 = vsel %vm9669_vm4, %v3272_v40, %v3276_v27  ;;  %v7545_v52 = vrot.slane %v7529_v22, 9  ;;  %v3861_v25 = vsel %vm10023_vm7, %v3859_v30, %v3860_v45  ;;  %v3865_v20 = vsel %vm10023_vm7, %v7548_v2, %v3864_v41  ;;  %v10945_v30 = vld [vmem:[%s11719_s1 + $0x10] sm:$0x3]  ;;  %v9515_v2 = vld [vmem:[%s9634_s12 + $0x48] sm:$0xff]  }
 0x150   : > { %8610 = vmatprep.mubr.msk.bf16.mxu0 %vm795_vm3, %v7491_v46  ;;  %8644 = vmatprep.mubr.msk.bf16.mxu1 %vm795_vm3, %v7491_v46  ;;  %v7494_v35 = vcombine.low %v3267_v19, %v3277_v39  ;;  %v3845_v46 = vrot.slane %v3843_v0, 4  ;;  %v3868_v62 = vsel %vm10023_vm7, %v3866_v6, %v3867_v12  ;;  %v3878_v57 = vrot.slane %v10567_v4, 5  ;;  %v7536_v19 = vld [vmem:[%s9634_s12 + $0x6c] sm:$0xe]  ;;  %v10950_v45 = vld [vmem:[%s11720_s2 + $0x10] sm:$0x3] }
 0x151   : > { %v3844_v44 = vsel %vm10023_vm7, %v7545_v52, %v3843_v0  ;;  %v7565_v13 = vcombine.low %v3865_v20, %v3868_v62  ;;  %v3881_v49 = vrot.slane %v10588_v17, 5  ;;  %v3892_v50 = vrot.slane %v10610_v11, 5  ;;  %v10963_v6 = vld [vmem:[%s9634_s12 + $0x58] sm:$0xf]  ;;  %v10966_v12 = vld [vmem:[%s9634_s12 + $0x5c] sm:$0x1] }
 0x152   : > { %v3847_v24 = vsel %vm10023_vm7, %v3845_v46, %v3846_v26  ;;  %v3880_v27 = vrot.slane %v3878_v57, 4  ;;  %v7552_v17 = vrot.slane %v7536_v19, 9  ;;  %v3895_v9 = vrot.slane %v10648_v36, 5  ;;  %v7538_v36 = vld [vmem:[%s9634_s12 + $0x84] sm:$0xe]  ;;  %v9516_v62 = vld [vmem:[%s9634_s12 + $0x54] sm:$0xff]  }
 0x153   : > { %v7562_v60 = vcombine.low %v3844_v44, %v3847_v24  ;;  %v3894_v0 = vrot.slane %v3892_v50, 4  ;;  %v3906_v22 = vrot.slane %v10671_v1, 5  ;;  %v3920_v52 = vrot.slane %v10703_v63, 5  ;;  %v7542_v44 = vld [vmem:[%s9634_s12 + $0xb4] sm:$0xe] }
 0x154   : > { %v3882_v3 = vsel %vm10023_vm7, %v3880_v27, %v3881_v49  ;;  %v3893_v11 = vsel %vm10023_vm7, %v7552_v17, %v3892_v50  ;;  %v3923_v34 = vrot.slane %v10728_v15, 5  ;;  %v3934_v54 = vrot.slane %v10738_v42, 5  ;;  %v10987_v27 = vld [vmem:[%s9634_s12 + $0x74] sm:$0x1]  ;;  %v7797_v49 = vld [vmem:[%s9634_s12 + $0x6c] sm:$0xe] }
 0x155   : > { %v3896_v21 = vsel %vm10023_vm7, %v3894_v0, %v3895_v9  ;;  %v3908_v23 = vrot.slane %v3906_v22, 4  ;;  %v3922_v58 = vrot.slane %v3920_v52, 4  ;;  %v7558_v24 = vrot.slane %v7542_v44, 9  ;;  %v7692_v17 = vld [vmem:[%s9634_s12 + $0x18] sm:$0xf] }
 0x156   : > { %v7569_v59 = vcombine.low %v3893_v11, %v3896_v21  ;;  %v3936_v7 = vrot.slane %v3934_v54, 4  ;;  %v3937_v8 = vrot.slane %v10761_v16, 5  ;;  %v11766_v16 = vld [vmem:[#allocation3_spill] sm:$0xff]  ;;  %v7813_v50 = vrot.slane %v7797_v49, 9  ;;  %v9519_v9 = vld [vmem:[%s9634_s12 + $0x78] sm:$0xff]  }
 0x157   : > { %8611 = vmatmul.mubr.msk.bf16.gmra.mrb[24].mxu0 %vm795_vm3, %v7492_v32  ;;  %8645 = vmatmul.mubr.msk.bf16.gmra.mrb[24].mxu1 %vm795_vm3, %v7492_v32  ;;  %v7534_v32 = vld [vmem:[%s9634_s12 + $0x54] sm:$0xe]  ;;  %v3924_v63 = vsel %vm10023_vm7, %v3922_v58, %v3923_v34  ;;  %v3935_v42 = vsel %vm10023_vm7, %v7558_v24, %v3934_v54  ;;  %v11000_v11 = vld [vmem:[%s9634_s12 + $0x1c] sm:$0xf] }
 0x158   : > { %8614 = vmatprep.mubr.msk.bf16.mxu0 %vm795_vm3, %v7493_v10  ;;  %8648 = vmatprep.mubr.msk.bf16.mxu1 %vm795_vm3, %v7493_v10  ;;  %v7564_v10 = vcombine.low %v3858_v28, %v3861_v25  ;;  %v7550_v40 = vrot.slane %v7534_v32, 9  ;;  %v3938_v41 = vsel %vm10023_vm7, %v3936_v7, %v3937_v8  ;;  %v6026_v28 = vrot.slane %v10966_v12, 5  ;;  %v9517_v32 = vld [vmem:[%s9634_s12 + $0x60] sm:$0xff]  }
 0x159   : > { %v7575_v53 = vcombine.low %v3935_v42, %v3938_v41  ;;  %v9520_v7 = vld [vmem:[%s9634_s12 + $0x84] sm:$0xff]   ;;  %v11029_v8 = vld [vmem:[%s9634_s12 + $0x20] sm:$0x1] }
 0x15a   : > { %v3879_v4 = vsel %vm10023_vm7, %v7550_v40, %v3878_v57  ;;  %v10984_v40 = vld [vmem:[%s9634_s12 + $0x70] sm:$0xf] }
 0x15b   : > { %v7567_v39 = vcombine.low %v3879_v4, %v3882_v3  ;;  %v6037_v4 = vrot.slane %v10984_v40, 5  ;;  %v6040_v3 = vrot.slane %v10987_v27, 5 }
 0x15d   : > { %v6039_v19 = vrot.slane %v6037_v4, 4  ;;  %v6038_v0 = vsel %vm10023_vm7, %v7813_v50, %v6037_v4 }
 0x15f   : > { %8615 = vmatmul.mubr.msk.bf16.gmra.mrb[28].mxu0 %vm795_vm3, %v7494_v35  ;;  %8649 = vmatmul.mubr.msk.bf16.gmra.mrb[28].mxu1 %vm795_vm3, %v7494_v35  ;;  %v7554_v35 = vrot.slane %v7538_v36, 9  ;;  %v6041_v21 = vsel %vm10023_vm7, %v6039_v19, %v6040_v3 }
 0x160   : > { %8654 = vmatprep.mubr.msk.bf16.mxu0 %vm795_vm3, %v7561_v29  ;;  %8688 = vmatprep.mubr.msk.bf16.mxu1 %vm795_vm3, %v7561_v29  ;;  %v3909_v29 = vrot.slane %v10692_v47, 5  ;;  %v7540_v47 = vld [vmem:[%s9634_s12 + $0x9c] sm:$0xe]  ;;  %v11005_v36 = vcombine.low %v6038_v0, %v6041_v21 }
 0x161   : > { %v7556_v26 = vrot.slane %v7540_v47, 9 }
 0x162   : > { %v3910_v1 = vsel %vm10023_vm7, %v3908_v23, %v3909_v29  ;;  %v11008_v23 = vld [vmem:[%s9634_s12 + $0x28] sm:$0xf]  ;;  %v5056_v29 = vshll.u32 %v11000_v11, 16 }
 0x167   : > { %8655 = vmatmul.mubr.msk.bf16.vlgmr.msra.gmra.mrb[0].mxu0 %vm795_vm3, %v7562_v60  ;;  %8689 = vmatmul.mubr.msk.bf16.vlgmr.msra.gmra.mrb[0].mxu1 %vm795_vm3, %v7562_v60  ;;  %v9512_v60 = vld [vmem:[%s9634_s12 + $0x24] sm:$0xff]  }
 0x168   : > { %8721 = vmatpush3.bf16.msra.mxu0 %v4605_v51  ;;  %8755 = vmatpush3.bf16.msra.mxu1 %v4803_v43  ;;  %v5529_v51 = vsel %vm844_vm0, %v10837_v5, 0  ;;  %v5727_v43 = vsel %vm844_vm0, %v10842_v48, 0 }
 0x169   : > { %8658 = vmatprep.mubr.msk.bf16.mxu0 %vm795_vm3, %v7563_v55  ;;  %8692 = vmatprep.mubr.msk.bf16.mxu1 %vm795_vm3, %v7563_v55  ;;  %v9514_v55 = vld [vmem:[%s9634_s12 + $0x3c] sm:$0xff]  }
 0x16a   : > { %9450 = vmatprep.subr.msk.bf16.mxu0 %vm844_vm0, %v10837_v5  ;;  %9451 = vmatprep.subr.msk.bf16.mxu1 %vm844_vm0, %v10842_v48  ;;  %v7795_v5 = vld [vmem:[%s9634_s12 + $0x54] sm:$0xe]  ;;  %v6023_v48 = vrot.slane %v10963_v6, 5 }
 0x16b   : > { %v7811_v25 = vrot.slane %v7795_v5, 9  ;;  %v7698_v5 = vld [vmem:[%s9634_s12 + $0x30] sm:$0xf] }
 0x16c   : > { %v6025_v20 = vrot.slane %v6023_v48, 4  ;;  %v5095_v3 = vshrl.u32 %v7698_v5, 16  ;;  %v5098_v50 = vshll.u32 %v7698_v5, 16 }
 0x16d   : > { %v6024_v57 = vsel %vm10023_vm7, %v7811_v25, %v6023_v48  ;;  %v11054_v25 = vld [vmem:[%s9634_s12 + $0xa0] sm:$0xf] }
 0x16f   : > { %8659 = vmatmul.mubr.msk.bf16.gmra.mrb[4].mxu0 %vm795_vm3, %v7564_v10  ;;  %8693 = vmatmul.mubr.msk.bf16.gmra.mrb[4].mxu1 %vm795_vm3, %v7564_v10  ;;  %v6027_v10 = vsel %vm10023_vm7, %v6025_v20, %v6026_v28  ;;  %v11051_v28 = vld [vmem:[%s9634_s12 + $0x34] sm:$0xf]  ;;  %v11057_v20 = vld [vmem:[%s9634_s12 + $0xa4] sm:$0x1] }
 0x170   : > { %8662 = vmatprep.mubr.msk.bf16.mxu0 %vm795_vm3, %v7565_v13  ;;  %8696 = vmatprep.mubr.msk.bf16.mxu1 %vm795_vm3, %v7565_v13  ;;  %v10979_v13 = vcombine.low %v6024_v57, %v6027_v10  ;;  %v6065_v10 = vrot.slane %v11054_v25, 5  ;;  %v6068_v49 = vrot.slane %v11057_v20, 5  ;;  %v5104_v0 = vshll.u32 %v11051_v28, 16 }
 0x177   : > { %8663 = vmatmul.mubr.msk.bf16.gmra.mrb[8].mxu0 %vm795_vm3, %v10364_v61  ;;  %8697 = vmatmul.mubr.msk.bf16.gmra.mrb[8].mxu1 %vm795_vm3, %v10364_v61  ;;  %v3907_v61 = vsel %vm10023_vm7, %v7554_v35, %v3906_v22  ;;  %v7695_v22 = vld [vmem:[%s9634_s12 + $0x24] sm:$0xf]  ;;  %v5050_v35 = vshll.u32 %v7692_v17, 16 }
 0x178   : > { %8666 = vmatprep.mubr.msk.bf16.mxu0 %vm795_vm3, %v7567_v39  ;;  %8700 = vmatprep.mubr.msk.bf16.mxu1 %vm795_vm3, %v7567_v39  ;;  %v7571_v46 = vcombine.low %v3907_v61, %v3910_v1  ;;  %v9518_v39 = vld [vmem:[%s9634_s12 + $0x6c] sm:$0xff]   ;;  %v5060_v61 = vshrl.u32 %v11000_v11, 16  ;;  %v11015_v1 = vld [vmem:[%s9634_s12 + $0x88] sm:$0xf]  ;;  %v5071_v47 = vshrl.u32 %v7695_v22, 16 }
 0x179   : > { %v6051_v58 = vrot.slane %v11015_v1, 5 }
 0x17a   : > { %v5062_v42 = vrot.slane %v5060_v61, 4  ;;  %v9523_v61 = vld [vmem:[%s9634_s12 + $0xa8] sm:$0xff]  }
 0x17b   : > { %v6053_v24 = vrot.slane %v6051_v58, 4 }
 0x17f   : > { %8667 = vmatmul.mubr.msk.bf16.gmra.mrb[12].mxu0 %vm795_vm3, %v10390_v18  ;;  %8701 = vmatmul.mubr.msk.bf16.gmra.mrb[12].mxu1 %vm795_vm3, %v10390_v18  ;;  %v3921_v18 = vsel %vm10023_vm7, %v7556_v26, %v3920_v52  ;;  %v11018_v52 = vld [vmem:[%s9634_s12 + $0x8c] sm:$0x1]  ;;  %v7799_v26 = vld [vmem:[%s9634_s12 + $0x84] sm:$0xe] }
 0x180   : > { %8670 = vmatprep.mubr.msk.bf16.mxu0 %vm795_vm3, %v7569_v59  ;;  %8704 = vmatprep.mubr.msk.bf16.mxu1 %vm795_vm3, %v7569_v59  ;;  %v7573_v15 = vcombine.low %v3921_v18, %v3924_v63  ;;  %v5047_v59 = vshrl.u32 %v7692_v17, 16  ;;  %v6054_v34 = vrot.slane %v11018_v52, 5  ;;  %v5080_v18 = vshll.u32 %v11008_v23, 16 }
 0x181   : > { %v5084_v63 = vshrl.u32 %v11008_v23, 16  ;;  %v7815_v54 = vrot.slane %v7799_v26, 9 }
 0x182   : > { %v5049_v44 = vrot.slane %v5047_v59, 4  ;;  %v7701_v59 = vld [vmem:[%s9634_s12 + $0x3c] sm:$0xf] }
 0x183   : > { %v6052_v41 = vsel %vm10023_vm7, %v7815_v54, %v6051_v58 }
 0x187   : > { %8671 = vmatmul.mubr.msk.bf16.gmra.mrb[16].mxu0 %vm795_vm3, %v10424_v33  ;;  %8705 = vmatmul.mubr.msk.bf16.gmra.mrb[16].mxu1 %vm795_vm3, %v10424_v33  ;;  %v11765_v33 = vld [vmem:[#allocation2_spill] sm:$0xff] }
 0x188   : > { %8674 = vmatprep.mubr.msk.bf16.mxu0 %vm795_vm3, %v7571_v46  ;;  %8708 = vmatprep.mubr.msk.bf16.mxu1 %vm795_vm3, %v7571_v46  ;;  %v5074_v46 = vshll.u32 %v7695_v22, 16  ;;  %v5108_v22 = vshrl.u32 %v11051_v28, 16 }
 0x18f   : > { %8675 = vmatmul.mubr.msk.bf16.gmra.mrb[20].mxu0 %vm795_vm3, %v11765_v33  ;;  %8709 = vmatmul.mubr.msk.bf16.gmra.mrb[20].mxu1 %vm795_vm3, %v11765_v33  ;;  %v11031_v33 = vrot.slane %v5056_v29, 5 }
 0x190   : > { %8678 = vmatprep.mubr.msk.bf16.mxu0 %vm795_vm3, %v7573_v15  ;;  %8712 = vmatprep.mubr.msk.bf16.mxu1 %vm795_vm3, %v7573_v15  ;;  %v5052_v15 = vrot.slane %v5050_v35, 5  ;;  %v11071_v35 = vld [vmem:[%s9634_s12 + $0x40] sm:$0xf] }
 0x191   : > { %v5063_v48 = vor.u32 %v5062_v42, %v11031_v33  ;;  %v5128_v42 = vshll.u32 %v11071_v35, 16 }
 0x193   : > { %v5064_v21 = vrot.slane %v5063_v48, 4 }
 0x197   : > { %8679 = vmatmul.mubr.msk.bf16.gmra.mrb[24].mxu0 %vm795_vm3, %v11766_v16  ;;  %8713 = vmatmul.mubr.msk.bf16.gmra.mrb[24].mxu1 %vm795_vm3, %v11766_v16  ;;  %v5073_v16 = vrot.slane %v5071_v47, 4 }
 0x198   : > { %8682 = vmatprep.mubr.msk.bf16.mxu0 %vm795_vm3, %v7575_v53  ;;  %8716 = vmatprep.mubr.msk.bf16.mxu1 %vm795_vm3, %v7575_v53  ;;  %v9521_v53 = vld [vmem:[%s9634_s12 + $0x90] sm:$0xff]  }
 0x19f   : > { %8683 = vmatmul.mubr.msk.bf16.gmra.mrb[28].mxu0 %vm795_vm3, %v11767_v37  ;;  %8717 = vmatmul.mubr.msk.bf16.gmra.mrb[28].mxu1 %vm795_vm3, %v11767_v37  ;;  %v6055_v37 = vsel %vm10023_vm7, %v6053_v24, %v6054_v34  ;;  %v5119_v24 = vshrl.u32 %v7701_v59, 16 }
 0x1a0   : > { %8722 = vmatprep.mubr.msk.bf16.mxu0 %vm795_vm3, %v9511_v14  ;;  %8756 = vmatprep.mubr.msk.bf16.mxu1 %vm795_vm3, %v9511_v14  ;;  %v5076_v14 = vrot.slane %v5074_v46, 5 }
 0x1a7   : > { %8723 = vmatmul.mubr.msk.bf16.vlgmr.msra.gmra.mrb[0].mxu0 %vm795_vm3, %v9512_v60  ;;  %8757 = vmatmul.mubr.msk.bf16.vlgmr.msra.gmra.mrb[0].mxu1 %vm795_vm3, %v9512_v60  ;;  %v11039_v60 = vld [vmem:[%s9634_s12 + $0x2c] sm:$0x1] }
 0x1a8   : > { %8789 = vmatpush3.bf16.msra.mxu0 %v5529_v51  ;;  %8823 = vmatpush3.bf16.msra.mxu1 %v5727_v43  ;;  %v11041_v51 = vrot.slane %v5080_v18, 5  ;;  %v5086_v43 = vrot.slane %v5084_v63, 4  ;;  %v5090_v57 = vshll.u32 %v11039_v60, 16  ;;  %v5097_v18 = vrot.slane %v5095_v3, 4 }
 0x1a9   : > { %8726 = vmatprep.mubr.msk.bf16.mxu0 %vm795_vm3, %v9513_v38  ;;  %8760 = vmatprep.mubr.msk.bf16.mxu1 %vm795_vm3, %v9513_v38  ;;  %v11043_v38 = vcombine.low %v6052_v41, %v6055_v37  ;;  %v5100_v63 = vrot.slane %v5098_v50, 5  ;;  %v5110_v41 = vrot.slane %v5108_v22, 4  ;;  %v11113_v3 = vrot.slane %v5128_v42, 5 }
 0x1aa   : > { %9452 = vmatprep.subr.msk.bf16.mxu0 %vm844_vm0, %v10945_v30  ;;  %9453 = vmatprep.subr.msk.bf16.mxu1 %vm844_vm0, %v10950_v45  ;;  %v5087_v4 = vor.u32 %v5086_v43, %v11041_v51  ;;  %v5092_v26 = vrot.slane %v5090_v57, 5  ;;  %v5998_v31 = vrot.slane %v11039_v60, 5  ;;  %v6009_v60 = vrot.slane %v11071_v35, 5 }
 0x1ab   : > { %v5101_v57 = vor.u32 %v5100_v63, %v5097_v18 }
 0x1ac   : > { %v5088_v34 = vrot.slane %v5087_v4, 4 }
 0x1ad   : > { %v5102_v18 = vrot.slane %v5101_v57, 4  ;;  %v11152_v57 = vld [vmem:[%s9634_s12 + $0x50] sm:$0x1] }
 0x1ae   : > { %v5093_v22 = vsel %vm9669_vm4, %v5088_v34, %v5092_v26  ;;  %v7707_v26 = vld [vmem:[%s9634_s12 + $0x54] sm:$0xf] }
 0x1af   : > { %8727 = vmatmul.mubr.msk.bf16.gmra.mrb[4].mxu0 %vm795_vm3, %v9514_v55  ;;  %8761 = vmatmul.mubr.msk.bf16.gmra.mrb[4].mxu1 %vm795_vm3, %v9514_v55  ;;  %v5053_v55 = vor.u32 %v5052_v15, %v5049_v44  ;;  %v11081_v44 = vld [vmem:[%s9634_s12 + $0x38] sm:$0x1]  ;;  %v11083_v15 = vrot.slane %v5104_v0, 5 }
 0x1b0   : > { %8730 = vmatprep.mubr.msk.bf16.mxu0 %vm795_vm3, %v9515_v2  ;;  %8764 = vmatprep.mubr.msk.bf16.mxu1 %vm795_vm3, %v9515_v2  ;;  %v5066_v2 = vshll.u32 %v11029_v8, 16 }
 0x1b1   : > { %v5054_v17 = vrot.slane %v5053_v55, 4  ;;  %v7704_v55 = vld [vmem:[%s9634_s12 + $0x48] sm:$0xf] }
 0x1b2   : > { %v5068_v47 = vrot.slane %v5066_v2, 5  ;;  %v7803_v2 = vld [vmem:[%s9634_s12 + $0xb4] sm:$0xe] }
 0x1b3   : > { %v5059_v37 = vsel %vm9669_vm4, %v5054_v17, %v11031_v33  ;;  %v7819_v33 = vrot.slane %v7803_v2, 9  ;;  %v11118_v17 = vld [vmem:[%s9634_s12 + $0x44] sm:$0x1] }
 0x1b4   : > { %v5069_v43 = vsel %vm9669_vm4, %v5064_v21, %v5068_v47  ;;  %v9525_v21 = vld [vmem:[%s9634_s12 + $0xc0] sm:$0xff]  }
 0x1b5   : > { %v7741_v47 = vcombine.low %v5059_v37, %v5069_v43  ;;  %v11139_v37 = vld [vmem:[%s9634_s12 + $0xd0] sm:$0xf]  ;;  %v11142_v43 = vld [vmem:[%s9634_s12 + $0xd4] sm:$0x1] }
 0x1b7   : > { %8731 = vmatmul.mubr.msk.bf16.gmra.mrb[8].mxu0 %vm795_vm3, %v9516_v62  ;;  %8765 = vmatmul.mubr.msk.bf16.gmra.mrb[8].mxu1 %vm795_vm3, %v9516_v62  ;;  %v5077_v62 = vor.u32 %v5076_v14, %v5073_v16  ;;  %v11090_v16 = vld [vmem:[%s9634_s12 + $0xb8] sm:$0xf]  ;;  %v11093_v14 = vld [vmem:[%s9634_s12 + $0xbc] sm:$0x1] }
 0x1b8   : > { %8734 = vmatprep.mubr.msk.bf16.mxu0 %vm795_vm3, %v9517_v32  ;;  %8768 = vmatprep.mubr.msk.bf16.mxu1 %vm795_vm3, %v9517_v32  ;;  %v7801_v32 = vld [vmem:[%s9634_s12 + $0x9c] sm:$0xe]  ;;  %v6079_v5 = vrot.slane %v11090_v16, 5  ;;  %v6082_v48 = vrot.slane %v11093_v14, 5 }
 0x1b9   : > { %v7817_v19 = vrot.slane %v7801_v32, 9  ;;  %v5078_v46 = vrot.slane %v5077_v62, 4  ;;  %v5114_v32 = vshll.u32 %v11081_v44, 16 }
 0x1ba   : > { %v6081_v50 = vrot.slane %v6079_v5, 4 }
 0x1bb   : > { %v6066_v29 = vsel %vm10023_vm7, %v7817_v19, %v6065_v10  ;;  %v5083_v62 = vsel %vm9669_vm4, %v5078_v46, %v11041_v51  ;;  %v9524_v19 = vld [vmem:[%s9634_s12 + $0xb4] sm:$0xff]   ;;  %v6080_v51 = vsel %vm10023_vm7, %v7819_v33, %v6079_v5  ;;  %v5116_v63 = vrot.slane %v5114_v32, 5  ;;  %v7805_v5 = vld [vmem:[%s9634_s12 + $0xcc] sm:$0xe] }
 0x1bc   : > { %v11135_v34 = vcombine.low %v5083_v62, %v5093_v22  ;;  %v6096_v62 = vrot.slane %v11142_v43, 5  ;;  %v5167_v33 = vshrl.u32 %v7707_v26, 16  ;;  %v5180_v22 = vshrl.u32 %v10963_v6, 16 }
 0x1bf   : > { %8735 = vmatmul.mubr.msk.bf16.gmra.mrb[12].mxu0 %vm795_vm3, %v9518_v39  ;;  %8769 = vmatmul.mubr.msk.bf16.gmra.mrb[12].mxu1 %vm795_vm3, %v9518_v39  ;;  %v9522_v39 = vld [vmem:[%s9634_s12 + $0x9c] sm:$0xff]  }
 0x1c0   : > { %8738 = vmatprep.mubr.msk.bf16.mxu0 %vm795_vm3, %v9519_v9  ;;  %8772 = vmatprep.mubr.msk.bf16.mxu1 %vm795_vm3, %v9519_v9  ;;  %v6067_v9 = vrot.slane %v6065_v10, 4  ;;  %v11111_v10 = vld [vmem:[%s9634_s12 + $0x4c] sm:$0xf] }
 0x1c1   : > { %v5156_v46 = vshrl.u32 %v11111_v10, 16 }
 0x1c2   : > { %v6069_v58 = vsel %vm10023_vm7, %v6067_v9, %v6068_v49  ;;  %v5121_v49 = vrot.slane %v5119_v24, 4  ;;  %v5143_v9 = vshrl.u32 %v7704_v55, 16 }
 0x1c3   : > { %v11078_v54 = vcombine.low %v6066_v29, %v6069_v58  ;;  %v5152_v29 = vshll.u32 %v11111_v10, 16  ;;  %v5158_v32 = vrot.slane %v5156_v46, 4 }
 0x1c5   : > { %v11146_v2 = vrot.slane %v5152_v29, 5  ;;  %v11168_v29 = vld [vmem:[%s9634_s12 + $0x64] sm:$0xf] }
 0x1c7   : > { %8739 = vmatmul.mubr.msk.bf16.gmra.mrb[16].mxu0 %vm795_vm3, %v9520_v7  ;;  %8773 = vmatmul.mubr.msk.bf16.gmra.mrb[16].mxu1 %vm795_vm3, %v9520_v7  ;;  %v5122_v7 = vshll.u32 %v7701_v59, 16  ;;  %v5146_v59 = vshll.u32 %v7704_v55, 16 }
 0x1c8   : > { %8742 = vmatprep.mubr.msk.bf16.mxu0 %vm795_vm3, %v9521_v53  ;;  %8776 = vmatprep.mubr.msk.bf16.mxu1 %vm795_vm3, %v9521_v53  ;;  %v5132_v53 = vshrl.u32 %v11071_v35, 16  ;;  %v6019_v35 = vrot.slane %v11152_v57, 5 }
 0x1c9   : > { %v5124_v4 = vrot.slane %v5122_v7, 5  ;;  %v5138_v7 = vshll.u32 %v11118_v17, 16  ;;  %v5148_v55 = vrot.slane %v5146_v59, 5  ;;  %v7710_v59 = vld [vmem:[%s9634_s12 + $0x60] sm:$0xf] }
 0x1ca   : > { %v5134_v0 = vrot.slane %v5132_v53, 4  ;;  %v5145_v53 = vrot.slane %v5143_v9, 4 }
 0x1cb   : > { %v5125_v24 = vor.u32 %v5124_v4, %v5121_v49  ;;  %v5170_v49 = vshll.u32 %v7707_v26, 16  ;;  %v7821_v4 = vrot.slane %v7805_v5, 9  ;;  %v5194_v5 = vshll.u32 %v7710_v59, 16 }
 0x1cd   : > { %v5172_v26 = vrot.slane %v5170_v49, 5 }
 0x1cf   : > { %8743 = vmatmul.mubr.msk.bf16.gmra.mrb[20].mxu0 %vm795_vm3, %v9522_v39  ;;  %8777 = vmatmul.mubr.msk.bf16.gmra.mrb[20].mxu1 %vm795_vm3, %v9522_v39  ;;  %v5111_v39 = vor.u32 %v5110_v41, %v11083_v15  ;;  %v5135_v41 = vor.u32 %v5134_v0, %v11113_v3  ;;  %v11160_v0 = vrot.slane %v5138_v7, 5  ;;  %v5169_v7 = vrot.slane %v5167_v33, 4 }
 0x1d0   : > { %8746 = vmatprep.mubr.msk.bf16.mxu0 %vm795_vm3, %v9523_v61  ;;  %8780 = vmatprep.mubr.msk.bf16.mxu1 %vm795_vm3, %v9523_v61  ;;  %v6083_v61 = vsel %vm10023_vm7, %v6081_v50, %v6082_v48  ;;  %v6093_v48 = vrot.slane %v11139_v37, 5  ;;  %v9526_v50 = vld [vmem:[%s9634_s12 + $0xcc] sm:$0xff]  }
 0x1d1   : > { %v11129_v58 = vcombine.low %v6080_v51, %v6083_v61  ;;  %v5112_v42 = vrot.slane %v5111_v39, 4  ;;  %v11158_v39 = vrot.slane %v5125_v24, 4  ;;  %v11172_v46 = vrot.slane %v5135_v41, 4 }
 0x1d2   : > { %v6095_v9 = vrot.slane %v6093_v48, 4  ;;  %v6094_v61 = vsel %vm10023_vm7, %v7821_v4, %v6093_v48  ;;  %v5200_v48 = vshll.u32 %v11168_v29, 16  ;;  %v5204_v41 = vshrl.u32 %v11168_v29, 16  ;;  %v11201_v4 = vld [vmem:[%s9634_s12 + $0x68] sm:$0x1] }
 0x1d3   : > { %v5117_v51 = vsel %vm9669_vm4, %v5112_v42, %v5116_v63  ;;  %v5159_v63 = vor.u32 %v5158_v32, %v11146_v2  ;;  %v5182_v32 = vrot.slane %v5180_v22, 4  ;;  %v5131_v49 = vsel %vm9669_vm4, %v11158_v39, %v11113_v3  ;;  %v11209_v39 = vld [vmem:[%s9634_s12 + $0x7c] sm:$0xf] }
 0x1d4   : > { %v6097_v24 = vsel %vm10023_vm7, %v6095_v9, %v6096_v62  ;;  %v5173_v22 = vor.u32 %v5172_v26, %v5169_v7  ;;  %v5206_v3 = vrot.slane %v5204_v41, 4 }
 0x1d5   : > { %v11178_v42 = vcombine.low %v6094_v61, %v6097_v24  ;;  %v11206_v61 = vrot.slane %v5200_v48, 5  ;;  %v5252_v48 = vshrl.u32 %v11209_v39, 16 }
 0x1d6   : > { %v11222_v41 = vrot.slane %v5173_v22, 4 }
 0x1d7   : > { %8747 = vmatmul.mubr.msk.bf16.gmra.mrb[24].mxu0 %vm795_vm3, %v9524_v19  ;;  %8781 = vmatmul.mubr.msk.bf16.gmra.mrb[24].mxu1 %vm795_vm3, %v9524_v19  ;;  %v5107_v19 = vsel %vm9669_vm4, %v5102_v18, %v11083_v15  ;;  %v5149_v15 = vor.u32 %v5148_v55, %v5145_v53  ;;  %v5162_v18 = vshll.u32 %v11152_v57, 16  ;;  %11768 = vst [vmem:[#allocation5_spill] sm:$0xff] %v11178_v42  ;;  %v6197_v53 = vsel %vm844_vm0, %v10945_v30, 0 }
 0x1d8   : > { %8750 = vmatprep.mubr.msk.bf16.mxu0 %vm795_vm3, %v9525_v21  ;;  %8784 = vmatprep.mubr.msk.bf16.mxu1 %vm795_vm3, %v9525_v21  ;;  %v5176_v21 = vshll.u32 %v10963_v6, 16  ;;  %v5191_v6 = vshrl.u32 %v7710_v59, 16  ;;  %v6395_v55 = vsel %vm844_vm0, %v10950_v45, 0  ;;  %v7743_v33 = vcombine.low %v5107_v19, %v5117_v51  ;;  %v7716_v19 = vld [vmem:[%s9634_s12 + $0x78] sm:$0xf] }
 0x1d9   : > { %v5141_v30 = vsel %vm9669_vm4, %v11172_v46, %v11160_v0  ;;  %v5164_v45 = vrot.slane %v5162_v18, 5  ;;  %v5150_v9 = vrot.slane %v5149_v15, 4  ;;  %v5196_v59 = vrot.slane %v5194_v5, 5 }
 0x1da   : > { %v11188_v62 = vrot.slane %v5176_v21, 5  ;;  %v5160_v21 = vrot.slane %v5159_v63, 4  ;;  %v5193_v51 = vrot.slane %v5191_v6, 4  ;;  %v5210_v0 = vshll.u32 %v11201_v4, 16 }
 0x1db   : > { %v5224_v15 = vshll.u32 %v10984_v40, 16  ;;  %v5228_v63 = vshrl.u32 %v10984_v40, 16  ;;  %v5242_v7 = vshll.u32 %v7716_v19, 16  ;;  %v5155_v26 = vsel %vm9669_vm4, %v5150_v9, %v11146_v2 }
 0x1dc   : > { %v5183_v24 = vor.u32 %v5182_v32, %v11188_v62  ;;  %v5165_v6 = vsel %vm9669_vm4, %v5160_v21, %v5164_v45  ;;  %v5248_v5 = vshll.u32 %v11209_v39, 16  ;;  %v5207_v40 = vor.u32 %v5206_v3, %v11206_v61  ;;  %v11237_v3 = vld [vmem:[%s9634_s12 + $0x80] sm:$0x1] }
 0x1dd   : > { %v5212_v45 = vrot.slane %v5210_v0, 5  ;;  %v11232_v22 = vrot.slane %v5224_v15, 5  ;;  %v7744_v15 = vcombine.low %v5131_v49, %v5141_v30 }
 0x1de   : > { %v5184_v2 = vrot.slane %v5183_v24, 4  ;;  %v11239_v42 = vrot.slane %v5248_v5, 5 }
 0x1df   : > { %8751 = vmatmul.mubr.msk.bf16.gmra.mrb[28].mxu0 %vm795_vm3, %v9526_v50  ;;  %8785 = vmatmul.mubr.msk.bf16.gmra.mrb[28].mxu1 %vm795_vm3, %v9526_v50  ;;  %v7713_v50 = vld [vmem:[%s9634_s12 + $0x6c] sm:$0xf] }
 0x1e0   : > { %8790 = vmatprep.mubr.msk.bf16.mxu0 %vm795_vm3, %v7741_v47  ;;  %8824 = vmatprep.mubr.msk.bf16.mxu1 %vm795_vm3, %v7741_v47  ;;  %v5186_v47 = vshll.u32 %v10966_v12, 16  ;;  %v5215_v46 = vshrl.u32 %v7713_v50, 16  ;;  %v5218_v18 = vshll.u32 %v7713_v50, 16  ;;  %v5239_v12 = vshrl.u32 %v7716_v19, 16  ;;  %v7719_v19 = vld [vmem:[%s9634_s12 + $0x84] sm:$0xf] }
 0x1e1   : > { %v5197_v50 = vor.u32 %v5196_v59, %v5193_v51  ;;  %v5244_v59 = vrot.slane %v5242_v7, 5  ;;  %v5263_v24 = vshrl.u32 %v7719_v19, 16  ;;  %v5266_v0 = vshll.u32 %v7719_v19, 16 }
 0x1e2   : > { %v11224_v32 = vrot.slane %v5186_v47, 5  ;;  %v5217_v9 = vrot.slane %v5215_v46, 4  ;;  %v5220_v21 = vrot.slane %v5218_v18, 5  ;;  %v5230_v47 = vrot.slane %v5228_v63, 4 }
 0x1e3   : > { %v5241_v51 = vrot.slane %v5239_v12, 4  ;;  %v5272_v46 = vshll.u32 %v11015_v1, 16  ;;  %v5276_v18 = vshrl.u32 %v11015_v1, 16  ;;  %v7745_v63 = vcombine.low %v5155_v26, %v5165_v6  ;;  %v11255_v1 = vld [vmem:[%s9634_s12 + $0x94] sm:$0xf] }
 0x1e4   : > { %v5189_v12 = vsel %vm9669_vm4, %v5184_v2, %v11224_v32  ;;  %v5221_v7 = vor.u32 %v5220_v21, %v5217_v9  ;;  %v5231_v5 = vor.u32 %v5230_v47, %v11232_v22  ;;  %v5265_v26 = vrot.slane %v5263_v24, 4 }
 0x1e5   : > { %v5245_v49 = vor.u32 %v5244_v59, %v5241_v51  ;;  %v5268_v6 = vrot.slane %v5266_v0, 5  ;;  %v11263_v32 = vrot.slane %v5272_v46, 5  ;;  %v5296_v9 = vshll.u32 %v11255_v1, 16 }
 0x1e6   : > { %v5300_v21 = vshrl.u32 %v11255_v1, 16  ;;  %v5282_v0 = vshll.u32 %v11018_v52, 16 }
 0x1e7   : > { %8791 = vmatmul.mubr.msk.bf16.vlgmr.msra.gmra.mrb[0].mxu0 %vm795_vm3, %v11135_v34  ;;  %8825 = vmatmul.mubr.msk.bf16.vlgmr.msra.gmra.mrb[0].mxu1 %vm795_vm3, %v11135_v34  ;;  %v5254_v34 = vrot.slane %v5252_v48, 4  ;;  %v5234_v48 = vshll.u32 %v10987_v27, 16  ;;  %v5278_v27 = vrot.slane %v5276_v18, 4  ;;  %v5246_v59 = vrot.slane %v5245_v49, 4 }
 0x1e8   : > { %8857 = vmatpush3.bf16.msra.mxu0 %v6197_v53  ;;  %8891 = vmatpush3.bf16.msra.mxu1 %v6395_v55  ;;  %v5198_v53 = vrot.slane %v5197_v50, 4  ;;  %v5208_v55 = vrot.slane %v5207_v40, 4  ;;  %v5258_v50 = vshll.u32 %v11237_v3, 16  ;;  %v7722_v40 = vld [vmem:[%s9634_s12 + $0x90] sm:$0xf]  ;;  %v5269_v24 = vor.u32 %v5268_v6, %v5265_v26 }
 0x1e9   : > { %8794 = vmatprep.mubr.msk.bf16.mxu0 %vm795_vm3, %v7743_v33  ;;  %8828 = vmatprep.mubr.msk.bf16.mxu1 %vm795_vm3, %v7743_v33  ;;  %v5179_v33 = vsel %vm9669_vm4, %v11222_v41, %v11188_v62  ;;  %v5255_v30 = vor.u32 %v5254_v34, %v11239_v42  ;;  %v5287_v19 = vshrl.u32 %v7722_v40, 16  ;;  %v5290_v2 = vshll.u32 %v7722_v40, 16 }
 0x1ea   : > { %v5203_v62 = vsel %vm9669_vm4, %v5198_v53, %v11206_v61  ;;  %v5213_v41 = vsel %vm9669_vm4, %v5208_v55, %v5212_v45  ;;  %v5222_v61 = vrot.slane %v5221_v7, 4  ;;  %v5232_v45 = vrot.slane %v5231_v5, 4  ;;  %v7725_v53 = vld [vmem:[%s9634_s12 + $0x9c] sm:$0xf] }
 0x1eb   : > { %v5236_v47 = vrot.slane %v5234_v48, 5  ;;  %v5260_v51 = vrot.slane %v5258_v50, 5  ;;  %v5256_v34 = vrot.slane %v5255_v30, 4  ;;  %v7746_v55 = vcombine.low %v5179_v33, %v5189_v12  ;;  %v7728_v33 = vld [vmem:[%s9634_s12 + $0xa8] sm:$0xf] }
 0x1ec   : > { %v7747_v46 = vcombine.low %v5203_v62, %v5213_v41  ;;  %v5279_v18 = vor.u32 %v5278_v27, %v11263_v32  ;;  %v5289_v40 = vrot.slane %v5287_v19, 4  ;;  %v11277_v7 = vrot.slane %v5296_v9, 5  ;;  %v11286_v12 = vld [vmem:[%s9634_s12 + $0xac] sm:$0xf] }
 0x1ed   : > { %v5302_v5 = vrot.slane %v5300_v21, 4  ;;  %v5227_v48 = vsel %vm9669_vm4, %v5222_v61, %v11232_v22  ;;  %v5237_v50 = vsel %vm9669_vm4, %v5232_v45, %v5236_v47  ;;  %v5311_v52 = vshrl.u32 %v7725_v53, 16 }
 0x1ee   : > { %v5314_v49 = vshll.u32 %v7725_v53, 16  ;;  %v5251_v30 = vsel %vm9669_vm4, %v5246_v59, %v11239_v42  ;;  %v5261_v26 = vsel %vm9669_vm4, %v5256_v34, %v5260_v51  ;;  %v5270_v6 = vrot.slane %v5269_v24, 4 }
 0x1ef   : > { %8795 = vmatmul.mubr.msk.bf16.gmra.mrb[4].mxu0 %vm795_vm3, %v7744_v15  ;;  %8829 = vmatmul.mubr.msk.bf16.gmra.mrb[4].mxu1 %vm795_vm3, %v7744_v15  ;;  %v11275_v15 = vld [vmem:[%s9634_s12 + $0x98] sm:$0x1]  ;;  %v5284_v62 = vrot.slane %v5282_v0, 5  ;;  %v5280_v41 = vrot.slane %v5279_v18, 4  ;;  %v5320_v27 = vshll.u32 %v11054_v25, 16  ;;  %v5324_v19 = vshrl.u32 %v11054_v25, 16 }
 0x1f0   : > { %8798 = vmatprep.mubr.msk.bf16.mxu0 %vm795_vm3, %v7745_v63  ;;  %8832 = vmatprep.mubr.msk.bf16.mxu1 %vm795_vm3, %v7745_v63  ;;  %v5292_v63 = vrot.slane %v5290_v2, 5  ;;  %v5306_v22 = vshll.u32 %v11275_v15, 16  ;;  %v5335_v2 = vshrl.u32 %v7728_v33, 16  ;;  %v5338_v9 = vshll.u32 %v7728_v33, 16 }
 0x1f1   : > { %v5344_v42 = vshll.u32 %v11286_v12, 16  ;;  %v5348_v21 = vshrl.u32 %v11286_v12, 16  ;;  %v5303_v45 = vor.u32 %v5302_v5, %v11277_v7  ;;  %v5313_v25 = vrot.slane %v5311_v52, 4 }
 0x1f2   : > { %v5293_v61 = vor.u32 %v5292_v63, %v5289_v40  ;;  %v5316_v47 = vrot.slane %v5314_v49, 5  ;;  %v7748_v51 = vcombine.low %v5227_v48, %v5237_v50  ;;  %v7749_v59 = vcombine.low %v5251_v30, %v5261_v26  ;;  %v7731_v48 = vld [vmem:[%s9634_s12 + $0xb4] sm:$0xf] }
 0x1f3   : > { %v5275_v34 = vsel %vm9669_vm4, %v5270_v6, %v11263_v32  ;;  %v5285_v24 = vsel %vm9669_vm4, %v5280_v41, %v5284_v62  ;;  %v5308_v0 = vrot.slane %v5306_v22, 5  ;;  %v11308_v53 = vrot.slane %v5320_v27, 5  ;;  %v7734_v41 = vld [vmem:[%s9634_s12 + $0xc0] sm:$0xf]  ;;  %v11321_v22 = vld [vmem:[%s9634_s12 + $0xc4] sm:$0xf] }
 0x1f4   : > { %v5337_v18 = vrot.slane %v5335_v2, 4  ;;  %v5340_v40 = vrot.slane %v5338_v9, 5  ;;  %v11313_v63 = vrot.slane %v5344_v42, 5  ;;  %v5350_v5 = vrot.slane %v5348_v21, 4 }
 0x1f5   : > { %v5294_v50 = vrot.slane %v5293_v61, 4  ;;  %v5304_v52 = vrot.slane %v5303_v45, 4  ;;  %v5317_v32 = vor.u32 %v5316_v47, %v5313_v25  ;;  %v5330_v49 = vshll.u32 %v11057_v20, 16 }
 0x1f6   : > { %v7750_v30 = vcombine.low %v5275_v34, %v5285_v24  ;;  %v5359_v6 = vshrl.u32 %v7731_v48, 16  ;;  %v5362_v62 = vshll.u32 %v7731_v48, 16  ;;  %v5341_v27 = vor.u32 %v5340_v40, %v5337_v18 }
 0x1f7   : > { %8799 = vmatmul.mubr.msk.bf16.gmra.mrb[8].mxu0 %vm795_vm3, %v7746_v55  ;;  %8833 = vmatmul.mubr.msk.bf16.gmra.mrb[8].mxu1 %vm795_vm3, %v7746_v55  ;;  %v5326_v55 = vrot.slane %v5324_v19, 4  ;;  %v5351_v19 = vor.u32 %v5350_v5, %v11313_v63  ;;  %v5368_v2 = vshll.u32 %v11090_v16, 16  ;;  %v5372_v20 = vshrl.u32 %v11090_v16, 16 }
 0x1f8   : > { %8802 = vmatprep.mubr.msk.bf16.mxu0 %vm795_vm3, %v7747_v46  ;;  %8836 = vmatprep.mubr.msk.bf16.mxu1 %vm795_vm3, %v7747_v46  ;;  %v11311_v46 = vld [vmem:[%s9634_s12 + $0xb0] sm:$0x1]  ;;  %v5299_v9 = vsel %vm9669_vm4, %v5294_v50, %v11277_v7  ;;  %v5309_v42 = vsel %vm9669_vm4, %v5304_v52, %v5308_v0  ;;  %v5318_v21 = vrot.slane %v5317_v32, 4  ;;  %v5332_v61 = vrot.slane %v5330_v49, 5  ;;  %v7737_v32 = vld [vmem:[%s9634_s12 + $0xcc] sm:$0xf] }
 0x1f9   : > { %v5354_v33 = vshll.u32 %v11311_v46, 16  ;;  %v5327_v26 = vor.u32 %v5326_v55, %v11308_v53  ;;  %v5383_v45 = vshrl.u32 %v7734_v41, 16  ;;  %v5386_v25 = vshll.u32 %v7734_v41, 16 }
 0x1fa   : > { %v5392_v47 = vshll.u32 %v11321_v22, 16  ;;  %v5396_v16 = vshrl.u32 %v11321_v22, 16  ;;  %v5364_v24 = vrot.slane %v5362_v62, 5  ;;  %v5342_v55 = vrot.slane %v5341_v27, 4 }
 0x1fb   : > { %v5356_v34 = vrot.slane %v5354_v33, 5  ;;  %v5352_v18 = vrot.slane %v5351_v19, 4  ;;  %v5370_v7 = vrot.slane %v5368_v2, 5  ;;  %v5374_v40 = vrot.slane %v5372_v20, 4 }
 0x1fc   : > { %v7751_v5 = vcombine.low %v5299_v9, %v5309_v42  ;;  %v5385_v0 = vrot.slane %v5383_v45, 4  ;;  %v5388_v48 = vrot.slane %v5386_v25, 5  ;;  %v5394_v50 = vrot.slane %v5392_v47, 5 }
 0x1fd   : > { %v5398_v52 = vrot.slane %v5396_v16, 4  ;;  %v5323_v49 = vsel %vm9669_vm4, %v5318_v21, %v11308_v53  ;;  %v5347_v62 = vsel %vm9669_vm4, %v5342_v55, %v11313_v63  ;;  %v5357_v41 = vsel %vm9669_vm4, %v5352_v18, %v5356_v34 }
 0x1fe   : > { %v5375_v27 = vor.u32 %v5374_v40, %v5370_v7  ;;  %v5378_v53 = vshll.u32 %v11093_v14, 16  ;;  %v5407_v19 = vshrl.u32 %v7737_v32, 16  ;;  %v5410_v2 = vshll.u32 %v7737_v32, 16 }
 0x1ff   : > { %8803 = vmatmul.mubr.msk.bf16.gmra.mrb[12].mxu0 %vm795_vm3, %v7748_v51  ;;  %8837 = vmatmul.mubr.msk.bf16.gmra.mrb[12].mxu1 %vm795_vm3, %v7748_v51  ;;  %v5328_v51 = vrot.slane %v5327_v26, 4  ;;  %v5416_v20 = vshll.u32 %v11139_v37, 16  ;;  %v5389_v9 = vor.u32 %v5388_v48, %v5385_v0  ;;  %v5399_v42 = vor.u32 %v5398_v52, %v5394_v50 }
 0x200   : > { %8806 = vmatprep.mubr.msk.bf16.mxu0 %vm795_vm3, %v7749_v59  ;;  %8840 = vmatprep.mubr.msk.bf16.mxu1 %vm795_vm3, %v7749_v59  ;;  %v5361_v59 = vrot.slane %v5359_v6, 4  ;;  %v11344_v6 = vld [vmem:[%s9634_s12 + $0xc8] sm:$0x1]  ;;  %v5376_v25 = vrot.slane %v5375_v27, 4  ;;  %v5380_v47 = vrot.slane %v5378_v53, 5  ;;  %v5409_v14 = vrot.slane %v5407_v19, 4 }
 0x201   : > { %v5333_v33 = vsel %vm9669_vm4, %v5328_v51, %v5332_v61  ;;  %v5402_v63 = vshll.u32 %v11344_v6, 16  ;;  %v7753_v61 = vcombine.low %v5347_v62, %v5357_v41  ;;  %v5412_v16 = vrot.slane %v5410_v2, 5 }
 0x202   : > { %v5365_v26 = vor.u32 %v5364_v24, %v5361_v59  ;;  %v7752_v21 = vcombine.low %v5323_v49, %v5333_v33  ;;  %v5418_v51 = vrot.slane %v5416_v20, 5  ;;  %v5390_v59 = vrot.slane %v5389_v9, 4  ;;  %v7791_v20 = vld [vmem:[%s9634_s12 + $0x24] sm:$0xe]  ;;  %v7792_v9 = vld [vmem:[%s9634_s12 + $0x30] sm:$0xe] }
 0x203   : > { %v5400_v24 = vrot.slane %v5399_v42, 4  ;;  %v5404_v55 = vrot.slane %v5402_v63, 5  ;;  %v5381_v18 = vsel %vm9669_vm4, %v5376_v25, %v5380_v47  ;;  %v5413_v40 = vor.u32 %v5412_v16, %v5409_v14  ;;  %v7793_v16 = vld [vmem:[%s9634_s12 + $0x3c] sm:$0xe] }
 0x204   : > { %v5366_v45 = vrot.slane %v5365_v26, 4  ;;  %v5426_v0 = vshll.u32 %v11142_v43, 16  ;;  %v5395_v48 = vsel %vm9669_vm4, %v5390_v59, %v5394_v50  ;;  %v5988_v32 = vrot.slane %v11000_v11, 5 }
 0x205   : > { %v5405_v52 = vsel %vm9669_vm4, %v5400_v24, %v5404_v55  ;;  %v5414_v26 = vrot.slane %v5413_v40, 4  ;;  %v5991_v43 = vrot.slane %v11029_v8, 5  ;;  %v5995_v19 = vrot.slane %v11008_v23, 5 }
 0x206   : > { %v7755_v33 = vcombine.low %v5395_v48, %v5405_v52  ;;  %v5428_v41 = vrot.slane %v5426_v0, 5  ;;  %v5990_v53 = vrot.slane %v5988_v32, 4  ;;  %v6005_v25 = vrot.slane %v11081_v44, 5  ;;  %v7796_v52 = vld [vmem:[%s9634_s12 + $0x60] sm:$0xe] }
 0x207   : > { %8807 = vmatmul.mubr.msk.bf16.gmra.mrb[16].mxu0 %vm795_vm3, %v7750_v30  ;;  %8841 = vmatmul.mubr.msk.bf16.gmra.mrb[16].mxu1 %vm795_vm3, %v7750_v30  ;;  %v5420_v30 = vshrl.u32 %v11139_v37, 16  ;;  %v5371_v37 = vsel %vm9669_vm4, %v5366_v45, %v5370_v7  ;;  %v7790_v7 = vld [vmem:[%s9634_s12 + $0x18] sm:$0xe]  ;;  %v5419_v11 = vsel %vm9669_vm4, %v5414_v26, %v5418_v51  ;;  %v7808_v45 = vrot.slane %v7792_v9, 9 }
 0x208   : > { %8810 = vmatprep.mubr.msk.bf16.mxu0 %vm795_vm3, %v7751_v5  ;;  %8844 = vmatprep.mubr.msk.bf16.mxu1 %vm795_vm3, %v7751_v5  ;;  %v7754_v49 = vcombine.low %v5371_v37, %v5381_v18  ;;  %v7806_v27 = vrot.slane %v7790_v7, 9  ;;  %v5992_v8 = vsel %vm10023_vm7, %v5990_v53, %v5991_v43  ;;  %v7809_v55 = vrot.slane %v7793_v16, 9 }
 0x209   : > { %v5422_v34 = vrot.slane %v5420_v30, 4  ;;  %v6002_v30 = vrot.slane %v11051_v28, 5  ;;  %v6011_v37 = vrot.slane %v6009_v60, 4  ;;  %v6012_v18 = vrot.slane %v11118_v17, 5 }
 0x20a   : > { %v5989_v2 = vsel %vm10023_vm7, %v7806_v27, %v5988_v32  ;;  %v6030_v48 = vrot.slane %v11168_v29, 5  ;;  %v6033_v26 = vrot.slane %v11201_v4, 5  ;;  %v7798_v27 = vld [vmem:[%s9634_s12 + $0x78] sm:$0xe]  ;;  %v6072_v9 = vrot.slane %v11286_v12, 5 }
 0x20b   : > { %v5423_v5 = vor.u32 %v5422_v34, %v5418_v51  ;;  %v7823_v63 = vcombine.low %v5989_v2, %v5992_v8  ;;  %v6004_v23 = vrot.slane %v6002_v30, 4  ;;  %v6003_v14 = vsel %vm10023_vm7, %v7808_v45, %v6002_v30  ;;  %v7794_v34 = vld [vmem:[%s9634_s12 + $0x48] sm:$0xe]  ;;  %v7804_v45 = vld [vmem:[%s9634_s12 + $0xc0] sm:$0xe] }
 0x20c   : > { %v6016_v51 = vrot.slane %v11111_v10, 5  ;;  %v7810_v40 = vrot.slane %v7794_v34, 9  ;;  %v6010_v10 = vsel %vm10023_vm7, %v7809_v55, %v6009_v60  ;;  %v6013_v0 = vsel %vm10023_vm7, %v6011_v37, %v6012_v18 }
 0x20d   : > { %v5424_v62 = vrot.slane %v5423_v5, 4  ;;  %v6006_v44 = vsel %vm10023_vm7, %v6004_v23, %v6005_v25  ;;  %v7826_v32 = vcombine.low %v6010_v10, %v6013_v0  ;;  %v7814_v4 = vrot.slane %v7798_v27, 9 }
 0x20e   : > { %v7825_v24 = vcombine.low %v6003_v14, %v6006_v44  ;;  %v6018_v5 = vrot.slane %v6016_v51, 4  ;;  %v6017_v17 = vsel %vm10023_vm7, %v7810_v40, %v6016_v51  ;;  %v6061_v30 = vrot.slane %v11275_v15, 5  ;;  %v7802_v15 = vld [vmem:[%s9634_s12 + $0xa8] sm:$0xe] }
 0x20f   : > { %8811 = vmatmul.mubr.msk.bf16.gmra.mrb[20].mxu0 %vm795_vm3, %v7752_v21  ;;  %8845 = vmatmul.mubr.msk.bf16.gmra.mrb[20].mxu1 %vm795_vm3, %v7752_v21  ;;  %v5429_v50 = vsel %vm9669_vm4, %v5424_v62, %v5428_v41  ;;  %v7807_v21 = vrot.slane %v7791_v20, 9  ;;  %v6044_v41 = vrot.slane %v11209_v39, 5  ;;  %v7820_v23 = vrot.slane %v7804_v45, 9 }
 0x210   : > { %8814 = vmatprep.mubr.msk.bf16.mxu0 %vm795_vm3, %v7753_v61  ;;  %8848 = vmatprep.mubr.msk.bf16.mxu1 %vm795_vm3, %v7753_v61  ;;  %v7756_v42 = vcombine.low %v5419_v11, %v5429_v50  ;;  %v5997_v61 = vrot.slane %v5995_v19, 4  ;;  %v6020_v57 = vsel %vm10023_vm7, %v6018_v5, %v6019_v35  ;;  %v6047_v11 = vrot.slane %v11237_v3, 5  ;;  %v7800_v3 = vld [vmem:[%s9634_s12 + $0x90] sm:$0xe] }
 0x211   : > { %v5996_v28 = vsel %vm10023_vm7, %v7807_v21, %v5995_v19  ;;  %v7827_v7 = vcombine.low %v6017_v17, %v6020_v57  ;;  %v6046_v43 = vrot.slane %v6044_v41, 4  ;;  %v6045_v39 = vsel %vm10023_vm7, %v7814_v4, %v6044_v41 }
 0x212   : > { %v5999_v47 = vsel %vm10023_vm7, %v5997_v61, %v5998_v31  ;;  %v6058_v19 = vrot.slane %v11255_v1, 5  ;;  %v7816_v8 = vrot.slane %v7800_v3, 9  ;;  %v6074_v21 = vrot.slane %v6072_v9, 4 }
 0x213   : > { %v7824_v59 = vcombine.low %v5996_v28, %v5999_v47  ;;  %v6048_v50 = vsel %vm10023_vm7, %v6046_v43, %v6047_v11  ;;  %v6075_v61 = vrot.slane %v11311_v46, 5  ;;  %v6086_v31 = vrot.slane %v11321_v22, 5 }
 0x214   : > { %v7831_v2 = vcombine.low %v6045_v39, %v6048_v50  ;;  %v6060_v20 = vrot.slane %v6058_v19, 4  ;;  %v6089_v28 = vrot.slane %v11344_v6, 5  ;;  %v11504_v6 = vld [vmem:[%s11722_s4] ss:$0 sm:$0xff] }
 0x215   : > { %v6076_v12 = vsel %vm10023_vm7, %v6074_v21, %v6075_v61  ;;  %v6088_v25 = vrot.slane %v6086_v31, 4 }
 0x216   : > { %v6062_v1 = vsel %vm10023_vm7, %v6060_v20, %v6061_v30 }
 0x217   : > { %8815 = vmatmul.mubr.msk.bf16.gmra.mrb[24].mxu0 %vm795_vm3, %v7754_v49  ;;  %8849 = vmatmul.mubr.msk.bf16.gmra.mrb[24].mxu1 %vm795_vm3, %v7754_v49  ;;  %v7812_v49 = vrot.slane %v7796_v52, 9  ;;  %v6090_v22 = vsel %vm10023_vm7, %v6088_v25, %v6089_v28 }
 0x218   : > { %8818 = vmatprep.mubr.msk.bf16.mxu0 %vm795_vm3, %v7755_v33  ;;  %8852 = vmatprep.mubr.msk.bf16.mxu1 %vm795_vm3, %v7755_v33  ;;  %v6032_v33 = vrot.slane %v6030_v48, 4 }
 0x219   : > { %v6031_v62 = vsel %vm10023_vm7, %v7812_v49, %v6030_v48 }
 0x21a   : > { %v6034_v29 = vsel %vm10023_vm7, %v6032_v33, %v6033_v26 }
 0x21b   : > { %v7829_v53 = vcombine.low %v6031_v62, %v6034_v29 }
 0x21f   : > { %8819 = vmatmul.mubr.msk.bf16.gmra.mrb[28].mxu0 %vm795_vm3, %v7756_v42  ;;  %8853 = vmatmul.mubr.msk.bf16.gmra.mrb[28].mxu1 %vm795_vm3, %v7756_v42 }
 0x220   : > { %8858 = vmatprep.mubr.msk.bf16.mxu0 %vm795_vm3, %v7823_v63  ;;  %8892 = vmatprep.mubr.msk.bf16.mxu1 %vm795_vm3, %v7823_v63  ;;  %v7818_v63 = vrot.slane %v7802_v15, 9 }
 0x227   : > { %8859 = vmatmul.mubr.msk.bf16.vlgmr.msra.gmra.mrb[0].mxu0 %vm795_vm3, %v7824_v59  ;;  %8893 = vmatmul.mubr.msk.bf16.vlgmr.msra.gmra.mrb[0].mxu1 %vm795_vm3, %v7824_v59 }
 0x228   : > { %8862 = vmatprep.mubr.msk.bf16.mxu0 %vm795_vm3, %v7825_v24  ;;  %8896 = vmatprep.mubr.msk.bf16.mxu1 %vm795_vm3, %v7825_v24 }
 0x22f   : > { %8863 = vmatmul.mubr.msk.bf16.gmra.mrb[4].mxu0 %vm795_vm3, %v7826_v32  ;;  %8897 = vmatmul.mubr.msk.bf16.gmra.mrb[4].mxu1 %vm795_vm3, %v7826_v32 }
 0x230   : > { %8866 = vmatprep.mubr.msk.bf16.mxu0 %vm795_vm3, %v7827_v7  ;;  %8900 = vmatprep.mubr.msk.bf16.mxu1 %vm795_vm3, %v7827_v7 }
 0x237   : > { %8867 = vmatmul.mubr.msk.bf16.gmra.mrb[8].mxu0 %vm795_vm3, %v10979_v13  ;;  %8901 = vmatmul.mubr.msk.bf16.gmra.mrb[8].mxu1 %vm795_vm3, %v10979_v13  ;;  %v6059_v13 = vsel %vm10023_vm7, %v7816_v8, %v6058_v19 }
 0x238   : > { %8870 = vmatprep.mubr.msk.bf16.mxu0 %vm795_vm3, %v7829_v53  ;;  %8904 = vmatprep.mubr.msk.bf16.mxu1 %vm795_vm3, %v7829_v53  ;;  %v7833_v42 = vcombine.low %v6059_v13, %v6062_v1 }
 0x23f   : > { %8871 = vmatmul.mubr.msk.bf16.gmra.mrb[12].mxu0 %vm795_vm3, %v11005_v36  ;;  %8905 = vmatmul.mubr.msk.bf16.gmra.mrb[12].mxu1 %vm795_vm3, %v11005_v36  ;;  %v6073_v36 = vsel %vm10023_vm7, %v7818_v63, %v6072_v9 }
 0x240   : > { %8874 = vmatprep.mubr.msk.bf16.mxu0 %vm795_vm3, %v7831_v2  ;;  %8908 = vmatprep.mubr.msk.bf16.mxu1 %vm795_vm3, %v7831_v2  ;;  %v7835_v46 = vcombine.low %v6073_v36, %v6076_v12 }
 0x247   : > { %8875 = vmatmul.mubr.msk.bf16.gmra.mrb[16].mxu0 %vm795_vm3, %v11043_v38  ;;  %8909 = vmatmul.mubr.msk.bf16.gmra.mrb[16].mxu1 %vm795_vm3, %v11043_v38  ;;  %v6087_v38 = vsel %vm10023_vm7, %v7820_v23, %v6086_v31 }
 0x248   : > { %8878 = vmatprep.mubr.msk.bf16.mxu0 %vm795_vm3, %v7833_v42  ;;  %8912 = vmatprep.mubr.msk.bf16.mxu1 %vm795_vm3, %v7833_v42  ;;  %v7837_v47 = vcombine.low %v6087_v38, %v6090_v22 }
 0x24f   : > { %8879 = vmatmul.mubr.msk.bf16.gmra.mrb[20].mxu0 %vm795_vm3, %v11078_v54  ;;  %8913 = vmatmul.mubr.msk.bf16.gmra.mrb[20].mxu1 %vm795_vm3, %v11078_v54  ;;  %v11769_v54 = vld [vmem:[#allocation5_spill] sm:$0xff] }
 0x250   : > { %8882 = vmatprep.mubr.msk.bf16.mxu0 %vm795_vm3, %v7835_v46  ;;  %8916 = vmatprep.mubr.msk.bf16.mxu1 %vm795_vm3, %v7835_v46 }
 0x257   : > { %8883 = vmatmul.mubr.msk.bf16.gmra.mrb[24].mxu0 %vm795_vm3, %v11129_v58  ;;  %8917 = vmatmul.mubr.msk.bf16.gmra.mrb[24].mxu1 %vm795_vm3, %v11129_v58 }
 0x258   : > { %8886 = vmatprep.mubr.msk.bf16.mxu0 %vm795_vm3, %v7837_v47  ;;  %8920 = vmatprep.mubr.msk.bf16.mxu1 %vm795_vm3, %v7837_v47 }
 0x25f   : > { %8887 = vmatmul.mubr.msk.bf16.gmra.mrb[28].mxu0 %vm795_vm3, %v11769_v54  ;;  %8921 = vmatmul.mubr.msk.bf16.gmra.mrb[28].mxu1 %vm795_vm3, %v11769_v54 }
 0x2fa   : > { %v8860_v58 = vpop.f32.mrb[0].mxu0  ;;  %v8894_v60 = vpop.f32.mrb[0].mxu1 }
 0x2fb   : > { %v6599_v14 = vadd.f32 %v8860_v58, %v11499_v56  ;;  %v6831_v44 = vadd.f32 %v8894_v60, %v11504_v6  ;;  %v6233_v16 = vpop.f32.mrb[1].mxu0  ;;  %v6431_v51 = vpop.f32.mrb[1].mxu1 }
 0x2fc   : > { %v6597_v34 = vadd.f32 %v11499_v56, %v6233_v16  ;;  %v6829_v59 = vadd.f32 %v11504_v6, %v6431_v51  ;;  %v8861_v24 = vpop.f32.mrb[2].mxu0  ;;  %v8895_v55 = vpop.f32.mrb[2].mxu1 }
 0x2fd   : > { %v6631_v37 = vmax.f32 %v6599_v14, 0.0  ;;  %v7976_v18 = vpack.c.bf16 %v6831_v44, %v6831_v44  ;;  %v6600_v40 = vadd.f32 %v8861_v24, %v11499_v56  ;;  %v6832_v5 = vadd.f32 %v8895_v55, %v11504_v6  ;;  %v6236_v35 = vpop.f32.mrb[3].mxu0  ;;  %v6434_v10 = vpop.f32.mrb[3].mxu1 }
 0x2fe   : > { %v6629_v0 = vmax.f32 %v6597_v34, 0.0  ;;  %v7974_v17 = vpack.c.bf16 %v6829_v59, %v6829_v59  ;;  %v6598_v57 = vadd.f32 %v11499_v56, %v6236_v35  ;;  %v6830_v48 = vadd.f32 %v11504_v6, %v6434_v10 }
 0x2ff   : > { %v7944_v52 = vpack.c.bf16 %v6631_v37, %v6631_v37  ;;  %6991 = vst.msk [vmem:[%s11512_s8 + $0x8] sm:$0xf] %vm6789_vm8, %v7976_v18  ;;  %v6632_v32 = vmax.f32 %v6600_v40, 0.0  ;;  %v7977_v7 = vpack.c.bf16 %v6832_v5, %v6832_v5 }
 0x300   : > { %v7942_v49 = vpack.c.bf16 %v6629_v0, %v6629_v0  ;;  %6989 = vst.msk [vmem:[%s11512_s8] sm:$0xf] %vm6789_vm8, %v7974_v17  ;;  %v6630_v33 = vmax.f32 %v6598_v57, 0.0  ;;  %v7975_v26 = vpack.c.bf16 %v6830_v48, %v6830_v48 }
 0x301   : > { %6792 = vst.msk [vmem:[%s11521_s10 + $0x8] sm:$0xf] %vm6789_vm8, %v7944_v52  ;;  %v7945_v62 = vpack.c.bf16 %v6632_v32, %v6632_v32  ;;  %6992 = vst.msk [vmem:[%s11512_s8 + $0xc] sm:$0xf] %vm6789_vm8, %v7977_v7 }
 0x302   : > { %6790 = vst.msk [vmem:[%s11521_s10] sm:$0xf] %vm6789_vm8, %v7942_v49  ;;  %v7943_v29 = vpack.c.bf16 %v6630_v33, %v6630_v33  ;;  %6990 = vst.msk [vmem:[%s11512_s8 + $0x4] sm:$0xf] %vm6789_vm8, %v7975_v26  ;;  %v8864_v41 = vpop.f32.mrb[4].mxu0  ;;  %v8898_v27 = vpop.f32.mrb[4].mxu1 }
 0x303   : > { %6793 = vst.msk [vmem:[%s11521_s10 + $0xc] sm:$0xf] %vm6789_vm8, %v7945_v62  ;;  %v6603_v53 = vadd.f32 %v8864_v41, %v11499_v56  ;;  %v6835_v4 = vadd.f32 %v8898_v27, %v11504_v6  ;;  %v6249_v43 = vpop.f32.mrb[5].mxu0  ;;  %v6447_v11 = vpop.f32.mrb[5].mxu1 }
 0x304   : > { %6791 = vst.msk [vmem:[%s11521_s10 + $0x4] sm:$0xf] %vm6789_vm8, %v7943_v29  ;;  %v6601_v39 = vadd.f32 %v11499_v56, %v6249_v43  ;;  %v6833_v50 = vadd.f32 %v11504_v6, %v6447_v11  ;;  %v8865_v19 = vpop.f32.mrb[6].mxu0  ;;  %v8899_v3 = vpop.f32.mrb[6].mxu1 }
 0x305   : > { %v6635_v2 = vmax.f32 %v6603_v53, 0.0  ;;  %v7980_v8 = vpack.c.bf16 %v6835_v4, %v6835_v4  ;;  %v6604_v20 = vadd.f32 %v8865_v19, %v11499_v56  ;;  %v6836_v30 = vadd.f32 %v8899_v3, %v11504_v6  ;;  %v6252_v13 = vpop.f32.mrb[7].mxu0  ;;  %v6450_v1 = vpop.f32.mrb[7].mxu1 }
 0x306   : > { %v6633_v9 = vmax.f32 %v6601_v39, 0.0  ;;  %v7978_v15 = vpack.c.bf16 %v6833_v50, %v6833_v50  ;;  %v6602_v42 = vadd.f32 %v11499_v56, %v6252_v13  ;;  %v6834_v63 = vadd.f32 %v11504_v6, %v6450_v1 }
 0x307   : > { %v7948_v21 = vpack.c.bf16 %v6635_v2, %v6635_v2  ;;  %6995 = vst.msk [vmem:[%s11512_s8 + $0x18] sm:$0xf] %vm6789_vm8, %v7980_v8  ;;  %v6636_v61 = vmax.f32 %v6604_v20, 0.0  ;;  %v7981_v36 = vpack.c.bf16 %v6836_v30, %v6836_v30 }
 0x308   : > { %v7946_v12 = vpack.c.bf16 %v6633_v9, %v6633_v9  ;;  %6993 = vst.msk [vmem:[%s11512_s8 + $0x10] sm:$0xf] %vm6789_vm8, %v7978_v15  ;;  %v6634_v31 = vmax.f32 %v6602_v42, 0.0  ;;  %v7979_v45 = vpack.c.bf16 %v6834_v63, %v6834_v63 }
 0x309   : > { %6796 = vst.msk [vmem:[%s11521_s10 + $0x18] sm:$0xf] %vm6789_vm8, %v7948_v21  ;;  %v7949_v46 = vpack.c.bf16 %v6636_v61, %v6636_v61  ;;  %6996 = vst.msk [vmem:[%s11512_s8 + $0x1c] sm:$0xf] %vm6789_vm8, %v7981_v36 }
 0x30a   : > { %6794 = vst.msk [vmem:[%s11521_s10 + $0x10] sm:$0xf] %vm6789_vm8, %v7946_v12  ;;  %v7947_v23 = vpack.c.bf16 %v6634_v31, %v6634_v31  ;;  %6994 = vst.msk [vmem:[%s11512_s8 + $0x14] sm:$0xf] %vm6789_vm8, %v7979_v45  ;;  %v8868_v25 = vpop.f32.mrb[8].mxu0  ;;  %v8902_v28 = vpop.f32.mrb[8].mxu1 }
 0x30b   : > { %6797 = vst.msk [vmem:[%s11521_s10 + $0x1c] sm:$0xf] %vm6789_vm8, %v7949_v46  ;;  %v6607_v38 = vadd.f32 %v8868_v25, %v11499_v56  ;;  %v6839_v22 = vadd.f32 %v8902_v28, %v11504_v6  ;;  %v6265_v47 = vpop.f32.mrb[9].mxu0  ;;  %v6463_v54 = vpop.f32.mrb[9].mxu1 }
 0x30c   : > { %6795 = vst.msk [vmem:[%s11521_s10 + $0x14] sm:$0xf] %vm6789_vm8, %v7947_v23  ;;  %v6605_v58 = vadd.f32 %v11499_v56, %v6265_v47  ;;  %v6837_v60 = vadd.f32 %v11504_v6, %v6463_v54  ;;  %v8869_v14 = vpop.f32.mrb[10].mxu0  ;;  %v8903_v44 = vpop.f32.mrb[10].mxu1 }
 0x30d   : > { %v6639_v16 = vmax.f32 %v6607_v38, 0.0  ;;  %v7984_v51 = vpack.c.bf16 %v6839_v22, %v6839_v22  ;;  %v6608_v34 = vadd.f32 %v8869_v14, %v11499_v56  ;;  %v6840_v59 = vadd.f32 %v8903_v44, %v11504_v6  ;;  %v6268_v24 = vpop.f32.mrb[11].mxu0  ;;  %v6466_v55 = vpop.f32.mrb[11].mxu1 }
 0x30e   : > { %v6637_v37 = vmax.f32 %v6605_v58, 0.0  ;;  %v7982_v18 = vpack.c.bf16 %v6837_v60, %v6837_v60  ;;  %v6606_v40 = vadd.f32 %v11499_v56, %v6268_v24  ;;  %v6838_v5 = vadd.f32 %v11504_v6, %v6466_v55 }
 0x30f   : > { %v7952_v35 = vpack.c.bf16 %v6639_v16, %v6639_v16  ;;  %6999 = vst.msk [vmem:[%s11512_s8 + $0x28] sm:$0xf] %vm6789_vm8, %v7984_v51  ;;  %v6640_v10 = vmax.f32 %v6608_v34, 0.0  ;;  %v7985_v0 = vpack.c.bf16 %v6840_v59, %v6840_v59 }
 0x310   : > { %v7950_v17 = vpack.c.bf16 %v6637_v37, %v6637_v37  ;;  %6997 = vst.msk [vmem:[%s11512_s8 + $0x20] sm:$0xf] %vm6789_vm8, %v7982_v18  ;;  %v6638_v57 = vmax.f32 %v6606_v40, 0.0  ;;  %v7983_v48 = vpack.c.bf16 %v6838_v5, %v6838_v5 }
 0x311   : > { %6800 = vst.msk [vmem:[%s11521_s10 + $0x28] sm:$0xf] %vm6789_vm8, %v7952_v35  ;;  %v7953_v52 = vpack.c.bf16 %v6640_v10, %v6640_v10  ;;  %7000 = vst.msk [vmem:[%s11512_s8 + $0x2c] sm:$0xf] %vm6789_vm8, %v7985_v0 }
 0x312   : > { %6798 = vst.msk [vmem:[%s11521_s10 + $0x20] sm:$0xf] %vm6789_vm8, %v7950_v17  ;;  %v7951_v32 = vpack.c.bf16 %v6638_v57, %v6638_v57  ;;  %6998 = vst.msk [vmem:[%s11512_s8 + $0x24] sm:$0xf] %vm6789_vm8, %v7983_v48  ;;  %v8872_v7 = vpop.f32.mrb[12].mxu0  ;;  %v8906_v49 = vpop.f32.mrb[12].mxu1 }
 0x313   : > { %6801 = vst.msk [vmem:[%s11521_s10 + $0x2c] sm:$0xf] %vm6789_vm8, %v7953_v52  ;;  %v6611_v33 = vadd.f32 %v8872_v7, %v11499_v56  ;;  %v6843_v26 = vadd.f32 %v8906_v49, %v11504_v6  ;;  %v6281_v62 = vpop.f32.mrb[13].mxu0  ;;  %v6479_v29 = vpop.f32.mrb[13].mxu1 }
 0x314   : > { %6799 = vst.msk [vmem:[%s11521_s10 + $0x24] sm:$0xf] %vm6789_vm8, %v7951_v32  ;;  %v6609_v41 = vadd.f32 %v11499_v56, %v6281_v62  ;;  %v6841_v27 = vadd.f32 %v11504_v6, %v6479_v29  ;;  %v8873_v53 = vpop.f32.mrb[14].mxu0  ;;  %v8907_v4 = vpop.f32.mrb[14].mxu1 }
 0x315   : > { %v6643_v43 = vmax.f32 %v6611_v33, 0.0  ;;  %v7988_v11 = vpack.c.bf16 %v6843_v26, %v6843_v26  ;;  %v6612_v39 = vadd.f32 %v8873_v53, %v11499_v56  ;;  %v6844_v50 = vadd.f32 %v8907_v4, %v11504_v6  ;;  %v6284_v19 = vpop.f32.mrb[15].mxu0  ;;  %v6482_v3 = vpop.f32.mrb[15].mxu1 }
 0x316   : > { %v6641_v2 = vmax.f32 %v6609_v41, 0.0  ;;  %v7986_v8 = vpack.c.bf16 %v6841_v27, %v6841_v27  ;;  %v6610_v20 = vadd.f32 %v11499_v56, %v6284_v19  ;;  %v6842_v30 = vadd.f32 %v11504_v6, %v6482_v3 }
 0x317   : > { %v7956_v13 = vpack.c.bf16 %v6643_v43, %v6643_v43  ;;  %7003 = vst.msk [vmem:[%s11512_s8 + $0x38] sm:$0xf] %vm6789_vm8, %v7988_v11  ;;  %v6644_v1 = vmax.f32 %v6612_v39, 0.0  ;;  %v7989_v9 = vpack.c.bf16 %v6844_v50, %v6844_v50 }
 0x318   : > { %v7954_v15 = vpack.c.bf16 %v6641_v2, %v6641_v2  ;;  %7001 = vst.msk [vmem:[%s11512_s8 + $0x30] sm:$0xf] %vm6789_vm8, %v7986_v8  ;;  %v6642_v42 = vmax.f32 %v6610_v20, 0.0  ;;  %v7987_v63 = vpack.c.bf16 %v6842_v30, %v6842_v30 }
 0x319   : > { %6804 = vst.msk [vmem:[%s11521_s10 + $0x38] sm:$0xf] %vm6789_vm8, %v7956_v13  ;;  %v7957_v21 = vpack.c.bf16 %v6644_v1, %v6644_v1  ;;  %7004 = vst.msk [vmem:[%s11512_s8 + $0x3c] sm:$0xf] %vm6789_vm8, %v7989_v9 }
 0x31a   : > { %6802 = vst.msk [vmem:[%s11521_s10 + $0x30] sm:$0xf] %vm6789_vm8, %v7954_v15  ;;  %v7955_v61 = vpack.c.bf16 %v6642_v42, %v6642_v42  ;;  %7002 = vst.msk [vmem:[%s11512_s8 + $0x34] sm:$0xf] %vm6789_vm8, %v7987_v63  ;;  %v8876_v36 = vpop.f32.mrb[16].mxu0  ;;  %v8910_v12 = vpop.f32.mrb[16].mxu1 }
 0x31b   : > { %6805 = vst.msk [vmem:[%s11521_s10 + $0x3c] sm:$0xf] %vm6789_vm8, %v7957_v21  ;;  %v6615_v31 = vadd.f32 %v8876_v36, %v11499_v56  ;;  %v6847_v45 = vadd.f32 %v8910_v12, %v11504_v6  ;;  %v6297_v46 = vpop.f32.mrb[17].mxu0  ;;  %v6495_v23 = vpop.f32.mrb[17].mxu1 }
 0x31c   : > { %6803 = vst.msk [vmem:[%s11521_s10 + $0x34] sm:$0xf] %vm6789_vm8, %v7955_v61  ;;  %v6613_v25 = vadd.f32 %v11499_v56, %v6297_v46  ;;  %v6845_v28 = vadd.f32 %v11504_v6, %v6495_v23  ;;  %v8877_v38 = vpop.f32.mrb[18].mxu0  ;;  %v8911_v22 = vpop.f32.mrb[18].mxu1 }
 0x31d   : > { %v6647_v47 = vmax.f32 %v6615_v31, 0.0  ;;  %v7992_v54 = vpack.c.bf16 %v6847_v45, %v6847_v45  ;;  %v6616_v58 = vadd.f32 %v8877_v38, %v11499_v56  ;;  %v6848_v60 = vadd.f32 %v8911_v22, %v11504_v6  ;;  %v6300_v14 = vpop.f32.mrb[19].mxu0  ;;  %v6498_v44 = vpop.f32.mrb[19].mxu1 }
 0x31e   : > { %v6645_v16 = vmax.f32 %v6613_v25, 0.0  ;;  %v7990_v51 = vpack.c.bf16 %v6845_v28, %v6845_v28  ;;  %v6614_v34 = vadd.f32 %v11499_v56, %v6300_v14  ;;  %v6846_v59 = vadd.f32 %v11504_v6, %v6498_v44 }
 0x31f   : > { %v7960_v24 = vpack.c.bf16 %v6647_v47, %v6647_v47  ;;  %7007 = vst.msk [vmem:[%s11512_s8 + $0x48] sm:$0xf] %vm6789_vm8, %v7992_v54  ;;  %v6648_v55 = vmax.f32 %v6616_v58, 0.0  ;;  %v7993_v37 = vpack.c.bf16 %v6848_v60, %v6848_v60 }
 0x320   : > { %v7958_v18 = vpack.c.bf16 %v6645_v16, %v6645_v16  ;;  %7005 = vst.msk [vmem:[%s11512_s8 + $0x40] sm:$0xf] %vm6789_vm8, %v7990_v51  ;;  %v6646_v40 = vmax.f32 %v6614_v34, 0.0  ;;  %v7991_v5 = vpack.c.bf16 %v6846_v59, %v6846_v59 }
 0x321   : > { %6808 = vst.msk [vmem:[%s11521_s10 + $0x48] sm:$0xf] %vm6789_vm8, %v7960_v24  ;;  %v7961_v35 = vpack.c.bf16 %v6648_v55, %v6648_v55  ;;  %7008 = vst.msk [vmem:[%s11512_s8 + $0x4c] sm:$0xf] %vm6789_vm8, %v7993_v37 }
 0x322   : > { %6806 = vst.msk [vmem:[%s11521_s10 + $0x40] sm:$0xf] %vm6789_vm8, %v7958_v18  ;;  %v7959_v10 = vpack.c.bf16 %v6646_v40, %v6646_v40  ;;  %7006 = vst.msk [vmem:[%s11512_s8 + $0x44] sm:$0xf] %vm6789_vm8, %v7991_v5  ;;  %v8880_v0 = vpop.f32.mrb[20].mxu0  ;;  %v8914_v17 = vpop.f32.mrb[20].mxu1 }
 0x323   : > { %6809 = vst.msk [vmem:[%s11521_s10 + $0x4c] sm:$0xf] %vm6789_vm8, %v7961_v35  ;;  %v6619_v57 = vadd.f32 %v8880_v0, %v11499_v56  ;;  %v6851_v48 = vadd.f32 %v8914_v17, %v11504_v6  ;;  %v6313_v52 = vpop.f32.mrb[21].mxu0  ;;  %v6511_v32 = vpop.f32.mrb[21].mxu1 }
 0x324   : > { %6807 = vst.msk [vmem:[%s11521_s10 + $0x44] sm:$0xf] %vm6789_vm8, %v7959_v10  ;;  %v6617_v7 = vadd.f32 %v11499_v56, %v6313_v52  ;;  %v6849_v49 = vadd.f32 %v11504_v6, %v6511_v32  ;;  %v8881_v33 = vpop.f32.mrb[22].mxu0  ;;  %v8915_v26 = vpop.f32.mrb[22].mxu1 }
 0x325   : > { %v6651_v62 = vmax.f32 %v6619_v57, 0.0  ;;  %v7996_v29 = vpack.c.bf16 %v6851_v48, %v6851_v48  ;;  %v6620_v41 = vadd.f32 %v8881_v33, %v11499_v56  ;;  %v6852_v27 = vadd.f32 %v8915_v26, %v11504_v6  ;;  %v6316_v53 = vpop.f32.mrb[23].mxu0  ;;  %v6514_v4 = vpop.f32.mrb[23].mxu1 }
 0x326   : > { %v6649_v43 = vmax.f32 %v6617_v7, 0.0  ;;  %v7994_v11 = vpack.c.bf16 %v6849_v49, %v6849_v49  ;;  %v6618_v39 = vadd.f32 %v11499_v56, %v6316_v53  ;;  %v6850_v50 = vadd.f32 %v11504_v6, %v6514_v4 }
 0x327   : > { %v7964_v19 = vpack.c.bf16 %v6651_v62, %v6651_v62  ;;  %7011 = vst.msk [vmem:[%s11512_s8 + $0x58] sm:$0xf] %vm6789_vm8, %v7996_v29  ;;  %v6652_v3 = vmax.f32 %v6620_v41, 0.0  ;;  %v7997_v2 = vpack.c.bf16 %v6852_v27, %v6852_v27 }
 0x328   : > { %v7962_v8 = vpack.c.bf16 %v6649_v43, %v6649_v43  ;;  %7009 = vst.msk [vmem:[%s11512_s8 + $0x50] sm:$0xf] %vm6789_vm8, %v7994_v11  ;;  %v6650_v20 = vmax.f32 %v6618_v39, 0.0  ;;  %v7995_v30 = vpack.c.bf16 %v6850_v50, %v6850_v50 }
 0x329   : > { %6812 = vst.msk [vmem:[%s11521_s10 + $0x58] sm:$0xf] %vm6789_vm8, %v7964_v19  ;;  %v7965_v13 = vpack.c.bf16 %v6652_v3, %v6652_v3  ;;  %7012 = vst.msk [vmem:[%s11512_s8 + $0x5c] sm:$0xf] %vm6789_vm8, %v7997_v2 }
 0x32a   : > { %6810 = vst.msk [vmem:[%s11521_s10 + $0x50] sm:$0xf] %vm6789_vm8, %v7962_v8  ;;  %v7963_v1 = vpack.c.bf16 %v6650_v20, %v6650_v20  ;;  %7010 = vst.msk [vmem:[%s11512_s8 + $0x54] sm:$0xf] %vm6789_vm8, %v7995_v30  ;;  %v8884_v9 = vpop.f32.mrb[24].mxu0  ;;  %v8918_v15 = vpop.f32.mrb[24].mxu1 }
 0x32b   : > { %6813 = vst.msk [vmem:[%s11521_s10 + $0x5c] sm:$0xf] %vm6789_vm8, %v7965_v13  ;;  %v6623_v42 = vadd.f32 %v8884_v9, %v11499_v56  ;;  %v6855_v63 = vadd.f32 %v8918_v15, %v11504_v6  ;;  %v6329_v21 = vpop.f32.mrb[25].mxu0  ;;  %v6527_v61 = vpop.f32.mrb[25].mxu1 }
 0x32c   : > { %6811 = vst.msk [vmem:[%s11521_s10 + $0x54] sm:$0xf] %vm6789_vm8, %v7963_v1  ;;  %v6621_v36 = vadd.f32 %v11499_v56, %v6329_v21  ;;  %v6853_v12 = vadd.f32 %v11504_v6, %v6527_v61  ;;  %v8885_v31 = vpop.f32.mrb[26].mxu0  ;;  %v8919_v45 = vpop.f32.mrb[26].mxu1 }
 0x32d   : > { %v6655_v46 = vmax.f32 %v6623_v42, 0.0  ;;  %v8000_v23 = vpack.c.bf16 %v6855_v63, %v6855_v63  ;;  %v6624_v25 = vadd.f32 %v8885_v31, %v11499_v56  ;;  %v6856_v28 = vadd.f32 %v8919_v45, %v11504_v6  ;;  %v6332_v38 = vpop.f32.mrb[27].mxu0  ;;  %v6530_v22 = vpop.f32.mrb[27].mxu1 }
 0x32e   : > { %v6653_v47 = vmax.f32 %v6621_v36, 0.0  ;;  %v7998_v54 = vpack.c.bf16 %v6853_v12, %v6853_v12  ;;  %v6622_v58 = vadd.f32 %v11499_v56, %v6332_v38  ;;  %v6854_v60 = vadd.f32 %v11504_v6, %v6530_v22 }
 0x32f   : > { %v7968_v14 = vpack.c.bf16 %v6655_v46, %v6655_v46  ;;  %7015 = vst.msk [vmem:[%s11512_s8 + $0x68] sm:$0xf] %vm6789_vm8, %v8000_v23  ;;  %v6656_v44 = vmax.f32 %v6624_v25, 0.0  ;;  %v8001_v16 = vpack.c.bf16 %v6856_v28, %v6856_v28 }
 0x330   : > { %v7966_v51 = vpack.c.bf16 %v6653_v47, %v6653_v47  ;;  %7013 = vst.msk [vmem:[%s11512_s8 + $0x60] sm:$0xf] %vm6789_vm8, %v7998_v54  ;;  %v6654_v34 = vmax.f32 %v6622_v58, 0.0  ;;  %v7999_v59 = vpack.c.bf16 %v6854_v60, %v6854_v60 }
 0x331   : > { %6816 = vst.msk [vmem:[%s11521_s10 + $0x68] sm:$0xf] %vm6789_vm8, %v7968_v14  ;;  %v7969_v24 = vpack.c.bf16 %v6656_v44, %v6656_v44  ;;  %7016 = vst.msk [vmem:[%s11512_s8 + $0x6c] sm:$0xf] %vm6789_vm8, %v8001_v16 }
 0x332   : > { %6814 = vst.msk [vmem:[%s11521_s10 + $0x60] sm:$0xf] %vm6789_vm8, %v7966_v51  ;;  %v7967_v55 = vpack.c.bf16 %v6654_v34, %v6654_v34  ;;  %7014 = vst.msk [vmem:[%s11512_s8 + $0x64] sm:$0xf] %vm6789_vm8, %v7999_v59  ;;  %v8888_v37 = vpop.f32.mrb[28].mxu0  ;;  %v8922_v18 = vpop.f32.mrb[28].mxu1 }
 0x333   : > { %6817 = vst.msk [vmem:[%s11521_s10 + $0x6c] sm:$0xf] %vm6789_vm8, %v7969_v24  ;;  %v6627_v40 = vadd.f32 %v8888_v37, %v11499_v56  ;;  %v6859_v5 = vadd.f32 %v8922_v18, %v11504_v6  ;;  %v6345_v35 = vpop.f32.mrb[29].mxu0  ;;  %v6543_v10 = vpop.f32.mrb[29].mxu1 }
 0x334   : > { %6815 = vst.msk [vmem:[%s11521_s10 + $0x64] sm:$0xf] %vm6789_vm8, %v7967_v55  ;;  %v6625_v0 = vadd.f32 %v11499_v56, %v6345_v35  ;;  %v6857_v17 = vadd.f32 %v11504_v6, %v6543_v10  ;;  %v8889_v57 = vpop.f32.mrb[30].mxu0  ;;  %v8923_v48 = vpop.f32.mrb[30].mxu1 }
 0x335   : > { %v6659_v52 = vmax.f32 %v6627_v40, 0.0  ;;  %v8004_v32 = vpack.c.bf16 %v6859_v5, %v6859_v5  ;;  %v6628_v7 = vadd.f32 %v8889_v57, %v11499_v56  ;;  %v6860_v49 = vadd.f32 %v8923_v48, %v11504_v6  ;;  %v6348_v33 = vpop.f32.mrb[31].mxu0  ;;  %v6546_v26 = vpop.f32.mrb[31].mxu1 }
 0x336   : > { %v6657_v62 = vmax.f32 %v6625_v0, 0.0  ;;  %v8002_v29 = vpack.c.bf16 %v6857_v17, %v6857_v17  ;;  %v6626_v41 = vadd.f32 %v11499_v56, %v6348_v33  ;;  %v6858_v27 = vadd.f32 %v11504_v6, %v6546_v26 }
 0x337   : > { %v7972_v53 = vpack.c.bf16 %v6659_v52, %v6659_v52  ;;  %7019 = vst.msk [vmem:[%s11512_s8 + $0x78] sm:$0xf] %vm6789_vm8, %v8004_v32  ;;  %v6660_v4 = vmax.f32 %v6628_v7, 0.0  ;;  %v8005_v43 = vpack.c.bf16 %v6860_v49, %v6860_v49 }
 0x338   : > { %v7970_v11 = vpack.c.bf16 %v6657_v62, %v6657_v62  ;;  %7017 = vst.msk [vmem:[%s11512_s8 + $0x70] sm:$0xf] %vm6789_vm8, %v8002_v29  ;;  %v6658_v39 = vmax.f32 %v6626_v41, 0.0  ;;  %v8003_v50 = vpack.c.bf16 %v6858_v27, %v6858_v27 }
 0x339   : > { %6820 = vst.msk [vmem:[%s11521_s10 + $0x78] sm:$0xf] %vm6789_vm8, %v7972_v53  ;;  %v7973_v19 = vpack.c.bf16 %v6660_v4, %v6660_v4  ;;  %7020 = vst.msk [vmem:[%s11512_s8 + $0x7c] sm:$0xf] %vm6789_vm8, %v8005_v43 }
 0x33a   : > { %6818 = vst.msk [vmem:[%s11521_s10 + $0x70] sm:$0xf] %vm6789_vm8, %v7970_v11  ;;  %v7971_v56 = vpack.c.bf16 %v6658_v39, %v6658_v39  ;;  %7018 = vst.msk [vmem:[%s11512_s8 + $0x74] sm:$0xf] %vm6789_vm8, %v8003_v50 }
 0x33b   : > { %6821 = vst.msk [vmem:[%s11521_s10 + $0x7c] sm:$0xf] %vm6789_vm8, %v7973_v19 }
 0x33c   : > { %6819 = vst.msk [vmem:[%s11521_s10 + $0x74] sm:$0xf] %vm6789_vm8, %v7971_v56 }
 0x33d PF: > { %s17_s23 = sadd.s32 1, %s9555_s23   ;;  %s11770_s21 = smov %s9551_s22 }
 0x33e   : > { %p14_p5 = scmp.ge.s32.totalorder %s17_s23, 4   ;;  %s11771_s22 = smov %s11773_s24 }
 0x340   :  { %16 = sbr.rel (!%p14_p5) target bundleno = 2 (0x2), region = 101 }

</bundles_post_ra>
